<compile_context>
chip_gen: v7x
topology: tpu7x:2x2x1
jax: 0.10.0
libtpu: 0.0.40
codegen_flags: <defaults>
</compile_context>

<pallas_src>
import functools

import jax
import jax.numpy as jnp
from jax import lax
from jax.experimental import pallas as pl
from jax.experimental.pallas import tpu as pltpu

MODEL_DIM = 512
FF_DIM = 1024
NUM_HEADS = 8
LN_EPS = 1e-5
MXU_DTYPE = jnp.bfloat16   # MXU operand dtype; accumulation is always f32.


def _pick_tile(dim, preferred, align):
    """Largest tile <= `preferred` that divides `dim` and is a multiple of `align`.
    Falls back to the full dim (always legal for BlockSpecs)."""
    if dim <= preferred:
        return dim
    t = (preferred // align) * align
    while t >= align:
        if dim % t == 0:
            return t
        t -= align
    return dim


# ----------------------------------------------------------------------------
# Tiled linear kernel:  out = x @ W + b   [optionally ReLU]
# ----------------------------------------------------------------------------
def _linear_kernel(x_ref, w_ref, b_ref, o_ref, acc_ref, *, relu):
    k = pl.program_id(2)

    @pl.when(k == 0)
    def _():
        acc_ref[...] = jnp.zeros_like(acc_ref)

    acc_ref[...] += jnp.dot(x_ref[...].astype(MXU_DTYPE), w_ref[...],
                            preferred_element_type=jnp.float32)

    @pl.when(k == pl.num_programs(2) - 1)
    def _():
        out = acc_ref[...] + b_ref[...]
        if relu:
            out = jnp.maximum(out, 0.0)
        o_ref[...] = out.astype(o_ref.dtype)


def pallas_linear(x, w, b, *, relu=False, out_dtype=None, tm=256, tn=2048, tk=512):
    m, k_in = x.shape
    _, n_out = w.shape
    out_dtype = x.dtype if out_dtype is None else out_dtype
    tm = _pick_tile(m, tm, 8)
    tn = _pick_tile(n_out, tn, 128)
    tk = _pick_tile(k_in, tk, 128)
    grid = (m // tm, n_out // tn, k_in // tk)
    return pl.pallas_call(
        functools.partial(_linear_kernel, relu=relu),
        out_shape=jax.ShapeDtypeStruct((m, n_out), out_dtype),
        grid_spec=pltpu.PrefetchScalarGridSpec(
            num_scalar_prefetch=0,
            grid=grid,
            in_specs=[
                pl.BlockSpec((tm, tk), lambda i, j, k: (i, k)),
                pl.BlockSpec((tk, tn), lambda i, j, k: (k, j)),
                pl.BlockSpec((1, tn), lambda i, j, k: (0, j)),
            ],
            out_specs=pl.BlockSpec((tm, tn), lambda i, j, k: (i, j)),
            scratch_shapes=[pltpu.VMEM((tm, tn), jnp.float32)],
        ),
        compiler_params=pltpu.CompilerParams(
            dimension_semantics=("parallel", "parallel", "arbitrary")),
    )(x, w.astype(MXU_DTYPE), b.reshape(1, n_out).astype(jnp.float32))


# ----------------------------------------------------------------------------
# Tiled linear with fused epilogue:  out = LayerNorm(x @ W + b [+ scalar] [+ residual])
# (requires the full output feature dim in one N tile, which holds for n_out = 512)
# ----------------------------------------------------------------------------
def _linear_ln_kernel(*refs, add_scalar, has_residual):
    if has_residual:
        x_ref, w_ref, b_ref, r_ref, g_ref, bt_ref, o_ref, acc_ref = refs
    else:
        x_ref, w_ref, b_ref, g_ref, bt_ref, o_ref, acc_ref = refs
        r_ref = None
    k = pl.program_id(1)

    @pl.when(k == 0)
    def _():
        acc_ref[...] = jnp.zeros_like(acc_ref)

    acc_ref[...] += jnp.dot(x_ref[...].astype(MXU_DTYPE), w_ref[...],
                            preferred_element_type=jnp.float32)

    @pl.when(k == pl.num_programs(1) - 1)
    def _():
        x = acc_ref[...] + b_ref[...]
        if add_scalar is not None:            # scalar `batch_size` residual (ref. quirk)
            x = x + add_scalar
        if has_residual:
            x = x + r_ref[...].astype(jnp.float32)
        mu = jnp.mean(x, axis=-1, keepdims=True)
        d = x - mu
        var = jnp.mean(d * d, axis=-1, keepdims=True)
        inv = lax.rsqrt(var + LN_EPS)
        o_ref[...] = (d * inv * g_ref[...] + bt_ref[...]).astype(o_ref.dtype)


def pallas_linear_ln(x, w, b, gamma, beta, *, residual=None, add_scalar=None,
                     tm=256, tk=512):
    m, k_in = x.shape
    _, n_out = w.shape
    tm = _pick_tile(m, tm, 8)
    tk = _pick_tile(k_in, tk, 128)
    grid = (m // tm, k_in // tk)
    has_residual = residual is not None

    in_specs = [
        pl.BlockSpec((tm, tk), lambda i, k: (i, k)),
        pl.BlockSpec((tk, n_out), lambda i, k: (k, 0)),
        pl.BlockSpec((1, n_out), lambda i, k: (0, 0)),
    ]
    args = [x, w.astype(MXU_DTYPE), b.reshape(1, n_out).astype(jnp.float32)]
    if has_residual:
        in_specs.append(pl.BlockSpec((tm, n_out), lambda i, k: (i, 0)))
        args.append(residual)
    in_specs += [pl.BlockSpec((1, n_out), lambda i, k: (0, 0)),
                 pl.BlockSpec((1, n_out), lambda i, k: (0, 0))]
    args += [gamma.reshape(1, n_out), beta.reshape(1, n_out)]

    return pl.pallas_call(
        functools.partial(_linear_ln_kernel, add_scalar=add_scalar,
                          has_residual=has_residual),
        out_shape=jax.ShapeDtypeStruct((m, n_out), jnp.float32),
        grid_spec=pltpu.PrefetchScalarGridSpec(
            num_scalar_prefetch=0,
            grid=grid,
            in_specs=in_specs,
            out_specs=pl.BlockSpec((tm, n_out), lambda i, k: (i, 0)),
            scratch_shapes=[pltpu.VMEM((tm, n_out), jnp.float32)],
        ),
        compiler_params=pltpu.CompilerParams(
            dimension_semantics=("parallel", "arbitrary")),
    )(*args)


# ----------------------------------------------------------------------------
# Scaled-dot-product attention (softmax over dim=1, as in the reference),
# tiled over the softmax *column* axis (which is independent for this softmax).
# ----------------------------------------------------------------------------
def _attention_kernel(q_ref, k_ref, v_ref, o_ref, acc_ref, *, scale):
    j = pl.program_id(1)

    @pl.when(j == 0)
    def _():
        acc_ref[...] = jnp.zeros_like(acc_ref)

    q = q_ref[0].astype(MXU_DTYPE)        # [M_tok, D]
    kb = k_ref[0].astype(MXU_DTYPE)       # [tj, D]
    s = lax.dot_general(q, kb, (((1,), (1,)), ((), ())),
                        preferred_element_type=jnp.float32) * scale   # [M_tok, tj]
    # F.softmax(similarity, dim=1) normalizes over the row index (axis 0 here),
    # which is complete within every column block.
    mx = jnp.max(s, axis=0, keepdims=True)
    e = jnp.exp(s - mx)
    denom = jnp.sum(e, axis=0, keepdims=True)
    p = e * pl.reciprocal(denom, approx=False)
    acc_ref[...] += jnp.dot(p.astype(MXU_DTYPE), v_ref[0].astype(MXU_DTYPE),
                            preferred_element_type=jnp.float32)

    @pl.when(j == pl.num_programs(1) - 1)
    def _():
        o_ref[0] = acc_ref[...].astype(o_ref.dtype)


def pallas_attention(q, k, v, *, out_dtype=None, tj=512):
    bsz, m_tok, d = q.shape
    out_dtype = q.dtype if out_dtype is None else out_dtype
    scale = 1.0 / float(d) ** 0.5
    tj = _pick_tile(m_tok, tj, 8)
    grid = (bsz, m_tok // tj)
    q_spec = pl.BlockSpec((1, m_tok, d), lambda b, j: (b, 0, 0))
    kv_spec = pl.BlockSpec((1, tj, d), lambda b, j: (b, j, 0))
    return pl.pallas_call(
        functools.partial(_attention_kernel, scale=scale),
        out_shape=jax.ShapeDtypeStruct((bsz, m_tok, d), out_dtype),
        grid_spec=pltpu.PrefetchScalarGridSpec(
            num_scalar_prefetch=0,
            grid=grid,
            in_specs=[q_spec, kv_spec, kv_spec],
            out_specs=q_spec,
            scratch_shapes=[pltpu.VMEM((m_tok, d), jnp.float32)],
        ),
        compiler_params=pltpu.CompilerParams(
            dimension_semantics=("parallel", "arbitrary")),
    )(q, k, v)


# ----------------------------------------------------------------------------
# EncoderLayer forward (glue in plain JAX, compute in Pallas kernels)
# ----------------------------------------------------------------------------
def prepare_params(p):
    """One-time packing for the Pallas forward: fuse the Q/K/V projection and
    store matmul weights in bf16 (done once, outside jit)."""
    fp = dict(p)
    fp["wqkv"] = jnp.concatenate([p["wq"], p["wk"], p["wv"]], axis=1).astype(MXU_DTYPE)
    fp["bqkv"] = jnp.concatenate([p["bq"], p["bk"], p["bv"]], axis=0)
    fp["wfc"] = p["wfc"].astype(MXU_DTYPE)
    fp["w1"] = p["w1"].astype(MXU_DTYPE)
    fp["w2"] = p["w2"].astype(MXU_DTYPE)
    return fp


def encoder_layer_forward(x, p):
    bsz, length, dm = x.shape
    xf = x.reshape(bsz * length, dm)
    dkh = dm * NUM_HEADS                    # 4096
    m_tok = length * NUM_HEADS              # tokens after .view(B, -1, model_dim)

    if "wqkv" in p:
        wqkv, bqkv = p["wqkv"], p["bqkv"]
    else:                                    # fallback: fuse on the fly
        wqkv = jnp.concatenate([p["wq"], p["wk"], p["wv"]], axis=1)
        bqkv = jnp.concatenate([p["bq"], p["bk"], p["bv"]], axis=0)

    # --- MultiHeadedAttention ---
    qkv = pallas_linear(xf, wqkv, bqkv, out_dtype=MXU_DTYPE)        # [M, 12288]
    q3 = qkv[:, :dkh].reshape(bsz, m_tok, dm)
    k3 = qkv[:, dkh:2 * dkh].reshape(bsz, m_tok, dm)
    v3 = qkv[:, 2 * dkh:].reshape(bsz, m_tok, dm)
    attn = pallas_attention(q3, k3, v3, out_dtype=MXU_DTYPE)        # [B, 8L, 512]
    attn_f = attn.reshape(bsz * length, dkh)                        # [M, 4096]
    # Output projection fused with the scalar `batch_size` residual (reference
    # quirk, baked in as a constant) + LayerNorm epilogue.
    mha = pallas_linear_ln(attn_f, p["wfc"], p["bfc"], p["ln1_g"], p["ln1_b"],
                           add_scalar=float(bsz))                   # [M, 512] f32

    # --- FeedForward ---
    h = pallas_linear(mha, p["w1"], p["b1"], relu=True, out_dtype=MXU_DTYPE)  # [M, 1024]
    out = pallas_linear_ln(h, p["w2"], p["b2"], p["ln2_g"], p["ln2_b"],
                           residual=mha)                            # [M, 512] f32
    return out.reshape(bsz, length, dm)


# ----------------------------------------------------------------------------
# Pure-JAX references (for validation)
# ----------------------------------------------------------------------------
def reference_forward(x, p, mxu_dtype=MXU_DTYPE):
    """Mirror of the kernel math: matmul operands cast to `mxu_dtype`,
    f32 accumulation. Pass mxu_dtype=jnp.float32 for a full-precision reference."""
    bsz, length, dm = x.shape
    scale = 1.0 / float(dm) ** 0.5

    def mm(a, b):
        return jnp.dot(a.astype(mxu_dtype), b.astype(mxu_dtype),
                       precision=lax.Precision.HIGHEST,
                       preferred_element_type=jnp.float32)

    def ln(t, g, b):
        mu = t.mean(-1, keepdims=True)
        d = t - mu
        var = (d * d).mean(-1, keepdims=True)
        return d * lax.rsqrt(var + LN_EPS) * g + b

    xf = x.reshape(bsz * length, dm)
    q = mm(xf, p["wq"]) + p["bq"]
    k = mm(xf, p["wk"]) + p["bk"]
    v = mm(xf, p["wv"]) + p["bv"]
    q3 = q.reshape(bsz, -1, dm)
    k3 = k.reshape(bsz, -1, dm)
    v3 = v.reshape(bsz, -1, dm)
    s = jnp.einsum("bid,bjd->bij", q3.astype(mxu_dtype), k3.astype(mxu_dtype),
                   precision=lax.Precision.HIGHEST,
                   preferred_element_type=jnp.float32) * scale
    mx = jnp.max(s, axis=1, keepdims=True)
    e = jnp.exp(s - mx)
    w = e * (1.0 / jnp.sum(e, axis=1, keepdims=True))               # softmax dim=1
    o = jnp.einsum("bij,bjd->bid", w.astype(mxu_dtype), v3.astype(mxu_dtype),
                   precision=lax.Precision.HIGHEST,
                   preferred_element_type=jnp.float32)
    o = o.reshape(bsz * length, dm * NUM_HEADS)
    proj = mm(o, p["wfc"]) + p["bfc"] + float(bsz)                  # scalar residual quirk
    mha = ln(proj, p["ln1_g"], p["ln1_b"])
    h = jax.nn.relu(mm(mha, p["w1"]) + p["b1"])
    y = mm(h, p["w2"]) + p["b2"]
    out = ln(y + mha, p["ln2_g"], p["ln2_b"])
    return out.reshape(bsz, length, dm)


def init_params(key):
    ks = jax.random.split(key, 12)
    dk_heads = MODEL_DIM * NUM_HEADS  # 4096

    def w(key, shape, scale=0.02):
        return (scale * jax.random.normal(key, shape)).astype(jnp.float32)

    return {
        "wq": w(ks[0], (MODEL_DIM, dk_heads)), "bq": w(ks[1], (dk_heads,)),
        "wk": w(ks[2], (MODEL_DIM, dk_heads)), "bk": w(ks[3], (dk_heads,)),
        "wv": w(ks[4], (MODEL_DIM, dk_heads)), "bv": w(ks[5], (dk_heads,)),
        "wfc": w(ks[6], (dk_heads, MODEL_DIM)), "bfc": w(ks[7], (MODEL_DIM,)),
        "ln1_g": jnp.ones((MODEL_DIM,), jnp.float32),
        "ln1_b": jnp.zeros((MODEL_DIM,), jnp.float32),
        "w1": w(ks[8], (MODEL_DIM, FF_DIM)), "b1": w(ks[9], (FF_DIM,)),
        "w2": w(ks[10], (FF_DIM, MODEL_DIM)), "b2": w(ks[11], (MODEL_DIM,)),
        "ln2_g": jnp.ones((MODEL_DIM,), jnp.float32),
        "ln2_b": jnp.zeros((MODEL_DIM,), jnp.float32),
    }


if __name__ == "__main__":
    key = jax.random.PRNGKey(0)
    k_param, k_x = jax.random.split(key)
    params = init_params(k_param)
    fused_params = prepare_params(params)   # one-time QKV fusion / bf16 weight cast

    batch, seq = 2, 8
    x = jax.random.normal(k_x, (batch, seq, MODEL_DIM), dtype=jnp.float32)

    out = jax.jit(encoder_layer_forward)(x, fused_params)
    out = jax.block_until_ready(out)
    assert out.shape == (batch, seq, MODEL_DIM)

    # Strict check against a pure-JAX reference that mirrors the kernel numerics
    # (bf16 MXU operands, f32 accumulation).
    ref = jax.block_until_ready(jax.jit(reference_forward)(x, params))
    assert jnp.allclose(out, ref, rtol=2e-3, atol=2e-3), (
        float(jnp.max(jnp.abs(out - ref))))

    # Loose sanity check against the full-f32 reference (bounds the bf16 MXU error).
    ref_f32 = jax.block_until_ready(
        jax.jit(functools.partial(reference_forward, mxu_dtype=jnp.float32))(x, params))
    assert jnp.allclose(out, ref_f32, rtol=1e-1, atol=1e-1), (
        float(jnp.max(jnp.abs(out - ref_f32))))

    print("KERNEL_OK")
</pallas_src>

<mosaic_0001>
module attributes {stable_mosaic.version = 11 : i64} {
  func.func @_attention_kernel(%arg0: i32, %arg1: i32, %arg2: memref<1x64x512xbf16, #tpu.memory_space<vmem>>, %arg3: memref<1x64x512xbf16, #tpu.memory_space<vmem>>, %arg4: memref<1x64x512xbf16, #tpu.memory_space<vmem>>, %arg5: memref<1x64x512xbf16, #tpu.memory_space<vmem>>, %arg6: memref<64x512xf32, #tpu.memory_space<vmem>>) attributes {dimension_semantics = [#tpu.dimension_semantics<parallel>, #tpu.dimension_semantics<arbitrary>], iteration_bounds = array<i64: 2, 1>, scalar_prefetch = 0 : i64, scratch_operands = 1 : i64, tpu.core_type = #tpu.core_type<tc>, window_params = [{transform_indices = @transform_0, window_bounds = array<i64: 1, 64, 512>}, {transform_indices = @transform_1, window_bounds = array<i64: 1, 64, 512>}, {transform_indices = @transform_2, window_bounds = array<i64: 1, 64, 512>}, {transform_indices = @transform_3, window_bounds = array<i64: 1, 64, 512>}]} {
    %c0_i32 = arith.constant 0 : i32
    %0 = arith.cmpi eq, %arg1, %c0_i32 : i32
    %1 = arith.extui %0 : i1 to i32
    %c0_i32_0 = arith.constant 0 : i32
    %2 = arith.cmpi ne, %1, %c0_i32_0 : i32
    scf.if %2 {
      %cst_19 = arith.constant 0.000000e+00 : f32
      %30 = vector.broadcast %cst_19 : f32 to vector<64x512xf32>
      %c0_20 = arith.constant 0 : index
      %c0_21 = arith.constant 0 : index
      %31 = vector.load %arg6[%c0_20, %c0_21] : memref<64x512xf32, #tpu.memory_space<vmem>>, vector<64x512xf32>
      tpu.vector_store %arg6[%c0_20, %c0_21], %30 {strides = array<i32>} : memref<64x512xf32, #tpu.memory_space<vmem>>, vector<64x512xf32>,
    } else {
    }
    %c0 = arith.constant 0 : index
    %c0_1 = arith.constant 0 : index
    %c0_2 = arith.constant 0 : index
    %3 = vector.load %arg2[%c0, %c0_1, %c0_2] : memref<1x64x512xbf16, #tpu.memory_space<vmem>>, vector<1x64x512xbf16>
    %4 = vector.shape_cast %3 : vector<1x64x512xbf16> to vector<64x512xbf16>
    %c0_3 = arith.constant 0 : index
    %c0_4 = arith.constant 0 : index
    %c0_5 = arith.constant 0 : index
    %5 = vector.load %arg3[%c0_3, %c0_4, %c0_5] : memref<1x64x512xbf16, #tpu.memory_space<vmem>>, vector<1x64x512xbf16>
    %6 = vector.shape_cast %5 : vector<1x64x512xbf16> to vector<64x512xbf16>
    %cst = arith.constant dense<0.000000e+00> : vector<64x64xf32>
    %7 = tpu.matmul %4, %6, %cst {dimension_numbers = #tpu.dot_dimension_numbers<[1], [1], [0], [0], [0, 0, 1, 0], [], []>} : vector<64x512xbf16>, vector<64x512xbf16>, vector<64x64xf32> -> vector<64x64xf32>
    %cst_6 = arith.constant 0.0441941731 : f32
    %8 = vector.broadcast %cst_6 : f32 to vector<64x64xf32>
    %9 = arith.mulf %7, %8 : vector<64x64xf32>
    %cst_7 = arith.constant dense<0xFF800000> : vector<64xf32>
    %10 = vector.multi_reduction <maximumf>, %9, %cst_7 [0] : vector<64x64xf32> to vector<64xf32>
    %11 = vector.shape_cast %10 : vector<64xf32> to vector<1x64xf32>
    %12 = vector.broadcast %11 : vector<1x64xf32> to vector<64x64xf32>
    %13 = arith.subf %9, %12 : vector<64x64xf32>
    %14 = math.exp %13 : vector<64x64xf32>
    %cst_8 = arith.constant dense<0.000000e+00> : vector<64xf32>
    %15 = vector.multi_reduction <add>, %14, %cst_8 [0] : vector<64x64xf32> to vector<64xf32>
    %16 = vector.shape_cast %15 : vector<64xf32> to vector<1x64xf32>
    %17 = tpu.reciprocal %16 : vector<1x64xf32> -> vector<1x64xf32>
    %18 = vector.broadcast %17 : vector<1x64xf32> to vector<64x64xf32>
    %19 = arith.mulf %14, %18 : vector<64x64xf32>
    %c0_9 = arith.constant 0 : index
    %c0_10 = arith.constant 0 : index
    %20 = vector.load %arg6[%c0_9, %c0_10] : memref<64x512xf32, #tpu.memory_space<vmem>>, vector<64x512xf32>
    %21 = arith.truncf %19 : vector<64x64xf32> to vector<64x64xbf16>
    %c0_11 = arith.constant 0 : index
    %c0_12 = arith.constant 0 : index
    %c0_13 = arith.constant 0 : index
    %22 = vector.load %arg4[%c0_11, %c0_12, %c0_13] : memref<1x64x512xbf16, #tpu.memory_space<vmem>>, vector<1x64x512xbf16>
    %23 = vector.shape_cast %22 : vector<1x64x512xbf16> to vector<64x512xbf16>
    %cst_14 = arith.constant dense<0.000000e+00> : vector<64x512xf32>
    %24 = tpu.matmul %21, %23, %cst_14 {dimension_numbers = #tpu.dot_dimension_numbers<[1], [0], [0], [1], [0, 0, 1, 1], [], []>} : vector<64x64xbf16>, vector<64x512xbf16>, vector<64x512xf32> -> vector<64x512xf32>
    %25 = arith.addf %20, %24 : vector<64x512xf32>
    %c0_15 = arith.constant 0 : index
    %c0_16 = arith.constant 0 : index
    %26 = vector.load %arg6[%c0_15, %c0_16] : memref<64x512xf32, #tpu.memory_space<vmem>>, vector<64x512xf32>
    tpu.vector_store %arg6[%c0_15, %c0_16], %25 {strides = array<i32>} : memref<64x512xf32, #tpu.memory_space<vmem>>, vector<64x512xf32>,
    %c0_i32_17 = arith.constant 0 : i32
    %27 = arith.cmpi eq, %arg1, %c0_i32_17 : i32
    %28 = arith.extui %27 : i1 to i32
    %c0_i32_18 = arith.constant 0 : i32
    %29 = arith.cmpi ne, %28, %c0_i32_18 : i32
    scf.if %29 {
      %c0_19 = arith.constant 0 : index
      %c0_20 = arith.constant 0 : index
      %30 = vector.load %arg6[%c0_19, %c0_20] : memref<64x512xf32, #tpu.memory_space<vmem>>, vector<64x512xf32>
      %31 = arith.truncf %30 : vector<64x512xf32> to vector<64x512xbf16>
      %c0_21 = arith.constant 0 : index
      %c0_22 = arith.constant 0 : index
      %c0_23 = arith.constant 0 : index
      %32 = vector.load %arg5[%c0_21, %c0_22, %c0_23] : memref<1x64x512xbf16, #tpu.memory_space<vmem>>, vector<1x64x512xbf16>
      %33 = vector.shape_cast %32 : vector<1x64x512xbf16> to vector<64x512xbf16>
      %34 = vector.shape_cast %31 : vector<64x512xbf16> to vector<1x64x512xbf16>
      tpu.vector_store %arg5[%c0_21, %c0_22, %c0_23], %34 {strides = array<i32>} : memref<1x64x512xbf16, #tpu.memory_space<vmem>>, vector<1x64x512xbf16>,
    } else {
    }
    return
  }
  func.func @transform_0(%arg0: i32, %arg1: i32) -> (i32, i32, i32) {
    %c0_i32 = arith.constant 0 : i32
    %c0_i32_0 = arith.constant 0 : i32
    %c0_i32_1 = arith.constant 0 : i32
    return %arg0, %c0_i32, %c0_i32_0 : i32, i32, i32
  }
  func.func @transform_1(%arg0: i32, %arg1: i32) -> (i32, i32, i32) {
    %c0_i32 = arith.constant 0 : i32
    %c0_i32_0 = arith.constant 0 : i32
    return %arg0, %arg1, %c0_i32 : i32, i32, i32
  }
  func.func @transform_2(%arg0: i32, %arg1: i32) -> (i32, i32, i32) {
    %c0_i32 = arith.constant 0 : i32
    %c0_i32_0 = arith.constant 0 : i32
    return %arg0, %arg1, %c0_i32 : i32, i32, i32
  }
  func.func @transform_3(%arg0: i32, %arg1: i32) -> (i32, i32, i32) {
    %c0_i32 = arith.constant 0 : i32
    %c0_i32_0 = arith.constant 0 : i32
    %c0_i32_1 = arith.constant 0 : i32
    return %arg0, %c0_i32, %c0_i32_0 : i32, i32, i32
  }
}

module attributes {stable_mosaic.version = 11 : i64} {
  func.func @_linear_kernel(%arg0: i32, %arg1: i32, %arg2: i32, %arg3: memref<16x512xf32, #tpu.memory_space<vmem>>, %arg4: memref<512x2048xbf16, #tpu.memory_space<vmem>>, %arg5: memref<1x2048xf32, #tpu.memory_space<vmem>>, %arg6: memref<16x2048xbf16, #tpu.memory_space<vmem>>, %arg7: memref<16x2048xf32, #tpu.memory_space<vmem>>) attributes {dimension_semantics = [#tpu.dimension_semantics<parallel>, #tpu.dimension_semantics<parallel>, #tpu.dimension_semantics<arbitrary>], iteration_bounds = array<i64: 1, 6, 1>, scalar_prefetch = 0 : i64, scratch_operands = 1 : i64, tpu.core_type = #tpu.core_type<tc>, window_params = [{transform_indices = @transform_0, window_bounds = array<i64: 16, 512>}, {transform_indices = @transform_1, window_bounds = array<i64: 512, 2048>}, {transform_indices = @transform_2, window_bounds = array<i64: 1, 2048>}, {transform_indices = @transform_3, window_bounds = array<i64: 16, 2048>}]} {
    %c0_i32 = arith.constant 0 : i32
    %0 = arith.cmpi eq, %arg2, %c0_i32 : i32
    %1 = arith.extui %0 : i1 to i32
    %c0_i32_0 = arith.constant 0 : i32
    %2 = arith.cmpi ne, %1, %c0_i32_0 : i32
    scf.if %2 {
      %cst_10 = arith.constant 0.000000e+00 : f32
      %13 = vector.broadcast %cst_10 : f32 to vector<16x2048xf32>
      %c0_11 = arith.constant 0 : index
      %c0_12 = arith.constant 0 : index
      %14 = vector.load %arg7[%c0_11, %c0_12] : memref<16x2048xf32, #tpu.memory_space<vmem>>, vector<16x2048xf32>
      tpu.vector_store %arg7[%c0_11, %c0_12], %13 {strides = array<i32>} : memref<16x2048xf32, #tpu.memory_space<vmem>>, vector<16x2048xf32>,
    } else {
    }
    %c0 = arith.constant 0 : index
    %c0_1 = arith.constant 0 : index
    %3 = vector.load %arg7[%c0, %c0_1] : memref<16x2048xf32, #tpu.memory_space<vmem>>, vector<16x2048xf32>
    %c0_2 = arith.constant 0 : index
    %c0_3 = arith.constant 0 : index
    %4 = vector.load %arg3[%c0_2, %c0_3] : memref<16x512xf32, #tpu.memory_space<vmem>>, vector<16x512xf32>
    %5 = arith.truncf %4 : vector<16x512xf32> to vector<16x512xbf16>
    %c0_4 = arith.constant 0 : index
    %c0_5 = arith.constant 0 : index
    %6 = vector.load %arg4[%c0_4, %c0_5] : memref<512x2048xbf16, #tpu.memory_space<vmem>>, vector<512x2048xbf16>
    %cst = arith.constant dense<0.000000e+00> : vector<16x2048xf32>
    %7 = tpu.matmul %5, %6, %cst {dimension_numbers = #tpu.dot_dimension_numbers<[1], [0], [0], [1], [0, 0, 1, 1], [], []>} : vector<16x512xbf16>, vector<512x2048xbf16>, vector<16x2048xf32> -> vector<16x2048xf32>
    %8 = arith.addf %3, %7 : vector<16x2048xf32>
    %c0_6 = arith.constant 0 : index
    %c0_7 = arith.constant 0 : index
    %9 = vector.load %arg7[%c0_6, %c0_7] : memref<16x2048xf32, #tpu.memory_space<vmem>>, vector<16x2048xf32>
    tpu.vector_store %arg7[%c0_6, %c0_7], %8 {strides = array<i32>} : memref<16x2048xf32, #tpu.memory_space<vmem>>, vector<16x2048xf32>,
    %c0_i32_8 = arith.constant 0 : i32
    %10 = arith.cmpi eq, %arg2, %c0_i32_8 : i32
    %11 = arith.extui %10 : i1 to i32
    %c0_i32_9 = arith.constant 0 : i32
    %12 = arith.cmpi ne, %11, %c0_i32_9 : i32
    scf.if %12 {
      %c0_10 = arith.constant 0 : index
      %c0_11 = arith.constant 0 : index
      %13 = vector.load %arg7[%c0_10, %c0_11] : memref<16x2048xf32, #tpu.memory_space<vmem>>, vector<16x2048xf32>
      %c0_12 = arith.constant 0 : index
      %c0_13 = arith.constant 0 : index
      %14 = vector.load %arg5[%c0_12, %c0_13] : memref<1x2048xf32, #tpu.memory_space<vmem>>, vector<1x2048xf32>
      %15 = vector.broadcast %14 : vector<1x2048xf32> to vector<16x2048xf32>
      %16 = arith.addf %13, %15 : vector<16x2048xf32>
      %17 = arith.truncf %16 : vector<16x2048xf32> to vector<16x2048xbf16>
      %c0_14 = arith.constant 0 : index
      %c0_15 = arith.constant 0 : index
      %18 = vector.load %arg6[%c0_14, %c0_15] : memref<16x2048xbf16, #tpu.memory_space<vmem>>, vector<16x2048xbf16>
      tpu.vector_store %arg6[%c0_14, %c0_15], %17 {strides = array<i32>} : memref<16x2048xbf16, #tpu.memory_space<vmem>>, vector<16x2048xbf16>,
    } else {
    }
    return
  }
  func.func @transform_0(%arg0: i32, %arg1: i32, %arg2: i32) -> (i32, i32) {
    %c0_i32 = arith.constant 0 : i32
    return %arg0, %arg2 : i32, i32
  }
  func.func @transform_1(%arg0: i32, %arg1: i32, %arg2: i32) -> (i32, i32) {
    %c0_i32 = arith.constant 0 : i32
    return %arg2, %arg1 : i32, i32
  }
  func.func @transform_2(%arg0: i32, %arg1: i32, %arg2: i32) -> (i32, i32) {
    %c0_i32 = arith.constant 0 : i32
    %c0_i32_0 = arith.constant 0 : i32
    return %c0_i32, %arg1 : i32, i32
  }
  func.func @transform_3(%arg0: i32, %arg1: i32, %arg2: i32) -> (i32, i32) {
    %c0_i32 = arith.constant 0 : i32
    return %arg0, %arg1 : i32, i32
  }
}

module attributes {stable_mosaic.version = 11 : i64} {
  func.func @_linear_ln_kernel(%arg0: i32, %arg1: i32, %arg2: memref<16x512xbf16, #tpu.memory_space<vmem>>, %arg3: memref<512x512xbf16, #tpu.memory_space<vmem>>, %arg4: memref<1x512xf32, #tpu.memory_space<vmem>>, %arg5: memref<1x512xf32, #tpu.memory_space<vmem>>, %arg6: memref<1x512xf32, #tpu.memory_space<vmem>>, %arg7: memref<16x512xf32, #tpu.memory_space<vmem>>, %arg8: memref<16x512xf32, #tpu.memory_space<vmem>>) attributes {dimension_semantics = [#tpu.dimension_semantics<parallel>, #tpu.dimension_semantics<arbitrary>], iteration_bounds = array<i64: 1, 8>, scalar_prefetch = 0 : i64, scratch_operands = 1 : i64, tpu.core_type = #tpu.core_type<tc>, window_params = [{transform_indices = @transform_0, window_bounds = array<i64: 16, 512>}, {transform_indices = @transform_1, window_bounds = array<i64: 512, 512>}, {pipeline_mode = #tpu.pipeline_mode<synchronous>, transform_indices = @transform_2, window_bounds = array<i64: 1, 512>}, {pipeline_mode = #tpu.pipeline_mode<synchronous>, transform_indices = @transform_3, window_bounds = array<i64: 1, 512>}, {pipeline_mode = #tpu.pipeline_mode<synchronous>, transform_indices = @transform_4, window_bounds = array<i64: 1, 512>}, {transform_indices = @transform_5, window_bounds = array<i64: 16, 512>}]} {
    %c0_i32 = arith.constant 0 : i32
    %0 = arith.cmpi eq, %arg1, %c0_i32 : i32
    %1 = arith.extui %0 : i1 to i32
    %c0_i32_0 = arith.constant 0 : i32
    %2 = arith.cmpi ne, %1, %c0_i32_0 : i32
    scf.if %2 {
      %cst_9 = arith.constant 0.000000e+00 : f32
      %12 = vector.broadcast %cst_9 : f32 to vector<16x512xf32>
      %c0_10 = arith.constant 0 : index
      %c0_11 = arith.constant 0 : index
      %13 = vector.load %arg8[%c0_10, %c0_11] : memref<16x512xf32, #tpu.memory_space<vmem>>, vector<16x512xf32>
      tpu.vector_store %arg8[%c0_10, %c0_11], %12 {strides = array<i32>} : memref<16x512xf32, #tpu.memory_space<vmem>>, vector<16x512xf32>,
    } else {
    }
    %c0 = arith.constant 0 : index
    %c0_1 = arith.constant 0 : index
    %3 = vector.load %arg8[%c0, %c0_1] : memref<16x512xf32, #tpu.memory_space<vmem>>, vector<16x512xf32>
    %c0_2 = arith.constant 0 : index
    %c0_3 = arith.constant 0 : index
    %4 = vector.load %arg2[%c0_2, %c0_3] : memref<16x512xbf16, #tpu.memory_space<vmem>>, vector<16x512xbf16>
    %c0_4 = arith.constant 0 : index
    %c0_5 = arith.constant 0 : index
    %5 = vector.load %arg3[%c0_4, %c0_5] : memref<512x512xbf16, #tpu.memory_space<vmem>>, vector<512x512xbf16>
    %cst = arith.constant dense<0.000000e+00> : vector<16x512xf32>
    %6 = tpu.matmul %4, %5, %cst {dimension_numbers = #tpu.dot_dimension_numbers<[1], [0], [0], [1], [0, 0, 1, 1], [], []>} : vector<16x512xbf16>, vector<512x512xbf16>, vector<16x512xf32> -> vector<16x512xf32>
    %7 = arith.addf %3, %6 : vector<16x512xf32>
    %c0_6 = arith.constant 0 : index
    %c0_7 = arith.constant 0 : index
    %8 = vector.load %arg8[%c0_6, %c0_7] : memref<16x512xf32, #tpu.memory_space<vmem>>, vector<16x512xf32>
    tpu.vector_store %arg8[%c0_6, %c0_7], %7 {strides = array<i32>} : memref<16x512xf32, #tpu.memory_space<vmem>>, vector<16x512xf32>,
    %c7_i32 = arith.constant 7 : i32
    %9 = arith.cmpi eq, %arg1, %c7_i32 : i32
    %10 = arith.extui %9 : i1 to i32
    %c0_i32_8 = arith.constant 0 : i32
    %11 = arith.cmpi ne, %10, %c0_i32_8 : i32
    scf.if %11 {
      %c0_9 = arith.constant 0 : index
      %c0_10 = arith.constant 0 : index
      %12 = vector.load %arg8[%c0_9, %c0_10] : memref<16x512xf32, #tpu.memory_space<vmem>>, vector<16x512xf32>
      %c0_11 = arith.constant 0 : index
      %c0_12 = arith.constant 0 : index
      %13 = vector.load %arg4[%c0_11, %c0_12] : memref<1x512xf32, #tpu.memory_space<vmem>>, vector<1x512xf32>
      %14 = vector.broadcast %13 : vector<1x512xf32> to vector<16x512xf32>
      %15 = arith.addf %12, %14 : vector<16x512xf32>
      %cst_13 = arith.constant 2.000000e+00 : f32
      %16 = vector.broadcast %cst_13 : f32 to vector<16x512xf32>
      %17 = arith.addf %15, %16 : vector<16x512xf32>
      %cst_14 = arith.constant dense<0.000000e+00> : vector<16xf32>
      %18 = vector.multi_reduction <add>, %17, %cst_14 [1] : vector<16x512xf32> to vector<16xf32>
      %19 = vector.shape_cast %18 : vector<16xf32> to vector<16x1xf32>
      %cst_15 = arith.constant 5.120000e+02 : f32
      %20 = vector.broadcast %cst_15 : f32 to vector<16x1xf32>
      %21 = arith.divf %19, %20 : vector<16x1xf32>
      %22 = vector.broadcast %21 : vector<16x1xf32> to vector<16x512xf32>
      %23 = arith.subf %17, %22 : vector<16x512xf32>
      %24 = arith.mulf %23, %23 : vector<16x512xf32>
      %cst_16 = arith.constant dense<0.000000e+00> : vector<16xf32>
      %25 = vector.multi_reduction <add>, %24, %cst_16 [1] : vector<16x512xf32> to vector<16xf32>
      %26 = vector.shape_cast %25 : vector<16xf32> to vector<16x1xf32>
      %cst_17 = arith.constant 5.120000e+02 : f32
      %27 = vector.broadcast %cst_17 : f32 to vector<16x1xf32>
      %28 = arith.divf %26, %27 : vector<16x1xf32>
      %cst_18 = arith.constant 9.99999974E-6 : f32
      %29 = vector.broadcast %cst_18 : f32 to vector<16x1xf32>
      %30 = arith.addf %28, %29 : vector<16x1xf32>
      %31 = math.rsqrt %30 : vector<16x1xf32>
      %32 = vector.broadcast %31 : vector<16x1xf32> to vector<16x512xf32>
      %33 = arith.mulf %23, %32 : vector<16x512xf32>
      %c0_19 = arith.constant 0 : index
      %c0_20 = arith.constant 0 : index
      %34 = vector.load %arg5[%c0_19, %c0_20] : memref<1x512xf32, #tpu.memory_space<vmem>>, vector<1x512xf32>
      %35 = vector.broadcast %34 : vector<1x512xf32> to vector<16x512xf32>
      %36 = arith.mulf %33, %35 : vector<16x512xf32>
      %c0_21 = arith.constant 0 : index
      %c0_22 = arith.constant 0 : index
      %37 = vector.load %arg6[%c0_21, %c0_22] : memref<1x512xf32, #tpu.memory_space<vmem>>, vector<1x512xf32>
      %38 = vector.broadcast %37 : vector<1x512xf32> to vector<16x512xf32>
      %39 = arith.addf %36, %38 : vector<16x512xf32>
      %c0_23 = arith.constant 0 : index
      %c0_24 = arith.constant 0 : index
      %40 = vector.load %arg7[%c0_23, %c0_24] : memref<16x512xf32, #tpu.memory_space<vmem>>, vector<16x512xf32>
      tpu.vector_store %arg7[%c0_23, %c0_24], %39 {strides = array<i32>} : memref<16x512xf32, #tpu.memory_space<vmem>>, vector<16x512xf32>,
    } else {
    }
    return
  }
  func.func @transform_0(%arg0: i32, %arg1: i32) -> (i32, i32) {
    %c0_i32 = arith.constant 0 : i32
    return %arg0, %arg1 : i32, i32
  }
  func.func @transform_1(%arg0: i32, %arg1: i32) -> (i32, i32) {
    %c0_i32 = arith.constant 0 : i32
    %c0_i32_0 = arith.constant 0 : i32
    return %arg1, %c0_i32 : i32, i32
  }
  func.func @transform_2(%arg0: i32, %arg1: i32) -> (i32, i32) {
    %c0_i32 = arith.constant 0 : i32
    %c0_i32_0 = arith.constant 0 : i32
    %c0_i32_1 = arith.constant 0 : i32
    return %c0_i32, %c0_i32_0 : i32, i32
  }
  func.func @transform_3(%arg0: i32, %arg1: i32) -> (i32, i32) {
    %c0_i32 = arith.constant 0 : i32
    %c0_i32_0 = arith.constant 0 : i32
    %c0_i32_1 = arith.constant 0 : i32
    return %c0_i32, %c0_i32_0 : i32, i32
  }
  func.func @transform_4(%arg0: i32, %arg1: i32) -> (i32, i32) {
    %c0_i32 = arith.constant 0 : i32
    %c0_i32_0 = arith.constant 0 : i32
    %c0_i32_1 = arith.constant 0 : i32
    return %c0_i32, %c0_i32_0 : i32, i32
  }
  func.func @transform_5(%arg0: i32, %arg1: i32) -> (i32, i32) {
    %c0_i32 = arith.constant 0 : i32
    %c0_i32_0 = arith.constant 0 : i32
    return %arg0, %c0_i32 : i32, i32
  }
}

module attributes {stable_mosaic.version = 11 : i64} {
  func.func @_linear_kernel(%arg0: i32, %arg1: i32, %arg2: i32, %arg3: memref<16x512xf32, #tpu.memory_space<vmem>>, %arg4: memref<512x1024xbf16, #tpu.memory_space<vmem>>, %arg5: memref<1x1024xf32, #tpu.memory_space<vmem>>, %arg6: memref<16x1024xbf16, #tpu.memory_space<vmem>>, %arg7: memref<16x1024xf32, #tpu.memory_space<vmem>>) attributes {dimension_semantics = [#tpu.dimension_semantics<parallel>, #tpu.dimension_semantics<parallel>, #tpu.dimension_semantics<arbitrary>], iteration_bounds = array<i64: 1, 1, 1>, scalar_prefetch = 0 : i64, scratch_operands = 1 : i64, tpu.core_type = #tpu.core_type<tc>, window_params = [{transform_indices = @transform_0, window_bounds = array<i64: 16, 512>}, {transform_indices = @transform_1, window_bounds = array<i64: 512, 1024>}, {transform_indices = @transform_2, window_bounds = array<i64: 1, 1024>}, {transform_indices = @transform_3, window_bounds = array<i64: 16, 1024>}]} {
    %c0_i32 = arith.constant 0 : i32
    %0 = arith.cmpi eq, %arg2, %c0_i32 : i32
    %1 = arith.extui %0 : i1 to i32
    %c0_i32_0 = arith.constant 0 : i32
    %2 = arith.cmpi ne, %1, %c0_i32_0 : i32
    scf.if %2 {
      %cst_10 = arith.constant 0.000000e+00 : f32
      %13 = vector.broadcast %cst_10 : f32 to vector<16x1024xf32>
      %c0_11 = arith.constant 0 : index
      %c0_12 = arith.constant 0 : index
      %14 = vector.load %arg7[%c0_11, %c0_12] : memref<16x1024xf32, #tpu.memory_space<vmem>>, vector<16x1024xf32>
      tpu.vector_store %arg7[%c0_11, %c0_12], %13 {strides = array<i32>} : memref<16x1024xf32, #tpu.memory_space<vmem>>, vector<16x1024xf32>,
    } else {
    }
    %c0 = arith.constant 0 : index
    %c0_1 = arith.constant 0 : index
    %3 = vector.load %arg7[%c0, %c0_1] : memref<16x1024xf32, #tpu.memory_space<vmem>>, vector<16x1024xf32>
    %c0_2 = arith.constant 0 : index
    %c0_3 = arith.constant 0 : index
    %4 = vector.load %arg3[%c0_2, %c0_3] : memref<16x512xf32, #tpu.memory_space<vmem>>, vector<16x512xf32>
    %5 = arith.truncf %4 : vector<16x512xf32> to vector<16x512xbf16>
    %c0_4 = arith.constant 0 : index
    %c0_5 = arith.constant 0 : index
    %6 = vector.load %arg4[%c0_4, %c0_5] : memref<512x1024xbf16, #tpu.memory_space<vmem>>, vector<512x1024xbf16>
    %cst = arith.constant dense<0.000000e+00> : vector<16x1024xf32>
    %7 = tpu.matmul %5, %6, %cst {dimension_numbers = #tpu.dot_dimension_numbers<[1], [0], [0], [1], [0, 0, 1, 1], [], []>} : vector<16x512xbf16>, vector<512x1024xbf16>, vector<16x1024xf32> -> vector<16x1024xf32>
    %8 = arith.addf %3, %7 : vector<16x1024xf32>
    %c0_6 = arith.constant 0 : index
    %c0_7 = arith.constant 0 : index
    %9 = vector.load %arg7[%c0_6, %c0_7] : memref<16x1024xf32, #tpu.memory_space<vmem>>, vector<16x1024xf32>
    tpu.vector_store %arg7[%c0_6, %c0_7], %8 {strides = array<i32>} : memref<16x1024xf32, #tpu.memory_space<vmem>>, vector<16x1024xf32>,
    %c0_i32_8 = arith.constant 0 : i32
    %10 = arith.cmpi eq, %arg2, %c0_i32_8 : i32
    %11 = arith.extui %10 : i1 to i32
    %c0_i32_9 = arith.constant 0 : i32
    %12 = arith.cmpi ne, %11, %c0_i32_9 : i32
    scf.if %12 {
      %c0_10 = arith.constant 0 : index
      %c0_11 = arith.constant 0 : index
      %13 = vector.load %arg7[%c0_10, %c0_11] : memref<16x1024xf32, #tpu.memory_space<vmem>>, vector<16x1024xf32>
      %c0_12 = arith.constant 0 : index
      %c0_13 = arith.constant 0 : index
      %14 = vector.load %arg5[%c0_12, %c0_13] : memref<1x1024xf32, #tpu.memory_space<vmem>>, vector<1x1024xf32>
      %15 = vector.broadcast %14 : vector<1x1024xf32> to vector<16x1024xf32>
      %16 = arith.addf %13, %15 : vector<16x1024xf32>
      %cst_14 = arith.constant 0.000000e+00 : f32
      %17 = vector.broadcast %cst_14 : f32 to vector<16x1024xf32>
      %18 = arith.maximumf %16, %17 : vector<16x1024xf32>
      %19 = arith.truncf %18 : vector<16x1024xf32> to vector<16x1024xbf16>
      %c0_15 = arith.constant 0 : index
      %c0_16 = arith.constant 0 : index
      %20 = vector.load %arg6[%c0_15, %c0_16] : memref<16x1024xbf16, #tpu.memory_space<vmem>>, vector<16x1024xbf16>
      tpu.vector_store %arg6[%c0_15, %c0_16], %19 {strides = array<i32>} : memref<16x1024xbf16, #tpu.memory_space<vmem>>, vector<16x1024xbf16>,
    } else {
    }
    return
  }
  func.func @transform_0(%arg0: i32, %arg1: i32, %arg2: i32) -> (i32, i32) {
    %c0_i32 = arith.constant 0 : i32
    return %arg0, %arg2 : i32, i32
  }
  func.func @transform_1(%arg0: i32, %arg1: i32, %arg2: i32) -> (i32, i32) {
    %c0_i32 = arith.constant 0 : i32
    return %arg2, %arg1 : i32, i32
  }
  func.func @transform_2(%arg0: i32, %arg1: i32, %arg2: i32) -> (i32, i32) {
    %c0_i32 = arith.constant 0 : i32
    %c0_i32_0 = arith.constant 0 : i32
    return %c0_i32, %arg1 : i32, i32
  }
  func.func @transform_3(%arg0: i32, %arg1: i32, %arg2: i32) -> (i32, i32) {
    %c0_i32 = arith.constant 0 : i32
    return %arg0, %arg1 : i32, i32
  }
}

module attributes {stable_mosaic.version = 11 : i64} {
  func.func @_linear_ln_kernel(%arg0: i32, %arg1: i32, %arg2: memref<16x512xbf16, #tpu.memory_space<vmem>>, %arg3: memref<512x512xbf16, #tpu.memory_space<vmem>>, %arg4: memref<1x512xf32, #tpu.memory_space<vmem>>, %arg5: memref<16x512xf32, #tpu.memory_space<vmem>>, %arg6: memref<1x512xf32, #tpu.memory_space<vmem>>, %arg7: memref<1x512xf32, #tpu.memory_space<vmem>>, %arg8: memref<16x512xf32, #tpu.memory_space<vmem>>, %arg9: memref<16x512xf32, #tpu.memory_space<vmem>>) attributes {dimension_semantics = [#tpu.dimension_semantics<parallel>, #tpu.dimension_semantics<arbitrary>], iteration_bounds = array<i64: 1, 2>, scalar_prefetch = 0 : i64, scratch_operands = 1 : i64, tpu.core_type = #tpu.core_type<tc>, window_params = [{transform_indices = @transform_0, window_bounds = array<i64: 16, 512>}, {transform_indices = @transform_1, window_bounds = array<i64: 512, 512>}, {pipeline_mode = #tpu.pipeline_mode<synchronous>, transform_indices = @transform_2, window_bounds = array<i64: 1, 512>}, {transform_indices = @transform_3, window_bounds = array<i64: 16, 512>}, {pipeline_mode = #tpu.pipeline_mode<synchronous>, transform_indices = @transform_4, window_bounds = array<i64: 1, 512>}, {pipeline_mode = #tpu.pipeline_mode<synchronous>, transform_indices = @transform_5, window_bounds = array<i64: 1, 512>}, {transform_indices = @transform_6, window_bounds = array<i64: 16, 512>}]} {
    %c0_i32 = arith.constant 0 : i32
    %0 = arith.cmpi eq, %arg1, %c0_i32 : i32
    %1 = arith.extui %0 : i1 to i32
    %c0_i32_0 = arith.constant 0 : i32
    %2 = arith.cmpi ne, %1, %c0_i32_0 : i32
    scf.if %2 {
      %cst_9 = arith.constant 0.000000e+00 : f32
      %12 = vector.broadcast %cst_9 : f32 to vector<16x512xf32>
      %c0_10 = arith.constant 0 : index
      %c0_11 = arith.constant 0 : index
      %13 = vector.load %arg9[%c0_10, %c0_11] : memref<16x512xf32, #tpu.memory_space<vmem>>, vector<16x512xf32>
      tpu.vector_store %arg9[%c0_10, %c0_11], %12 {strides = array<i32>} : memref<16x512xf32, #tpu.memory_space<vmem>>, vector<16x512xf32>,
    } else {
    }
    %c0 = arith.constant 0 : index
    %c0_1 = arith.constant 0 : index
    %3 = vector.load %arg9[%c0, %c0_1] : memref<16x512xf32, #tpu.memory_space<vmem>>, vector<16x512xf32>
    %c0_2 = arith.constant 0 : index
    %c0_3 = arith.constant 0 : index
    %4 = vector.load %arg2[%c0_2, %c0_3] : memref<16x512xbf16, #tpu.memory_space<vmem>>, vector<16x512xbf16>
    %c0_4 = arith.constant 0 : index
    %c0_5 = arith.constant 0 : index
    %5 = vector.load %arg3[%c0_4, %c0_5] : memref<512x512xbf16, #tpu.memory_space<vmem>>, vector<512x512xbf16>
    %cst = arith.constant dense<0.000000e+00> : vector<16x512xf32>
    %6 = tpu.matmul %4, %5, %cst {dimension_numbers = #tpu.dot_dimension_numbers<[1], [0], [0], [1], [0, 0, 1, 1], [], []>} : vector<16x512xbf16>, vector<512x512xbf16>, vector<16x512xf32> -> vector<16x512xf32>
    %7 = arith.addf %3, %6 : vector<16x512xf32>
    %c0_6 = arith.constant 0 : index
    %c0_7 = arith.constant 0 : index
    %8 = vector.load %arg9[%c0_6, %c0_7] : memref<16x512xf32, #tpu.memory_space<vmem>>, vector<16x512xf32>
    tpu.vector_store %arg9[%c0_6, %c0_7], %7 {strides = array<i32>} : memref<16x512xf32, #tpu.memory_space<vmem>>, vector<16x512xf32>,
    %c1_i32 = arith.constant 1 : i32
    %9 = arith.cmpi eq, %arg1, %c1_i32 : i32
    %10 = arith.extui %9 : i1 to i32
    %c0_i32_8 = arith.constant 0 : i32
    %11 = arith.cmpi ne, %10, %c0_i32_8 : i32
    scf.if %11 {
      %c0_9 = arith.constant 0 : index
      %c0_10 = arith.constant 0 : index
      %12 = vector.load %arg9[%c0_9, %c0_10] : memref<16x512xf32, #tpu.memory_space<vmem>>, vector<16x512xf32>
      %c0_11 = arith.constant 0 : index
      %c0_12 = arith.constant 0 : index
      %13 = vector.load %arg4[%c0_11, %c0_12] : memref<1x512xf32, #tpu.memory_space<vmem>>, vector<1x512xf32>
      %14 = vector.broadcast %13 : vector<1x512xf32> to vector<16x512xf32>
      %15 = arith.addf %12, %14 : vector<16x512xf32>
      %c0_13 = arith.constant 0 : index
      %c0_14 = arith.constant 0 : index
      %16 = vector.load %arg5[%c0_13, %c0_14] : memref<16x512xf32, #tpu.memory_space<vmem>>, vector<16x512xf32>
      %17 = arith.addf %15, %16 : vector<16x512xf32>
      %cst_15 = arith.constant dense<0.000000e+00> : vector<16xf32>
      %18 = vector.multi_reduction <add>, %17, %cst_15 [1] : vector<16x512xf32> to vector<16xf32>
      %19 = vector.shape_cast %18 : vector<16xf32> to vector<16x1xf32>
      %cst_16 = arith.constant 5.120000e+02 : f32
      %20 = vector.broadcast %cst_16 : f32 to vector<16x1xf32>
      %21 = arith.divf %19, %20 : vector<16x1xf32>
      %22 = vector.broadcast %21 : vector<16x1xf32> to vector<16x512xf32>
      %23 = arith.subf %17, %22 : vector<16x512xf32>
      %24 = arith.mulf %23, %23 : vector<16x512xf32>
      %cst_17 = arith.constant dense<0.000000e+00> : vector<16xf32>
      %25 = vector.multi_reduction <add>, %24, %cst_17 [1] : vector<16x512xf32> to vector<16xf32>
      %26 = vector.shape_cast %25 : vector<16xf32> to vector<16x1xf32>
      %cst_18 = arith.constant 5.120000e+02 : f32
      %27 = vector.broadcast %cst_18 : f32 to vector<16x1xf32>
      %28 = arith.divf %26, %27 : vector<16x1xf32>
      %cst_19 = arith.constant 9.99999974E-6 : f32
      %29 = vector.broadcast %cst_19 : f32 to vector<16x1xf32>
      %30 = arith.addf %28, %29 : vector<16x1xf32>
      %31 = math.rsqrt %30 : vector<16x1xf32>
      %32 = vector.broadcast %31 : vector<16x1xf32> to vector<16x512xf32>
      %33 = arith.mulf %23, %32 : vector<16x512xf32>
      %c0_20 = arith.constant 0 : index
      %c0_21 = arith.constant 0 : index
      %34 = vector.load %arg6[%c0_20, %c0_21] : memref<1x512xf32, #tpu.memory_space<vmem>>, vector<1x512xf32>
      %35 = vector.broadcast %34 : vector<1x512xf32> to vector<16x512xf32>
      %36 = arith.mulf %33, %35 : vector<16x512xf32>
      %c0_22 = arith.constant 0 : index
      %c0_23 = arith.constant 0 : index
      %37 = vector.load %arg7[%c0_22, %c0_23] : memref<1x512xf32, #tpu.memory_space<vmem>>, vector<1x512xf32>
      %38 = vector.broadcast %37 : vector<1x512xf32> to vector<16x512xf32>
      %39 = arith.addf %36, %38 : vector<16x512xf32>
      %c0_24 = arith.constant 0 : index
      %c0_25 = arith.constant 0 : index
      %40 = vector.load %arg8[%c0_24, %c0_25] : memref<16x512xf32, #tpu.memory_space<vmem>>, vector<16x512xf32>
      tpu.vector_store %arg8[%c0_24, %c0_25], %39 {strides = array<i32>} : memref<16x512xf32, #tpu.memory_space<vmem>>, vector<16x512xf32>,
    } else {
    }
    return
  }
  func.func @transform_0(%arg0: i32, %arg1: i32) -> (i32, i32) {
    %c0_i32 = arith.constant 0 : i32
    return %arg0, %arg1 : i32, i32
  }
  func.func @transform_1(%arg0: i32, %arg1: i32) -> (i32, i32) {
    %c0_i32 = arith.constant 0 : i32
    %c0_i32_0 = arith.constant 0 : i32
    return %arg1, %c0_i32 : i32, i32
  }
  func.func @transform_2(%arg0: i32, %arg1: i32) -> (i32, i32) {
    %c0_i32 = arith.constant 0 : i32
    %c0_i32_0 = arith.constant 0 : i32
    %c0_i32_1 = arith.constant 0 : i32
    return %c0_i32, %c0_i32_0 : i32, i32
  }
  func.func @transform_3(%arg0: i32, %arg1: i32) -> (i32, i32) {
    %c0_i32 = arith.constant 0 : i32
    %c0_i32_0 = arith.constant 0 : i32
    return %arg0, %c0_i32 : i32, i32
  }
  func.func @transform_4(%arg0: i32, %arg1: i32) -> (i32, i32) {
    %c0_i32 = arith.constant 0 : i32
    %c0_i32_0 = arith.constant 0 : i32
    %c0_i32_1 = arith.constant 0 : i32
    return %c0_i32, %c0_i32_0 : i32, i32
  }
  func.func @transform_5(%arg0: i32, %arg1: i32) -> (i32, i32) {
    %c0_i32 = arith.constant 0 : i32
    %c0_i32_0 = arith.constant 0 : i32
    %c0_i32_1 = arith.constant 0 : i32
    return %c0_i32, %c0_i32_0 : i32, i32
  }
  func.func @transform_6(%arg0: i32, %arg1: i32) -> (i32, i32) {
    %c0_i32 = arith.constant 0 : i32
    %c0_i32_0 = arith.constant 0 : i32
    return %arg0, %c0_i32 : i32, i32
  }
}

</mosaic_0001>

<bundles_post_ra>
// kernel: encoder_layer_forward.6
= control target key start
LH: loop header
LB: loop body
LE: loop exit
PB: predicated region body
PF: predicated region fallthrough
CT: control target
= control target key end

     0   :  { %s1593_s12 = smov 0   ;;  %s1595_s13 = smov 0   ;;  %s1742_s0 = inlined_call_operand.vmem [shape: bf16[2,64,512], index: 0, kind: input, shape index: {}]   ;;  %s1743_s1 = inlined_call_operand.vmem [shape: bf16[2,64,512], index: 1, kind: input, shape index: {}]   ;;  %s1744_s2 = inlined_call_operand.vmem [shape: bf16[2,64,512], index: 2, kind: input, shape index: {}]   ;;  %s1745_s3 = inlined_call_operand.vmem [shape: bf16[2,64,512], index: 3, kind: output, shape index: {}]  }
   0x1   :  { %s1597_s14 = smov 0  }
   0x2 LB: > { %s25_s15 = sadd.s32 1, %s1566_s13  ;;  %p1314_p0 = scmp.ge.s32.totalorder %s1570_s14, 1  ;;  %s1570_s14 = sphi %s1597_s14, %s13_s14   ;;  %s1566_s13 = sphi %s1595_s13, %s1747_s13   ;;  %s1562_s12 = sphi %s1593_s12, %s1746_s12  }
   0x3   : > { %p27_p1 = scmp.ge.s32.totalorder %s25_s15, 2  ;;  %p185_p2 = scmp.lt.s32.totalorder %s1570_s14, 3 }
   0x5   : > { %s1749_s15 = smov (%p27_p1, %s25_s15), 0  ;;  %p186_p3 = pnand %p1314_p0, %p185_p2 }
   0x6   : > { %p229_p4 = scmp.lt.s32.totalorder (!%p186_p3), %s1562_s12, 1  ;;  %v1572_v33 = vmov (!%p186_p3), 0   ;;  %vm628_vm0 = vcmask (!%p186_p3), 523264  }
   0x7   : > { %189 = sbr.rel (%p186_p3) target bundleno = 673 (0x2a1), region = 32  ;;  %880 = vmatprep.mubr.bf16.mxu1 (!%p186_p3), %v1572_v33 }
   0xe   : > { %s1751_s12 = smov (!%p229_p4, %s1562_s12), 1 }
   0xf   : > { %s1611_s16 = sshll.u32 %s1751_s12, 7 }
  0x10   : > { %s1617_s19 = scalar_lea.vmem %s1743_s1, %s1611_s16  ;;  %s1626_s22 = scalar_lea.vmem %s1742_s0, %s1611_s16 }
  0x11   : > { %v1458_v0 = vld [vmem:[%s1617_s19 + $0x4] ss:$16 sps:$4 sm:$0xff]   ;;  %v1460_v1 = vld [vmem:[%s1617_s19] ss:$16 sps:$4 sm:$0xff]   ;;  %v1475_v9 = vld [vmem:[%s1617_s19 + $0xc] ss:$16 sps:$4 sm:$0xff]   ;;  %s1661_s25 = scalar_lea.vmem %s1744_s2, %s1611_s16  ;;  %s1715_s28 = scalar_lea.vmem %s1745_s3, %s1611_s16 }
  0x12   : > { %490 = vmatprep.subr.bf16.mxu0 %v1458_v0  ;;  %v1461_v2 = vld [vmem:[%s1617_s19 + $0x24] ss:$16 sps:$4 sm:$0xff]   ;;  %v1463_v4 = vld [vmem:[%s1617_s19 + $0x20] ss:$16 sps:$4 sm:$0xff]   ;;  %v1473_v11 = vld [vmem:[%s1617_s19 + $0x8] ss:$16 sps:$4 sm:$0xff]  }
  0x13   : > { %491 = vmatpush1.bf16.xpose.msra.mxu0 %v1460_v1  ;;  %v1472_v3 = vld [vmem:[%s1626_s22 + $0x4] ss:$16 sps:$4 sm:$0xff]   ;;  %v1466_v6 = vld [vmem:[%s1617_s19 + $0x40] ss:$16 sps:$4 sm:$0xff]   ;;  %v1481_v13 = vld [vmem:[%s1617_s19 + $0x2c] ss:$16 sps:$4 sm:$0xff]  }
  0x14   : > { %492 = vmatprep.subr.bf16.mxu0 %v1461_v2  ;;  %v1464_v5 = vld [vmem:[%s1617_s19 + $0x44] ss:$16 sps:$4 sm:$0xff]   ;;  %522 = vmatprep.mubr.bf16.mxu0 %v1472_v3  ;;  %v1469_v8 = vld [vmem:[%s1617_s19 + $0x60] ss:$16 sps:$4 sm:$0xff]   ;;  %v1479_v15 = vld [vmem:[%s1617_s19 + $0x28] ss:$16 sps:$4 sm:$0xff]  }
  0x15   : > { %v1467_v7 = vld [vmem:[%s1617_s19 + $0x64] ss:$16 sps:$4 sm:$0xff]   ;;  %v1470_v10 = vld [vmem:[%s1626_s22] ss:$16 sps:$4 sm:$0xff]   ;;  %v1487_v17 = vld [vmem:[%s1617_s19 + $0x4c] ss:$16 sps:$4 sm:$0xff]  }
  0x16   : > { %v1476_v12 = vld [vmem:[%s1626_s22 + $0x24] ss:$16 sps:$4 sm:$0xff]   ;;  %v1478_v14 = vld [vmem:[%s1626_s22 + $0x20] ss:$16 sps:$4 sm:$0xff]   ;;  %v1485_v19 = vld [vmem:[%s1617_s19 + $0x48] ss:$16 sps:$4 sm:$0xff]  }
  0x17   : > { %v1482_v16 = vld [vmem:[%s1626_s22 + $0x44] ss:$16 sps:$4 sm:$0xff]   ;;  %v1484_v18 = vld [vmem:[%s1626_s22 + $0x40] ss:$16 sps:$4 sm:$0xff]   ;;  %v1493_v21 = vld [vmem:[%s1617_s19 + $0x6c] ss:$16 sps:$4 sm:$0xff]  }
  0x18   : > { %v1488_v20 = vld [vmem:[%s1626_s22 + $0x64] ss:$16 sps:$4 sm:$0xff]   ;;  %v1490_v22 = vld [vmem:[%s1626_s22 + $0x60] ss:$16 sps:$4 sm:$0xff]   ;;  %v1491_v23 = vld [vmem:[%s1617_s19 + $0x68] ss:$16 sps:$4 sm:$0xff]  }
  0x19   : > { %v1496_v24 = vld [vmem:[%s1626_s22 + $0xc] ss:$16 sps:$4 sm:$0xff]   ;;  %v1494_v25 = vld [vmem:[%s1626_s22 + $0x8] ss:$16 sps:$4 sm:$0xff]   ;;  %v1506_v32 = vld [vmem:[%s1661_s25 + $0x4] ss:$16 sps:$4 sm:$0xff]  }
  0x1a   : > { %v1497_v26 = vld [vmem:[%s1626_s22 + $0x2c] ss:$16 sps:$4 sm:$0xff]   ;;  %v1499_v27 = vld [vmem:[%s1626_s22 + $0x28] ss:$16 sps:$4 sm:$0xff]   ;;  %v1508_v34 = vld [vmem:[%s1661_s25] ss:$16 sps:$4 sm:$0xff]   ;;  %848 = vmatprep.subr.bf16.mxu1 %v1506_v32 }
  0x1b   : > { %493 = vmatpush1.bf16.xpose.msra.mxu0 %v1463_v4  ;;  %v1500_v28 = vld [vmem:[%s1626_s22 + $0x4c] ss:$16 sps:$4 sm:$0xff]   ;;  %v1502_v29 = vld [vmem:[%s1626_s22 + $0x48] ss:$16 sps:$4 sm:$0xff]   ;;  %v1509_v35 = vld [vmem:[%s1661_s25 + $0x24] ss:$16 sps:$4 sm:$0xff]   ;;  %849 = vmatpush1.bf16.msra.mxu1 %v1508_v34 }
  0x1c   : > { %494 = vmatprep.subr.bf16.mxu0 %v1464_v5  ;;  %v1503_v30 = vld [vmem:[%s1626_s22 + $0x6c] ss:$16 sps:$4 sm:$0xff]   ;;  %v1505_v31 = vld [vmem:[%s1626_s22 + $0x68] ss:$16 sps:$4 sm:$0xff]   ;;  %v1511_v36 = vld [vmem:[%s1661_s25 + $0x20] ss:$16 sps:$4 sm:$0xff]   ;;  %850 = vmatprep.subr.bf16.mxu1 %v1509_v35 }
  0x1d   : > { %v1512_v37 = vld [vmem:[%s1661_s25 + $0x44] ss:$16 sps:$4 sm:$0xff]   ;;  %v1514_v38 = vld [vmem:[%s1661_s25 + $0x40] ss:$16 sps:$4 sm:$0xff]   ;;  %v1520_v41 = vld [vmem:[%s1661_s25 + $0xc] ss:$16 sps:$4 sm:$0xff]  }
  0x1e   : > { %v1515_v39 = vld [vmem:[%s1661_s25 + $0x64] ss:$16 sps:$4 sm:$0xff]   ;;  %v1517_v40 = vld [vmem:[%s1661_s25 + $0x60] ss:$16 sps:$4 sm:$0xff]  }
  0x1f   : > { %851 = vmatpush1.bf16.msra.mxu1 %v1511_v36 }
  0x20   : > { %852 = vmatprep.subr.bf16.mxu1 %v1512_v37 }
  0x23   : > { %495 = vmatpush1.bf16.xpose.msra.mxu0 %v1466_v6  ;;  %853 = vmatpush1.bf16.msra.mxu1 %v1514_v38 }
  0x24   : > { %496 = vmatprep.subr.bf16.mxu0 %v1467_v7  ;;  %854 = vmatprep.subr.bf16.mxu1 %v1515_v39 }
  0x27   : > { %855 = vmatpush1.bf16.msra.mxu1 %v1517_v40 }
  0x28   : > { %921 = vmatprep.subr.bf16.mxu1 %v1520_v41 }
  0x2b   : > { %497 = vmatpush1.bf16.xpose.msra.mxu0 %v1469_v8 }
  0x2c   : > { %555 = vmatprep.subr.bf16.mxu0 %v1475_v9 }
  0x32   : > { %523 = vmatmul.mubr.bf16.vlgmr.msra.gmra.mrb[0].mxu0 %v1470_v10 }
  0x33   : > { %556 = vmatpush1.bf16.xpose.msra.mxu0 %v1473_v11  ;;  %530 = vmatprep.mubr.bf16.mxu0 %v1476_v12 }
  0x34   : > { %557 = vmatprep.subr.bf16.mxu0 %v1481_v13 }
  0x3a   : > { %531 = vmatmul.mubr.bf16.gmra.mrb[4].mxu0 %v1478_v14 }
  0x3b   : > { %558 = vmatpush1.bf16.xpose.msra.mxu0 %v1479_v15  ;;  %538 = vmatprep.mubr.bf16.mxu0 %v1482_v16 }
  0x3c   : > { %559 = vmatprep.subr.bf16.mxu0 %v1487_v17 }
  0x42   : > { %539 = vmatmul.mubr.bf16.gmra.mrb[8].mxu0 %v1484_v18 }
  0x43   : > { %560 = vmatpush1.bf16.xpose.msra.mxu0 %v1485_v19  ;;  %546 = vmatprep.mubr.bf16.mxu0 %v1488_v20 }
  0x44   : > { %561 = vmatprep.subr.bf16.mxu0 %v1493_v21 }
  0x4a   : > { %547 = vmatmul.mubr.bf16.gmra.mrb[12].mxu0 %v1490_v22 }
  0x4b   : > { %562 = vmatpush1.bf16.xpose.msra.mxu0 %v1491_v23  ;;  %587 = vmatprep.mubr.bf16.mxu0 %v1496_v24 }
  0x52   : > { %588 = vmatmul.mubr.bf16.vlgmr.msra.gmra.mrb[0].mxu0 %v1494_v25 }
  0x53   : > { %595 = vmatprep.mubr.bf16.mxu0 %v1497_v26 }
  0x5a   : > { %596 = vmatmul.mubr.bf16.gmra.mrb[4].mxu0 %v1499_v27 }
  0x5b   : > { %603 = vmatprep.mubr.bf16.mxu0 %v1500_v28 }
  0x62   : > { %604 = vmatmul.mubr.bf16.gmra.mrb[8].mxu0 %v1502_v29 }
  0x63   : > { %611 = vmatprep.mubr.bf16.mxu0 %v1503_v30 }
  0x6a   : > { %612 = vmatmul.mubr.bf16.gmra.mrb[12].mxu0 %v1505_v31 }
 0x125   : > { %v589_v42 = vpop.f32.mrb[0].mxu0 }
 0x126   : > { %v591_v43 = vpop.f32.mrb[1].mxu0  ;;  %v620_v50 = vmul.f32 0.044194173, %v589_v42 }
 0x127   : > { %v592_v44 = vpop.f32.mrb[2].mxu0 }
 0x128   : > { %v594_v45 = vpop.f32.mrb[3].mxu0  ;;  %v621_v52 = vmul.f32 0.044194173, %v592_v44  ;;  %v629_v56 = vsel %vm628_vm0, %v620_v50, -inf }
 0x12a   : > { %v630_v61 = vsel %vm628_vm0, %v621_v52, -inf }
 0x12d   : > { %v597_v46 = vpop.f32.mrb[4].mxu0 }
 0x12e   : > { %v599_v47 = vpop.f32.mrb[5].mxu0  ;;  %v622_v0 = vmul.f32 0.044194173, %v597_v46 }
 0x12f   : > { %v600_v48 = vpop.f32.mrb[6].mxu0 }
 0x130   : > { %v602_v49 = vpop.f32.mrb[7].mxu0  ;;  %v623_v3 = vmul.f32 0.044194173, %v600_v48  ;;  %v631_v7 = vsel %vm628_vm0, %v622_v0, -inf }
 0x132   : > { %v632_v12 = vsel %vm628_vm0, %v623_v3, -inf }
 0x135   : > { %v605_v51 = vpop.f32.mrb[8].mxu0 }
 0x136   : > { %v624_v53 = vmul.f32 0.044194173, %v605_v51  ;;  %v607_v54 = vpop.f32.mrb[9].mxu0 }
 0x137   : > { %v608_v55 = vpop.f32.mrb[10].mxu0 }
 0x138   : > { %v633_v57 = vsel %vm628_vm0, %v624_v53, -inf  ;;  %v625_v58 = vmul.f32 0.044194173, %v608_v55  ;;  %v610_v59 = vpop.f32.mrb[11].mxu0 }
 0x139   : > { %v634_v60 = vmax.f32 %v629_v56, %v633_v57 }
 0x13a   : > { %v635_v62 = vsel %vm628_vm0, %v625_v58, -inf }
 0x13b   : > { %v636_v63 = vmax.f32 %v630_v61, %v635_v62 }
 0x13d   : > { %v641_v1 = vmax.f32 %v634_v60, %v636_v63  ;;  %v613_v2 = vpop.f32.mrb[12].mxu0 }
 0x13e   : > { %v626_v4 = vmul.f32 0.044194173, %v613_v2  ;;  %v615_v5 = vpop.f32.mrb[13].mxu0 }
 0x13f   : > { %v616_v6 = vpop.f32.mrb[14].mxu0 }
 0x140   : > { %v637_v8 = vsel %vm628_vm0, %v626_v4, -inf  ;;  %v627_v9 = vmul.f32 0.044194173, %v616_v6  ;;  %v618_v10 = vpop.f32.mrb[15].mxu0 }
 0x141   : > { %v638_v11 = vmax.f32 %v631_v7, %v637_v8  ;;  %v1518_v10 = vld [vmem:[%s1661_s25 + $0x8] ss:$16 sps:$4 sm:$0xff]  }
 0x142   : > { %v639_v13 = vsel %vm628_vm0, %v627_v9, -inf }
 0x143   : > { %v640_v14 = vmax.f32 %v632_v12, %v639_v13 }
 0x145   : > { %v642_v15 = vmax.f32 %v638_v11, %v640_v14 }
 0x147   : > { %v643_v16 = vmax.f32 %v641_v1, %v642_v15 }
 0x149   : > { %v644_v17 = vrot.slane %v643_v16, 4 }
 0x14b   : > { %v645_v18 = vmax.f32 %v643_v16, %v644_v17  ;;  %v1523_v17 = vld [vmem:[%s1661_s25 + $0x2c] ss:$16 sps:$4 sm:$0xff]  }
 0x14d   : > { %v646_v19 = vrot.slane %v645_v18, 2 }
 0x14f   : > { %v647_v20 = vmax.f32 %v645_v18, %v646_v19 }
 0x151   : > { %v648_v21 = vrot.slane %v647_v20, 1 }
 0x153   : > { %v649_v22 = vmax.f32 %v647_v20, %v648_v21  ;;  %v1521_v20 = vld [vmem:[%s1661_s25 + $0x28] ss:$16 sps:$4 sm:$0xff]   ;;  %v1526_v21 = vld [vmem:[%s1661_s25 + $0x4c] ss:$16 sps:$4 sm:$0xff]  }
 0x155   : > { %v650_v23 = vsub.f32 %v620_v50, %v649_v22  ;;  %v651_v24 = vsub.f32 %v621_v52, %v649_v22  ;;  %v652_v25 = vsub.f32 %v622_v0, %v649_v22  ;;  %v653_v26 = vsub.f32 %v623_v3, %v649_v22 }
 0x156   : > { %v654_v27 = vsub.f32 %v624_v53, %v649_v22  ;;  %v655_v28 = vsub.f32 %v625_v58, %v649_v22  ;;  %v656_v29 = vsub.f32 %v626_v4, %v649_v22  ;;  %v657_v30 = vsub.f32 %v627_v9, %v649_v22  ;;  %v1524_v22 = vld [vmem:[%s1661_s25 + $0x48] ss:$16 sps:$4 sm:$0xff]  }
 0x157   : > { %v658_v31 = vmul.f32 1.442695, %v650_v23  ;;  %v660_v32 = vmul.f32 1.442695, %v651_v24  ;;  %v662_v34 = vmul.f32 1.442695, %v652_v25 }
 0x158   : > { %v664_v35 = vmul.f32 1.442695, %v653_v26  ;;  %v666_v36 = vmul.f32 1.442695, %v654_v27  ;;  %v668_v37 = vmul.f32 1.442695, %v655_v28 }
 0x159   : > { %1530 = vpow2.f32 %v658_v31  ;;  %v670_v38 = vmul.f32 1.442695, %v656_v29  ;;  %v672_v39 = vmul.f32 1.442695, %v657_v30  ;;  %v1529_v23 = vld [vmem:[%s1661_s25 + $0x6c] ss:$16 sps:$4 sm:$0xff]  }
 0x15a   : > { %1532 = vpow2.f32 %v660_v32  ;;  %v1527_v24 = vld [vmem:[%s1661_s25 + $0x68] ss:$16 sps:$4 sm:$0xff]  }
 0x15b   : > { %1534 = vpow2.f32 %v662_v34 }
 0x15c   : > { %1536 = vpow2.f32 %v664_v35 }
 0x15d   : > { %1538 = vpow2.f32 %v666_v36 }
 0x15e   : > { %1540 = vpow2.f32 %v668_v37 }
 0x15f   : > { %1542 = vpow2.f32 %v670_v38 }
 0x160   : > { %1544 = vpow2.f32 %v672_v39 }
 0x163   : > { %v1531_v40 = vpop.eup %1530 }
 0x164   : > { %v1533_v41 = vpop.eup %1532  ;;  %v674_v42 = vsel %vm628_vm0, %v1531_v40, 0.0 }
 0x165   : > { %v1535_v43 = vpop.eup %1534  ;;  %v675_v44 = vsel %vm628_vm0, %v1533_v41, 0.0 }
 0x166   : > { %v1537_v45 = vpop.eup %1536  ;;  %v676_v46 = vadd.f32 %v675_v44, %v674_v42  ;;  %v677_v47 = vsel %vm628_vm0, %v1535_v43, 0.0 }
 0x167   : > { %v1539_v48 = vpop.eup %1538  ;;  %v679_v50 = vsel %vm628_vm0, %v1537_v45, 0.0 }
 0x168   : > { %v678_v49 = vadd.f32 %v677_v47, %v676_v46  ;;  %v1541_v51 = vpop.eup %1540  ;;  %v681_v53 = vsel %vm628_vm0, %v1539_v48, 0.0 }
 0x169   : > { %v1543_v54 = vpop.eup %1542  ;;  %v683_v56 = vsel %vm628_vm0, %v1541_v51, 0.0 }
 0x16a   : > { %v680_v52 = vadd.f32 %v679_v50, %v678_v49  ;;  %v1545_v57 = vpop.eup %1544  ;;  %v685_v59 = vsel %vm628_vm0, %v1543_v54, 0.0 }
 0x16b   : > { %v687_v61 = vsel %vm628_vm0, %v1545_v57, 0.0 }
 0x16c   : > { %v682_v55 = vadd.f32 %v681_v53, %v680_v52 }
 0x16e   : > { %v684_v58 = vadd.f32 %v683_v56, %v682_v55 }
 0x170   : > { %v686_v60 = vadd.f32 %v685_v59, %v684_v58 }
 0x172   : > { %v688_v62 = vadd.f32 %v687_v61, %v686_v60 }
 0x174   : > { %v689_v63 = vrot.slane %v688_v62, 4 }
 0x176   : > { %v690_v0 = vadd.f32 %v689_v63, %v688_v62 }
 0x178   : > { %v691_v1 = vrot.slane %v690_v0, 2 }
 0x17a   : > { %v692_v2 = vadd.f32 %v691_v1, %v690_v0 }
 0x17c   : > { %v693_v3 = vrot.slane %v692_v2, 1 }
 0x17e   : > { %v694_v4 = vadd.f32 %v693_v3, %v692_v2 }
 0x180   : > { %1546 = vrcp.f32 %v694_v4 }
 0x18a   : > { %v1547_v5 = vpop.eup %1546 }
 0x18b   : > { %v696_v6 = vmul.f32 %v1547_v5, %v1531_v40  ;;  %v697_v7 = vmul.f32 %v1547_v5, %v1533_v41  ;;  %v698_v8 = vmul.f32 %v1547_v5, %v1535_v43  ;;  %v699_v9 = vmul.f32 %v1547_v5, %v1537_v45 }
 0x18c   : > { %v700_v11 = vmul.f32 %v1547_v5, %v1539_v48  ;;  %v701_v12 = vmul.f32 %v1547_v5, %v1541_v51  ;;  %v702_v13 = vmul.f32 %v1547_v5, %v1543_v54  ;;  %v703_v14 = vmul.f32 %v1547_v5, %v1545_v57 }
 0x18d   : > { %v736_v15 = vpack.c.bf16 %v697_v7, %v696_v6  ;;  %v737_v16 = vpack.c.bf16 %v699_v9, %v698_v8 }
 0x18e   : > { %v738_v18 = vpack.c.bf16 %v701_v12, %v700_v11  ;;  %v739_v19 = vpack.c.bf16 %v703_v14, %v702_v13 }
 0x18f   : > { %1371 = vmatmul.mubr.msk.bf16.vlgmr.msra.gmra.mrb[0].mxu1 %vm628_vm0, %v736_v15 }
 0x190   : > { %922 = vmatpush1.bf16.msra.mxu1 %v1518_v10  ;;  %890 = vmatprep.mubr.bf16.mxu1 %v1572_v33 }
 0x191   : > { %923 = vmatprep.subr.bf16.mxu1 %v1523_v17 }
 0x194   : > { %924 = vmatpush1.bf16.msra.mxu1 %v1521_v20 }
 0x195   : > { %925 = vmatprep.subr.bf16.mxu1 %v1526_v21 }
 0x197   : > { %1372 = vmatmul.mubr.msk.bf16.gmra.mrb[4].mxu1 %vm628_vm0, %v737_v16 }
 0x198   : > { %900 = vmatprep.mubr.bf16.mxu1 %v1572_v33  ;;  %926 = vmatpush1.bf16.msra.mxu1 %v1524_v22 }
 0x199   : > { %927 = vmatprep.subr.bf16.mxu1 %v1529_v23 }
 0x19c   : > { %928 = vmatpush1.bf16.msra.mxu1 %v1527_v24 }
 0x19f   : > { %1373 = vmatmul.mubr.msk.bf16.gmra.mrb[8].mxu1 %vm628_vm0, %v738_v18 }
 0x1a0   : > { %910 = vmatprep.mubr.bf16.mxu1 %v1572_v33 }
 0x1a7   : > { %1374 = vmatmul.mubr.msk.bf16.gmra.mrb[12].mxu1 %vm628_vm0, %v739_v19 }
 0x1a8   : > { %953 = vmatprep.mubr.bf16.mxu1 %v1572_v33 }
 0x1af   : > { %1375 = vmatmul.mubr.msk.bf16.vlgmr.msra.gmra.mrb[16].mxu1 %vm628_vm0, %v736_v15 }
 0x1b0   : > { %963 = vmatprep.mubr.bf16.mxu1 %v1572_v33 }
 0x1b7   : > { %1376 = vmatmul.mubr.msk.bf16.gmra.mrb[20].mxu1 %vm628_vm0, %v737_v16 }
 0x1b8   : > { %973 = vmatprep.mubr.bf16.mxu1 %v1572_v33 }
 0x1bf   : > { %1377 = vmatmul.mubr.msk.bf16.gmra.mrb[24].mxu1 %vm628_vm0, %v738_v18 }
 0x1c0   : > { %983 = vmatprep.mubr.bf16.mxu1 %v1572_v33 }
 0x1c7   : > { %1378 = vmatmul.mubr.msk.bf16.gmra.mrb[28].mxu1 %vm628_vm0, %v739_v19 }
 0x262   : > { %v882_v25 = vpop.f32.mrb[0].mxu1 }
 0x263   : > { %v884_v26 = vpop.f32.mrb[1].mxu1 }
 0x264   : > { %v1401_v27 = vpack.c.bf16 %v884_v26, %v882_v25  ;;  %v886_v28 = vpop.f32.mrb[2].mxu1 }
 0x265   : > { %v888_v29 = vpop.f32.mrb[3].mxu1 }
 0x266   : > { %1189 = vst [vmem:[%s1715_s28] sm:$0xff] %v1401_v27  ;;  %v1403_v30 = vpack.c.bf16 %v888_v29, %v886_v28 }
 0x268   : > { %1191 = vst [vmem:[%s1715_s28 + $0x10] sm:$0xff] %v1403_v30 }
 0x26a   : > { %v892_v33 = vpop.f32.mrb[4].mxu1 }
 0x26b   : > { %v894_v31 = vpop.f32.mrb[5].mxu1 }
 0x26c   : > { %v1405_v32 = vpack.c.bf16 %v894_v31, %v892_v33  ;;  %v896_v34 = vpop.f32.mrb[6].mxu1 }
 0x26d   : > { %v898_v35 = vpop.f32.mrb[7].mxu1 }
 0x26e   : > { %1193 = vst [vmem:[%s1715_s28 + $0x20] sm:$0xff] %v1405_v32  ;;  %v1407_v36 = vpack.c.bf16 %v898_v35, %v896_v34 }
 0x270   : > { %1195 = vst [vmem:[%s1715_s28 + $0x30] sm:$0xff] %v1407_v36 }
 0x272   : > { %v902_v37 = vpop.f32.mrb[8].mxu1 }
 0x273   : > { %v904_v38 = vpop.f32.mrb[9].mxu1 }
 0x274   : > { %v1409_v39 = vpack.c.bf16 %v904_v38, %v902_v37  ;;  %v906_v40 = vpop.f32.mrb[10].mxu1 }
 0x275   : > { %v908_v41 = vpop.f32.mrb[11].mxu1 }
 0x276   : > { %1197 = vst [vmem:[%s1715_s28 + $0x40] sm:$0xff] %v1409_v39  ;;  %v1411_v42 = vpack.c.bf16 %v908_v41, %v906_v40 }
 0x278   : > { %1199 = vst [vmem:[%s1715_s28 + $0x50] sm:$0xff] %v1411_v42 }
 0x27a   : > { %v912_v43 = vpop.f32.mrb[12].mxu1 }
 0x27b   : > { %v914_v44 = vpop.f32.mrb[13].mxu1 }
 0x27c   : > { %v1413_v45 = vpack.c.bf16 %v914_v44, %v912_v43  ;;  %v916_v46 = vpop.f32.mrb[14].mxu1 }
 0x27d   : > { %v918_v47 = vpop.f32.mrb[15].mxu1 }
 0x27e   : > { %1201 = vst [vmem:[%s1715_s28 + $0x60] sm:$0xff] %v1413_v45  ;;  %v1415_v48 = vpack.c.bf16 %v918_v47, %v916_v46 }
 0x280   : > { %1203 = vst [vmem:[%s1715_s28 + $0x70] sm:$0xff] %v1415_v48 }
 0x282   : > { %v955_v49 = vpop.f32.mrb[16].mxu1 }
 0x283   : > { %v957_v50 = vpop.f32.mrb[17].mxu1 }
 0x284   : > { %v1402_v51 = vpack.c.bf16 %v957_v50, %v955_v49  ;;  %v959_v52 = vpop.f32.mrb[18].mxu1 }
 0x285   : > { %v961_v53 = vpop.f32.mrb[19].mxu1 }
 0x286   : > { %1190 = vst [vmem:[%s1715_s28 + $0x8] sm:$0xff] %v1402_v51  ;;  %v1404_v54 = vpack.c.bf16 %v961_v53, %v959_v52 }
 0x288   : > { %1192 = vst [vmem:[%s1715_s28 + $0x18] sm:$0xff] %v1404_v54 }
 0x28a   : > { %v965_v55 = vpop.f32.mrb[20].mxu1 }
 0x28b   : > { %v967_v56 = vpop.f32.mrb[21].mxu1 }
 0x28c   : > { %v1406_v57 = vpack.c.bf16 %v967_v56, %v965_v55  ;;  %v969_v58 = vpop.f32.mrb[22].mxu1 }
 0x28d   : > { %v971_v59 = vpop.f32.mrb[23].mxu1 }
 0x28e   : > { %1194 = vst [vmem:[%s1715_s28 + $0x28] sm:$0xff] %v1406_v57  ;;  %v1408_v60 = vpack.c.bf16 %v971_v59, %v969_v58 }
 0x290   : > { %1196 = vst [vmem:[%s1715_s28 + $0x38] sm:$0xff] %v1408_v60 }
 0x292   : > { %v975_v61 = vpop.f32.mrb[24].mxu1 }
 0x293   : > { %v977_v62 = vpop.f32.mrb[25].mxu1 }
 0x294   : > { %v1410_v63 = vpack.c.bf16 %v977_v62, %v975_v61  ;;  %v979_v0 = vpop.f32.mrb[26].mxu1 }
 0x295   : > { %v981_v1 = vpop.f32.mrb[27].mxu1 }
 0x296   : > { %1198 = vst [vmem:[%s1715_s28 + $0x48] sm:$0xff] %v1410_v63  ;;  %v1412_v2 = vpack.c.bf16 %v981_v1, %v979_v0 }
 0x298   : > { %1200 = vst [vmem:[%s1715_s28 + $0x58] sm:$0xff] %v1412_v2 }
 0x29a   : > { %v985_v3 = vpop.f32.mrb[28].mxu1 }
 0x29b   : > { %v987_v4 = vpop.f32.mrb[29].mxu1 }
 0x29c   : > { %v1414_v5 = vpack.c.bf16 %v987_v4, %v985_v3  ;;  %v989_v6 = vpop.f32.mrb[30].mxu1 }
 0x29d   : > { %v991_v7 = vpop.f32.mrb[31].mxu1 }
 0x29e   : > { %1202 = vst [vmem:[%s1715_s28 + $0x68] sm:$0xff] %v1414_v5  ;;  %v1416_v8 = vpack.c.bf16 %v991_v7, %v989_v6 }
 0x2a0   : > { %1204 = vst [vmem:[%s1715_s28 + $0x78] sm:$0xff] %v1416_v8 }
 0x2a1 PF: > { %s13_s14 = sadd.s32 1, %s1570_s14   ;;  %s1746_s12 = smov %s1566_s13 }
 0x2a2   : > { %p10_p5 = scmp.ge.s32.totalorder %s13_s14, 4   ;;  %s1747_s13 = smov %s1749_s15 }
 0x2a4   :  { %12 = sbr.rel (!%p10_p5) target bundleno = 2 (0x2), region = 76 }

// kernel: encoder_layer_forward.7
= control target key start
LH: loop header
LB: loop body
LE: loop exit
PB: predicated region body
PF: predicated region fallthrough
CT: control target
= control target key end

     0   :  { %s2027_s18 = smov 0   ;;  %s2029_s19 = smov 0   ;;  %s2283_s0 = inlined_call_operand.vmem [shape: bf16[16,4096], index: 0, kind: input, shape index: {}]   ;;  %s2284_s1 = inlined_call_operand.vmem [shape: bf16[4096,512], index: 1, kind: input, shape index: {}]   ;;  %s2285_s2 = inlined_call_operand.vmem [shape: f32[1,512], index: 2, kind: input, shape index: {}]   ;;  %s2286_s3 = inlined_call_operand.vmem [shape: f32[1,512], index: 3, kind: input, shape index: {}]   ;;  %s2287_s4 = inlined_call_operand.vmem [shape: f32[1,512], index: 4, kind: input, shape index: {}]   ;;  %s2288_s5 = inlined_call_operand.vmem [shape: f32[16,512], index: 5, kind: output, shape index: {}]  }
   0x1   :  { %s2031_s20 = smov 0   ;;  %s2033_s21 = smov 0  }
   0x2   :  { %s2035_s22 = smov 0  }
   0x3 LB: > { %s24_s23 = sadd.s32 1, %s1990_s21  ;;  %p43_p1 = scmp.ne.s32.totalorder %s1982_s19, %s1978_s18  ;;  %s1994_s22 = sphi %s2035_s22, %s15_s22   ;;  %s1990_s21 = sphi %s2033_s21, %s2292_s21   ;;  %s1986_s20 = sphi %s2031_s20, %s2291_s20   ;;  %s1982_s19 = sphi %s2029_s19, %s2290_s19   ;;  %s1978_s18 = sphi %s2027_s18, %s2289_s18  }
   0x4   : > { %p25_p0 = scmp.ge.s32.totalorder %s24_s23, 8  ;;  %p44_p2 = scmp.eq.s32.totalorder %s1994_s22, 0 }
   0x5   : > { %s36_s25 = sadd.s32 1, %s1982_s19  ;;  %p1556_p5 = scmp.ge.s32.totalorder %s1994_s22, 8 }
   0x6   : > { %s2294_s23 = smov (%p25_p0, %s24_s23), 0  ;;  %p45_p3 = por %p44_p2, %p43_p1 }
   0x7   : > { %s32_s24 = ssub.s32 %s1990_s21, %s2294_s23  ;;  %193 = sbr.rel (%p1556_p5) target bundleno = 21 (0x15), region = 28 }
   0x8   : > { %p34_p4 = scmp.eq.s32.totalorder %s32_s24, 0 }
   0xa   : > { %s2062_s26 = scalar_select %p34_p4, %s1982_s19, %s36_s25  }
   0xe   : > { %196 = sbr.rel (!%p45_p3) target bundleno = 21 (0x15), region = 32  ;;  %s198_s27 = sand.u32 (%p45_p3), 1, %s1982_s19  }
   0xf   : > { %s1703_s28 = sshll.u32 (%p45_p3), %s1990_s21, 4  ;;  %s1557_s29 = sshll.u32 (%p45_p3), %s198_s27, 5 }
  0x10   : > { %s206_s7 = scalar_lea.vmem (%p45_p3), %s2283_s0, %s1703_s28  ;;  %s200_s8 = scalar_lea.vmem (%p45_p3), [#allocation3], %s1557_s29 }
  0x11   : > { %v219_v0 = vld [vmem:[%s206_s7] sm:$0xff] (%p45_p3)  ;;  %v221_v1 = vld [vmem:[%s206_s7 + $0x8] sm:$0xff] (%p45_p3) }
  0x12   : > { %v223_v2 = vld [vmem:[%s206_s7 + $0x80] sm:$0xff] (%p45_p3)  ;;  %220 = vst [vmem:[%s200_s8] sm:$0xff] (%p45_p3), %v219_v0  ;;  %222 = vst [vmem:[%s200_s8 + $0x8] sm:$0xff] (%p45_p3), %v221_v1  ;;  %v225_v3 = vld [vmem:[%s206_s7 + $0x88] sm:$0xff] (%p45_p3) }
  0x13   : > { %224 = vst [vmem:[%s200_s8 + $0x10] sm:$0xff] (%p45_p3), %v223_v2  ;;  %226 = vst [vmem:[%s200_s8 + $0x18] sm:$0xff] (%p45_p3), %v225_v3 }
  0x15 PF: > { %p1560_p6 = scmp.ge.s32.totalorder %s1994_s22, 1  ;;  %p241_p7 = scmp.lt.s32.totalorder %s1994_s22, 9 }
  0x17   : > { %p242_p8 = pnand %p1560_p6, %p241_p7 }
  0x18   : > { %s248_s9 = sand.u32 (!%p242_p8), 1, %s1978_s18   ;;  %s1562_s10 = sshll.u32 (!%p242_p8), %s1986_s20, 6 }
  0x19   : > { %245 = sbr.rel (%p242_p8) target bundleno = 725 (0x2d5), region = 59  ;;  %s1561_s11 = sshll.u32 (!%p242_p8), %s248_s9, 5 }
  0x1a   : > { %p285_p9 = scmp.lt.s32.totalorder (!%p242_p8), %s1562_s10, 511  ;;  %s2079_s16 = scalar_lea.vmem (!%p242_p8), [#allocation3], %s1561_s11 }
  0x1b   : > { %p1565_p10 = scmp.ne.s32.totalorder (!%p242_p8), %s1986_s20, 0 }
  0x20   : > { %s2296_s10 = smov (!%p285_p9, %s1562_s10), 511  ;;  %301 = sbr.rel (%p1565_p10) target bundleno = 39 (0x27), region = 67 }
  0x21   : > { %s1704_s12 = sshll.u32 %s2296_s10, 4  ;;  %v1996_v4 = vmov (!%p1565_p10), 0.0  }
  0x22   : > { %s2077_s15 = scalar_lea.vmem %s2284_s1, %s1704_s12  ;;  %302 = vst [vmem:[#allocation2] sm:$0xff] (!%p1565_p10), %v1996_v4  ;;  %303 = vst [vmem:[#allocation2 + $0x8] sm:$0xff] (!%p1565_p10), %v1996_v4 }
  0x23   : > { %304 = vst [vmem:[#allocation2 + $0x10] sm:$0xff] (!%p1565_p10), %v1996_v4  ;;  %305 = vst [vmem:[#allocation2 + $0x18] sm:$0xff] (!%p1565_p10), %v1996_v4 }
  0x24   : > { %306 = vst [vmem:[#allocation2 + $0x20] sm:$0xff] (!%p1565_p10), %v1996_v4  ;;  %307 = vst [vmem:[#allocation2 + $0x28] sm:$0xff] (!%p1565_p10), %v1996_v4 }
  0x25   : > { %308 = vst [vmem:[#allocation2 + $0x30] sm:$0xff] (!%p1565_p10), %v1996_v4  ;;  %309 = vst [vmem:[#allocation2 + $0x38] sm:$0xff] (!%p1565_p10), %v1996_v4 }
  0x27 PF: > { %v1754_v5 = vld [vmem:[%s2077_s15 + $0x4] ss:$16 sps:$4 sm:$0xff]   ;;  %v1756_v6 = vld [vmem:[%s2077_s15 + $0xc] ss:$16 sps:$4 sm:$0xff]   ;;  %v1758_v7 = vld [vmem:[%s2077_s15] ss:$16 sps:$4 sm:$0xff]  }
  0x28   : > { %1110 = vmatprep.subr.bf16.mxu0 %v1754_v5  ;;  %v1759_v8 = vld [vmem:[%s2077_s15 + $0x8] ss:$16 sps:$4 sm:$0xff]   ;;  %1196 = vmatprep.subr.bf16.mxu1 %v1756_v6  ;;  %v1760_v9 = vld [vmem:[%s2077_s15 + $0x24] ss:$16 sps:$4 sm:$0xff]   ;;  %v1762_v10 = vld [vmem:[%s2077_s15 + $0x2c] ss:$16 sps:$4 sm:$0xff]  }
  0x29   : > { %1111 = vmatpush1.bf16.msra.mxu0 %v1758_v7  ;;  %1197 = vmatpush1.bf16.msra.mxu1 %v1759_v8  ;;  %v1764_v11 = vld [vmem:[%s2077_s15 + $0x20] ss:$16 sps:$4 sm:$0xff]   ;;  %v1765_v12 = vld [vmem:[%s2077_s15 + $0x28] ss:$16 sps:$4 sm:$0xff]   ;;  %v1766_v13 = vld [vmem:[%s2077_s15 + $0x44] ss:$16 sps:$4 sm:$0xff]  }
  0x2a   : > { %1112 = vmatprep.subr.bf16.mxu0 %v1760_v9  ;;  %1198 = vmatprep.subr.bf16.mxu1 %v1762_v10  ;;  %v1768_v14 = vld [vmem:[%s2077_s15 + $0x4c] ss:$16 sps:$4 sm:$0xff]   ;;  %v1770_v15 = vld [vmem:[%s2077_s15 + $0x40] ss:$16 sps:$4 sm:$0xff]   ;;  %v1771_v16 = vld [vmem:[%s2077_s15 + $0x48] ss:$16 sps:$4 sm:$0xff]  }
  0x2b   : > { %v1772_v17 = vld [vmem:[%s2077_s15 + $0x64] ss:$16 sps:$4 sm:$0xff]   ;;  %v1774_v18 = vld [vmem:[%s2077_s15 + $0x6c] ss:$16 sps:$4 sm:$0xff]   ;;  %v1776_v19 = vld [vmem:[%s2077_s15 + $0x60] ss:$16 sps:$4 sm:$0xff]  }
  0x2c   : > { %v1777_v20 = vld [vmem:[%s2077_s15 + $0x68] ss:$16 sps:$4 sm:$0xff]   ;;  %v1778_v21 = vld [vmem:[%s2077_s15 + $0x84] ss:$16 sps:$4 sm:$0xff]   ;;  %v1780_v22 = vld [vmem:[%s2077_s15 + $0x8c] ss:$16 sps:$4 sm:$0xff]  }
  0x2d   : > { %1113 = vmatpush1.bf16.msra.mxu0 %v1764_v11  ;;  %1199 = vmatpush1.bf16.msra.mxu1 %v1765_v12  ;;  %v1782_v23 = vld [vmem:[%s2077_s15 + $0x80] ss:$16 sps:$4 sm:$0xff]   ;;  %v1783_v24 = vld [vmem:[%s2077_s15 + $0x88] ss:$16 sps:$4 sm:$0xff]   ;;  %v1784_v25 = vld [vmem:[%s2077_s15 + $0xa4] ss:$16 sps:$4 sm:$0xff]  }
  0x2e   : > { %1114 = vmatprep.subr.bf16.mxu0 %v1766_v13  ;;  %1200 = vmatprep.subr.bf16.mxu1 %v1768_v14  ;;  %v1786_v26 = vld [vmem:[%s2077_s15 + $0xac] ss:$16 sps:$4 sm:$0xff]   ;;  %v1788_v27 = vld [vmem:[%s2077_s15 + $0xa0] ss:$16 sps:$4 sm:$0xff]   ;;  %v1789_v28 = vld [vmem:[%s2077_s15 + $0xa8] ss:$16 sps:$4 sm:$0xff]  }
  0x2f   : > { %v1790_v29 = vld [vmem:[%s2077_s15 + $0xc4] ss:$16 sps:$4 sm:$0xff]   ;;  %v1792_v30 = vld [vmem:[%s2077_s15 + $0xcc] ss:$16 sps:$4 sm:$0xff]   ;;  %v1794_v31 = vld [vmem:[%s2077_s15 + $0xc0] ss:$16 sps:$4 sm:$0xff]  }
  0x30   : > { %v1795_v32 = vld [vmem:[%s2077_s15 + $0xc8] ss:$16 sps:$4 sm:$0xff]   ;;  %v1796_v33 = vld [vmem:[%s2077_s15 + $0xe4] ss:$16 sps:$4 sm:$0xff]   ;;  %v1798_v34 = vld [vmem:[%s2077_s15 + $0xec] ss:$16 sps:$4 sm:$0xff]  }
  0x31   : > { %1115 = vmatpush1.bf16.msra.mxu0 %v1770_v15  ;;  %1201 = vmatpush1.bf16.msra.mxu1 %v1771_v16  ;;  %v1800_v35 = vld [vmem:[%s2077_s15 + $0xe0] ss:$16 sps:$4 sm:$0xff]   ;;  %v1801_v36 = vld [vmem:[%s2077_s15 + $0xe8] ss:$16 sps:$4 sm:$0xff]   ;;  %v1802_v37 = vld [vmem:[%s2077_s15 + $0x104] ss:$16 sps:$4 sm:$0xff]  }
  0x32   : > { %1116 = vmatprep.subr.bf16.mxu0 %v1772_v17  ;;  %1202 = vmatprep.subr.bf16.mxu1 %v1774_v18  ;;  %v1804_v38 = vld [vmem:[%s2077_s15 + $0x10c] ss:$16 sps:$4 sm:$0xff]   ;;  %v1806_v39 = vld [vmem:[%s2077_s15 + $0x100] ss:$16 sps:$4 sm:$0xff]   ;;  %v1807_v40 = vld [vmem:[%s2077_s15 + $0x108] ss:$16 sps:$4 sm:$0xff]  }
  0x33   : > { %v1808_v41 = vld [vmem:[%s2077_s15 + $0x124] ss:$16 sps:$4 sm:$0xff]   ;;  %v1810_v42 = vld [vmem:[%s2077_s15 + $0x12c] ss:$16 sps:$4 sm:$0xff]   ;;  %v1812_v43 = vld [vmem:[%s2077_s15 + $0x120] ss:$16 sps:$4 sm:$0xff]  }
  0x34   : > { %v1813_v44 = vld [vmem:[%s2077_s15 + $0x128] ss:$16 sps:$4 sm:$0xff]   ;;  %v1814_v45 = vld [vmem:[%s2077_s15 + $0x144] ss:$16 sps:$4 sm:$0xff]   ;;  %v1816_v46 = vld [vmem:[%s2077_s15 + $0x14c] ss:$16 sps:$4 sm:$0xff]  }
  0x35   : > { %1117 = vmatpush1.bf16.msra.mxu0 %v1776_v19  ;;  %1203 = vmatpush1.bf16.msra.mxu1 %v1777_v20  ;;  %v1818_v47 = vld [vmem:[%s2077_s15 + $0x140] ss:$16 sps:$4 sm:$0xff]   ;;  %v1819_v48 = vld [vmem:[%s2077_s15 + $0x148] ss:$16 sps:$4 sm:$0xff]   ;;  %v1820_v49 = vld [vmem:[%s2077_s15 + $0x164] ss:$16 sps:$4 sm:$0xff]  }
  0x36   : > { %1118 = vmatprep.subr.bf16.mxu0 %v1778_v21  ;;  %1204 = vmatprep.subr.bf16.mxu1 %v1780_v22  ;;  %v1822_v50 = vld [vmem:[%s2077_s15 + $0x16c] ss:$16 sps:$4 sm:$0xff]   ;;  %v1824_v51 = vld [vmem:[%s2077_s15 + $0x160] ss:$16 sps:$4 sm:$0xff]   ;;  %v1825_v52 = vld [vmem:[%s2077_s15 + $0x168] ss:$16 sps:$4 sm:$0xff]  }
  0x37   : > { %v1852_v53 = vld [vmem:[%s2079_s16 + $0x4] ss:$16 sps:$4 sm:$0xff]   ;;  %v1828_v55 = vld [vmem:[%s2077_s15 + $0x18c] ss:$16 sps:$4 sm:$0xff]   ;;  %v1830_v56 = vld [vmem:[%s2077_s15 + $0x180] ss:$16 sps:$4 sm:$0xff]  }
  0x38   : > { %v1826_v54 = vld [vmem:[%s2077_s15 + $0x184] ss:$16 sps:$4 sm:$0xff]   ;;  %1142 = vmatprep.mubr.bf16.mxu0 %v1852_v53  ;;  %1228 = vmatprep.mubr.bf16.mxu1 %v1852_v53  ;;  %v1831_v57 = vld [vmem:[%s2077_s15 + $0x188] ss:$16 sps:$4 sm:$0xff]   ;;  %v1834_v59 = vld [vmem:[%s2077_s15 + $0x1ac] ss:$16 sps:$4 sm:$0xff]  }
  0x39   : > { %1119 = vmatpush1.bf16.msra.mxu0 %v1782_v23  ;;  %1205 = vmatpush1.bf16.msra.mxu1 %v1783_v24  ;;  %v1832_v58 = vld [vmem:[%s2077_s15 + $0x1a4] ss:$16 sps:$4 sm:$0xff]   ;;  %v1836_v60 = vld [vmem:[%s2077_s15 + $0x1a0] ss:$16 sps:$4 sm:$0xff]   ;;  %v1837_v61 = vld [vmem:[%s2077_s15 + $0x1a8] ss:$16 sps:$4 sm:$0xff]  }
  0x3a   : > { %1120 = vmatprep.subr.bf16.mxu0 %v1784_v25  ;;  %1206 = vmatprep.subr.bf16.mxu1 %v1786_v26  ;;  %v1838_v62 = vld [vmem:[%s2077_s15 + $0x1c4] ss:$16 sps:$4 sm:$0xff]   ;;  %v1840_v63 = vld [vmem:[%s2077_s15 + $0x1cc] ss:$16 sps:$4 sm:$0xff]   ;;  %v1842_v0 = vld [vmem:[%s2077_s15 + $0x1c0] ss:$16 sps:$4 sm:$0xff]  }
  0x3b   : > { %v1843_v1 = vld [vmem:[%s2077_s15 + $0x1c8] ss:$16 sps:$4 sm:$0xff]   ;;  %v1844_v2 = vld [vmem:[%s2077_s15 + $0x1e4] ss:$16 sps:$4 sm:$0xff]   ;;  %v1846_v3 = vld [vmem:[%s2077_s15 + $0x1ec] ss:$16 sps:$4 sm:$0xff]  }
  0x3c   : > { %v1848_v4 = vld [vmem:[%s2077_s15 + $0x1e0] ss:$16 sps:$4 sm:$0xff]   ;;  %v1849_v5 = vld [vmem:[%s2077_s15 + $0x1e8] ss:$16 sps:$4 sm:$0xff]   ;;  %v1855_v6 = vld [vmem:[%s2077_s15 + $0x204] ss:$16 sps:$4 sm:$0xff]  }
  0x3d   : > { %1121 = vmatpush1.bf16.msra.mxu0 %v1788_v27  ;;  %1207 = vmatpush1.bf16.msra.mxu1 %v1789_v28  ;;  %v1858_v7 = vld [vmem:[%s2077_s15 + $0x20c] ss:$16 sps:$4 sm:$0xff]   ;;  %v1850_v8 = vld [vmem:[%s2079_s16] ss:$16 sps:$4 sm:$0xff]   ;;  %v1856_v10 = vld [vmem:[%s2077_s15 + $0x208] ss:$16 sps:$4 sm:$0xff]  }
  0x3e   : > { %1122 = vmatprep.subr.bf16.mxu0 %v1790_v29  ;;  %1208 = vmatprep.subr.bf16.mxu1 %v1792_v30  ;;  %v1853_v9 = vld [vmem:[%s2077_s15 + $0x200] ss:$16 sps:$4 sm:$0xff]   ;;  %v1861_v11 = vld [vmem:[%s2077_s15 + $0x224] ss:$16 sps:$4 sm:$0xff]   ;;  %v1864_v12 = vld [vmem:[%s2077_s15 + $0x22c] ss:$16 sps:$4 sm:$0xff]  }
  0x3f   : > { %v1859_v13 = vld [vmem:[%s2077_s15 + $0x220] ss:$16 sps:$4 sm:$0xff]   ;;  %v1862_v14 = vld [vmem:[%s2077_s15 + $0x228] ss:$16 sps:$4 sm:$0xff]   ;;  %v1867_v15 = vld [vmem:[%s2077_s15 + $0x244] ss:$16 sps:$4 sm:$0xff]  }
  0x40   : > { %v1870_v16 = vld [vmem:[%s2077_s15 + $0x24c] ss:$16 sps:$4 sm:$0xff]   ;;  %v1865_v17 = vld [vmem:[%s2077_s15 + $0x240] ss:$16 sps:$4 sm:$0xff]   ;;  %v1868_v18 = vld [vmem:[%s2077_s15 + $0x248] ss:$16 sps:$4 sm:$0xff]  }
  0x41   : > { %1123 = vmatpush1.bf16.msra.mxu0 %v1794_v31  ;;  %1209 = vmatpush1.bf16.msra.mxu1 %v1795_v32  ;;  %v1873_v19 = vld [vmem:[%s2077_s15 + $0x264] ss:$16 sps:$4 sm:$0xff]   ;;  %v1876_v20 = vld [vmem:[%s2077_s15 + $0x26c] ss:$16 sps:$4 sm:$0xff]   ;;  %v1871_v21 = vld [vmem:[%s2077_s15 + $0x260] ss:$16 sps:$4 sm:$0xff]  }
  0x42   : > { %1124 = vmatprep.subr.bf16.mxu0 %v1796_v33  ;;  %1210 = vmatprep.subr.bf16.mxu1 %v1798_v34  ;;  %v1874_v22 = vld [vmem:[%s2077_s15 + $0x268] ss:$16 sps:$4 sm:$0xff]   ;;  %v1879_v23 = vld [vmem:[%s2077_s15 + $0x284] ss:$16 sps:$4 sm:$0xff]   ;;  %v1882_v24 = vld [vmem:[%s2077_s15 + $0x28c] ss:$16 sps:$4 sm:$0xff]  }
  0x43   : > { %v1877_v25 = vld [vmem:[%s2077_s15 + $0x280] ss:$16 sps:$4 sm:$0xff]   ;;  %v1880_v26 = vld [vmem:[%s2077_s15 + $0x288] ss:$16 sps:$4 sm:$0xff]   ;;  %v1885_v27 = vld [vmem:[%s2077_s15 + $0x2a4] ss:$16 sps:$4 sm:$0xff]  }
  0x44   : > { %v1888_v28 = vld [vmem:[%s2077_s15 + $0x2ac] ss:$16 sps:$4 sm:$0xff]   ;;  %v1883_v29 = vld [vmem:[%s2077_s15 + $0x2a0] ss:$16 sps:$4 sm:$0xff]   ;;  %v1886_v30 = vld [vmem:[%s2077_s15 + $0x2a8] ss:$16 sps:$4 sm:$0xff]  }
  0x45   : > { %1125 = vmatpush1.bf16.msra.mxu0 %v1800_v35  ;;  %1211 = vmatpush1.bf16.msra.mxu1 %v1801_v36  ;;  %v1891_v31 = vld [vmem:[%s2077_s15 + $0x2c4] ss:$16 sps:$4 sm:$0xff]   ;;  %v1894_v32 = vld [vmem:[%s2077_s15 + $0x2cc] ss:$16 sps:$4 sm:$0xff]   ;;  %v1889_v34 = vld [vmem:[%s2077_s15 + $0x2c0] ss:$16 sps:$4 sm:$0xff]  }
  0x46   : > { %1126 = vmatprep.subr.bf16.mxu0 %v1802_v37  ;;  %1212 = vmatprep.subr.bf16.mxu1 %v1804_v38  ;;  %v1951_v33 = vld [vmem:[%s2079_s16 + $0xc] ss:$16 sps:$4 sm:$0xff]   ;;  %v1892_v35 = vld [vmem:[%s2077_s15 + $0x2c8] ss:$16 sps:$4 sm:$0xff]   ;;  %v1897_v36 = vld [vmem:[%s2077_s15 + $0x2e4] ss:$16 sps:$4 sm:$0xff]  }
  0x47   : > { %v1900_v37 = vld [vmem:[%s2077_s15 + $0x2ec] ss:$16 sps:$4 sm:$0xff]   ;;  %v1895_v38 = vld [vmem:[%s2077_s15 + $0x2e0] ss:$16 sps:$4 sm:$0xff]   ;;  %p1698_p11 = scmp.ne.s32.totalorder %s1986_s20, 7 }
  0x48   : > { %v1924_v53 = vld [vmem:[%s2077_s15 + $0x36c] ss:$16 sps:$4 sm:$0xff]  }
  0x49   : > { %1127 = vmatpush1.bf16.msra.mxu0 %v1806_v39  ;;  %1213 = vmatpush1.bf16.msra.mxu1 %v1807_v40  ;;  %v1898_v39 = vld [vmem:[%s2077_s15 + $0x2e8] ss:$16 sps:$4 sm:$0xff]   ;;  %v1903_v40 = vld [vmem:[%s2077_s15 + $0x304] ss:$16 sps:$4 sm:$0xff]  }
  0x4a   : > { %1128 = vmatprep.subr.bf16.mxu0 %v1808_v41  ;;  %1214 = vmatprep.subr.bf16.mxu1 %v1810_v42  ;;  %v1906_v41 = vld [vmem:[%s2077_s15 + $0x30c] ss:$16 sps:$4 sm:$0xff]   ;;  %v1901_v42 = vld [vmem:[%s2077_s15 + $0x300] ss:$16 sps:$4 sm:$0xff]  }
  0x4d   : > { %1129 = vmatpush1.bf16.msra.mxu0 %v1812_v43  ;;  %1215 = vmatpush1.bf16.msra.mxu1 %v1813_v44  ;;  %v1904_v43 = vld [vmem:[%s2077_s15 + $0x308] ss:$16 sps:$4 sm:$0xff]   ;;  %v1909_v44 = vld [vmem:[%s2077_s15 + $0x324] ss:$16 sps:$4 sm:$0xff]  }
  0x4e   : > { %1130 = vmatprep.subr.bf16.mxu0 %v1814_v45  ;;  %1216 = vmatprep.subr.bf16.mxu1 %v1816_v46  ;;  %v1912_v45 = vld [vmem:[%s2077_s15 + $0x32c] ss:$16 sps:$4 sm:$0xff]   ;;  %v1907_v46 = vld [vmem:[%s2077_s15 + $0x320] ss:$16 sps:$4 sm:$0xff]  }
  0x51   : > { %1131 = vmatpush1.bf16.msra.mxu0 %v1818_v47  ;;  %1217 = vmatpush1.bf16.msra.mxu1 %v1819_v48  ;;  %v1910_v47 = vld [vmem:[%s2077_s15 + $0x328] ss:$16 sps:$4 sm:$0xff]   ;;  %v1915_v48 = vld [vmem:[%s2077_s15 + $0x344] ss:$16 sps:$4 sm:$0xff]  }
  0x52   : > { %1132 = vmatprep.subr.bf16.mxu0 %v1820_v49  ;;  %1218 = vmatprep.subr.bf16.mxu1 %v1822_v50  ;;  %v1918_v49 = vld [vmem:[%s2077_s15 + $0x34c] ss:$16 sps:$4 sm:$0xff]   ;;  %v1913_v50 = vld [vmem:[%s2077_s15 + $0x340] ss:$16 sps:$4 sm:$0xff]  }
  0x55   : > { %1133 = vmatpush1.bf16.msra.mxu0 %v1824_v51  ;;  %1219 = vmatpush1.bf16.msra.mxu1 %v1825_v52  ;;  %v1916_v51 = vld [vmem:[%s2077_s15 + $0x348] ss:$16 sps:$4 sm:$0xff]   ;;  %v1921_v52 = vld [vmem:[%s2077_s15 + $0x364] ss:$16 sps:$4 sm:$0xff]  }
  0x56   : > { %1134 = vmatprep.subr.bf16.mxu0 %v1826_v54  ;;  %1220 = vmatprep.subr.bf16.mxu1 %v1828_v55  ;;  %v1919_v54 = vld [vmem:[%s2077_s15 + $0x360] ss:$16 sps:$4 sm:$0xff]   ;;  %v1922_v55 = vld [vmem:[%s2077_s15 + $0x368] ss:$16 sps:$4 sm:$0xff]  }
  0x59   : > { %1135 = vmatpush1.bf16.msra.mxu0 %v1830_v56  ;;  %1221 = vmatpush1.bf16.msra.mxu1 %v1831_v57  ;;  %v1927_v56 = vld [vmem:[%s2077_s15 + $0x384] ss:$16 sps:$4 sm:$0xff]   ;;  %v1930_v57 = vld [vmem:[%s2077_s15 + $0x38c] ss:$16 sps:$4 sm:$0xff]  }
  0x5a   : > { %1136 = vmatprep.subr.bf16.mxu0 %v1832_v58  ;;  %1222 = vmatprep.subr.bf16.mxu1 %v1834_v59  ;;  %v1925_v58 = vld [vmem:[%s2077_s15 + $0x380] ss:$16 sps:$4 sm:$0xff]   ;;  %v1928_v59 = vld [vmem:[%s2077_s15 + $0x388] ss:$16 sps:$4 sm:$0xff]  }
  0x5d   : > { %1137 = vmatpush1.bf16.msra.mxu0 %v1836_v60  ;;  %1223 = vmatpush1.bf16.msra.mxu1 %v1837_v61  ;;  %v1933_v60 = vld [vmem:[%s2077_s15 + $0x3a4] ss:$16 sps:$4 sm:$0xff]   ;;  %v1936_v61 = vld [vmem:[%s2077_s15 + $0x3ac] ss:$16 sps:$4 sm:$0xff]  }
  0x5e   : > { %1138 = vmatprep.subr.bf16.mxu0 %v1838_v62  ;;  %1224 = vmatprep.subr.bf16.mxu1 %v1840_v63  ;;  %v1931_v62 = vld [vmem:[%s2077_s15 + $0x3a0] ss:$16 sps:$4 sm:$0xff]   ;;  %v1934_v63 = vld [vmem:[%s2077_s15 + $0x3a8] ss:$16 sps:$4 sm:$0xff]  }
  0x61   : > { %1139 = vmatpush1.bf16.msra.mxu0 %v1842_v0  ;;  %1225 = vmatpush1.bf16.msra.mxu1 %v1843_v1  ;;  %v1939_v0 = vld [vmem:[%s2077_s15 + $0x3c4] ss:$16 sps:$4 sm:$0xff]   ;;  %v1942_v1 = vld [vmem:[%s2077_s15 + $0x3cc] ss:$16 sps:$4 sm:$0xff]  }
  0x62   : > { %1140 = vmatprep.subr.bf16.mxu0 %v1844_v2  ;;  %1226 = vmatprep.subr.bf16.mxu1 %v1846_v3  ;;  %v1937_v2 = vld [vmem:[%s2077_s15 + $0x3c0] ss:$16 sps:$4 sm:$0xff]   ;;  %v1940_v3 = vld [vmem:[%s2077_s15 + $0x3c8] ss:$16 sps:$4 sm:$0xff]  }
  0x65   : > { %1141 = vmatpush1.bf16.msra.mxu0 %v1848_v4  ;;  %1227 = vmatpush1.bf16.msra.mxu1 %v1849_v5  ;;  %v1945_v4 = vld [vmem:[%s2077_s15 + $0x3e4] ss:$16 sps:$4 sm:$0xff]   ;;  %v1948_v5 = vld [vmem:[%s2077_s15 + $0x3ec] ss:$16 sps:$4 sm:$0xff]  }
  0x66   : > { %1153 = vmatprep.subr.bf16.mxu0 %v1855_v6  ;;  %1239 = vmatprep.subr.bf16.mxu1 %v1858_v7  ;;  %v1943_v6 = vld [vmem:[%s2077_s15 + $0x3e0] ss:$16 sps:$4 sm:$0xff]   ;;  %v1946_v7 = vld [vmem:[%s2077_s15 + $0x3e8] ss:$16 sps:$4 sm:$0xff]  }
  0x68   : > { %1143 = vmatmul.mubr.bf16.vlgmr.msra.gmra.mrb[0].mxu0 %v1850_v8  ;;  %1229 = vmatmul.mubr.bf16.vlgmr.msra.gmra.mrb[0].mxu1 %v1850_v8  ;;  %v1949_v8 = vld [vmem:[%s2079_s16 + $0x8] ss:$16 sps:$4 sm:$0xff]  }
  0x69   : > { %1154 = vmatpush1.bf16.msra.mxu0 %v1853_v9  ;;  %1240 = vmatpush1.bf16.msra.mxu1 %v1856_v10  ;;  %v310_v9 = vld [vmem:[#allocation2] sm:$0xff]  ;;  %v312_v10 = vld [vmem:[#allocation2 + $0x10] sm:$0xff] }
  0x6a   : > { %1155 = vmatprep.subr.bf16.mxu0 %v1861_v11  ;;  %1241 = vmatprep.subr.bf16.mxu1 %v1864_v12  ;;  %v311_v11 = vld [vmem:[#allocation2 + $0x8] sm:$0xff]  ;;  %v313_v12 = vld [vmem:[#allocation2 + $0x18] sm:$0xff] }
  0x6b   : > { %1185 = vmatprep.mubr.bf16.mxu0 %v1951_v33  ;;  %1271 = vmatprep.mubr.bf16.mxu1 %v1951_v33  ;;  %v1312_v33 = vlaneseq (!%p1698_p11) }
  0x6d   : > { %1156 = vmatpush1.bf16.msra.mxu0 %v1859_v13  ;;  %1242 = vmatpush1.bf16.msra.mxu1 %v1862_v14 }
  0x6e   : > { %1157 = vmatprep.subr.bf16.mxu0 %v1867_v15  ;;  %1243 = vmatprep.subr.bf16.mxu1 %v1870_v16  ;;  %v314_v15 = vld [vmem:[#allocation2 + $0x20] sm:$0xff]  ;;  %v316_v16 = vld [vmem:[#allocation2 + $0x30] sm:$0xff] }
  0x71   : > { %1158 = vmatpush1.bf16.msra.mxu0 %v1865_v17  ;;  %1244 = vmatpush1.bf16.msra.mxu1 %v1868_v18 }
  0x72   : > { %1159 = vmatprep.subr.bf16.mxu0 %v1873_v19  ;;  %1245 = vmatprep.subr.bf16.mxu1 %v1876_v20 }
  0x75   : > { %1160 = vmatpush1.bf16.msra.mxu0 %v1871_v21  ;;  %1246 = vmatpush1.bf16.msra.mxu1 %v1874_v22  ;;  %v315_v21 = vld [vmem:[#allocation2 + $0x28] sm:$0xff]  ;;  %v317_v22 = vld [vmem:[#allocation2 + $0x38] sm:$0xff] }
  0x76   : > { %1161 = vmatprep.subr.bf16.mxu0 %v1879_v23  ;;  %1247 = vmatprep.subr.bf16.mxu1 %v1882_v24 }
  0x79   : > { %1162 = vmatpush1.bf16.msra.mxu0 %v1877_v25  ;;  %1248 = vmatpush1.bf16.msra.mxu1 %v1880_v26 }
  0x7a   : > { %1163 = vmatprep.subr.bf16.mxu0 %v1885_v27  ;;  %1249 = vmatprep.subr.bf16.mxu1 %v1888_v28 }
  0x7d   : > { %1164 = vmatpush1.bf16.msra.mxu0 %v1883_v29  ;;  %1250 = vmatpush1.bf16.msra.mxu1 %v1886_v30 }
  0x7e   : > { %1165 = vmatprep.subr.bf16.mxu0 %v1891_v31  ;;  %1251 = vmatprep.subr.bf16.mxu1 %v1894_v32 }
  0x81   : > { %1166 = vmatpush1.bf16.msra.mxu0 %v1889_v34  ;;  %1252 = vmatpush1.bf16.msra.mxu1 %v1892_v35  ;;  %v1313_v34 = vshrl.u32 (!%p1698_p11), %v1312_v33, 7  ;;  %v1310_v35 = vld [vmem:[%s2285_s2] sm:$0xf] (!%p1698_p11) }
  0x82   : > { %1167 = vmatprep.subr.bf16.mxu0 %v1897_v36  ;;  %1253 = vmatprep.subr.bf16.mxu1 %v1900_v37 }
  0x83   : > { %v2218_v37 = vsub.s32 (!%p1698_p11), 0, %v1313_v34 }
  0x85   : > { %1168 = vmatpush1.bf16.msra.mxu0 %v1895_v38  ;;  %1254 = vmatpush1.bf16.msra.mxu1 %v1898_v39  ;;  %v2220_v38 = vsub.s32 (!%p1698_p11), 1, %v1313_v34  ;;  %v2222_v39 = vsub.s32 (!%p1698_p11), 2, %v1313_v34 }
  0x86   : > { %1169 = vmatprep.subr.bf16.mxu0 %v1903_v40  ;;  %1255 = vmatprep.subr.bf16.mxu1 %v1906_v41  ;;  %v2224_v40 = vsub.s32 (!%p1698_p11), 3, %v1313_v34 }
  0x89   : > { %1170 = vmatpush1.bf16.msra.mxu0 %v1901_v42  ;;  %1256 = vmatpush1.bf16.msra.mxu1 %v1904_v43 }
  0x8a   : > { %1171 = vmatprep.subr.bf16.mxu0 %v1909_v44  ;;  %1257 = vmatprep.subr.bf16.mxu1 %v1912_v45  ;;  %v1315_v44 = vrot.slane (!%p1698_p11), %v1310_v35, %v2218_v37  ;;  %v1319_v45 = vrot.slane (!%p1698_p11), %v1310_v35, %v2220_v38 }
  0x8d   : > { %1172 = vmatpush1.bf16.msra.mxu0 %v1907_v46  ;;  %1258 = vmatpush1.bf16.msra.mxu1 %v1910_v47  ;;  %v1323_v46 = vrot.slane (!%p1698_p11), %v1310_v35, %v2222_v39  ;;  %v1327_v47 = vrot.slane (!%p1698_p11), %v1310_v35, %v2224_v40 }
  0x8e   : > { %1173 = vmatprep.subr.bf16.mxu0 %v1915_v48  ;;  %1259 = vmatprep.subr.bf16.mxu1 %v1918_v49 }
  0x91   : > { %1174 = vmatpush1.bf16.msra.mxu0 %v1913_v50  ;;  %1260 = vmatpush1.bf16.msra.mxu1 %v1916_v51 }
  0x92   : > { %1175 = vmatprep.subr.bf16.mxu0 %v1921_v52  ;;  %1261 = vmatprep.subr.bf16.mxu1 %v1924_v53 }
  0x95   : > { %1176 = vmatpush1.bf16.msra.mxu0 %v1919_v54  ;;  %1262 = vmatpush1.bf16.msra.mxu1 %v1922_v55 }
  0x96   : > { %1177 = vmatprep.subr.bf16.mxu0 %v1927_v56  ;;  %1263 = vmatprep.subr.bf16.mxu1 %v1930_v57 }
  0x99   : > { %1178 = vmatpush1.bf16.msra.mxu0 %v1925_v58  ;;  %1264 = vmatpush1.bf16.msra.mxu1 %v1928_v59 }
  0x9a   : > { %1179 = vmatprep.subr.bf16.mxu0 %v1933_v60  ;;  %1265 = vmatprep.subr.bf16.mxu1 %v1936_v61 }
  0x9d   : > { %1180 = vmatpush1.bf16.msra.mxu0 %v1931_v62  ;;  %1266 = vmatpush1.bf16.msra.mxu1 %v1934_v63 }
  0x9e   : > { %1181 = vmatprep.subr.bf16.mxu0 %v1939_v0  ;;  %1267 = vmatprep.subr.bf16.mxu1 %v1942_v1 }
  0xa1   : > { %1182 = vmatpush1.bf16.msra.mxu0 %v1937_v2  ;;  %1268 = vmatpush1.bf16.msra.mxu1 %v1940_v3 }
  0xa2   : > { %1183 = vmatprep.subr.bf16.mxu0 %v1945_v4  ;;  %1269 = vmatprep.subr.bf16.mxu1 %v1948_v5 }
  0xa5   : > { %1184 = vmatpush1.bf16.msra.mxu0 %v1943_v6  ;;  %1270 = vmatpush1.bf16.msra.mxu1 %v1946_v7 }
  0xa8   : > { %1186 = vmatmul.mubr.bf16.vlgmr.msra.gmra.mrb[0].mxu0 %v1949_v8  ;;  %1272 = vmatmul.mubr.bf16.vlgmr.msra.gmra.mrb[0].mxu1 %v1949_v8 }
 0x17b   : > { %v1187_v13 = vpop.f32.mrb[0].mxu0  ;;  %v1273_v14 = vpop.f32.mrb[0].mxu1  ;;  %1301 = sbr.rel (%p1698_p11) target bundleno = 725 (0x2d5), region = 71 }
 0x17c   : > { %v1282_v17 = vadd.f32 %v1187_v13, %v310_v9  ;;  %v1284_v18 = vadd.f32 %v1273_v14, %v312_v10  ;;  %v1189_v19 = vpop.f32.mrb[1].mxu0  ;;  %v1275_v20 = vpop.f32.mrb[1].mxu1 }
 0x17d   : > { %v1283_v23 = vadd.f32 %v1189_v19, %v311_v11  ;;  %v1285_v24 = vadd.f32 %v1275_v20, %v313_v12  ;;  %v1191_v25 = vpop.f32.mrb[2].mxu0  ;;  %v1277_v26 = vpop.f32.mrb[2].mxu1 }
 0x17e   : > { %1290 = vst [vmem:[#allocation2] sm:$0xff] %v1282_v17  ;;  %1292 = vst [vmem:[#allocation2 + $0x10] sm:$0xff] %v1284_v18  ;;  %v1286_v27 = vadd.f32 %v1191_v25, %v314_v15  ;;  %v1288_v28 = vadd.f32 %v1277_v26, %v316_v16  ;;  %v1193_v29 = vpop.f32.mrb[3].mxu0  ;;  %v1279_v30 = vpop.f32.mrb[3].mxu1 }
 0x17f   : > { %1291 = vst [vmem:[#allocation2 + $0x8] sm:$0xff] %v1283_v23  ;;  %1293 = vst [vmem:[#allocation2 + $0x18] sm:$0xff] %v1285_v24  ;;  %v1287_v31 = vadd.f32 %v1193_v29, %v315_v21  ;;  %v1289_v32 = vadd.f32 %v1279_v30, %v317_v22 }
 0x180   : > { %1294 = vst [vmem:[#allocation2 + $0x20] sm:$0xff] %v1286_v27  ;;  %1296 = vst [vmem:[#allocation2 + $0x30] sm:$0xff] %v1288_v28 }
 0x181   : > { %1295 = vst [vmem:[#allocation2 + $0x28] sm:$0xff] %v1287_v31  ;;  %1297 = vst [vmem:[#allocation2 + $0x38] sm:$0xff] %v1289_v32 }
 0x185   : > { %v1302_v36 = vld [vmem:[#allocation2] sm:$0xff]  ;;  %v1304_v42 = vld [vmem:[#allocation2 + $0x10] sm:$0xff] }
 0x186   : > { %v1303_v41 = vld [vmem:[#allocation2 + $0x8] sm:$0xff]  ;;  %v1305_v43 = vld [vmem:[#allocation2 + $0x18] sm:$0xff]  ;;  %v1332_v49 = vadd.f32 %v1315_v44, %v1302_v36  ;;  %v1334_v51 = vadd.f32 %v1323_v46, %v1304_v42 }
 0x187   : > { %v1306_v48 = vld [vmem:[#allocation2 + $0x20] sm:$0xff]  ;;  %v1333_v50 = vadd.f32 %v1319_v45, %v1303_v41  ;;  %v1335_v52 = vadd.f32 %v1327_v47, %v1305_v43  ;;  %v1308_v54 = vld [vmem:[#allocation2 + $0x30] sm:$0xff] }
 0x188   : > { %v1307_v53 = vld [vmem:[#allocation2 + $0x28] sm:$0xff]  ;;  %v1309_v55 = vld [vmem:[#allocation2 + $0x38] sm:$0xff]  ;;  %v1340_v56 = vadd.f32 2.0, %v1332_v49  ;;  %v1342_v58 = vadd.f32 2.0, %v1334_v51  ;;  %v1336_v59 = vadd.f32 %v1315_v44, %v1306_v48  ;;  %v1338_v61 = vadd.f32 %v1323_v46, %v1308_v54  ;;  %v1401_v46 = vld [vmem:[%s2286_s3] sm:$0xf] }
 0x189   : > { %v1341_v57 = vadd.f32 2.0, %v1333_v50  ;;  %v1337_v60 = vadd.f32 %v1319_v45, %v1307_v53  ;;  %v1339_v62 = vadd.f32 %v1327_v47, %v1309_v55  ;;  %v1343_v63 = vadd.f32 2.0, %v1335_v52  ;;  %v1431_v47 = vld [vmem:[%s2287_s4] sm:$0xf] }
 0x18a   : > { %v1344_v1 = vadd.f32 2.0, %v1336_v59  ;;  %v1346_v3 = vadd.f32 2.0, %v1338_v61  ;;  %v1406_v48 = vrot.slane %v1401_v46, %v2218_v37  ;;  %v1410_v49 = vrot.slane %v1401_v46, %v2220_v38 }
 0x18b   : > { %v1348_v0 = vadd.f32 %v1341_v57, %v1340_v56  ;;  %v1345_v2 = vadd.f32 2.0, %v1337_v60  ;;  %v1347_v5 = vadd.f32 2.0, %v1339_v62  ;;  %v1414_v50 = vrot.slane %v1401_v46, %v2222_v39 }
 0x18c   : > { %v1418_v51 = vrot.slane %v1401_v46, %v2224_v40  ;;  %v1436_v53 = vrot.slane %v1431_v47, %v2218_v37  ;;  %v1440_v54 = vrot.slane %v1431_v47, %v2220_v38  ;;  %v1444_v55 = vrot.slane %v1431_v47, %v2222_v39 }
 0x18d   : > { %v1349_v4 = vadd.f32 %v1348_v0, %v1342_v58  ;;  %v1353_v6 = vadd.f32 %v1345_v2, %v1344_v1 }
 0x18f   : > { %v1350_v7 = vadd.f32 %v1349_v4, %v1343_v63  ;;  %v1354_v8 = vadd.f32 %v1353_v6, %v1346_v3 }
 0x191   : > { %1351 = vadd.xlane.f32.xlu0 %v1350_v7  ;;  %v1355_v9 = vadd.f32 %v1354_v8, %v1347_v5 }
 0x195   : > { %1356 = vadd.xlane.f32.xlu0 %v1355_v9 }
 0x21e   : > { %v1352_v10 = vpop.xlane.xlu0 %1351 }
 0x21f   : > { %v1359_v11 = vmul.f32 0.001953125, %v1352_v10 }
 0x221   : > { %v1361_v12 = vsub.f32 %v1340_v56, %v1359_v11  ;;  %v1362_v13 = vsub.f32 %v1341_v57, %v1359_v11  ;;  %v1363_v14 = vsub.f32 %v1342_v58, %v1359_v11  ;;  %v1364_v16 = vsub.f32 %v1343_v63, %v1359_v11 }
 0x222   : > { %v1357_v15 = vpop.xlane.xlu0 %1356  ;;  %v1448_v56 = vrot.slane %v1431_v47, %v2224_v40 }
 0x223   : > { %v1360_v17 = vmul.f32 0.001953125, %v1357_v15  ;;  %v1369_v18 = vmul.f32 %v1361_v12, %v1361_v12  ;;  %v1370_v19 = vmul.f32 %v1362_v13, %v1362_v13  ;;  %v1371_v20 = vmul.f32 %v1363_v14, %v1363_v14 }
 0x224   : > { %v1372_v25 = vmul.f32 %v1364_v16, %v1364_v16 }
 0x225   : > { %v1365_v21 = vsub.f32 %v1344_v1, %v1360_v17  ;;  %v1366_v22 = vsub.f32 %v1345_v2, %v1360_v17  ;;  %v1377_v23 = vadd.f32 %v1370_v19, %v1369_v18  ;;  %v1367_v24 = vsub.f32 %v1346_v3, %v1360_v17 }
 0x226   : > { %v1368_v27 = vsub.f32 %v1347_v5, %v1360_v17 }
 0x227   : > { %v1378_v26 = vadd.f32 %v1377_v23, %v1371_v20  ;;  %v1373_v28 = vmul.f32 %v1365_v21, %v1365_v21  ;;  %v1374_v29 = vmul.f32 %v1366_v22, %v1366_v22  ;;  %v1375_v31 = vmul.f32 %v1367_v24, %v1367_v24 }
 0x228   : > { %v1376_v33 = vmul.f32 %v1368_v27, %v1368_v27 }
 0x229   : > { %v1379_v30 = vadd.f32 %v1378_v26, %v1372_v25  ;;  %v1382_v32 = vadd.f32 %v1374_v29, %v1373_v28 }
 0x22b   : > { %1380 = vadd.xlane.f32.xlu1 %v1379_v30  ;;  %v1383_v34 = vadd.f32 %v1382_v32, %v1375_v31 }
 0x22d   : > { %v1384_v35 = vadd.f32 %v1383_v34, %v1376_v33 }
 0x22f   : > { %1385 = vadd.xlane.f32.xlu1 %v1384_v35 }
 0x2b8   : > { %v1381_v36 = vpop.xlane.xlu1 %1380 }
 0x2b9   : > { %v1387_v41 = vmul.f32 0.001953125, %v1381_v36 }
 0x2bb   : > { %v1389_v42 = vadd.f32 1e-05, %v1387_v41 }
 0x2bc   : > { %v1386_v43 = vpop.xlane.xlu1 %1385 }
 0x2bd   : > { %1952 = vrsqrt.f32 %v1389_v42  ;;  %v1388_v44 = vmul.f32 0.001953125, %v1386_v43 }
 0x2bf   : > { %v1390_v45 = vadd.f32 1e-05, %v1388_v44 }
 0x2c1   : > { %1954 = vrsqrt.f32 %v1390_v45 }
 0x2c7   : > { %v1953_v52 = vpop.eup %1952 }
 0x2c8   : > { %v1393_v57 = vmul.f32 %v1953_v52, %v1361_v12  ;;  %v1394_v58 = vmul.f32 %v1953_v52, %v1362_v13  ;;  %v1395_v59 = vmul.f32 %v1953_v52, %v1363_v14  ;;  %v1396_v60 = vmul.f32 %v1953_v52, %v1364_v16 }
 0x2ca   : > { %v1423_v61 = vmul.f32 %v1406_v48, %v1393_v57  ;;  %v1424_v62 = vmul.f32 %v1410_v49, %v1394_v58  ;;  %v1425_v63 = vmul.f32 %v1414_v50, %v1395_v59  ;;  %v1426_v0 = vmul.f32 %v1418_v51, %v1396_v60 }
 0x2cb   : > { %v1955_v1 = vpop.eup %1954 }
 0x2cc   : > { %v1453_v2 = vadd.f32 %v1436_v53, %v1423_v61  ;;  %v1454_v3 = vadd.f32 %v1440_v54, %v1424_v62  ;;  %v1455_v4 = vadd.f32 %v1444_v55, %v1425_v63  ;;  %v1456_v5 = vadd.f32 %v1448_v56, %v1426_v0 }
 0x2cd   : > { %v1397_v37 = vmul.f32 %v1955_v1, %v1365_v21  ;;  %v1398_v6 = vmul.f32 %v1955_v1, %v1366_v22  ;;  %v1399_v38 = vmul.f32 %v1955_v1, %v1367_v24  ;;  %v1400_v7 = vmul.f32 %v1955_v1, %v1368_v27 }
 0x2ce   : > { %1461 = vst [vmem:[%s2288_s5] sm:$0xff] %v1453_v2  ;;  %1462 = vst [vmem:[%s2288_s5 + $0x8] sm:$0xff] %v1454_v3 }
 0x2cf   : > { %1463 = vst [vmem:[%s2288_s5 + $0x10] sm:$0xff] %v1455_v4  ;;  %1464 = vst [vmem:[%s2288_s5 + $0x18] sm:$0xff] %v1456_v5  ;;  %v1427_v39 = vmul.f32 %v1406_v48, %v1397_v37  ;;  %v1428_v40 = vmul.f32 %v1410_v49, %v1398_v6  ;;  %v1429_v8 = vmul.f32 %v1414_v50, %v1399_v38 }
 0x2d0   : > { %v1430_v9 = vmul.f32 %v1418_v51, %v1400_v7 }
 0x2d1   : > { %v1457_v10 = vadd.f32 %v1436_v53, %v1427_v39  ;;  %v1458_v11 = vadd.f32 %v1440_v54, %v1428_v40  ;;  %v1459_v12 = vadd.f32 %v1444_v55, %v1429_v8 }
 0x2d2   : > { %v1460_v13 = vadd.f32 %v1448_v56, %v1430_v9 }
 0x2d3   : > { %1465 = vst [vmem:[%s2288_s5 + $0x20] sm:$0xff] %v1457_v10  ;;  %1466 = vst [vmem:[%s2288_s5 + $0x28] sm:$0xff] %v1458_v11 }
 0x2d4   : > { %1467 = vst [vmem:[%s2288_s5 + $0x30] sm:$0xff] %v1459_v12  ;;  %1468 = vst [vmem:[%s2288_s5 + $0x38] sm:$0xff] %v1460_v13 }
 0x2d5 PF: > { %s15_s22 = sadd.s32 1, %s1994_s22   ;;  %s2289_s18 = smov %s1982_s19 }
 0x2d6   : > { %p12_p12 = scmp.ge.s32.totalorder %s15_s22, 10   ;;  %s2290_s19 = smov %s2062_s26 }
 0x2d7   : > { %s2291_s20 = smov %s1990_s21  ;;  %s2292_s21 = smov %s2294_s23 }
 0x2d8   :  { %14 = sbr.rel (!%p12_p12) target bundleno = 3 (0x3), region = 109 }

// kernel: encoder_layer_forward.9
= control target key start
LH: loop header
LB: loop body
LE: loop exit
PB: predicated region body
PF: predicated region fallthrough
CT: control target
= control target key end

     0   :  { %11 = vsyncpa [#allocation5], 0  ;;  %s2138_s21 = smov 0   ;;  %s2140_s22 = smov 0   ;;  %s2423_s0 = inlined_call_operand.vmem [shape: bf16[16,1024], index: 0, kind: input, shape index: {}]   ;;  %s2424_s1 = inlined_call_operand.vmem [shape: bf16[1024,512], index: 1, kind: input, shape index: {}]   ;;  %s2425_s2 = inlined_call_operand.vmem [shape: f32[1,512], index: 2, kind: input, shape index: {}]   ;;  %s2426_s3 = inlined_call_operand.vmem [shape: f32[16,512], index: 3, kind: input, shape index: {}]   ;;  %s2427_s4 = inlined_call_operand.vmem [shape: f32[1,512], index: 4, kind: input, shape index: {}]   ;;  %s2428_s5 = inlined_call_operand.vmem [shape: f32[1,512], index: 5, kind: input, shape index: {}]   ;;  %s2429_s6 = inlined_call_operand.hbm [shape: f32[16,512], index: 6, kind: output, shape index: {}]  }
   0x1   :  { %s2142_s23 = smov 0   ;;  %s2144_s24 = smov 0  }
   0x2   :  { %s2146_s25 = smov 0  }
   0x3 LB: > { %s1617_s26 = sadd.s32 4294967295, %s2097_s25   ;;  %s26_s27 = sadd.s32 1, %s2093_s24  ;;  %s2097_s25 = sphi %s2146_s25, %s17_s25   ;;  %s2093_s24 = sphi %s2144_s24, %s2434_s24   ;;  %s2089_s23 = sphi %s2142_s23, %s2433_s23   ;;  %s2085_s22 = sphi %s2140_s22, %s2432_s22   ;;  %s2081_s21 = sphi %s2138_s21, %s2431_s21  }
   0x4   : > { %p27_p0 = scmp.ge.s32.totalorder %s26_s27, 2  ;;  %p45_p1 = scmp.ne.s32.totalorder %s2085_s22, %s2081_s21 }
   0x5   : > { %p46_p2 = scmp.eq.s32.totalorder %s2097_s25, 0  ;;  %s38_s29 = sadd.s32 1, %s2085_s22 }
   0x6   : > { %s2436_s27 = smov (%p27_p0, %s26_s27), 0  ;;  %p1620_p5 = scmp.ge.s32.totalorder %s2097_s25, 2 }
   0x7   : > { %p47_p3 = por %p46_p2, %p45_p1  ;;  %s34_s28 = ssub.s32 %s2093_s24, %s2436_s27 }
   0x8   : > { %p36_p4 = scmp.eq.s32.totalorder %s34_s28, 0  ;;  %231 = sbr.rel (%p1620_p5) target bundleno = 22 (0x16), region = 32 }
   0xa   : > { %s2174_s30 = scalar_select %p36_p4, %s2085_s22, %s38_s29  }
   0xf   : > { %234 = sbr.rel (!%p47_p3) target bundleno = 22 (0x16), region = 36  ;;  %s236_s7 = sand.u32 (%p47_p3), 1, %s2085_s22  }
  0x10   : > { %s1767_s8 = sshll.u32 (%p47_p3), %s2093_s24, 4  ;;  %s1621_s9 = sshll.u32 (%p47_p3), %s236_s7, 5 }
  0x11   : > { %s244_s12 = scalar_lea.vmem (%p47_p3), %s2423_s0, %s1767_s8  ;;  %s238_s13 = scalar_lea.vmem (%p47_p3), [#allocation3], %s1621_s9 }
  0x12   : > { %v257_v0 = vld [vmem:[%s244_s12] sm:$0xff] (%p47_p3)  ;;  %v259_v1 = vld [vmem:[%s244_s12 + $0x8] sm:$0xff] (%p47_p3) }
  0x13   : > { %v261_v2 = vld [vmem:[%s244_s12 + $0x20] sm:$0xff] (%p47_p3)  ;;  %258 = vst [vmem:[%s238_s13] sm:$0xff] (%p47_p3), %v257_v0  ;;  %260 = vst [vmem:[%s238_s13 + $0x8] sm:$0xff] (%p47_p3), %v259_v1  ;;  %v263_v3 = vld [vmem:[%s244_s12 + $0x28] sm:$0xff] (%p47_p3) }
  0x14   : > { %262 = vst [vmem:[%s238_s13 + $0x10] sm:$0xff] (%p47_p3), %v261_v2  ;;  %264 = vst [vmem:[%s238_s13 + $0x18] sm:$0xff] (%p47_p3), %v263_v3 }
  0x16 PF: > { %p1624_p6 = scmp.ge.s32.totalorder %s2097_s25, 1  ;;  %p279_p7 = scmp.lt.s32.totalorder %s2097_s25, 3 }
  0x18   : > { %p280_p8 = pnand %p1624_p6, %p279_p7 }
  0x19   : > { %s286_s14 = sand.u32 (!%p280_p8), 1, %s2081_s21   ;;  %s1626_s15 = sshll.u32 (!%p280_p8), %s2089_s23, 6 }
  0x1a   : > { %283 = sbr.rel (%p280_p8) target bundleno = 752 (0x2f0), region = 63  ;;  %s1625_s16 = sshll.u32 (!%p280_p8), %s286_s14, 5 }
  0x1b   : > { %p325_p9 = scmp.lt.s32.totalorder (!%p280_p8), %s1626_s15, 127  ;;  %s2191_s28 = scalar_lea.vmem (!%p280_p8), [#allocation3], %s1625_s16 }
  0x1c   : > { %p1629_p10 = scmp.ne.s32.totalorder (!%p280_p8), %s2089_s23, 0 }
  0x21   : > { %s2438_s15 = smov (!%p325_p9, %s1626_s15), 127  ;;  %342 = sbr.rel (%p1629_p10) target bundleno = 40 (0x28), region = 71 }
  0x22   : > { %s1768_s17 = sshll.u32 %s2438_s15, 4  ;;  %v2099_v4 = vmov (!%p1629_p10), 0.0  }
  0x23   : > { %s2189_s20 = scalar_lea.vmem %s2424_s1, %s1768_s17  ;;  %343 = vst [vmem:[#allocation2] sm:$0xff] (!%p1629_p10), %v2099_v4  ;;  %344 = vst [vmem:[#allocation2 + $0x8] sm:$0xff] (!%p1629_p10), %v2099_v4 }
  0x24   : > { %345 = vst [vmem:[#allocation2 + $0x10] sm:$0xff] (!%p1629_p10), %v2099_v4  ;;  %346 = vst [vmem:[#allocation2 + $0x18] sm:$0xff] (!%p1629_p10), %v2099_v4 }
  0x25   : > { %347 = vst [vmem:[#allocation2 + $0x20] sm:$0xff] (!%p1629_p10), %v2099_v4  ;;  %348 = vst [vmem:[#allocation2 + $0x28] sm:$0xff] (!%p1629_p10), %v2099_v4 }
  0x26   : > { %349 = vst [vmem:[#allocation2 + $0x30] sm:$0xff] (!%p1629_p10), %v2099_v4  ;;  %350 = vst [vmem:[#allocation2 + $0x38] sm:$0xff] (!%p1629_p10), %v2099_v4 }
  0x28 PF: > { %v1827_v5 = vld [vmem:[%s2189_s20 + $0x4] ss:$16 sps:$4 sm:$0xff]   ;;  %v1829_v6 = vld [vmem:[%s2189_s20 + $0xc] ss:$16 sps:$4 sm:$0xff]   ;;  %v1831_v7 = vld [vmem:[%s2189_s20] ss:$16 sps:$4 sm:$0xff]  }
  0x29   : > { %1151 = vmatprep.subr.bf16.mxu0 %v1827_v5  ;;  %v1832_v8 = vld [vmem:[%s2189_s20 + $0x8] ss:$16 sps:$4 sm:$0xff]   ;;  %1237 = vmatprep.subr.bf16.mxu1 %v1829_v6  ;;  %v1833_v9 = vld [vmem:[%s2189_s20 + $0x24] ss:$16 sps:$4 sm:$0xff]   ;;  %v1835_v10 = vld [vmem:[%s2189_s20 + $0x2c] ss:$16 sps:$4 sm:$0xff]  }
  0x2a   : > { %1152 = vmatpush1.bf16.msra.mxu0 %v1831_v7  ;;  %1238 = vmatpush1.bf16.msra.mxu1 %v1832_v8  ;;  %v1837_v11 = vld [vmem:[%s2189_s20 + $0x20] ss:$16 sps:$4 sm:$0xff]   ;;  %v1838_v12 = vld [vmem:[%s2189_s20 + $0x28] ss:$16 sps:$4 sm:$0xff]   ;;  %v1839_v13 = vld [vmem:[%s2189_s20 + $0x44] ss:$16 sps:$4 sm:$0xff]  }
  0x2b   : > { %1153 = vmatprep.subr.bf16.mxu0 %v1833_v9  ;;  %1239 = vmatprep.subr.bf16.mxu1 %v1835_v10  ;;  %v1841_v14 = vld [vmem:[%s2189_s20 + $0x4c] ss:$16 sps:$4 sm:$0xff]   ;;  %v1843_v15 = vld [vmem:[%s2189_s20 + $0x40] ss:$16 sps:$4 sm:$0xff]   ;;  %v1844_v16 = vld [vmem:[%s2189_s20 + $0x48] ss:$16 sps:$4 sm:$0xff]  }
  0x2c   : > { %v1845_v17 = vld [vmem:[%s2189_s20 + $0x64] ss:$16 sps:$4 sm:$0xff]   ;;  %v1847_v18 = vld [vmem:[%s2189_s20 + $0x6c] ss:$16 sps:$4 sm:$0xff]   ;;  %v1849_v19 = vld [vmem:[%s2189_s20 + $0x60] ss:$16 sps:$4 sm:$0xff]  }
  0x2d   : > { %v1850_v20 = vld [vmem:[%s2189_s20 + $0x68] ss:$16 sps:$4 sm:$0xff]   ;;  %v1851_v21 = vld [vmem:[%s2189_s20 + $0x84] ss:$16 sps:$4 sm:$0xff]   ;;  %v1853_v22 = vld [vmem:[%s2189_s20 + $0x8c] ss:$16 sps:$4 sm:$0xff]  }
  0x2e   : > { %1154 = vmatpush1.bf16.msra.mxu0 %v1837_v11  ;;  %1240 = vmatpush1.bf16.msra.mxu1 %v1838_v12  ;;  %v1855_v23 = vld [vmem:[%s2189_s20 + $0x80] ss:$16 sps:$4 sm:$0xff]   ;;  %v1856_v24 = vld [vmem:[%s2189_s20 + $0x88] ss:$16 sps:$4 sm:$0xff]   ;;  %v1857_v25 = vld [vmem:[%s2189_s20 + $0xa4] ss:$16 sps:$4 sm:$0xff]  }
  0x2f   : > { %1155 = vmatprep.subr.bf16.mxu0 %v1839_v13  ;;  %1241 = vmatprep.subr.bf16.mxu1 %v1841_v14  ;;  %v1859_v26 = vld [vmem:[%s2189_s20 + $0xac] ss:$16 sps:$4 sm:$0xff]   ;;  %v1861_v27 = vld [vmem:[%s2189_s20 + $0xa0] ss:$16 sps:$4 sm:$0xff]   ;;  %v1862_v28 = vld [vmem:[%s2189_s20 + $0xa8] ss:$16 sps:$4 sm:$0xff]  }
  0x30   : > { %v1863_v29 = vld [vmem:[%s2189_s20 + $0xc4] ss:$16 sps:$4 sm:$0xff]   ;;  %v1865_v30 = vld [vmem:[%s2189_s20 + $0xcc] ss:$16 sps:$4 sm:$0xff]   ;;  %v1867_v31 = vld [vmem:[%s2189_s20 + $0xc0] ss:$16 sps:$4 sm:$0xff]  }
  0x31   : > { %v1868_v32 = vld [vmem:[%s2189_s20 + $0xc8] ss:$16 sps:$4 sm:$0xff]   ;;  %v1869_v33 = vld [vmem:[%s2189_s20 + $0xe4] ss:$16 sps:$4 sm:$0xff]   ;;  %v1871_v34 = vld [vmem:[%s2189_s20 + $0xec] ss:$16 sps:$4 sm:$0xff]  }
  0x32   : > { %1156 = vmatpush1.bf16.msra.mxu0 %v1843_v15  ;;  %1242 = vmatpush1.bf16.msra.mxu1 %v1844_v16  ;;  %v1873_v35 = vld [vmem:[%s2189_s20 + $0xe0] ss:$16 sps:$4 sm:$0xff]   ;;  %v1874_v36 = vld [vmem:[%s2189_s20 + $0xe8] ss:$16 sps:$4 sm:$0xff]   ;;  %v1875_v37 = vld [vmem:[%s2189_s20 + $0x104] ss:$16 sps:$4 sm:$0xff]  }
  0x33   : > { %1157 = vmatprep.subr.bf16.mxu0 %v1845_v17  ;;  %1243 = vmatprep.subr.bf16.mxu1 %v1847_v18  ;;  %v1877_v38 = vld [vmem:[%s2189_s20 + $0x10c] ss:$16 sps:$4 sm:$0xff]   ;;  %v1879_v39 = vld [vmem:[%s2189_s20 + $0x100] ss:$16 sps:$4 sm:$0xff]   ;;  %v1880_v40 = vld [vmem:[%s2189_s20 + $0x108] ss:$16 sps:$4 sm:$0xff]  }
  0x34   : > { %v1881_v41 = vld [vmem:[%s2189_s20 + $0x124] ss:$16 sps:$4 sm:$0xff]   ;;  %v1883_v42 = vld [vmem:[%s2189_s20 + $0x12c] ss:$16 sps:$4 sm:$0xff]   ;;  %v1885_v43 = vld [vmem:[%s2189_s20 + $0x120] ss:$16 sps:$4 sm:$0xff]  }
  0x35   : > { %v1886_v44 = vld [vmem:[%s2189_s20 + $0x128] ss:$16 sps:$4 sm:$0xff]   ;;  %v1887_v45 = vld [vmem:[%s2189_s20 + $0x144] ss:$16 sps:$4 sm:$0xff]   ;;  %v1889_v46 = vld [vmem:[%s2189_s20 + $0x14c] ss:$16 sps:$4 sm:$0xff]  }
  0x36   : > { %1158 = vmatpush1.bf16.msra.mxu0 %v1849_v19  ;;  %1244 = vmatpush1.bf16.msra.mxu1 %v1850_v20  ;;  %v1891_v47 = vld [vmem:[%s2189_s20 + $0x140] ss:$16 sps:$4 sm:$0xff]   ;;  %v1892_v48 = vld [vmem:[%s2189_s20 + $0x148] ss:$16 sps:$4 sm:$0xff]   ;;  %v1893_v49 = vld [vmem:[%s2189_s20 + $0x164] ss:$16 sps:$4 sm:$0xff]  }
  0x37   : > { %1159 = vmatprep.subr.bf16.mxu0 %v1851_v21  ;;  %1245 = vmatprep.subr.bf16.mxu1 %v1853_v22  ;;  %v1895_v50 = vld [vmem:[%s2189_s20 + $0x16c] ss:$16 sps:$4 sm:$0xff]   ;;  %v1897_v51 = vld [vmem:[%s2189_s20 + $0x160] ss:$16 sps:$4 sm:$0xff]   ;;  %v1898_v52 = vld [vmem:[%s2189_s20 + $0x168] ss:$16 sps:$4 sm:$0xff]  }
  0x38   : > { %v1925_v53 = vld [vmem:[%s2191_s28 + $0x4] ss:$16 sps:$4 sm:$0xff]   ;;  %v1901_v55 = vld [vmem:[%s2189_s20 + $0x18c] ss:$16 sps:$4 sm:$0xff]   ;;  %v1903_v56 = vld [vmem:[%s2189_s20 + $0x180] ss:$16 sps:$4 sm:$0xff]  }
  0x39   : > { %v1899_v54 = vld [vmem:[%s2189_s20 + $0x184] ss:$16 sps:$4 sm:$0xff]   ;;  %1183 = vmatprep.mubr.bf16.mxu0 %v1925_v53  ;;  %1269 = vmatprep.mubr.bf16.mxu1 %v1925_v53  ;;  %v1904_v57 = vld [vmem:[%s2189_s20 + $0x188] ss:$16 sps:$4 sm:$0xff]   ;;  %v1907_v59 = vld [vmem:[%s2189_s20 + $0x1ac] ss:$16 sps:$4 sm:$0xff]  }
  0x3a   : > { %1160 = vmatpush1.bf16.msra.mxu0 %v1855_v23  ;;  %1246 = vmatpush1.bf16.msra.mxu1 %v1856_v24  ;;  %v1905_v58 = vld [vmem:[%s2189_s20 + $0x1a4] ss:$16 sps:$4 sm:$0xff]   ;;  %v1909_v60 = vld [vmem:[%s2189_s20 + $0x1a0] ss:$16 sps:$4 sm:$0xff]   ;;  %v1910_v61 = vld [vmem:[%s2189_s20 + $0x1a8] ss:$16 sps:$4 sm:$0xff]  }
  0x3b   : > { %1161 = vmatprep.subr.bf16.mxu0 %v1857_v25  ;;  %1247 = vmatprep.subr.bf16.mxu1 %v1859_v26  ;;  %v1911_v62 = vld [vmem:[%s2189_s20 + $0x1c4] ss:$16 sps:$4 sm:$0xff]   ;;  %v1913_v63 = vld [vmem:[%s2189_s20 + $0x1cc] ss:$16 sps:$4 sm:$0xff]   ;;  %v1915_v0 = vld [vmem:[%s2189_s20 + $0x1c0] ss:$16 sps:$4 sm:$0xff]  }
  0x3c   : > { %v1916_v1 = vld [vmem:[%s2189_s20 + $0x1c8] ss:$16 sps:$4 sm:$0xff]   ;;  %v1917_v2 = vld [vmem:[%s2189_s20 + $0x1e4] ss:$16 sps:$4 sm:$0xff]   ;;  %v1919_v3 = vld [vmem:[%s2189_s20 + $0x1ec] ss:$16 sps:$4 sm:$0xff]  }
  0x3d   : > { %v1921_v4 = vld [vmem:[%s2189_s20 + $0x1e0] ss:$16 sps:$4 sm:$0xff]   ;;  %v1922_v5 = vld [vmem:[%s2189_s20 + $0x1e8] ss:$16 sps:$4 sm:$0xff]   ;;  %v1928_v6 = vld [vmem:[%s2189_s20 + $0x204] ss:$16 sps:$4 sm:$0xff]  }
  0x3e   : > { %1162 = vmatpush1.bf16.msra.mxu0 %v1861_v27  ;;  %1248 = vmatpush1.bf16.msra.mxu1 %v1862_v28  ;;  %v1931_v7 = vld [vmem:[%s2189_s20 + $0x20c] ss:$16 sps:$4 sm:$0xff]   ;;  %v1923_v8 = vld [vmem:[%s2191_s28] ss:$16 sps:$4 sm:$0xff]   ;;  %v1929_v10 = vld [vmem:[%s2189_s20 + $0x208] ss:$16 sps:$4 sm:$0xff]  }
  0x3f   : > { %1163 = vmatprep.subr.bf16.mxu0 %v1863_v29  ;;  %1249 = vmatprep.subr.bf16.mxu1 %v1865_v30  ;;  %v1926_v9 = vld [vmem:[%s2189_s20 + $0x200] ss:$16 sps:$4 sm:$0xff]   ;;  %v1934_v11 = vld [vmem:[%s2189_s20 + $0x224] ss:$16 sps:$4 sm:$0xff]   ;;  %v1937_v12 = vld [vmem:[%s2189_s20 + $0x22c] ss:$16 sps:$4 sm:$0xff]  }
  0x40   : > { %v1932_v13 = vld [vmem:[%s2189_s20 + $0x220] ss:$16 sps:$4 sm:$0xff]   ;;  %v1935_v14 = vld [vmem:[%s2189_s20 + $0x228] ss:$16 sps:$4 sm:$0xff]   ;;  %v1940_v15 = vld [vmem:[%s2189_s20 + $0x244] ss:$16 sps:$4 sm:$0xff]  }
  0x41   : > { %v1943_v16 = vld [vmem:[%s2189_s20 + $0x24c] ss:$16 sps:$4 sm:$0xff]   ;;  %v1938_v17 = vld [vmem:[%s2189_s20 + $0x240] ss:$16 sps:$4 sm:$0xff]   ;;  %v1941_v18 = vld [vmem:[%s2189_s20 + $0x248] ss:$16 sps:$4 sm:$0xff]  }
  0x42   : > { %1164 = vmatpush1.bf16.msra.mxu0 %v1867_v31  ;;  %1250 = vmatpush1.bf16.msra.mxu1 %v1868_v32  ;;  %v1946_v19 = vld [vmem:[%s2189_s20 + $0x264] ss:$16 sps:$4 sm:$0xff]   ;;  %v1949_v20 = vld [vmem:[%s2189_s20 + $0x26c] ss:$16 sps:$4 sm:$0xff]   ;;  %v1944_v21 = vld [vmem:[%s2189_s20 + $0x260] ss:$16 sps:$4 sm:$0xff]  }
  0x43   : > { %1165 = vmatprep.subr.bf16.mxu0 %v1869_v33  ;;  %1251 = vmatprep.subr.bf16.mxu1 %v1871_v34  ;;  %v1947_v22 = vld [vmem:[%s2189_s20 + $0x268] ss:$16 sps:$4 sm:$0xff]   ;;  %v1952_v23 = vld [vmem:[%s2189_s20 + $0x284] ss:$16 sps:$4 sm:$0xff]   ;;  %v1955_v24 = vld [vmem:[%s2189_s20 + $0x28c] ss:$16 sps:$4 sm:$0xff]  }
  0x44   : > { %v1950_v25 = vld [vmem:[%s2189_s20 + $0x280] ss:$16 sps:$4 sm:$0xff]   ;;  %v1953_v26 = vld [vmem:[%s2189_s20 + $0x288] ss:$16 sps:$4 sm:$0xff]   ;;  %v1958_v27 = vld [vmem:[%s2189_s20 + $0x2a4] ss:$16 sps:$4 sm:$0xff]  }
  0x45   : > { %v1961_v28 = vld [vmem:[%s2189_s20 + $0x2ac] ss:$16 sps:$4 sm:$0xff]   ;;  %v1956_v29 = vld [vmem:[%s2189_s20 + $0x2a0] ss:$16 sps:$4 sm:$0xff]   ;;  %v1959_v30 = vld [vmem:[%s2189_s20 + $0x2a8] ss:$16 sps:$4 sm:$0xff]  }
  0x46   : > { %1166 = vmatpush1.bf16.msra.mxu0 %v1873_v35  ;;  %1252 = vmatpush1.bf16.msra.mxu1 %v1874_v36  ;;  %v1964_v31 = vld [vmem:[%s2189_s20 + $0x2c4] ss:$16 sps:$4 sm:$0xff]   ;;  %v1967_v32 = vld [vmem:[%s2189_s20 + $0x2cc] ss:$16 sps:$4 sm:$0xff]   ;;  %v1962_v34 = vld [vmem:[%s2189_s20 + $0x2c0] ss:$16 sps:$4 sm:$0xff]  }
  0x47   : > { %1167 = vmatprep.subr.bf16.mxu0 %v1875_v37  ;;  %1253 = vmatprep.subr.bf16.mxu1 %v1877_v38  ;;  %v2024_v33 = vld [vmem:[%s2191_s28 + $0xc] ss:$16 sps:$4 sm:$0xff]   ;;  %v1965_v35 = vld [vmem:[%s2189_s20 + $0x2c8] ss:$16 sps:$4 sm:$0xff]   ;;  %v1970_v36 = vld [vmem:[%s2189_s20 + $0x2e4] ss:$16 sps:$4 sm:$0xff]  }
  0x48   : > { %v1973_v37 = vld [vmem:[%s2189_s20 + $0x2ec] ss:$16 sps:$4 sm:$0xff]   ;;  %v1968_v38 = vld [vmem:[%s2189_s20 + $0x2e0] ss:$16 sps:$4 sm:$0xff]   ;;  %p1762_p11 = scmp.ne.s32.totalorder %s2089_s23, 1 }
  0x49   : > { %v1997_v53 = vld [vmem:[%s2189_s20 + $0x36c] ss:$16 sps:$4 sm:$0xff]  }
  0x4a   : > { %1168 = vmatpush1.bf16.msra.mxu0 %v1879_v39  ;;  %1254 = vmatpush1.bf16.msra.mxu1 %v1880_v40  ;;  %v1971_v39 = vld [vmem:[%s2189_s20 + $0x2e8] ss:$16 sps:$4 sm:$0xff]   ;;  %v1976_v40 = vld [vmem:[%s2189_s20 + $0x304] ss:$16 sps:$4 sm:$0xff]  }
  0x4b   : > { %1169 = vmatprep.subr.bf16.mxu0 %v1881_v41  ;;  %1255 = vmatprep.subr.bf16.mxu1 %v1883_v42  ;;  %v1979_v41 = vld [vmem:[%s2189_s20 + $0x30c] ss:$16 sps:$4 sm:$0xff]   ;;  %v1974_v42 = vld [vmem:[%s2189_s20 + $0x300] ss:$16 sps:$4 sm:$0xff]  }
  0x4e   : > { %1170 = vmatpush1.bf16.msra.mxu0 %v1885_v43  ;;  %1256 = vmatpush1.bf16.msra.mxu1 %v1886_v44  ;;  %v1977_v43 = vld [vmem:[%s2189_s20 + $0x308] ss:$16 sps:$4 sm:$0xff]   ;;  %v1982_v44 = vld [vmem:[%s2189_s20 + $0x324] ss:$16 sps:$4 sm:$0xff]  }
  0x4f   : > { %1171 = vmatprep.subr.bf16.mxu0 %v1887_v45  ;;  %1257 = vmatprep.subr.bf16.mxu1 %v1889_v46  ;;  %v1985_v45 = vld [vmem:[%s2189_s20 + $0x32c] ss:$16 sps:$4 sm:$0xff]   ;;  %v1980_v46 = vld [vmem:[%s2189_s20 + $0x320] ss:$16 sps:$4 sm:$0xff]  }
  0x52   : > { %1172 = vmatpush1.bf16.msra.mxu0 %v1891_v47  ;;  %1258 = vmatpush1.bf16.msra.mxu1 %v1892_v48  ;;  %v1983_v47 = vld [vmem:[%s2189_s20 + $0x328] ss:$16 sps:$4 sm:$0xff]   ;;  %v1988_v48 = vld [vmem:[%s2189_s20 + $0x344] ss:$16 sps:$4 sm:$0xff]  }
  0x53   : > { %1173 = vmatprep.subr.bf16.mxu0 %v1893_v49  ;;  %1259 = vmatprep.subr.bf16.mxu1 %v1895_v50  ;;  %v1991_v49 = vld [vmem:[%s2189_s20 + $0x34c] ss:$16 sps:$4 sm:$0xff]   ;;  %v1986_v50 = vld [vmem:[%s2189_s20 + $0x340] ss:$16 sps:$4 sm:$0xff]  }
  0x56   : > { %1174 = vmatpush1.bf16.msra.mxu0 %v1897_v51  ;;  %1260 = vmatpush1.bf16.msra.mxu1 %v1898_v52  ;;  %v1989_v51 = vld [vmem:[%s2189_s20 + $0x348] ss:$16 sps:$4 sm:$0xff]   ;;  %v1994_v52 = vld [vmem:[%s2189_s20 + $0x364] ss:$16 sps:$4 sm:$0xff]  }
  0x57   : > { %1175 = vmatprep.subr.bf16.mxu0 %v1899_v54  ;;  %1261 = vmatprep.subr.bf16.mxu1 %v1901_v55  ;;  %v1992_v54 = vld [vmem:[%s2189_s20 + $0x360] ss:$16 sps:$4 sm:$0xff]   ;;  %v1995_v55 = vld [vmem:[%s2189_s20 + $0x368] ss:$16 sps:$4 sm:$0xff]  }
  0x5a   : > { %1176 = vmatpush1.bf16.msra.mxu0 %v1903_v56  ;;  %1262 = vmatpush1.bf16.msra.mxu1 %v1904_v57  ;;  %v2000_v56 = vld [vmem:[%s2189_s20 + $0x384] ss:$16 sps:$4 sm:$0xff]   ;;  %v2003_v57 = vld [vmem:[%s2189_s20 + $0x38c] ss:$16 sps:$4 sm:$0xff]  }
  0x5b   : > { %1177 = vmatprep.subr.bf16.mxu0 %v1905_v58  ;;  %1263 = vmatprep.subr.bf16.mxu1 %v1907_v59  ;;  %v1998_v58 = vld [vmem:[%s2189_s20 + $0x380] ss:$16 sps:$4 sm:$0xff]   ;;  %v2001_v59 = vld [vmem:[%s2189_s20 + $0x388] ss:$16 sps:$4 sm:$0xff]  }
  0x5e   : > { %1178 = vmatpush1.bf16.msra.mxu0 %v1909_v60  ;;  %1264 = vmatpush1.bf16.msra.mxu1 %v1910_v61  ;;  %v2006_v60 = vld [vmem:[%s2189_s20 + $0x3a4] ss:$16 sps:$4 sm:$0xff]   ;;  %v2009_v61 = vld [vmem:[%s2189_s20 + $0x3ac] ss:$16 sps:$4 sm:$0xff]  }
  0x5f   : > { %1179 = vmatprep.subr.bf16.mxu0 %v1911_v62  ;;  %1265 = vmatprep.subr.bf16.mxu1 %v1913_v63  ;;  %v2004_v62 = vld [vmem:[%s2189_s20 + $0x3a0] ss:$16 sps:$4 sm:$0xff]   ;;  %v2007_v63 = vld [vmem:[%s2189_s20 + $0x3a8] ss:$16 sps:$4 sm:$0xff]  }
  0x62   : > { %1180 = vmatpush1.bf16.msra.mxu0 %v1915_v0  ;;  %1266 = vmatpush1.bf16.msra.mxu1 %v1916_v1  ;;  %v2012_v0 = vld [vmem:[%s2189_s20 + $0x3c4] ss:$16 sps:$4 sm:$0xff]   ;;  %v2015_v1 = vld [vmem:[%s2189_s20 + $0x3cc] ss:$16 sps:$4 sm:$0xff]  }
  0x63   : > { %1181 = vmatprep.subr.bf16.mxu0 %v1917_v2  ;;  %1267 = vmatprep.subr.bf16.mxu1 %v1919_v3  ;;  %v2010_v2 = vld [vmem:[%s2189_s20 + $0x3c0] ss:$16 sps:$4 sm:$0xff]   ;;  %v2013_v3 = vld [vmem:[%s2189_s20 + $0x3c8] ss:$16 sps:$4 sm:$0xff]  }
  0x66   : > { %1182 = vmatpush1.bf16.msra.mxu0 %v1921_v4  ;;  %1268 = vmatpush1.bf16.msra.mxu1 %v1922_v5  ;;  %v2018_v4 = vld [vmem:[%s2189_s20 + $0x3e4] ss:$16 sps:$4 sm:$0xff]   ;;  %v2021_v5 = vld [vmem:[%s2189_s20 + $0x3ec] ss:$16 sps:$4 sm:$0xff]  }
  0x67   : > { %1194 = vmatprep.subr.bf16.mxu0 %v1928_v6  ;;  %1280 = vmatprep.subr.bf16.mxu1 %v1931_v7  ;;  %v2016_v6 = vld [vmem:[%s2189_s20 + $0x3e0] ss:$16 sps:$4 sm:$0xff]   ;;  %v2019_v7 = vld [vmem:[%s2189_s20 + $0x3e8] ss:$16 sps:$4 sm:$0xff]  }
  0x69   : > { %1184 = vmatmul.mubr.bf16.vlgmr.msra.gmra.mrb[0].mxu0 %v1923_v8  ;;  %1270 = vmatmul.mubr.bf16.vlgmr.msra.gmra.mrb[0].mxu1 %v1923_v8  ;;  %v2022_v8 = vld [vmem:[%s2191_s28 + $0x8] ss:$16 sps:$4 sm:$0xff]  }
  0x6a   : > { %1195 = vmatpush1.bf16.msra.mxu0 %v1926_v9  ;;  %1281 = vmatpush1.bf16.msra.mxu1 %v1929_v10  ;;  %v351_v9 = vld [vmem:[#allocation2] sm:$0xff]  ;;  %v353_v10 = vld [vmem:[#allocation2 + $0x10] sm:$0xff] }
  0x6b   : > { %1196 = vmatprep.subr.bf16.mxu0 %v1934_v11  ;;  %1282 = vmatprep.subr.bf16.mxu1 %v1937_v12  ;;  %v352_v11 = vld [vmem:[#allocation2 + $0x8] sm:$0xff]  ;;  %v354_v12 = vld [vmem:[#allocation2 + $0x18] sm:$0xff] }
  0x6c   : > { %1226 = vmatprep.mubr.bf16.mxu0 %v2024_v33  ;;  %1312 = vmatprep.mubr.bf16.mxu1 %v2024_v33  ;;  %v1353_v33 = vlaneseq (!%p1762_p11) }
  0x6e   : > { %1197 = vmatpush1.bf16.msra.mxu0 %v1932_v13  ;;  %1283 = vmatpush1.bf16.msra.mxu1 %v1935_v14 }
  0x6f   : > { %1198 = vmatprep.subr.bf16.mxu0 %v1940_v15  ;;  %1284 = vmatprep.subr.bf16.mxu1 %v1943_v16  ;;  %v355_v15 = vld [vmem:[#allocation2 + $0x20] sm:$0xff]  ;;  %v357_v16 = vld [vmem:[#allocation2 + $0x30] sm:$0xff] }
  0x72   : > { %1199 = vmatpush1.bf16.msra.mxu0 %v1938_v17  ;;  %1285 = vmatpush1.bf16.msra.mxu1 %v1941_v18 }
  0x73   : > { %1200 = vmatprep.subr.bf16.mxu0 %v1946_v19  ;;  %1286 = vmatprep.subr.bf16.mxu1 %v1949_v20 }
  0x76   : > { %1201 = vmatpush1.bf16.msra.mxu0 %v1944_v21  ;;  %1287 = vmatpush1.bf16.msra.mxu1 %v1947_v22  ;;  %v356_v21 = vld [vmem:[#allocation2 + $0x28] sm:$0xff]  ;;  %v358_v22 = vld [vmem:[#allocation2 + $0x38] sm:$0xff] }
  0x77   : > { %1202 = vmatprep.subr.bf16.mxu0 %v1952_v23  ;;  %1288 = vmatprep.subr.bf16.mxu1 %v1955_v24 }
  0x7a   : > { %1203 = vmatpush1.bf16.msra.mxu0 %v1950_v25  ;;  %1289 = vmatpush1.bf16.msra.mxu1 %v1953_v26 }
  0x7b   : > { %1204 = vmatprep.subr.bf16.mxu0 %v1958_v27  ;;  %1290 = vmatprep.subr.bf16.mxu1 %v1961_v28 }
  0x7e   : > { %1205 = vmatpush1.bf16.msra.mxu0 %v1956_v29  ;;  %1291 = vmatpush1.bf16.msra.mxu1 %v1959_v30 }
  0x7f   : > { %1206 = vmatprep.subr.bf16.mxu0 %v1964_v31  ;;  %1292 = vmatprep.subr.bf16.mxu1 %v1967_v32 }
  0x82   : > { %1207 = vmatpush1.bf16.msra.mxu0 %v1962_v34  ;;  %1293 = vmatpush1.bf16.msra.mxu1 %v1965_v35  ;;  %v1354_v34 = vshrl.u32 (!%p1762_p11), %v1353_v33, 7  ;;  %v1351_v35 = vld [vmem:[%s2425_s2] sm:$0xf] (!%p1762_p11) }
  0x83   : > { %1208 = vmatprep.subr.bf16.mxu0 %v1970_v36  ;;  %1294 = vmatprep.subr.bf16.mxu1 %v1973_v37 }
  0x84   : > { %v2330_v37 = vsub.s32 (!%p1762_p11), 0, %v1354_v34 }
  0x86   : > { %1209 = vmatpush1.bf16.msra.mxu0 %v1968_v38  ;;  %1295 = vmatpush1.bf16.msra.mxu1 %v1971_v39  ;;  %v2332_v38 = vsub.s32 (!%p1762_p11), 1, %v1354_v34  ;;  %v2334_v39 = vsub.s32 (!%p1762_p11), 2, %v1354_v34 }
  0x87   : > { %1210 = vmatprep.subr.bf16.mxu0 %v1976_v40  ;;  %1296 = vmatprep.subr.bf16.mxu1 %v1979_v41  ;;  %v2336_v40 = vsub.s32 (!%p1762_p11), 3, %v1354_v34 }
  0x8a   : > { %1211 = vmatpush1.bf16.msra.mxu0 %v1974_v42  ;;  %1297 = vmatpush1.bf16.msra.mxu1 %v1977_v43 }
  0x8b   : > { %1212 = vmatprep.subr.bf16.mxu0 %v1982_v44  ;;  %1298 = vmatprep.subr.bf16.mxu1 %v1985_v45  ;;  %v1356_v44 = vrot.slane (!%p1762_p11), %v1351_v35, %v2330_v37  ;;  %v1360_v45 = vrot.slane (!%p1762_p11), %v1351_v35, %v2332_v38 }
  0x8e   : > { %1213 = vmatpush1.bf16.msra.mxu0 %v1980_v46  ;;  %1299 = vmatpush1.bf16.msra.mxu1 %v1983_v47  ;;  %v1364_v46 = vrot.slane (!%p1762_p11), %v1351_v35, %v2334_v39  ;;  %v1368_v47 = vrot.slane (!%p1762_p11), %v1351_v35, %v2336_v40 }
  0x8f   : > { %1214 = vmatprep.subr.bf16.mxu0 %v1988_v48  ;;  %1300 = vmatprep.subr.bf16.mxu1 %v1991_v49  ;;  %v1381_v48 = vld [vmem:[%s2426_s3] sm:$0xff] (!%p1762_p11)  ;;  %v1382_v49 = vld [vmem:[%s2426_s3 + $0x8] sm:$0xff] (!%p1762_p11) }
  0x92   : > { %1215 = vmatpush1.bf16.msra.mxu0 %v1986_v50  ;;  %1301 = vmatpush1.bf16.msra.mxu1 %v1989_v51  ;;  %v1383_v50 = vld [vmem:[%s2426_s3 + $0x10] sm:$0xff] (!%p1762_p11) }
  0x93   : > { %1216 = vmatprep.subr.bf16.mxu0 %v1994_v52  ;;  %1302 = vmatprep.subr.bf16.mxu1 %v1997_v53 }
  0x96   : > { %1217 = vmatpush1.bf16.msra.mxu0 %v1992_v54  ;;  %1303 = vmatpush1.bf16.msra.mxu1 %v1995_v55 }
  0x97   : > { %1218 = vmatprep.subr.bf16.mxu0 %v2000_v56  ;;  %1304 = vmatprep.subr.bf16.mxu1 %v2003_v57 }
  0x9a   : > { %1219 = vmatpush1.bf16.msra.mxu0 %v1998_v58  ;;  %1305 = vmatpush1.bf16.msra.mxu1 %v2001_v59  ;;  %v1384_v59 = vld [vmem:[%s2426_s3 + $0x18] sm:$0xff] (!%p1762_p11) }
  0x9b   : > { %1220 = vmatprep.subr.bf16.mxu0 %v2006_v60  ;;  %1306 = vmatprep.subr.bf16.mxu1 %v2009_v61 }
  0x9e   : > { %1221 = vmatpush1.bf16.msra.mxu0 %v2004_v62  ;;  %1307 = vmatpush1.bf16.msra.mxu1 %v2007_v63  ;;  %v1385_v63 = vld [vmem:[%s2426_s3 + $0x20] sm:$0xff] (!%p1762_p11) }
  0x9f   : > { %1222 = vmatprep.subr.bf16.mxu0 %v2012_v0  ;;  %1308 = vmatprep.subr.bf16.mxu1 %v2015_v1  ;;  %v1386_v0 = vld [vmem:[%s2426_s3 + $0x28] sm:$0xff] (!%p1762_p11)  ;;  %v1387_v1 = vld [vmem:[%s2426_s3 + $0x30] sm:$0xff] (!%p1762_p11) }
  0xa2   : > { %1223 = vmatpush1.bf16.msra.mxu0 %v2010_v2  ;;  %1309 = vmatpush1.bf16.msra.mxu1 %v2013_v3 }
  0xa3   : > { %1224 = vmatprep.subr.bf16.mxu0 %v2018_v4  ;;  %1310 = vmatprep.subr.bf16.mxu1 %v2021_v5 }
  0xa6   : > { %1225 = vmatpush1.bf16.msra.mxu0 %v2016_v6  ;;  %1311 = vmatpush1.bf16.msra.mxu1 %v2019_v7 }
  0xa9   : > { %1227 = vmatmul.mubr.bf16.vlgmr.msra.gmra.mrb[0].mxu0 %v2022_v8  ;;  %1313 = vmatmul.mubr.bf16.vlgmr.msra.gmra.mrb[0].mxu1 %v2022_v8  ;;  %v1388_v8 = vld [vmem:[%s2426_s3 + $0x38] sm:$0xff] (!%p1762_p11) }
 0x17c   : > { %v1228_v13 = vpop.f32.mrb[0].mxu0  ;;  %v1314_v14 = vpop.f32.mrb[0].mxu1  ;;  %1342 = sbr.rel (%p1762_p11) target bundleno = 726 (0x2d6), region = 75 }
 0x17d   : > { %v1323_v17 = vadd.f32 %v1228_v13, %v351_v9  ;;  %v1325_v18 = vadd.f32 %v1314_v14, %v353_v10  ;;  %v1230_v19 = vpop.f32.mrb[1].mxu0  ;;  %v1316_v20 = vpop.f32.mrb[1].mxu1 }
 0x17e   : > { %v1324_v23 = vadd.f32 %v1230_v19, %v352_v11  ;;  %v1326_v24 = vadd.f32 %v1316_v20, %v354_v12  ;;  %v1232_v25 = vpop.f32.mrb[2].mxu0  ;;  %v1318_v26 = vpop.f32.mrb[2].mxu1 }
 0x17f   : > { %1331 = vst [vmem:[#allocation2] sm:$0xff] %v1323_v17  ;;  %1333 = vst [vmem:[#allocation2 + $0x10] sm:$0xff] %v1325_v18  ;;  %v1327_v27 = vadd.f32 %v1232_v25, %v355_v15  ;;  %v1329_v28 = vadd.f32 %v1318_v26, %v357_v16  ;;  %v1234_v29 = vpop.f32.mrb[3].mxu0  ;;  %v1320_v30 = vpop.f32.mrb[3].mxu1 }
 0x180   : > { %1332 = vst [vmem:[#allocation2 + $0x8] sm:$0xff] %v1324_v23  ;;  %1334 = vst [vmem:[#allocation2 + $0x18] sm:$0xff] %v1326_v24  ;;  %v1328_v31 = vadd.f32 %v1234_v29, %v356_v21  ;;  %v1330_v32 = vadd.f32 %v1320_v30, %v358_v22 }
 0x181   : > { %1335 = vst [vmem:[#allocation2 + $0x20] sm:$0xff] %v1327_v27  ;;  %1337 = vst [vmem:[#allocation2 + $0x30] sm:$0xff] %v1329_v28 }
 0x182   : > { %1336 = vst [vmem:[#allocation2 + $0x28] sm:$0xff] %v1328_v31  ;;  %1338 = vst [vmem:[#allocation2 + $0x38] sm:$0xff] %v1330_v32 }
 0x186   : > { %v1343_v36 = vld [vmem:[#allocation2] sm:$0xff]  ;;  %v1345_v42 = vld [vmem:[#allocation2 + $0x10] sm:$0xff] }
 0x187   : > { %v1344_v41 = vld [vmem:[#allocation2 + $0x8] sm:$0xff]  ;;  %v1346_v43 = vld [vmem:[#allocation2 + $0x18] sm:$0xff]  ;;  %v1373_v52 = vadd.f32 %v1356_v44, %v1343_v36  ;;  %v1375_v54 = vadd.f32 %v1364_v46, %v1345_v42 }
 0x188   : > { %v1347_v51 = vld [vmem:[#allocation2 + $0x20] sm:$0xff]  ;;  %v1374_v53 = vadd.f32 %v1360_v45, %v1344_v41  ;;  %v1376_v55 = vadd.f32 %v1368_v47, %v1346_v43  ;;  %v1349_v57 = vld [vmem:[#allocation2 + $0x30] sm:$0xff] }
 0x189   : > { %v1348_v56 = vld [vmem:[#allocation2 + $0x28] sm:$0xff]  ;;  %v1350_v58 = vld [vmem:[#allocation2 + $0x38] sm:$0xff]  ;;  %v1389_v60 = vadd.f32 %v1381_v48, %v1373_v52  ;;  %v1391_v62 = vadd.f32 %v1383_v50, %v1375_v54  ;;  %v1377_v2 = vadd.f32 %v1356_v44, %v1347_v51  ;;  %v1379_v4 = vadd.f32 %v1364_v46, %v1349_v57  ;;  %v1450_v54 = vld [vmem:[%s2427_s4] sm:$0xf] }
 0x18a   : > { %v1390_v61 = vadd.f32 %v1382_v49, %v1374_v53  ;;  %v1378_v3 = vadd.f32 %v1360_v45, %v1348_v56  ;;  %v1380_v5 = vadd.f32 %v1368_v47, %v1350_v58  ;;  %v1392_v6 = vadd.f32 %v1384_v59, %v1376_v55  ;;  %v1480_v55 = vld [vmem:[%s2428_s5] sm:$0xf] }
 0x18b   : > { %v1393_v9 = vadd.f32 %v1385_v63, %v1377_v2  ;;  %v1395_v11 = vadd.f32 %v1387_v1, %v1379_v4  ;;  %v1455_v56 = vrot.slane %v1450_v54, %v2330_v37  ;;  %v1459_v57 = vrot.slane %v1450_v54, %v2332_v38 }
 0x18c   : > { %v1397_v7 = vadd.f32 %v1390_v61, %v1389_v60  ;;  %v1394_v10 = vadd.f32 %v1386_v0, %v1378_v3  ;;  %v1396_v13 = vadd.f32 %v1388_v8, %v1380_v5  ;;  %v1463_v58 = vrot.slane %v1450_v54, %v2334_v39 }
 0x18d   : > { %v1467_v59 = vrot.slane %v1450_v54, %v2336_v40  ;;  %v1493_v63 = vrot.slane %v1480_v55, %v2334_v39  ;;  %v1497_v0 = vrot.slane %v1480_v55, %v2336_v40 }
 0x18e   : > { %v1398_v12 = vadd.f32 %v1397_v7, %v1391_v62  ;;  %v1402_v14 = vadd.f32 %v1394_v10, %v1393_v9 }
 0x190   : > { %v1399_v15 = vadd.f32 %v1398_v12, %v1392_v6  ;;  %v1403_v16 = vadd.f32 %v1402_v14, %v1395_v11 }
 0x192   : > { %1400 = vadd.xlane.f32.xlu0 %v1399_v15  ;;  %v1404_v17 = vadd.f32 %v1403_v16, %v1396_v13 }
 0x196   : > { %1405 = vadd.xlane.f32.xlu0 %v1404_v17 }
 0x21f   : > { %v1401_v18 = vpop.xlane.xlu0 %1400 }
 0x220   : > { %v1408_v19 = vmul.f32 0.001953125, %v1401_v18 }
 0x222   : > { %v1410_v20 = vsub.f32 %v1389_v60, %v1408_v19  ;;  %v1411_v21 = vsub.f32 %v1390_v61, %v1408_v19  ;;  %v1412_v22 = vsub.f32 %v1391_v62, %v1408_v19  ;;  %v1413_v24 = vsub.f32 %v1392_v6, %v1408_v19 }
 0x223   : > { %v1406_v23 = vpop.xlane.xlu0 %1405  ;;  %v1485_v61 = vrot.slane %v1480_v55, %v2330_v37  ;;  %v1489_v62 = vrot.slane %v1480_v55, %v2332_v38 }
 0x224   : > { %v1409_v25 = vmul.f32 0.001953125, %v1406_v23  ;;  %v1418_v26 = vmul.f32 %v1410_v20, %v1410_v20  ;;  %v1419_v27 = vmul.f32 %v1411_v21, %v1411_v21  ;;  %v1420_v28 = vmul.f32 %v1412_v22, %v1412_v22 }
 0x225   : > { %v1421_v33 = vmul.f32 %v1413_v24, %v1413_v24 }
 0x226   : > { %v1414_v29 = vsub.f32 %v1393_v9, %v1409_v25  ;;  %v1415_v30 = vsub.f32 %v1394_v10, %v1409_v25  ;;  %v1426_v31 = vadd.f32 %v1419_v27, %v1418_v26  ;;  %v1416_v32 = vsub.f32 %v1395_v11, %v1409_v25 }
 0x227   : > { %v1417_v35 = vsub.f32 %v1396_v13, %v1409_v25 }
 0x228   : > { %v1427_v34 = vadd.f32 %v1426_v31, %v1420_v28  ;;  %v1422_v36 = vmul.f32 %v1414_v29, %v1414_v29  ;;  %v1423_v41 = vmul.f32 %v1415_v30, %v1415_v30  ;;  %v1424_v43 = vmul.f32 %v1416_v32, %v1416_v32 }
 0x229   : > { %v1425_v45 = vmul.f32 %v1417_v35, %v1417_v35 }
 0x22a   : > { %v1428_v42 = vadd.f32 %v1427_v34, %v1421_v33  ;;  %v1431_v44 = vadd.f32 %v1423_v41, %v1422_v36 }
 0x22c   : > { %1429 = vadd.xlane.f32.xlu1 %v1428_v42  ;;  %v1432_v46 = vadd.f32 %v1431_v44, %v1424_v43 }
 0x22e   : > { %v1433_v47 = vadd.f32 %v1432_v46, %v1425_v45 }
 0x230   : > { %1434 = vadd.xlane.f32.xlu1 %v1433_v47 }
 0x2b9   : > { %v1430_v48 = vpop.xlane.xlu1 %1429 }
 0x2ba   : > { %v1436_v49 = vmul.f32 0.001953125, %v1430_v48 }
 0x2bc   : > { %v1438_v50 = vadd.f32 1e-05, %v1436_v49 }
 0x2bd   : > { %v1435_v51 = vpop.xlane.xlu1 %1434 }
 0x2be   : > { %2025 = vrsqrt.f32 %v1438_v50  ;;  %v1437_v52 = vmul.f32 0.001953125, %v1435_v51 }
 0x2c0   : > { %v1439_v53 = vadd.f32 1e-05, %v1437_v52 }
 0x2c2   : > { %2027 = vrsqrt.f32 %v1439_v53 }
 0x2c8   : > { %v2026_v60 = vpop.eup %2025 }
 0x2c9   : > { %v1442_v1 = vmul.f32 %v2026_v60, %v1410_v20  ;;  %v1443_v2 = vmul.f32 %v2026_v60, %v1411_v21  ;;  %v1444_v3 = vmul.f32 %v2026_v60, %v1412_v22  ;;  %v1445_v4 = vmul.f32 %v2026_v60, %v1413_v24 }
 0x2cb   : > { %v1472_v5 = vmul.f32 %v1455_v56, %v1442_v1  ;;  %v1473_v6 = vmul.f32 %v1459_v57, %v1443_v2  ;;  %v1474_v7 = vmul.f32 %v1463_v58, %v1444_v3  ;;  %v1475_v8 = vmul.f32 %v1467_v59, %v1445_v4 }
 0x2cc   : > { %v2028_v9 = vpop.eup %2027 }
 0x2cd   : > { %v1502_v10 = vadd.f32 %v1485_v61, %v1472_v5  ;;  %v1503_v11 = vadd.f32 %v1489_v62, %v1473_v6  ;;  %v1504_v12 = vadd.f32 %v1493_v63, %v1474_v7  ;;  %v1505_v13 = vadd.f32 %v1497_v0, %v1475_v8 }
 0x2ce   : > { %v1446_v37 = vmul.f32 %v2028_v9, %v1414_v29  ;;  %v1447_v14 = vmul.f32 %v2028_v9, %v1415_v30  ;;  %v1448_v38 = vmul.f32 %v2028_v9, %v1416_v32  ;;  %v1449_v15 = vmul.f32 %v2028_v9, %v1417_v35 }
 0x2cf   : > { %1510 = vst [vmem:[#allocation4] sm:$0xff] %v1502_v10  ;;  %1511 = vst [vmem:[#allocation4 + $0x8] sm:$0xff] %v1503_v11 }
 0x2d0   : > { %1512 = vst [vmem:[#allocation4 + $0x10] sm:$0xff] %v1504_v12  ;;  %1513 = vst [vmem:[#allocation4 + $0x18] sm:$0xff] %v1505_v13  ;;  %v1476_v39 = vmul.f32 %v1455_v56, %v1446_v37  ;;  %v1477_v40 = vmul.f32 %v1459_v57, %v1447_v14  ;;  %v1478_v16 = vmul.f32 %v1463_v58, %v1448_v38 }
 0x2d1   : > { %v1479_v17 = vmul.f32 %v1467_v59, %v1449_v15 }
 0x2d2   : > { %v1506_v18 = vadd.f32 %v1485_v61, %v1476_v39  ;;  %v1507_v19 = vadd.f32 %v1489_v62, %v1477_v40  ;;  %v1508_v20 = vadd.f32 %v1493_v63, %v1478_v16 }
 0x2d3   : > { %v1509_v21 = vadd.f32 %v1497_v0, %v1479_v17 }
 0x2d4   : > { %1514 = vst [vmem:[#allocation4 + $0x20] sm:$0xff] %v1506_v18  ;;  %1515 = vst [vmem:[#allocation4 + $0x28] sm:$0xff] %v1507_v19 }
 0x2d5   : > { %1516 = vst [vmem:[#allocation4 + $0x30] sm:$0xff] %v1508_v20  ;;  %1517 = vst [vmem:[#allocation4 + $0x38] sm:$0xff] %v1509_v21 }
 0x2d6 PF: > { %p2382_p12 = scmp.eq.s32.totalorder %s1617_s26, 1  ;;  %s2100_s9 = smov [#allocation4]  }
 0x2d7   : > { %s1528_s10 = sshll.u32 %s2100_s9, 4  ;;  %s1529_s10 = int_to_ptr.vmem [resolvable:$true] %s1528_s10 }
 0x2d8   : > { %s2029_s11 = scalar_lea.vmem %s1529_s10, 1024  ;;  %p2036_p2 = scmp.lt.s32.totalorder %s1529_s10, %s1529_s10 }
 0x2d9   : > { %p2030_p13 = scmp.ne.s32.totalorder %s1529_s10, %s2029_s11  ;;  %p2037_p3 = scmp.lt.s32.totalorder %s2029_s11, %s2029_s11 }
 0x2db   : > { %p2031_p0 = pnand %p2030_p13, %p2382_p12  ;;  %p2038_p4 = por %p2037_p3, %p2036_p2 }
 0x2dd   : > { %p2032_p1 = pneg %p2031_p0 }
 0x2df   : > { %p2039_p5 = pnand %p2038_p4, %p2032_p1 }
 0x2e1   : > { %2042 = shalt.err (!%p2039_p5)
}
 0x2e2   : > { %s2043_s26 = scalar_lea.hbm %s2429_s6, 1024 }
 0x2e3   : > { %p2044_p6 = scmp.ne.s32.totalorder %s2429_s6, %s2043_s26  ;;  %p2049_p9 = scmp.lt.u32.totalorder %s2043_s26, %s2429_s6 }
 0x2e5   : > { %p2045_p7 = pnand %p2044_p6, %p2382_p12 }
 0x2e7   : > { %p2046_p8 = pneg %p2045_p7 }
 0x2e9   : > { %p2051_p10 = pnand %p2049_p9, %p2046_p8 }
 0x2eb   : > { %2054 = shalt.err (!%p2051_p10)
}
 0x2ec   : > { %s2101_s18 = smov 512   ;;  %s2102_s19 = smov 32  }
 0x2ed   : > { %1778 = dma.vmem_to_hbm [thread:$0]  (%p2382_p12), %s1529_s10, 1024, %s2429_s6, [#allocation5], %s2101_s18, %s2101_s18, %s2102_s19  }
 0x2ee   : > { %2076 = dma.done.wait (%p2382_p12), [#allocation5], 1024  }
 0x2ef   : > { %2078 = vsyncadd (%p2382_p12), [#allocation5], 4294966272 }
 0x2f0 PF: > { %s17_s25 = sadd.s32 1, %s2097_s25   ;;  %s2431_s21 = smov %s2085_s22 }
 0x2f1   : > { %p14_p11 = scmp.ge.s32.totalorder %s17_s25, 4   ;;  %s2432_s22 = smov %s2174_s30 }
 0x2f2   : > { %s2433_s23 = smov %s2093_s24  ;;  %s2434_s24 = smov %s2436_s27 }
 0x2f3   :  { %16 = sbr.rel (!%p14_p11) target bundleno = 3 (0x3), region = 114 }
 0x2fa   :  { %1544 = vsyncpa [#allocation5], 1 }
 0x2fb   :  { %1546 = vsyncpa [#allocation5 + $0x1], 1 }

// kernel: encoder_layer_forward.8
= control target key start
LH: loop header
LB: loop body
LE: loop exit
PB: predicated region body
PF: predicated region fallthrough
CT: control target
= control target key end

     0   :  { %s3278_s1 = inlined_call_operand.vmem [shape: bf16[512,1024], index: 1, kind: input, shape index: {}]   ;;  %s3279_s0 = inlined_call_operand.vmem [shape: f32[16,512], index: 0, kind: input, shape index: {}]   ;;  %s3280_s2 = inlined_call_operand.vmem [shape: f32[1,1024], index: 2, kind: input, shape index: {}]   ;;  %s3281_s3 = inlined_call_operand.vmem [shape: bf16[16,1024], index: 3, kind: output, shape index: {}]  }
   0x1   :  { %v62_v0 = vld [vmem:[%s3278_s1] sm:$0xff]  ;;  %v63_v2 = vld [vmem:[%s3278_s1 + $0x8] sm:$0xff] }
   0x2   :  { %v66_v1 = vld [vmem:[%s3278_s1 + $0x20] sm:$0xff]  ;;  %v67_v4 = vld [vmem:[%s3278_s1 + $0x28] sm:$0xff] }
   0x3   :  { %v2128_v3 = vcombine.high %v62_v0, %v66_v1  ;;  %v2127_v5 = vcombine.low %v62_v0, %v66_v1  ;;  %v70_v6 = vld [vmem:[%s3278_s1 + $0x40] sm:$0xff]  ;;  %v2130_v8 = vcombine.high %v63_v2, %v67_v4  ;;  %v2129_v9 = vcombine.low %v63_v2, %v67_v4  ;;  %v71_v11 = vld [vmem:[%s3278_s1 + $0x48] sm:$0xff] }
   0x4   :  { %v74_v7 = vld [vmem:[%s3278_s1 + $0x60] sm:$0xff]  ;;  %v75_v12 = vld [vmem:[%s3278_s1 + $0x68] sm:$0xff] }
   0x5   :  { %v2136_v10 = vcombine.high %v70_v6, %v74_v7  ;;  %v78_v13 = vld [vmem:[%s3278_s1 + $0x80] sm:$0xff]  ;;  %1598 = vmatprep.subr.bf16.mxu0 %v2128_v3  ;;  %v2138_v14 = vcombine.high %v71_v11, %v75_v12  ;;  %v79_v16 = vld [vmem:[%s3278_s1 + $0x88] sm:$0xff]  ;;  %1684 = vmatprep.subr.bf16.mxu1 %v2130_v8  ;;  %v2135_v18 = vcombine.low %v70_v6, %v74_v7 }
   0x6   :  { %v82_v15 = vld [vmem:[%s3278_s1 + $0xa0] sm:$0xff]  ;;  %v83_v17 = vld [vmem:[%s3278_s1 + $0xa8] sm:$0xff]  ;;  %1599 = vmatpush1.bf16.msra.mxu0 %v2127_v5  ;;  %1685 = vmatpush1.bf16.msra.mxu1 %v2129_v9  ;;  %v2137_v19 = vcombine.low %v71_v11, %v75_v12 }
   0x7   :  { %1600 = vmatprep.subr.bf16.mxu0 %v2136_v10  ;;  %v2144_v20 = vcombine.high %v78_v13, %v82_v15  ;;  %1686 = vmatprep.subr.bf16.mxu1 %v2138_v14  ;;  %v2146_v21 = vcombine.high %v79_v16, %v83_v17  ;;  %v86_v22 = vld [vmem:[%s3278_s1 + $0xc0] sm:$0xff]  ;;  %v87_v24 = vld [vmem:[%s3278_s1 + $0xc8] sm:$0xff]  ;;  %v2143_v26 = vcombine.low %v78_v13, %v82_v15 }
   0x8   :  { %v90_v23 = vld [vmem:[%s3278_s1 + $0xe0] sm:$0xff]  ;;  %v91_v25 = vld [vmem:[%s3278_s1 + $0xe8] sm:$0xff]  ;;  %v2145_v27 = vcombine.low %v79_v16, %v83_v17 }
   0x9   :  { %v2152_v28 = vcombine.high %v86_v22, %v90_v23  ;;  %v2154_v29 = vcombine.high %v87_v24, %v91_v25  ;;  %v94_v30 = vld [vmem:[%s3278_s1 + $0x100] sm:$0xff]  ;;  %v95_v32 = vld [vmem:[%s3278_s1 + $0x108] sm:$0xff]  ;;  %v2151_v34 = vcombine.low %v86_v22, %v90_v23  ;;  %v2153_v35 = vcombine.low %v87_v24, %v91_v25 }
   0xa   :  { %1601 = vmatpush1.bf16.msra.mxu0 %v2135_v18  ;;  %1687 = vmatpush1.bf16.msra.mxu1 %v2137_v19  ;;  %v98_v31 = vld [vmem:[%s3278_s1 + $0x120] sm:$0xff]  ;;  %v99_v33 = vld [vmem:[%s3278_s1 + $0x128] sm:$0xff] }
   0xb   :  { %1602 = vmatprep.subr.bf16.mxu0 %v2144_v20  ;;  %1688 = vmatprep.subr.bf16.mxu1 %v2146_v21  ;;  %v2160_v36 = vcombine.high %v94_v30, %v98_v31  ;;  %v2162_v37 = vcombine.high %v95_v32, %v99_v33  ;;  %v102_v38 = vld [vmem:[%s3278_s1 + $0x140] sm:$0xff]  ;;  %v103_v40 = vld [vmem:[%s3278_s1 + $0x148] sm:$0xff]  ;;  %v2159_v42 = vcombine.low %v94_v30, %v98_v31 }
   0xc   :  { %v106_v39 = vld [vmem:[%s3278_s1 + $0x160] sm:$0xff]  ;;  %v107_v41 = vld [vmem:[%s3278_s1 + $0x168] sm:$0xff]  ;;  %v2161_v43 = vcombine.low %v95_v32, %v99_v33 }
   0xd   :  { %v2168_v44 = vcombine.high %v102_v38, %v106_v39  ;;  %v2170_v45 = vcombine.high %v103_v40, %v107_v41  ;;  %v110_v46 = vld [vmem:[%s3278_s1 + $0x180] sm:$0xff]  ;;  %v111_v48 = vld [vmem:[%s3278_s1 + $0x188] sm:$0xff]  ;;  %v2167_v50 = vcombine.low %v102_v38, %v106_v39  ;;  %v2169_v51 = vcombine.low %v103_v40, %v107_v41 }
   0xe   :  { %1603 = vmatpush1.bf16.msra.mxu0 %v2143_v26  ;;  %1689 = vmatpush1.bf16.msra.mxu1 %v2145_v27  ;;  %v114_v47 = vld [vmem:[%s3278_s1 + $0x1a0] sm:$0xff]  ;;  %v115_v49 = vld [vmem:[%s3278_s1 + $0x1a8] sm:$0xff] }
   0xf   :  { %1604 = vmatprep.subr.bf16.mxu0 %v2152_v28  ;;  %1690 = vmatprep.subr.bf16.mxu1 %v2154_v29  ;;  %v2176_v52 = vcombine.high %v110_v46, %v114_v47  ;;  %v51_v53 = vld [vmem:[%s3279_s0 + $0x8] sm:$0xff]  ;;  %v2178_v55 = vcombine.high %v111_v48, %v115_v49  ;;  %v118_v56 = vld [vmem:[%s3278_s1 + $0x1c0] sm:$0xff]  ;;  %v2175_v61 = vcombine.low %v110_v46, %v114_v47 }
  0x10   :  { %v55_v54 = vld [vmem:[%s3279_s0 + $0x28] sm:$0xff]  ;;  %v122_v57 = vld [vmem:[%s3278_s1 + $0x1e0] sm:$0xff]  ;;  %v2177_v62 = vcombine.low %v111_v48, %v115_v49 }
  0x11   :  { %v2531_v58 = vpack.c.bf16 %v55_v54, %v51_v53  ;;  %v119_v59 = vld [vmem:[%s3278_s1 + $0x1c8] sm:$0xff]  ;;  %v2184_v63 = vcombine.high %v118_v56, %v122_v57  ;;  %v126_v1 = vld [vmem:[%s3278_s1 + $0x200] sm:$0xff]  ;;  %v2183_v5 = vcombine.low %v118_v56, %v122_v57 }
  0x12   :  { %1605 = vmatpush1.bf16.msra.mxu0 %v2151_v34  ;;  %1691 = vmatpush1.bf16.msra.mxu1 %v2153_v35  ;;  %v123_v60 = vld [vmem:[%s3278_s1 + $0x1e8] sm:$0xff]  ;;  %v130_v2 = vld [vmem:[%s3278_s1 + $0x220] sm:$0xff] }
  0x13   :  { %1606 = vmatprep.subr.bf16.mxu0 %v2160_v36  ;;  %1692 = vmatprep.subr.bf16.mxu1 %v2162_v37  ;;  %v2186_v0 = vcombine.high %v119_v59, %v123_v60  ;;  %v127_v3 = vld [vmem:[%s3278_s1 + $0x208] sm:$0xff]  ;;  %v2185_v6 = vcombine.low %v119_v59, %v123_v60  ;;  %v2192_v7 = vcombine.high %v126_v1, %v130_v2  ;;  %v134_v9 = vld [vmem:[%s3278_s1 + $0x240] sm:$0xff] }
  0x14   :  { %1630 = vmatprep.mubr.bf16.mxu0 %v2531_v58  ;;  %1716 = vmatprep.mubr.bf16.mxu1 %v2531_v58  ;;  %v131_v4 = vld [vmem:[%s3278_s1 + $0x228] sm:$0xff]  ;;  %v138_v10 = vld [vmem:[%s3278_s1 + $0x260] sm:$0xff]  ;;  %v2191_v13 = vcombine.low %v126_v1, %v130_v2 }
  0x15   :  { %v2194_v8 = vcombine.high %v127_v3, %v131_v4  ;;  %v135_v11 = vld [vmem:[%s3278_s1 + $0x248] sm:$0xff]  ;;  %v2193_v14 = vcombine.low %v127_v3, %v131_v4  ;;  %v2200_v15 = vcombine.high %v134_v9, %v138_v10  ;;  %v142_v17 = vld [vmem:[%s3278_s1 + $0x280] sm:$0xff]  ;;  %v2199_v21 = vcombine.low %v134_v9, %v138_v10 }
  0x16   :  { %1607 = vmatpush1.bf16.msra.mxu0 %v2159_v42  ;;  %1693 = vmatpush1.bf16.msra.mxu1 %v2161_v43  ;;  %v139_v12 = vld [vmem:[%s3278_s1 + $0x268] sm:$0xff]  ;;  %v146_v18 = vld [vmem:[%s3278_s1 + $0x2a0] sm:$0xff] }
  0x17   :  { %1608 = vmatprep.subr.bf16.mxu0 %v2168_v44  ;;  %1694 = vmatprep.subr.bf16.mxu1 %v2170_v45  ;;  %v2202_v16 = vcombine.high %v135_v11, %v139_v12  ;;  %v143_v19 = vld [vmem:[%s3278_s1 + $0x288] sm:$0xff]  ;;  %v2201_v22 = vcombine.low %v135_v11, %v139_v12  ;;  %v2208_v23 = vcombine.high %v142_v17, %v146_v18  ;;  %v150_v25 = vld [vmem:[%s3278_s1 + $0x2c0] sm:$0xff] }
  0x18   :  { %v147_v20 = vld [vmem:[%s3278_s1 + $0x2a8] sm:$0xff]  ;;  %v154_v26 = vld [vmem:[%s3278_s1 + $0x2e0] sm:$0xff]  ;;  %v2207_v29 = vcombine.low %v142_v17, %v146_v18  ;;  %v53_v17 = vld [vmem:[%s3279_s0 + $0x18] sm:$0xff] }
  0x19   :  { %v2210_v24 = vcombine.high %v143_v19, %v147_v20  ;;  %v151_v27 = vld [vmem:[%s3278_s1 + $0x2c8] sm:$0xff]  ;;  %v2209_v30 = vcombine.low %v143_v19, %v147_v20  ;;  %v2216_v31 = vcombine.high %v150_v25, %v154_v26  ;;  %v158_v33 = vld [vmem:[%s3278_s1 + $0x300] sm:$0xff]  ;;  %v2215_v37 = vcombine.low %v150_v25, %v154_v26  ;;  %v57_v18 = vld [vmem:[%s3279_s0 + $0x38] sm:$0xff] }
  0x1a   :  { %1609 = vmatpush1.bf16.msra.mxu0 %v2167_v50  ;;  %1695 = vmatpush1.bf16.msra.mxu1 %v2169_v51  ;;  %v155_v28 = vld [vmem:[%s3278_s1 + $0x2e8] sm:$0xff]  ;;  %v162_v34 = vld [vmem:[%s3278_s1 + $0x320] sm:$0xff]  ;;  %v2681_v25 = vpack.c.bf16 %v57_v18, %v53_v17 }
  0x1b   :  { %1610 = vmatprep.subr.bf16.mxu0 %v2176_v52  ;;  %1696 = vmatprep.subr.bf16.mxu1 %v2178_v55  ;;  %v2218_v32 = vcombine.high %v151_v27, %v155_v28  ;;  %v159_v35 = vld [vmem:[%s3278_s1 + $0x308] sm:$0xff]  ;;  %v2217_v38 = vcombine.low %v151_v27, %v155_v28  ;;  %v2224_v39 = vcombine.high %v158_v33, %v162_v34  ;;  %v166_v41 = vld [vmem:[%s3278_s1 + $0x340] sm:$0xff] }
  0x1c   :  { %v163_v36 = vld [vmem:[%s3278_s1 + $0x328] sm:$0xff]  ;;  %v170_v42 = vld [vmem:[%s3278_s1 + $0x360] sm:$0xff]  ;;  %v2223_v45 = vcombine.low %v158_v33, %v162_v34 }
  0x1d   :  { %v2226_v40 = vcombine.high %v159_v35, %v163_v36  ;;  %v167_v43 = vld [vmem:[%s3278_s1 + $0x348] sm:$0xff]  ;;  %v2225_v46 = vcombine.low %v159_v35, %v163_v36  ;;  %v2232_v47 = vcombine.high %v166_v41, %v170_v42  ;;  %v174_v49 = vld [vmem:[%s3278_s1 + $0x380] sm:$0xff]  ;;  %v2231_v53 = vcombine.low %v166_v41, %v170_v42 }
  0x1e   :  { %1611 = vmatpush1.bf16.msra.mxu0 %v2175_v61  ;;  %1697 = vmatpush1.bf16.msra.mxu1 %v2177_v62  ;;  %v171_v44 = vld [vmem:[%s3278_s1 + $0x368] sm:$0xff]  ;;  %v178_v50 = vld [vmem:[%s3278_s1 + $0x3a0] sm:$0xff] }
  0x1f   :  { %1612 = vmatprep.subr.bf16.mxu0 %v2184_v63  ;;  %1698 = vmatprep.subr.bf16.mxu1 %v2186_v0  ;;  %v2234_v48 = vcombine.high %v167_v43, %v171_v44  ;;  %v175_v51 = vld [vmem:[%s3278_s1 + $0x388] sm:$0xff]  ;;  %v2233_v54 = vcombine.low %v167_v43, %v171_v44  ;;  %v2240_v55 = vcombine.high %v174_v49, %v178_v50  ;;  %v182_v57 = vld [vmem:[%s3278_s1 + $0x3c0] sm:$0xff] }
  0x20   :  { %v179_v52 = vld [vmem:[%s3278_s1 + $0x3a8] sm:$0xff]  ;;  %v186_v59 = vld [vmem:[%s3278_s1 + $0x3e0] sm:$0xff]  ;;  %v2239_v62 = vcombine.low %v174_v49, %v178_v50 }
  0x21   :  { %v2242_v56 = vcombine.high %v175_v51, %v179_v52  ;;  %v183_v60 = vld [vmem:[%s3278_s1 + $0x3c8] sm:$0xff]  ;;  %v2241_v63 = vcombine.low %v175_v51, %v179_v52  ;;  %v2248_v0 = vcombine.high %v182_v57, %v186_v59  ;;  %v190_v2 = vld [vmem:[%s3278_s1 + $0x400] sm:$0xff] }
  0x22   :  { %1613 = vmatpush1.bf16.msra.mxu0 %v2183_v5  ;;  %1699 = vmatpush1.bf16.msra.mxu1 %v2185_v6  ;;  %v187_v61 = vld [vmem:[%s3278_s1 + $0x3e8] sm:$0xff]  ;;  %v194_v3 = vld [vmem:[%s3278_s1 + $0x420] sm:$0xff]  ;;  %v2247_v6 = vcombine.low %v182_v57, %v186_v59 }
  0x23   :  { %1614 = vmatprep.subr.bf16.mxu0 %v2192_v7  ;;  %1700 = vmatprep.subr.bf16.mxu1 %v2194_v8  ;;  %v2250_v1 = vcombine.high %v183_v60, %v187_v61  ;;  %v191_v4 = vld [vmem:[%s3278_s1 + $0x408] sm:$0xff]  ;;  %v50_v7 = vld [vmem:[%s3279_s0] sm:$0xff]  ;;  %v2249_v9 = vcombine.low %v183_v60, %v187_v61  ;;  %v2256_v10 = vcombine.high %v190_v2, %v194_v3 }
  0x24   :  { %v195_v5 = vld [vmem:[%s3278_s1 + $0x428] sm:$0xff]  ;;  %v54_v8 = vld [vmem:[%s3279_s0 + $0x20] sm:$0xff]  ;;  %v2255_v19 = vcombine.low %v190_v2, %v194_v3 }
  0x25   :  { %v2258_v11 = vcombine.high %v191_v4, %v195_v5  ;;  %v198_v12 = vld [vmem:[%s3278_s1 + $0x440] sm:$0xff]  ;;  %v2257_v20 = vcombine.low %v191_v4, %v195_v5  ;;  %v207_v26 = vld [vmem:[%s3278_s1 + $0x488] sm:$0xff] }
  0x26   :  { %1615 = vmatpush1.bf16.msra.mxu0 %v2191_v13  ;;  %1701 = vmatpush1.bf16.msra.mxu1 %v2193_v14  ;;  %v202_v13 = vld [vmem:[%s3278_s1 + $0x460] sm:$0xff]  ;;  %v199_v14 = vld [vmem:[%s3278_s1 + $0x448] sm:$0xff] }
  0x27   :  { %1616 = vmatprep.subr.bf16.mxu0 %v2200_v15  ;;  %1702 = vmatprep.subr.bf16.mxu1 %v2202_v16  ;;  %v2664_v15 = vpack.c.bf16 %v54_v8, %v50_v7  ;;  %v203_v16 = vld [vmem:[%s3278_s1 + $0x468] sm:$0xff]  ;;  %v2263_v28 = vcombine.low %v198_v12, %v202_v13  ;;  %v218_v33 = vld [vmem:[%s3278_s1 + $0x4e0] sm:$0xff] }
  0x28   :  { %v211_v27 = vld [vmem:[%s3278_s1 + $0x4a8] sm:$0xff]  ;;  %v226_v41 = vld [vmem:[%s3278_s1 + $0x520] sm:$0xff] }
  0x29   :  { %v215_v34 = vld [vmem:[%s3278_s1 + $0x4c8] sm:$0xff]  ;;  %v234_v49 = vld [vmem:[%s3278_s1 + $0x560] sm:$0xff] }
  0x2a   :  { %1617 = vmatpush1.bf16.msra.mxu0 %v2199_v21  ;;  %1703 = vmatpush1.bf16.msra.mxu1 %v2201_v22  ;;  %v2264_v21 = vcombine.high %v198_v12, %v202_v13  ;;  %v2266_v22 = vcombine.high %v199_v14, %v203_v16  ;;  %v219_v35 = vld [vmem:[%s3278_s1 + $0x4e8] sm:$0xff]  ;;  %v242_v57 = vld [vmem:[%s3278_s1 + $0x5a0] sm:$0xff] }
  0x2b   :  { %1618 = vmatprep.subr.bf16.mxu0 %v2208_v23  ;;  %1704 = vmatprep.subr.bf16.mxu1 %v2210_v24  ;;  %v206_v23 = vld [vmem:[%s3278_s1 + $0x480] sm:$0xff]  ;;  %v223_v42 = vld [vmem:[%s3278_s1 + $0x508] sm:$0xff] }
  0x2c   :  { %v210_v24 = vld [vmem:[%s3278_s1 + $0x4a0] sm:$0xff]  ;;  %v227_v43 = vld [vmem:[%s3278_s1 + $0x528] sm:$0xff] }
  0x2d   :  { %v2271_v36 = vcombine.low %v206_v23, %v210_v24  ;;  %v231_v50 = vld [vmem:[%s3278_s1 + $0x548] sm:$0xff]  ;;  %v250_v2 = vld [vmem:[%s3278_s1 + $0x5e0] sm:$0xff] }
  0x2e   :  { %1619 = vmatpush1.bf16.msra.mxu0 %v2207_v29  ;;  %1705 = vmatpush1.bf16.msra.mxu1 %v2209_v30  ;;  %v2265_v29 = vcombine.low %v199_v14, %v203_v16  ;;  %v2272_v30 = vcombine.high %v206_v23, %v210_v24  ;;  %v235_v51 = vld [vmem:[%s3278_s1 + $0x568] sm:$0xff]  ;;  %v262_v18 = vld [vmem:[%s3278_s1 + $0x640] sm:$0xff] }
  0x2f   :  { %1620 = vmatprep.subr.bf16.mxu0 %v2216_v31  ;;  %1706 = vmatprep.subr.bf16.mxu1 %v2218_v32  ;;  %v2274_v31 = vcombine.high %v207_v26, %v211_v27  ;;  %v214_v32 = vld [vmem:[%s3278_s1 + $0x4c0] sm:$0xff]  ;;  %v239_v59 = vld [vmem:[%s3278_s1 + $0x588] sm:$0xff] }
  0x30   :  { %v2279_v44 = vcombine.low %v214_v32, %v218_v33  ;;  %v243_v60 = vld [vmem:[%s3278_s1 + $0x5a8] sm:$0xff] }
  0x31   :  { %v247_v3 = vld [vmem:[%s3278_s1 + $0x5c8] sm:$0xff] }
  0x32   :  { %1621 = vmatpush1.bf16.msra.mxu0 %v2215_v37  ;;  %1707 = vmatpush1.bf16.msra.mxu1 %v2217_v38  ;;  %v2273_v37 = vcombine.low %v207_v26, %v211_v27  ;;  %v2280_v38 = vcombine.high %v214_v32, %v218_v33  ;;  %v251_v4 = vld [vmem:[%s3278_s1 + $0x5e8] sm:$0xff]  ;;  %v270_v27 = vld [vmem:[%s3278_s1 + $0x680] sm:$0xff] }
  0x33   :  { %1622 = vmatprep.subr.bf16.mxu0 %v2224_v39  ;;  %1708 = vmatprep.subr.bf16.mxu1 %v2226_v40  ;;  %v2282_v39 = vcombine.high %v215_v34, %v219_v35  ;;  %v222_v40 = vld [vmem:[%s3278_s1 + $0x500] sm:$0xff]  ;;  %v2314_v8 = vcombine.high %v247_v3, %v251_v4  ;;  %v259_v12 = vld [vmem:[%s3278_s1 + $0x628] sm:$0xff]  ;;  %v2313_v14 = vcombine.low %v247_v3, %v251_v4 }
  0x34   :  { %v2287_v52 = vcombine.low %v222_v40, %v226_v41  ;;  %v310_v4 = vld [vmem:[%s3278_s1 + $0x7c0] sm:$0xff] }
  0x36   :  { %1623 = vmatpush1.bf16.msra.mxu0 %v2223_v45  ;;  %1709 = vmatpush1.bf16.msra.mxu1 %v2225_v46  ;;  %v2281_v45 = vcombine.low %v215_v34, %v219_v35  ;;  %v2288_v46 = vcombine.high %v222_v40, %v226_v41  ;;  %v278_v35 = vld [vmem:[%s3278_s1 + $0x6c0] sm:$0xff] }
  0x37   :  { %1624 = vmatprep.subr.bf16.mxu0 %v2232_v47  ;;  %1710 = vmatprep.subr.bf16.mxu1 %v2234_v48  ;;  %v2290_v47 = vcombine.high %v223_v42, %v227_v43  ;;  %v230_v48 = vld [vmem:[%s3278_s1 + $0x540] sm:$0xff] }
  0x38   :  { %v2295_v61 = vcombine.low %v230_v48, %v234_v49 }
  0x3a   :  { %1625 = vmatpush1.bf16.msra.mxu0 %v2231_v53  ;;  %1711 = vmatpush1.bf16.msra.mxu1 %v2233_v54  ;;  %v2289_v53 = vcombine.low %v223_v42, %v227_v43  ;;  %v2296_v54 = vcombine.high %v230_v48, %v234_v49  ;;  %v286_v43 = vld [vmem:[%s3278_s1 + $0x700] sm:$0xff] }
  0x3b   :  { %1626 = vmatprep.subr.bf16.mxu0 %v2240_v55  ;;  %1712 = vmatprep.subr.bf16.mxu1 %v2242_v56  ;;  %v2298_v55 = vcombine.high %v231_v50, %v235_v51  ;;  %v238_v56 = vld [vmem:[%s3278_s1 + $0x580] sm:$0xff] }
  0x3c   :  { %v2303_v5 = vcombine.low %v238_v56, %v242_v57 }
  0x3e   :  { %1627 = vmatpush1.bf16.msra.mxu0 %v2239_v62  ;;  %1713 = vmatpush1.bf16.msra.mxu1 %v2241_v63  ;;  %v2297_v62 = vcombine.low %v231_v50, %v235_v51  ;;  %v2304_v63 = vcombine.high %v238_v56, %v242_v57  ;;  %v294_v51 = vld [vmem:[%s3278_s1 + $0x740] sm:$0xff] }
  0x3f   :  { %1628 = vmatprep.subr.bf16.mxu0 %v2248_v0  ;;  %1714 = vmatprep.subr.bf16.mxu1 %v2250_v1  ;;  %v2306_v0 = vcombine.high %v239_v59, %v243_v60  ;;  %v246_v1 = vld [vmem:[%s3278_s1 + $0x5c0] sm:$0xff] }
  0x40   :  { %v2312_v7 = vcombine.high %v246_v1, %v250_v2  ;;  %v2311_v13 = vcombine.low %v246_v1, %v250_v2 }
  0x42   :  { %1629 = vmatpush1.bf16.msra.mxu0 %v2247_v6  ;;  %1715 = vmatpush1.bf16.msra.mxu1 %v2249_v9  ;;  %v2305_v6 = vcombine.low %v239_v59, %v243_v60  ;;  %v254_v9 = vld [vmem:[%s3278_s1 + $0x600] sm:$0xff] }
  0x43   :  { %1641 = vmatprep.subr.bf16.mxu0 %v2256_v10  ;;  %1727 = vmatprep.subr.bf16.mxu1 %v2258_v11  ;;  %v258_v10 = vld [vmem:[%s3278_s1 + $0x620] sm:$0xff]  ;;  %v255_v11 = vld [vmem:[%s3278_s1 + $0x608] sm:$0xff] }
  0x44   :  { %v2320_v16 = vcombine.high %v254_v9, %v258_v10  ;;  %v2322_v17 = vcombine.high %v255_v11, %v259_v12  ;;  %v2321_v23 = vcombine.low %v255_v11, %v259_v12  ;;  %v302_v60 = vld [vmem:[%s3278_s1 + $0x780] sm:$0xff]  ;;  %v64_v12 = vld [vmem:[%s3278_s1 + $0x10] sm:$0xff] }
  0x45   :  { %1631 = vmatmul.mubr.bf16.vlgmr.msra.gmra.mrb[0].mxu0 %v2664_v15  ;;  %1717 = vmatmul.mubr.bf16.vlgmr.msra.gmra.mrb[0].mxu1 %v2664_v15 }
  0x46   :  { %1642 = vmatpush1.bf16.msra.mxu0 %v2255_v19  ;;  %1728 = vmatpush1.bf16.msra.mxu1 %v2257_v20  ;;  %v266_v19 = vld [vmem:[%s3278_s1 + $0x660] sm:$0xff]  ;;  %v263_v20 = vld [vmem:[%s3278_s1 + $0x648] sm:$0xff] }
  0x47   :  { %1643 = vmatprep.subr.bf16.mxu0 %v2264_v21  ;;  %1729 = vmatprep.subr.bf16.mxu1 %v2266_v22  ;;  %v267_v21 = vld [vmem:[%s3278_s1 + $0x668] sm:$0xff]  ;;  %v2319_v22 = vcombine.low %v254_v9, %v258_v10  ;;  %v2328_v24 = vcombine.high %v262_v18, %v266_v19 }
  0x48   :  { %1673 = vmatprep.mubr.bf16.mxu0 %v2681_v25  ;;  %1759 = vmatprep.mubr.bf16.mxu1 %v2681_v25  ;;  %v2330_v26 = vcombine.high %v263_v20, %v267_v21  ;;  %v2329_v32 = vcombine.low %v263_v20, %v267_v21 }
  0x4a   :  { %1644 = vmatpush1.bf16.msra.mxu0 %v2263_v28  ;;  %1730 = vmatpush1.bf16.msra.mxu1 %v2265_v29  ;;  %v274_v28 = vld [vmem:[%s3278_s1 + $0x6a0] sm:$0xff]  ;;  %v271_v29 = vld [vmem:[%s3278_s1 + $0x688] sm:$0xff] }
  0x4b   :  { %1645 = vmatprep.subr.bf16.mxu0 %v2272_v30  ;;  %1731 = vmatprep.subr.bf16.mxu1 %v2274_v31  ;;  %v275_v30 = vld [vmem:[%s3278_s1 + $0x6a8] sm:$0xff]  ;;  %v2327_v31 = vcombine.low %v262_v18, %v266_v19  ;;  %v2336_v33 = vcombine.high %v270_v27, %v274_v28  ;;  %v52_v18 = vld [vmem:[%s3279_s0 + $0x10] sm:$0xff] }
  0x4c   :  { %v2338_v34 = vcombine.high %v271_v29, %v275_v30  ;;  %v2337_v40 = vcombine.low %v271_v29, %v275_v30  ;;  %v56_v19 = vld [vmem:[%s3279_s0 + $0x30] sm:$0xff] }
  0x4e   :  { %1646 = vmatpush1.bf16.msra.mxu0 %v2271_v36  ;;  %1732 = vmatpush1.bf16.msra.mxu1 %v2273_v37  ;;  %v282_v36 = vld [vmem:[%s3278_s1 + $0x6e0] sm:$0xff]  ;;  %v279_v37 = vld [vmem:[%s3278_s1 + $0x6c8] sm:$0xff] }
  0x4f   :  { %1647 = vmatprep.subr.bf16.mxu0 %v2280_v38  ;;  %1733 = vmatprep.subr.bf16.mxu1 %v2282_v39  ;;  %v283_v38 = vld [vmem:[%s3278_s1 + $0x6e8] sm:$0xff]  ;;  %v2335_v39 = vcombine.low %v270_v27, %v274_v28  ;;  %v2344_v41 = vcombine.high %v278_v35, %v282_v36  ;;  %v73_v27 = vld [vmem:[%s3278_s1 + $0x58] sm:$0xff] }
  0x50   :  { %v2346_v42 = vcombine.high %v279_v37, %v283_v38  ;;  %v2345_v48 = vcombine.low %v279_v37, %v283_v38  ;;  %v77_v28 = vld [vmem:[%s3278_s1 + $0x78] sm:$0xff] }
  0x51   :  { %v2141_v38 = vcombine.low %v73_v27, %v77_v28 }
  0x52   :  { %1648 = vmatpush1.bf16.msra.mxu0 %v2279_v44  ;;  %1734 = vmatpush1.bf16.msra.mxu1 %v2281_v45  ;;  %v290_v44 = vld [vmem:[%s3278_s1 + $0x720] sm:$0xff]  ;;  %v287_v45 = vld [vmem:[%s3278_s1 + $0x708] sm:$0xff] }
  0x53   :  { %1649 = vmatprep.subr.bf16.mxu0 %v2288_v46  ;;  %1735 = vmatprep.subr.bf16.mxu1 %v2290_v47  ;;  %v291_v46 = vld [vmem:[%s3278_s1 + $0x728] sm:$0xff]  ;;  %v2343_v47 = vcombine.low %v278_v35, %v282_v36  ;;  %v2352_v49 = vcombine.high %v286_v43, %v290_v44  ;;  %v81_v35 = vld [vmem:[%s3278_s1 + $0x98] sm:$0xff] }
  0x54   :  { %v2354_v50 = vcombine.high %v287_v45, %v291_v46  ;;  %v2353_v56 = vcombine.low %v287_v45, %v291_v46  ;;  %v85_v36 = vld [vmem:[%s3278_s1 + $0xb8] sm:$0xff] }
  0x55   :  { %v2149_v46 = vcombine.low %v81_v35, %v85_v36 }
  0x56   :  { %1650 = vmatpush1.bf16.msra.mxu0 %v2287_v52  ;;  %1736 = vmatpush1.bf16.msra.mxu1 %v2289_v53  ;;  %v298_v52 = vld [vmem:[%s3278_s1 + $0x760] sm:$0xff]  ;;  %v295_v53 = vld [vmem:[%s3278_s1 + $0x748] sm:$0xff] }
  0x57   :  { %1651 = vmatprep.subr.bf16.mxu0 %v2296_v54  ;;  %1737 = vmatprep.subr.bf16.mxu1 %v2298_v55  ;;  %v299_v54 = vld [vmem:[%s3278_s1 + $0x768] sm:$0xff]  ;;  %v2351_v55 = vcombine.low %v286_v43, %v290_v44  ;;  %v2360_v57 = vcombine.high %v294_v51, %v298_v52  ;;  %v89_v43 = vld [vmem:[%s3278_s1 + $0xd8] sm:$0xff] }
  0x58   :  { %v2362_v59 = vcombine.high %v295_v53, %v299_v54  ;;  %v2361_v1 = vcombine.low %v295_v53, %v299_v54  ;;  %v93_v44 = vld [vmem:[%s3278_s1 + $0xf8] sm:$0xff] }
  0x59   :  { %v2157_v53 = vcombine.low %v89_v43, %v93_v44 }
  0x5a   :  { %1652 = vmatpush1.bf16.msra.mxu0 %v2295_v61  ;;  %1738 = vmatpush1.bf16.msra.mxu1 %v2297_v62  ;;  %v306_v61 = vld [vmem:[%s3278_s1 + $0x7a0] sm:$0xff]  ;;  %v303_v62 = vld [vmem:[%s3278_s1 + $0x788] sm:$0xff] }
  0x5b   :  { %1653 = vmatprep.subr.bf16.mxu0 %v2304_v63  ;;  %1739 = vmatprep.subr.bf16.mxu1 %v2306_v0  ;;  %v307_v63 = vld [vmem:[%s3278_s1 + $0x7a8] sm:$0xff]  ;;  %v2359_v0 = vcombine.low %v294_v51, %v298_v52  ;;  %v2368_v2 = vcombine.high %v302_v60, %v306_v61  ;;  %v101_v51 = vld [vmem:[%s3278_s1 + $0x138] sm:$0xff] }
  0x5c   :  { %v2370_v3 = vcombine.high %v303_v62, %v307_v63  ;;  %v2369_v9 = vcombine.low %v303_v62, %v307_v63 }
  0x5e   :  { %1654 = vmatpush1.bf16.msra.mxu0 %v2303_v5  ;;  %1740 = vmatpush1.bf16.msra.mxu1 %v2305_v6  ;;  %v314_v5 = vld [vmem:[%s3278_s1 + $0x7e0] sm:$0xff]  ;;  %v311_v6 = vld [vmem:[%s3278_s1 + $0x7c8] sm:$0xff] }
  0x5f   :  { %1655 = vmatprep.subr.bf16.mxu0 %v2312_v7  ;;  %1741 = vmatprep.subr.bf16.mxu1 %v2314_v8  ;;  %v315_v7 = vld [vmem:[%s3278_s1 + $0x7e8] sm:$0xff]  ;;  %v2367_v8 = vcombine.low %v302_v60, %v306_v61  ;;  %v2376_v10 = vcombine.high %v310_v4, %v314_v5  ;;  %v109_v60 = vld [vmem:[%s3278_s1 + $0x178] sm:$0xff] }
  0x60   :  { %v2378_v11 = vcombine.high %v311_v6, %v315_v7  ;;  %v2377_v20 = vcombine.low %v311_v6, %v315_v7 }
  0x62   :  { %1656 = vmatpush1.bf16.msra.mxu0 %v2311_v13  ;;  %1742 = vmatpush1.bf16.msra.mxu1 %v2313_v14  ;;  %v68_v13 = vld [vmem:[%s3278_s1 + $0x30] sm:$0xff]  ;;  %v65_v14 = vld [vmem:[%s3278_s1 + $0x18] sm:$0xff] }
  0x63   :  { %1657 = vmatprep.subr.bf16.mxu0 %v2320_v16  ;;  %1743 = vmatprep.subr.bf16.mxu1 %v2322_v17  ;;  %v69_v16 = vld [vmem:[%s3278_s1 + $0x38] sm:$0xff]  ;;  %v2375_v17 = vcombine.low %v310_v4, %v314_v5  ;;  %v2132_v21 = vcombine.high %v64_v12, %v68_v13  ;;  %v2131_v29 = vcombine.low %v64_v12, %v68_v13 }
  0x64   :  { %v2133_v30 = vcombine.low %v65_v14, %v69_v16  ;;  %v117_v4 = vld [vmem:[%s3278_s1 + $0x1b8] sm:$0xff] }
  0x65   :  { %v125_v12 = vld [vmem:[%s3278_s1 + $0x1f8] sm:$0xff] }
  0x66   :  { %1658 = vmatpush1.bf16.msra.mxu0 %v2319_v22  ;;  %1744 = vmatpush1.bf16.msra.mxu1 %v2321_v23  ;;  %v2134_v22 = vcombine.high %v65_v14, %v69_v16  ;;  %v72_v23 = vld [vmem:[%s3278_s1 + $0x50] sm:$0xff] }
  0x67   :  { %1659 = vmatprep.subr.bf16.mxu0 %v2328_v24  ;;  %1745 = vmatprep.subr.bf16.mxu1 %v2330_v26  ;;  %v76_v24 = vld [vmem:[%s3278_s1 + $0x70] sm:$0xff]  ;;  %v2873_v26 = vpack.c.bf16 %v56_v19, %v52_v18 }
  0x68   :  { %v2139_v37 = vcombine.low %v72_v23, %v76_v24  ;;  %v128_v18 = vld [vmem:[%s3278_s1 + $0x210] sm:$0xff] }
  0x69   :  { %v132_v19 = vld [vmem:[%s3278_s1 + $0x230] sm:$0xff] }
  0x6a   :  { %1660 = vmatpush1.bf16.msra.mxu0 %v2327_v31  ;;  %1746 = vmatpush1.bf16.msra.mxu1 %v2329_v32  ;;  %v2140_v31 = vcombine.high %v72_v23, %v76_v24  ;;  %v2142_v32 = vcombine.high %v73_v27, %v77_v28  ;;  %v2196_v24 = vcombine.high %v128_v18, %v132_v19  ;;  %v136_v28 = vld [vmem:[%s3278_s1 + $0x250] sm:$0xff] }
  0x6b   :  { %1661 = vmatprep.subr.bf16.mxu0 %v2336_v33  ;;  %1747 = vmatprep.subr.bf16.mxu1 %v2338_v34  ;;  %v80_v33 = vld [vmem:[%s3278_s1 + $0x90] sm:$0xff] }
  0x6c   :  { %v84_v34 = vld [vmem:[%s3278_s1 + $0xb0] sm:$0xff] }
  0x6d   :  { %v2147_v45 = vcombine.low %v80_v33, %v84_v34 }
  0x6e   :  { %1662 = vmatpush1.bf16.msra.mxu0 %v2335_v39  ;;  %1748 = vmatpush1.bf16.msra.mxu1 %v2337_v40  ;;  %v2148_v39 = vcombine.high %v80_v33, %v84_v34  ;;  %v2150_v40 = vcombine.high %v81_v35, %v85_v36  ;;  %v144_v36 = vld [vmem:[%s3278_s1 + $0x290] sm:$0xff] }
  0x6f   :  { %1663 = vmatprep.subr.bf16.mxu0 %v2344_v41  ;;  %1749 = vmatprep.subr.bf16.mxu1 %v2346_v42  ;;  %v88_v41 = vld [vmem:[%s3278_s1 + $0xd0] sm:$0xff] }
  0x70   :  { %v92_v42 = vld [vmem:[%s3278_s1 + $0xf0] sm:$0xff] }
  0x71   :  { %v2155_v52 = vcombine.low %v88_v41, %v92_v42 }
  0x72   :  { %1664 = vmatpush1.bf16.msra.mxu0 %v2343_v47  ;;  %1750 = vmatpush1.bf16.msra.mxu1 %v2345_v48  ;;  %v2156_v47 = vcombine.high %v88_v41, %v92_v42  ;;  %v2158_v48 = vcombine.high %v89_v43, %v93_v44  ;;  %v152_v44 = vld [vmem:[%s3278_s1 + $0x2d0] sm:$0xff] }
  0x73   :  { %1665 = vmatprep.subr.bf16.mxu0 %v2352_v49  ;;  %1751 = vmatprep.subr.bf16.mxu1 %v2354_v50  ;;  %v96_v49 = vld [vmem:[%s3278_s1 + $0x110] sm:$0xff] }
  0x74   :  { %v100_v50 = vld [vmem:[%s3278_s1 + $0x130] sm:$0xff] }
  0x75   :  { %v2164_v54 = vcombine.high %v96_v49, %v100_v50  ;;  %v2163_v61 = vcombine.low %v96_v49, %v100_v50 }
  0x76   :  { %1666 = vmatpush1.bf16.msra.mxu0 %v2351_v55  ;;  %1752 = vmatpush1.bf16.msra.mxu1 %v2353_v56  ;;  %v104_v56 = vld [vmem:[%s3278_s1 + $0x150] sm:$0xff] }
  0x77   :  { %1667 = vmatprep.subr.bf16.mxu0 %v2360_v57  ;;  %1753 = vmatprep.subr.bf16.mxu1 %v2362_v59  ;;  %v108_v57 = vld [vmem:[%s3278_s1 + $0x170] sm:$0xff]  ;;  %v105_v59 = vld [vmem:[%s3278_s1 + $0x158] sm:$0xff] }
  0x78   :  { %v2172_v63 = vcombine.high %v104_v56, %v108_v57  ;;  %v2171_v5 = vcombine.low %v104_v56, %v108_v57  ;;  %v2173_v6 = vcombine.low %v105_v59, %v109_v60 }
  0x7a   :  { %1668 = vmatpush1.bf16.msra.mxu0 %v2359_v0  ;;  %1754 = vmatpush1.bf16.msra.mxu1 %v2361_v1  ;;  %v2174_v0 = vcombine.high %v105_v59, %v109_v60  ;;  %v112_v1 = vld [vmem:[%s3278_s1 + $0x190] sm:$0xff] }
  0x7b   :  { %1669 = vmatprep.subr.bf16.mxu0 %v2368_v2  ;;  %1755 = vmatprep.subr.bf16.mxu1 %v2370_v3  ;;  %v116_v2 = vld [vmem:[%s3278_s1 + $0x1b0] sm:$0xff]  ;;  %v113_v3 = vld [vmem:[%s3278_s1 + $0x198] sm:$0xff] }
  0x7c   :  { %v2180_v7 = vcombine.high %v112_v1, %v116_v2  ;;  %v2179_v13 = vcombine.low %v112_v1, %v116_v2  ;;  %v2181_v14 = vcombine.low %v113_v3, %v117_v4  ;;  %v168_v60 = vld [vmem:[%s3278_s1 + $0x350] sm:$0xff] }
  0x7e   :  { %1670 = vmatpush1.bf16.msra.mxu0 %v2367_v8  ;;  %1756 = vmatpush1.bf16.msra.mxu1 %v2369_v9  ;;  %v2182_v8 = vcombine.high %v113_v3, %v117_v4  ;;  %v120_v9 = vld [vmem:[%s3278_s1 + $0x1d0] sm:$0xff] }
  0x7f   :  { %1671 = vmatprep.subr.bf16.mxu0 %v2376_v10  ;;  %1757 = vmatprep.subr.bf16.mxu1 %v2378_v11  ;;  %v124_v10 = vld [vmem:[%s3278_s1 + $0x1f0] sm:$0xff]  ;;  %v121_v11 = vld [vmem:[%s3278_s1 + $0x1d8] sm:$0xff] }
  0x80   :  { %v2188_v16 = vcombine.high %v120_v9, %v124_v10  ;;  %v2189_v23 = vcombine.low %v121_v11, %v125_v12  ;;  %v176_v4 = vld [vmem:[%s3278_s1 + $0x390] sm:$0xff] }
  0x82   :  { %1672 = vmatpush1.bf16.msra.mxu0 %v2375_v17  ;;  %1758 = vmatpush1.bf16.msra.mxu1 %v2377_v20  ;;  %v2190_v17 = vcombine.high %v121_v11, %v125_v12  ;;  %v129_v20 = vld [vmem:[%s3278_s1 + $0x218] sm:$0xff]  ;;  %v184_v12 = vld [vmem:[%s3278_s1 + $0x3d0] sm:$0xff] }
  0x83   :  { %1770 = vmatprep.subr.bf16.mxu0 %v2132_v21  ;;  %1856 = vmatprep.subr.bf16.mxu1 %v2134_v22  ;;  %v133_v21 = vld [vmem:[%s3278_s1 + $0x238] sm:$0xff]  ;;  %v2187_v22 = vcombine.low %v120_v9, %v124_v10 }
  0x84   :  { %v2198_v27 = vcombine.high %v129_v20, %v133_v21  ;;  %v2197_v33 = vcombine.low %v129_v20, %v133_v21  ;;  %v192_v21 = vld [vmem:[%s3278_s1 + $0x410] sm:$0xff] }
  0x85   :  { %1674 = vmatmul.mubr.bf16.vlgmr.msra.gmra.mrb[0].mxu0 %v2873_v26  ;;  %1760 = vmatmul.mubr.bf16.vlgmr.msra.gmra.mrb[0].mxu1 %v2873_v26 }
  0x86   :  { %1771 = vmatpush1.bf16.msra.mxu0 %v2131_v29  ;;  %1857 = vmatpush1.bf16.msra.mxu1 %v2133_v30  ;;  %v140_v29 = vld [vmem:[%s3278_s1 + $0x270] sm:$0xff]  ;;  %v137_v30 = vld [vmem:[%s3278_s1 + $0x258] sm:$0xff] }
  0x87   :  { %1772 = vmatprep.subr.bf16.mxu0 %v2140_v31  ;;  %1858 = vmatprep.subr.bf16.mxu1 %v2142_v32  ;;  %v141_v31 = vld [vmem:[%s3278_s1 + $0x278] sm:$0xff]  ;;  %v2195_v32 = vcombine.low %v128_v18, %v132_v19  ;;  %v2204_v34 = vcombine.high %v136_v28, %v140_v29 }
  0x88   :  { %1802 = vmatprep.mubr.bf16.mxu0 %v2531_v58  ;;  %1888 = vmatprep.mubr.bf16.mxu1 %v2531_v58  ;;  %v97_v58 = vld [vmem:[%s3278_s1 + $0x118] sm:$0xff]  ;;  %v2206_v35 = vcombine.high %v137_v30, %v141_v31  ;;  %v2205_v41 = vcombine.low %v137_v30, %v141_v31  ;;  %v200_v31 = vld [vmem:[%s3278_s1 + $0x450] sm:$0xff] }
  0x89   :  { %v2166_v55 = vcombine.high %v97_v58, %v101_v51  ;;  %v2165_v62 = vcombine.low %v97_v58, %v101_v51  ;;  %v160_v51 = vld [vmem:[%s3278_s1 + $0x310] sm:$0xff] }
  0x8a   :  { %1773 = vmatpush1.bf16.msra.mxu0 %v2139_v37  ;;  %1859 = vmatpush1.bf16.msra.mxu1 %v2141_v38  ;;  %v148_v37 = vld [vmem:[%s3278_s1 + $0x2b0] sm:$0xff]  ;;  %v145_v38 = vld [vmem:[%s3278_s1 + $0x298] sm:$0xff] }
  0x8b   :  { %1774 = vmatprep.subr.bf16.mxu0 %v2148_v39  ;;  %1860 = vmatprep.subr.bf16.mxu1 %v2150_v40  ;;  %v149_v39 = vld [vmem:[%s3278_s1 + $0x2b8] sm:$0xff]  ;;  %v2203_v40 = vcombine.low %v136_v28, %v140_v29  ;;  %v2212_v42 = vcombine.high %v144_v36, %v148_v37 }
  0x8c   :  { %v2214_v43 = vcombine.high %v145_v38, %v149_v39  ;;  %v2213_v49 = vcombine.low %v145_v38, %v149_v39  ;;  %v208_v39 = vld [vmem:[%s3278_s1 + $0x490] sm:$0xff] }
  0x8e   :  { %1775 = vmatpush1.bf16.msra.mxu0 %v2147_v45  ;;  %1861 = vmatpush1.bf16.msra.mxu1 %v2149_v46  ;;  %v156_v45 = vld [vmem:[%s3278_s1 + $0x2f0] sm:$0xff]  ;;  %v153_v46 = vld [vmem:[%s3278_s1 + $0x2d8] sm:$0xff] }
  0x8f   :  { %1776 = vmatprep.subr.bf16.mxu0 %v2156_v47  ;;  %1862 = vmatprep.subr.bf16.mxu1 %v2158_v48  ;;  %v157_v47 = vld [vmem:[%s3278_s1 + $0x2f8] sm:$0xff]  ;;  %v2211_v48 = vcombine.low %v144_v36, %v148_v37  ;;  %v2220_v50 = vcombine.high %v152_v44, %v156_v45 }
  0x90   :  { %v2222_v58 = vcombine.high %v153_v46, %v157_v47  ;;  %v2221_v56 = vcombine.low %v153_v46, %v157_v47  ;;  %v216_v47 = vld [vmem:[%s3278_s1 + $0x4d0] sm:$0xff] }
  0x92   :  { %1777 = vmatpush1.bf16.msra.mxu0 %v2155_v52  ;;  %1863 = vmatpush1.bf16.msra.mxu1 %v2157_v53  ;;  %v164_v52 = vld [vmem:[%s3278_s1 + $0x330] sm:$0xff]  ;;  %v161_v53 = vld [vmem:[%s3278_s1 + $0x318] sm:$0xff] }
  0x93   :  { %1778 = vmatprep.subr.bf16.mxu0 %v2164_v54  ;;  %1864 = vmatprep.subr.bf16.mxu1 %v2166_v55  ;;  %v165_v54 = vld [vmem:[%s3278_s1 + $0x338] sm:$0xff]  ;;  %v2219_v55 = vcombine.low %v152_v44, %v156_v45  ;;  %v2228_v57 = vcombine.high %v160_v51, %v164_v52 }
  0x94   :  { %v2230_v59 = vcombine.high %v161_v53, %v165_v54  ;;  %v2229_v1 = vcombine.low %v161_v53, %v165_v54  ;;  %v224_v53 = vld [vmem:[%s3278_s1 + $0x510] sm:$0xff] }
  0x95   :  { %v228_v54 = vld [vmem:[%s3278_s1 + $0x530] sm:$0xff] }
  0x96   :  { %1779 = vmatpush1.bf16.msra.mxu0 %v2163_v61  ;;  %1865 = vmatpush1.bf16.msra.mxu1 %v2165_v62  ;;  %v172_v61 = vld [vmem:[%s3278_s1 + $0x370] sm:$0xff]  ;;  %v169_v62 = vld [vmem:[%s3278_s1 + $0x358] sm:$0xff] }
  0x97   :  { %1780 = vmatprep.subr.bf16.mxu0 %v2172_v63  ;;  %1866 = vmatprep.subr.bf16.mxu1 %v2174_v0  ;;  %v173_v63 = vld [vmem:[%s3278_s1 + $0x378] sm:$0xff]  ;;  %v2227_v0 = vcombine.low %v160_v51, %v164_v52  ;;  %v2236_v2 = vcombine.high %v168_v60, %v172_v61 }
  0x98   :  { %v2238_v3 = vcombine.high %v169_v62, %v173_v63  ;;  %v2237_v9 = vcombine.low %v169_v62, %v173_v63  ;;  %v236_v62 = vld [vmem:[%s3278_s1 + $0x570] sm:$0xff]  ;;  %v233_v63 = vld [vmem:[%s3278_s1 + $0x558] sm:$0xff] }
  0x9a   :  { %1781 = vmatpush1.bf16.msra.mxu0 %v2171_v5  ;;  %1867 = vmatpush1.bf16.msra.mxu1 %v2173_v6  ;;  %v180_v5 = vld [vmem:[%s3278_s1 + $0x3b0] sm:$0xff]  ;;  %v177_v6 = vld [vmem:[%s3278_s1 + $0x398] sm:$0xff] }
  0x9b   :  { %1782 = vmatprep.subr.bf16.mxu0 %v2180_v7  ;;  %1868 = vmatprep.subr.bf16.mxu1 %v2182_v8  ;;  %v181_v7 = vld [vmem:[%s3278_s1 + $0x3b8] sm:$0xff]  ;;  %v2235_v8 = vcombine.low %v168_v60, %v172_v61  ;;  %v2244_v10 = vcombine.high %v176_v4, %v180_v5  ;;  %v232_v61 = vld [vmem:[%s3278_s1 + $0x550] sm:$0xff] }
  0x9c   :  { %v2246_v11 = vcombine.high %v177_v6, %v181_v7  ;;  %v2245_v18 = vcombine.low %v177_v6, %v181_v7  ;;  %v244_v6 = vld [vmem:[%s3278_s1 + $0x5b0] sm:$0xff]  ;;  %v241_v7 = vld [vmem:[%s3278_s1 + $0x598] sm:$0xff] }
  0x9e   :  { %1783 = vmatpush1.bf16.msra.mxu0 %v2179_v13  ;;  %1869 = vmatpush1.bf16.msra.mxu1 %v2181_v14  ;;  %v188_v13 = vld [vmem:[%s3278_s1 + $0x3f0] sm:$0xff]  ;;  %v185_v14 = vld [vmem:[%s3278_s1 + $0x3d8] sm:$0xff] }
  0x9f   :  { %1784 = vmatprep.subr.bf16.mxu0 %v2188_v16  ;;  %1870 = vmatprep.subr.bf16.mxu1 %v2190_v17  ;;  %v189_v16 = vld [vmem:[%s3278_s1 + $0x3f8] sm:$0xff]  ;;  %v2243_v17 = vcombine.low %v176_v4, %v180_v5  ;;  %v2252_v19 = vcombine.high %v184_v12, %v188_v13  ;;  %v240_v5 = vld [vmem:[%s3278_s1 + $0x590] sm:$0xff] }
  0xa0   :  { %v2254_v20 = vcombine.high %v185_v14, %v189_v16  ;;  %v2253_v28 = vcombine.low %v185_v14, %v189_v16  ;;  %v252_v14 = vld [vmem:[%s3278_s1 + $0x5f0] sm:$0xff]  ;;  %v249_v16 = vld [vmem:[%s3278_s1 + $0x5d8] sm:$0xff] }
  0xa2   :  { %1785 = vmatpush1.bf16.msra.mxu0 %v2187_v22  ;;  %1871 = vmatpush1.bf16.msra.mxu1 %v2189_v23  ;;  %v196_v22 = vld [vmem:[%s3278_s1 + $0x430] sm:$0xff]  ;;  %v193_v23 = vld [vmem:[%s3278_s1 + $0x418] sm:$0xff] }
  0xa3   :  { %1786 = vmatprep.subr.bf16.mxu0 %v2196_v24  ;;  %1872 = vmatprep.subr.bf16.mxu1 %v2198_v27  ;;  %v197_v24 = vld [vmem:[%s3278_s1 + $0x438] sm:$0xff]  ;;  %v2251_v27 = vcombine.low %v184_v12, %v188_v13  ;;  %v2260_v29 = vcombine.high %v192_v21, %v196_v22  ;;  %v248_v13 = vld [vmem:[%s3278_s1 + $0x5d0] sm:$0xff] }
  0xa4   :  { %v2262_v30 = vcombine.high %v193_v23, %v197_v24  ;;  %v2261_v36 = vcombine.low %v193_v23, %v197_v24  ;;  %v260_v23 = vld [vmem:[%s3278_s1 + $0x630] sm:$0xff]  ;;  %v257_v24 = vld [vmem:[%s3278_s1 + $0x618] sm:$0xff] }
  0xa6   :  { %1787 = vmatpush1.bf16.msra.mxu0 %v2195_v32  ;;  %1873 = vmatpush1.bf16.msra.mxu1 %v2197_v33  ;;  %v204_v32 = vld [vmem:[%s3278_s1 + $0x470] sm:$0xff]  ;;  %v201_v33 = vld [vmem:[%s3278_s1 + $0x458] sm:$0xff] }
  0xa7   :  { %1788 = vmatprep.subr.bf16.mxu0 %v2204_v34  ;;  %1874 = vmatprep.subr.bf16.mxu1 %v2206_v35  ;;  %v205_v34 = vld [vmem:[%s3278_s1 + $0x478] sm:$0xff]  ;;  %v2259_v35 = vcombine.low %v192_v21, %v196_v22  ;;  %v2268_v37 = vcombine.high %v200_v31, %v204_v32  ;;  %v256_v22 = vld [vmem:[%s3278_s1 + $0x610] sm:$0xff] }
  0xa8   :  { %v2270_v38 = vcombine.high %v201_v33, %v205_v34  ;;  %v2269_v44 = vcombine.low %v201_v33, %v205_v34  ;;  %v268_v33 = vld [vmem:[%s3278_s1 + $0x670] sm:$0xff]  ;;  %v265_v34 = vld [vmem:[%s3278_s1 + $0x658] sm:$0xff] }
  0xaa   :  { %1789 = vmatpush1.bf16.msra.mxu0 %v2203_v40  ;;  %1875 = vmatpush1.bf16.msra.mxu1 %v2205_v41  ;;  %v212_v40 = vld [vmem:[%s3278_s1 + $0x4b0] sm:$0xff]  ;;  %v209_v41 = vld [vmem:[%s3278_s1 + $0x498] sm:$0xff] }
  0xab   :  { %1790 = vmatprep.subr.bf16.mxu0 %v2212_v42  ;;  %1876 = vmatprep.subr.bf16.mxu1 %v2214_v43  ;;  %v213_v42 = vld [vmem:[%s3278_s1 + $0x4b8] sm:$0xff]  ;;  %v2267_v43 = vcombine.low %v200_v31, %v204_v32  ;;  %v2276_v45 = vcombine.high %v208_v39, %v212_v40  ;;  %v264_v32 = vld [vmem:[%s3278_s1 + $0x650] sm:$0xff] }
  0xac   :  { %v2278_v46 = vcombine.high %v209_v41, %v213_v42 }
  0xae   :  { %1791 = vmatpush1.bf16.msra.mxu0 %v2211_v48  ;;  %1877 = vmatpush1.bf16.msra.mxu1 %v2213_v49  ;;  %v220_v48 = vld [vmem:[%s3278_s1 + $0x4f0] sm:$0xff]  ;;  %v221_v49 = vld [vmem:[%s3278_s1 + $0x4f8] sm:$0xff] }
  0xaf   :  { %1792 = vmatprep.subr.bf16.mxu0 %v2220_v50  ;;  %1878 = vmatprep.subr.bf16.mxu1 %v2222_v58  ;;  %v2275_v50 = vcombine.low %v208_v39, %v212_v40  ;;  %v2277_v58 = vcombine.low %v209_v41, %v213_v42  ;;  %v2284_v51 = vcombine.high %v216_v47, %v220_v48  ;;  %v272_v40 = vld [vmem:[%s3278_s1 + $0x690] sm:$0xff]  ;;  %v273_v42 = vld [vmem:[%s3278_s1 + $0x698] sm:$0xff] }
  0xb0   :  { %v276_v41 = vld [vmem:[%s3278_s1 + $0x6b0] sm:$0xff] }
  0xb2   :  { %1793 = vmatpush1.bf16.msra.mxu0 %v2219_v55  ;;  %1879 = vmatpush1.bf16.msra.mxu1 %v2221_v56  ;;  %v229_v55 = vld [vmem:[%s3278_s1 + $0x538] sm:$0xff]  ;;  %v2283_v56 = vcombine.low %v216_v47, %v220_v48  ;;  %v280_v48 = vld [vmem:[%s3278_s1 + $0x6d0] sm:$0xff] }
  0xb3   :  { %1794 = vmatprep.subr.bf16.mxu0 %v2228_v57  ;;  %1880 = vmatprep.subr.bf16.mxu1 %v2230_v59  ;;  %v2292_v59 = vcombine.high %v224_v53, %v228_v54 }
  0xb6   :  { %1795 = vmatpush1.bf16.msra.mxu0 %v2227_v0  ;;  %1881 = vmatpush1.bf16.msra.mxu1 %v2229_v1  ;;  %v237_v0 = vld [vmem:[%s3278_s1 + $0x578] sm:$0xff]  ;;  %v2291_v1 = vcombine.low %v224_v53, %v228_v54  ;;  %v288_v54 = vld [vmem:[%s3278_s1 + $0x710] sm:$0xff] }
  0xb7   :  { %1796 = vmatprep.subr.bf16.mxu0 %v2236_v2  ;;  %1882 = vmatprep.subr.bf16.mxu1 %v2238_v3  ;;  %v2300_v3 = vcombine.high %v232_v61, %v236_v62  ;;  %v2302_v4 = vcombine.high %v233_v63, %v237_v0 }
  0xba   :  { %1797 = vmatpush1.bf16.msra.mxu0 %v2235_v8  ;;  %1883 = vmatpush1.bf16.msra.mxu1 %v2237_v9  ;;  %v245_v8 = vld [vmem:[%s3278_s1 + $0x5b8] sm:$0xff]  ;;  %v2299_v9 = vcombine.low %v232_v61, %v236_v62  ;;  %v296_v62 = vld [vmem:[%s3278_s1 + $0x750] sm:$0xff] }
  0xbb   :  { %1798 = vmatprep.subr.bf16.mxu0 %v2244_v10  ;;  %1884 = vmatprep.subr.bf16.mxu1 %v2246_v11  ;;  %v2301_v10 = vcombine.low %v233_v63, %v237_v0  ;;  %v2308_v11 = vcombine.high %v240_v5, %v244_v6  ;;  %v2310_v12 = vcombine.high %v241_v7, %v245_v8  ;;  %v300_v63 = vld [vmem:[%s3278_s1 + $0x770] sm:$0xff]  ;;  %v297_v0 = vld [vmem:[%s3278_s1 + $0x758] sm:$0xff] }
  0xbe   :  { %1799 = vmatpush1.bf16.msra.mxu0 %v2243_v17  ;;  %1885 = vmatpush1.bf16.msra.mxu1 %v2245_v18  ;;  %v253_v17 = vld [vmem:[%s3278_s1 + $0x5f8] sm:$0xff]  ;;  %v2307_v18 = vcombine.low %v240_v5, %v244_v6  ;;  %v304_v6 = vld [vmem:[%s3278_s1 + $0x790] sm:$0xff] }
  0xbf   :  { %1800 = vmatprep.subr.bf16.mxu0 %v2252_v19  ;;  %1886 = vmatprep.subr.bf16.mxu1 %v2254_v20  ;;  %v2309_v19 = vcombine.low %v241_v7, %v245_v8  ;;  %v2316_v20 = vcombine.high %v248_v13, %v252_v14  ;;  %v2318_v21 = vcombine.high %v249_v16, %v253_v17  ;;  %v308_v7 = vld [vmem:[%s3278_s1 + $0x7b0] sm:$0xff]  ;;  %v305_v8 = vld [vmem:[%s3278_s1 + $0x798] sm:$0xff] }
  0xc2   :  { %1801 = vmatpush1.bf16.msra.mxu0 %v2251_v27  ;;  %1887 = vmatpush1.bf16.msra.mxu1 %v2253_v28  ;;  %v261_v27 = vld [vmem:[%s3278_s1 + $0x638] sm:$0xff]  ;;  %v2315_v28 = vcombine.low %v248_v13, %v252_v14  ;;  %v312_v14 = vld [vmem:[%s3278_s1 + $0x7d0] sm:$0xff] }
  0xc3   :  { %1813 = vmatprep.subr.bf16.mxu0 %v2260_v29  ;;  %1899 = vmatprep.subr.bf16.mxu1 %v2262_v30  ;;  %v2317_v29 = vcombine.low %v249_v16, %v253_v17  ;;  %v2324_v30 = vcombine.high %v256_v22, %v260_v23  ;;  %v2326_v31 = vcombine.high %v257_v24, %v261_v27  ;;  %v316_v16 = vld [vmem:[%s3278_s1 + $0x7f0] sm:$0xff]  ;;  %v313_v17 = vld [vmem:[%s3278_s1 + $0x7d8] sm:$0xff] }
  0xc5   :  { %1803 = vmatmul.mubr.bf16.vlgmr.msra.gmra.mrb[4].mxu0 %v2664_v15  ;;  %1889 = vmatmul.mubr.bf16.vlgmr.msra.gmra.mrb[4].mxu1 %v2664_v15  ;;  %v217_v15 = vld [vmem:[%s3278_s1 + $0x4d8] sm:$0xff] }
  0xc6   :  { %1814 = vmatpush1.bf16.msra.mxu0 %v2259_v35  ;;  %1900 = vmatpush1.bf16.msra.mxu1 %v2261_v36  ;;  %v2286_v52 = vcombine.high %v217_v15, %v221_v49  ;;  %v2285_v57 = vcombine.low %v217_v15, %v221_v49  ;;  %v269_v35 = vld [vmem:[%s3278_s1 + $0x678] sm:$0xff]  ;;  %v2323_v36 = vcombine.low %v256_v22, %v260_v23  ;;  %v284_v15 = vld [vmem:[%s3278_s1 + $0x6f0] sm:$0xff] }
  0xc7   :  { %1815 = vmatprep.subr.bf16.mxu0 %v2268_v37  ;;  %1901 = vmatprep.subr.bf16.mxu1 %v2270_v38  ;;  %v2325_v37 = vcombine.low %v257_v24, %v261_v27  ;;  %v2332_v38 = vcombine.high %v264_v32, %v268_v33  ;;  %v2334_v39 = vcombine.high %v265_v34, %v269_v35  ;;  %v281_v49 = vld [vmem:[%s3278_s1 + $0x6d8] sm:$0xff]  ;;  %v1995_v27 = vlaneseq }
  0xc8   :  { %1845 = vmatprep.mubr.bf16.mxu0 %v2681_v25  ;;  %1931 = vmatprep.mubr.bf16.mxu1 %v2681_v25  ;;  %v225_v25 = vld [vmem:[%s3278_s1 + $0x518] sm:$0xff]  ;;  %v2379_v23 = vcombine.low %v312_v14, %v316_v16 }
  0xc9   :  { %v2294_v60 = vcombine.high %v225_v25, %v229_v55  ;;  %v2293_v2 = vcombine.low %v225_v25, %v229_v55  ;;  %v292_v25 = vld [vmem:[%s3278_s1 + $0x730] sm:$0xff]  ;;  %v289_v55 = vld [vmem:[%s3278_s1 + $0x718] sm:$0xff] }
  0xca   :  { %1816 = vmatpush1.bf16.msra.mxu0 %v2267_v43  ;;  %1902 = vmatpush1.bf16.msra.mxu1 %v2269_v44  ;;  %v277_v43 = vld [vmem:[%s3278_s1 + $0x6b8] sm:$0xff]  ;;  %v2331_v44 = vcombine.low %v264_v32, %v268_v33 }
  0xcb   :  { %1817 = vmatprep.subr.bf16.mxu0 %v2276_v45  ;;  %1903 = vmatprep.subr.bf16.mxu1 %v2278_v46  ;;  %v2333_v45 = vcombine.low %v265_v34, %v269_v35  ;;  %v2340_v46 = vcombine.high %v272_v40, %v276_v41  ;;  %v2342_v47 = vcombine.high %v273_v42, %v277_v43 }
  0xce   :  { %1818 = vmatpush1.bf16.msra.mxu0 %v2275_v50  ;;  %1904 = vmatpush1.bf16.msra.mxu1 %v2277_v58  ;;  %v285_v50 = vld [vmem:[%s3278_s1 + $0x6f8] sm:$0xff]  ;;  %v2339_v58 = vcombine.low %v272_v40, %v276_v41 }
  0xcf   :  { %1819 = vmatprep.subr.bf16.mxu0 %v2284_v51  ;;  %1905 = vmatprep.subr.bf16.mxu1 %v2286_v52  ;;  %v2341_v51 = vcombine.low %v273_v42, %v277_v43  ;;  %v2348_v52 = vcombine.high %v280_v48, %v284_v15  ;;  %v2350_v53 = vcombine.high %v281_v49, %v285_v50 }
  0xd2   :  { %1820 = vmatpush1.bf16.msra.mxu0 %v2283_v56  ;;  %1906 = vmatpush1.bf16.msra.mxu1 %v2285_v57  ;;  %v293_v56 = vld [vmem:[%s3278_s1 + $0x738] sm:$0xff]  ;;  %v2347_v57 = vcombine.low %v280_v48, %v284_v15 }
  0xd3   :  { %1821 = vmatprep.subr.bf16.mxu0 %v2292_v59  ;;  %1907 = vmatprep.subr.bf16.mxu1 %v2294_v60  ;;  %v2349_v59 = vcombine.low %v281_v49, %v285_v50  ;;  %v2356_v60 = vcombine.high %v288_v54, %v292_v25  ;;  %v2358_v61 = vcombine.high %v289_v55, %v293_v56 }
  0xd6   :  { %1822 = vmatpush1.bf16.msra.mxu0 %v2291_v1  ;;  %1908 = vmatpush1.bf16.msra.mxu1 %v2293_v2  ;;  %v301_v1 = vld [vmem:[%s3278_s1 + $0x778] sm:$0xff]  ;;  %v2355_v2 = vcombine.low %v288_v54, %v292_v25 }
  0xd7   :  { %1823 = vmatprep.subr.bf16.mxu0 %v2300_v3  ;;  %1909 = vmatprep.subr.bf16.mxu1 %v2302_v4  ;;  %v2357_v3 = vcombine.low %v289_v55, %v293_v56  ;;  %v2364_v4 = vcombine.high %v296_v62, %v300_v63  ;;  %v2366_v5 = vcombine.high %v297_v0, %v301_v1 }
  0xda   :  { %1824 = vmatpush1.bf16.msra.mxu0 %v2299_v9  ;;  %1910 = vmatpush1.bf16.msra.mxu1 %v2301_v10  ;;  %v309_v9 = vld [vmem:[%s3278_s1 + $0x7b8] sm:$0xff]  ;;  %v2363_v10 = vcombine.low %v296_v62, %v300_v63 }
  0xdb   :  { %1825 = vmatprep.subr.bf16.mxu0 %v2308_v11  ;;  %1911 = vmatprep.subr.bf16.mxu1 %v2310_v12  ;;  %v2365_v11 = vcombine.low %v297_v0, %v301_v1  ;;  %v2372_v12 = vcombine.high %v304_v6, %v308_v7  ;;  %v2374_v13 = vcombine.high %v305_v8, %v309_v9 }
  0xde   :  { %1826 = vmatpush1.bf16.msra.mxu0 %v2307_v18  ;;  %1912 = vmatpush1.bf16.msra.mxu1 %v2309_v19  ;;  %v317_v18 = vld [vmem:[%s3278_s1 + $0x7f8] sm:$0xff]  ;;  %v2371_v19 = vcombine.low %v304_v6, %v308_v7 }
  0xdf   :  { %1827 = vmatprep.subr.bf16.mxu0 %v2316_v20  ;;  %1913 = vmatprep.subr.bf16.mxu1 %v2318_v21  ;;  %v2373_v20 = vcombine.low %v305_v8, %v309_v9  ;;  %v2380_v21 = vcombine.high %v312_v14, %v316_v16  ;;  %v2382_v22 = vcombine.high %v313_v17, %v317_v18 }
  0xe0   :  { %v2381_v24 = vcombine.low %v313_v17, %v317_v18 }
  0xe2   :  { %1828 = vmatpush1.bf16.msra.mxu0 %v2315_v28  ;;  %1914 = vmatpush1.bf16.msra.mxu1 %v2317_v29  ;;  %v1996_v28 = vshrl.u32 %v1995_v27, 7 }
  0xe3   :  { %1829 = vmatprep.subr.bf16.mxu0 %v2324_v30  ;;  %1915 = vmatprep.subr.bf16.mxu1 %v2326_v31  ;;  %v1993_v30 = vld [vmem:[%s3280_s2] sm:$0xff] }
  0xe4   :  { %v1997_v29 = vsub.s32 0, %v1996_v28  ;;  %v2005_v31 = vsub.s32 2, %v1996_v28  ;;  %v2001_v32 = vsub.s32 1, %v1996_v28  ;;  %v2009_v33 = vsub.s32 3, %v1996_v28 }
  0xe5   :  { %v2013_v63 = vsub.s32 4, %v1996_v28  ;;  %v2021_v0 = vsub.s32 6, %v1996_v28  ;;  %v2017_v1 = vsub.s32 5, %v1996_v28 }
  0xe6   :  { %1830 = vmatpush1.bf16.msra.mxu0 %v2323_v36  ;;  %1916 = vmatpush1.bf16.msra.mxu1 %v2325_v37  ;;  %v1998_v34 = vrot.slane %v1993_v30, %v1997_v29  ;;  %v2006_v35 = vrot.slane %v1993_v30, %v2005_v31  ;;  %v2002_v36 = vrot.slane %v1993_v30, %v2001_v32 }
  0xe7   :  { %1831 = vmatprep.subr.bf16.mxu0 %v2332_v38  ;;  %1917 = vmatprep.subr.bf16.mxu1 %v2334_v39  ;;  %v2010_v37 = vrot.slane %v1993_v30, %v2009_v33 }
  0xea   :  { %1832 = vmatpush1.bf16.msra.mxu0 %v2331_v44  ;;  %1918 = vmatpush1.bf16.msra.mxu1 %v2333_v45 }
  0xeb   :  { %1833 = vmatprep.subr.bf16.mxu0 %v2340_v46  ;;  %1919 = vmatprep.subr.bf16.mxu1 %v2342_v47 }
  0xee   :  { %1834 = vmatpush1.bf16.msra.mxu0 %v2339_v58  ;;  %1920 = vmatpush1.bf16.msra.mxu1 %v2341_v51 }
  0xef   :  { %1835 = vmatprep.subr.bf16.mxu0 %v2348_v52  ;;  %1921 = vmatprep.subr.bf16.mxu1 %v2350_v53 }
  0xf2   :  { %1836 = vmatpush1.bf16.msra.mxu0 %v2347_v57  ;;  %1922 = vmatpush1.bf16.msra.mxu1 %v2349_v59 }
  0xf3   :  { %1837 = vmatprep.subr.bf16.mxu0 %v2356_v60  ;;  %1923 = vmatprep.subr.bf16.mxu1 %v2358_v61 }
  0xf6   :  { %1838 = vmatpush1.bf16.msra.mxu0 %v2355_v2  ;;  %1924 = vmatpush1.bf16.msra.mxu1 %v2357_v3  ;;  %v2025_v2 = vsub.s32 7, %v1996_v28  ;;  %v2014_v3 = vrot.slane %v1993_v30, %v2013_v63 }
  0xf7   :  { %1839 = vmatprep.subr.bf16.mxu0 %v2364_v4  ;;  %1925 = vmatprep.subr.bf16.mxu1 %v2366_v5  ;;  %v2022_v4 = vrot.slane %v1993_v30, %v2021_v0  ;;  %v2018_v5 = vrot.slane %v1993_v30, %v2017_v1 }
  0xf8   :  { %v2026_v6 = vrot.slane %v1993_v30, %v2025_v2 }
  0xfa   :  { %1840 = vmatpush1.bf16.msra.mxu0 %v2363_v10  ;;  %1926 = vmatpush1.bf16.msra.mxu1 %v2365_v11 }
  0xfb   :  { %1841 = vmatprep.subr.bf16.mxu0 %v2372_v12  ;;  %1927 = vmatprep.subr.bf16.mxu1 %v2374_v13 }
  0xfe   :  { %1842 = vmatpush1.bf16.msra.mxu0 %v2371_v19  ;;  %1928 = vmatpush1.bf16.msra.mxu1 %v2373_v20 }
  0xff   :  { %1843 = vmatprep.subr.bf16.mxu0 %v2380_v21  ;;  %1929 = vmatprep.subr.bf16.mxu1 %v2382_v22 }
 0x102   :  { %1844 = vmatpush1.bf16.msra.mxu0 %v2379_v23  ;;  %1930 = vmatpush1.bf16.msra.mxu1 %v2381_v24 }
 0x105   :  { %1846 = vmatmul.mubr.bf16.vlgmr.msra.gmra.mrb[4].mxu0 %v2873_v26  ;;  %1932 = vmatmul.mubr.bf16.vlgmr.msra.gmra.mrb[4].mxu1 %v2873_v26 }
 0x158   :  { %v1675_v38 = vpop.f32.mrb[0].mxu0  ;;  %v1761_v40 = vpop.f32.mrb[0].mxu1 }
 0x159   :  { %v2035_v39 = vadd.f32 %v1998_v34, %v1675_v38  ;;  %v1677_v41 = vpop.f32.mrb[1].mxu0  ;;  %v2037_v42 = vadd.f32 %v2006_v35, %v1761_v40  ;;  %v1763_v43 = vpop.f32.mrb[1].mxu1 }
 0x15a   :  { %v2036_v26 = vadd.f32 %v2002_v36, %v1677_v41  ;;  %v1679_v44 = vpop.f32.mrb[2].mxu0  ;;  %v2038_v46 = vadd.f32 %v2010_v37, %v1763_v43  ;;  %v1765_v48 = vpop.f32.mrb[2].mxu1 }
 0x15b   :  { %v2051_v45 = vmax.f32 %v2035_v39, 0.0  ;;  %v2043_v47 = vadd.f32 %v1998_v34, %v1679_v44  ;;  %v1681_v15 = vpop.f32.mrb[3].mxu0  ;;  %v2053_v49 = vmax.f32 %v2037_v42, 0.0  ;;  %v2045_v58 = vadd.f32 %v2006_v35, %v1765_v48  ;;  %v1767_v52 = vpop.f32.mrb[3].mxu1 }
 0x15c   :  { %v2052_v50 = vmax.f32 %v2036_v26, 0.0  ;;  %v2044_v51 = vadd.f32 %v2002_v36, %v1681_v15  ;;  %v2054_v53 = vmax.f32 %v2038_v46, 0.0  ;;  %v2046_v25 = vadd.f32 %v2010_v37, %v1767_v52 }
 0x15d   :  { %v2059_v54 = vmax.f32 %v2043_v47, 0.0  ;;  %v2061_v56 = vmax.f32 %v2045_v58, 0.0 }
 0x15e   :  { %v2391_v55 = vpack.c.bf16 %v2052_v50, %v2051_v45  ;;  %v2060_v57 = vmax.f32 %v2044_v51, 0.0  ;;  %v2392_v59 = vpack.c.bf16 %v2054_v53, %v2053_v49  ;;  %v2062_v60 = vmax.f32 %v2046_v25, 0.0 }
 0x160   :  { %2115 = vst [vmem:[%s3281_s3] sm:$0xff] %v2391_v55  ;;  %v2395_v61 = vpack.c.bf16 %v2060_v57, %v2059_v54  ;;  %2116 = vst [vmem:[%s3281_s3 + $0x8] sm:$0xff] %v2392_v59  ;;  %v2396_v62 = vpack.c.bf16 %v2062_v60, %v2061_v56 }
 0x162   :  { %2119 = vst [vmem:[%s3281_s3 + $0x20] sm:$0xff] %v2395_v61  ;;  %2120 = vst [vmem:[%s3281_s3 + $0x28] sm:$0xff] %v2396_v62 }
 0x1d8   :  { %v1847_v7 = vpop.f32.mrb[4].mxu0  ;;  %v1933_v9 = vpop.f32.mrb[4].mxu1 }
 0x1d9   :  { %v2039_v8 = vadd.f32 %v2014_v3, %v1847_v7  ;;  %v1849_v10 = vpop.f32.mrb[5].mxu0  ;;  %v2041_v11 = vadd.f32 %v2022_v4, %v1933_v9  ;;  %v1935_v13 = vpop.f32.mrb[5].mxu1 }
 0x1da   :  { %v2040_v12 = vadd.f32 %v2018_v5, %v1849_v10  ;;  %v1851_v14 = vpop.f32.mrb[6].mxu0  ;;  %v2042_v17 = vadd.f32 %v2026_v6, %v1935_v13  ;;  %v1937_v19 = vpop.f32.mrb[6].mxu1 }
 0x1db   :  { %v2055_v16 = vmax.f32 %v2039_v8, 0.0  ;;  %v2047_v18 = vadd.f32 %v2014_v3, %v1851_v14  ;;  %v1853_v20 = vpop.f32.mrb[7].mxu0  ;;  %v2057_v21 = vmax.f32 %v2041_v11, 0.0  ;;  %v2049_v23 = vadd.f32 %v2022_v4, %v1937_v19  ;;  %v1939_v27 = vpop.f32.mrb[7].mxu1 }
 0x1dc   :  { %v2056_v22 = vmax.f32 %v2040_v12, 0.0  ;;  %v2048_v24 = vadd.f32 %v2018_v5, %v1853_v20  ;;  %v2058_v28 = vmax.f32 %v2042_v17, 0.0  ;;  %v2050_v30 = vadd.f32 %v2026_v6, %v1939_v27 }
 0x1dd   :  { %v2063_v29 = vmax.f32 %v2047_v18, 0.0  ;;  %v2065_v32 = vmax.f32 %v2049_v23, 0.0 }
 0x1de   :  { %v2393_v31 = vpack.c.bf16 %v2056_v22, %v2055_v16  ;;  %v2064_v33 = vmax.f32 %v2048_v24, 0.0  ;;  %v2394_v34 = vpack.c.bf16 %v2058_v28, %v2057_v21  ;;  %v2066_v35 = vmax.f32 %v2050_v30, 0.0 }
 0x1e0   :  { %2117 = vst [vmem:[%s3281_s3 + $0x10] sm:$0xff] %v2393_v31  ;;  %v2397_v36 = vpack.c.bf16 %v2064_v33, %v2063_v29  ;;  %2118 = vst [vmem:[%s3281_s3 + $0x18] sm:$0xff] %v2394_v34  ;;  %v2398_v37 = vpack.c.bf16 %v2066_v35, %v2065_v32 }
 0x1e2   :  { %2121 = vst [vmem:[%s3281_s3 + $0x30] sm:$0xff] %v2397_v36  ;;  %2122 = vst [vmem:[%s3281_s3 + $0x38] sm:$0xff] %v2398_v37 }

// kernel: encoder_layer_forward.5
= control target key start
LH: loop header
LB: loop body
LE: loop exit
PB: predicated region body
PF: predicated region fallthrough
CT: control target
= control target key end

     0   :  { %s6327_s0 = inlined_call_operand.hbm [shape: f32[16,512], index: 0, kind: input, shape index: {}]   ;;  %s6328_s1 = inlined_call_operand.hbm [shape: bf16[512,12288], index: 1, kind: input, shape index: {}]   ;;  %s6329_s2 = inlined_call_operand.hbm [shape: f32[1,12288], index: 2, kind: input, shape index: {}]   ;;  %s6330_s3 = inlined_call_operand.vmem [shape: bf16[16,12288], index: 3, kind: output, shape index: {}]  }
   0x1   :  { %6338 = sst [smem:[#allocation12_spill]] %s6328_s1 }
   0x2   :  { %8 = vsyncpa [#allocation4], 0 }
   0x3   :  { %9 = vsyncpa [#allocation6], 0 }
   0x4   :  { %11 = vsyncpa [#allocation6 + $0x1], 0  ;;  %s5472_s12 = smov 0   ;;  %s5474_s13 = smov 0  }
   0x5   :  { %s5476_s14 = smov 0   ;;  %s5478_s15 = smov 0  }
   0x6   :  { %s5480_s16 = smov 0   ;;  %s5482_s17 = smov 0  }
   0x7 LB: > { %s32_s18 = sadd.s32 1, %s5438_s16  ;;  %s73_s19 = sadd.s32 1, %s5430_s14  ;;  %s5442_s17 = sphi %s5482_s17, %s17_s17   ;;  %s5438_s16 = sphi %s5480_s16, %s6359_s16   ;;  %s5434_s15 = sphi %s5478_s15, %s6358_s15   ;;  %s5430_s14 = sphi %s5476_s14, %s6357_s14   ;;  %s5426_s13 = sphi %s5474_s13, %s6356_s13   ;;  %s5422_s12 = sphi %s5472_s12, %s6355_s12  }
   0x8   : > { %p34_p0 = scmp.ge.s32.totalorder %s32_s18, 6  ;;  %p80_p1 = scmp.ne.s32.totalorder %s5430_s14, %s5426_s13 }
   0x9   : > { %p81_p2 = scmp.eq.s32.totalorder %s5442_s17, 0  ;;  %p5244_p4 = scmp.lt.s32.totalorder %s5442_s17, 6 }
   0xa   : > { %s6361_s18 = smov (%p34_p0, %s32_s18), 0  ;;  %s183_s21 = sand.u32 1, %s5442_s17  }
   0xb   : > { %6339 = sst [smem:[#allocation11_spill]] %s6361_s18  ;;  %p82_p3 = por %p81_p2, %p80_p1 }
   0xc   : > { %s69_s20 = ssub.s32 %s5438_s16, %s6361_s18  ;;  %s185_s22 = sand.u32 1, %s5430_s14  }
   0xd   : > { %p71_p5 = scmp.eq.s32.totalorder %s69_s20, 0  ;;  %s5173_s23 = sshll.u32 %s5438_s16, 10 }
   0xe   : > { %s4629_s25 = sshll.u32 %s185_s22, 12  ;;  %s6340_s1 = sld [smem:[#allocation12_spill]] }
   0xf   : > { %s5519_s24 = scalar_select %p71_p5, %s5430_s14, %s73_s19  }
  0x10   : > { %p5528_p6 = pnand %p5244_p4, %p82_p3  ;;  %s187_s30 = scalar_lea.vmem [#allocation5], %s4629_s25 }
  0x11   : > { %s197_s4 = sshll.u32 %s187_s30, 4  ;;  %s5534_s5 = scalar_lea.sflag [#allocation6], %s183_s21  ;;  %s5532_s4 = int_to_ptr.vmem [resolvable:$true] %s197_s4 }
  0x12   : > { %s6341_s29 = scalar_select %p5528_p6, 1, 0 }
  0x13   : > { %p6332_p8 = pneg %p5528_p6 }
  0x14   : > { %s5526_s28 = scalar_lea.hbm %s6340_s1, %s5173_s23  ;;  %s5305_s9 = scalar_lea.hbm %s6340_s1, 393216 }
  0x15   : > { %s5300_s6 = scalar_lea.hbm %s5526_s28, 65536  ;;  %p5306_p11 = scmp.lt.u32.totalorder %s5526_s28, %s6340_s1 }
  0x16   : > { %p5301_p7 = scmp.ne.s32.totalorder %s5526_s28, %s5300_s6  ;;  %p5307_p12 = scmp.lt.u32.totalorder %s5305_s9, %s5300_s6 }
  0x17   : > { %p5309_p0 = scmp.lt.u32.totalorder %s5300_s6, %s5526_s28 }
  0x18   : > { %p5303_p9 = pnand %p6332_p8, %p5301_p7  ;;  %p5308_p13 = por %p5307_p12, %p5306_p11 }
  0x1a   : > { %p5304_p10 = pneg %p5303_p9  ;;  %p5310_p2 = por %p5309_p0, %p5308_p13 }
  0x1c   : > { %p5311_p3 = pnand %p5310_p2, %p5304_p10 }
  0x1e   : > { %5314 = shalt.err (!%p5311_p3)
}
  0x1f   : > { %s5315_s19 = scalar_lea.vmem %s5532_s4, 65536  ;;  %s5444_s20 = smov [#allocation5]  }
  0x20   : > { %p5316_p4 = scmp.ne.s32.totalorder %s5532_s4, %s5315_s19  ;;  %s5320_s21 = sshll.u32 %s5444_s20, 4  ;;  %s5321_s21 = int_to_ptr.vmem [resolvable:$false] %s5320_s21 }
  0x21   : > { %s5322_s23 = scalar_lea.vmem %s5321_s21, 131072  ;;  %p5323_p9 = scmp.lt.s32.totalorder %s5532_s4, %s5321_s21 }
  0x22   : > { %p5318_p5 = pnand %p5316_p4, %p6332_p8  ;;  %p5324_p11 = scmp.lt.s32.totalorder %s5322_s23, %s5315_s19 }
  0x24   : > { %p5319_p7 = pneg %p5318_p5  ;;  %p5325_p12 = por %p5324_p11, %p5323_p9 }
  0x26   : > { %p5326_p13 = pnand %p5325_p12, %p5319_p7 }
  0x28   : > { %5329 = shalt.err (!%p5326_p13)
}
  0x29   : > { %s5445_s25 = smov 6144   ;;  %s5446_s26 = smov 1024  }
  0x2a   : > { %s5447_s27 = smov 64   ;;  %s5563_s30 = sadd.s32 4294967295, %s5442_s17  }
  0x2b   : > { %5239 = dma.hbm_to_vmem [thread:$0]  (!%p5528_p6), %s5526_s28, 65536, %s5532_s4, %s5534_s5, %s5445_s25, %s5446_s26, %s5447_s27  }
  0x2c   : > { %p86_p10 = scmp.ne.s32.totalorder %s5426_s13, %s5422_s12  ;;  %p6331_p0 = scmp.eq.s32.totalorder %s5563_s30, 0 }
  0x2d   : > { %p138_p2 = scmp.eq.s32.totalorder %s5563_s30, 5  ;;  %p4626_p3 = scmp.ge.s32.totalorder %s5442_s17, 1 }
  0x2e   : > { %p151_p4 = scmp.lt.s32.totalorder %s5442_s17, 7  ;;  %p5573_p5 = por %p6331_p0, %p86_p10 }
  0x2f   : > { %p5580_p7 = por %p138_p2, %p80_p1  ;;  %s5448_s12 = smov [#allocation3]  }
  0x30   : > { %s6342_s6 = scalar_select %p5573_p5, 1, 0 }
  0x31   : > { %s6343_s28 = scalar_select %p5580_p7, 1, 0 }
  0x32   : > { %p5584_p9 = pnand %p4626_p3, %p151_p4  ;;  %s169_s7 = sshll.u32 %s5448_s12, 4  ;;  %s170_s7 = int_to_ptr.vmem [resolvable:$true] %s169_s7 }
  0x33   : > { %s4632_s9 = sshll.u32 %s185_s22, 4  ;;  %s5174_s10 = sshll.u32 %s5438_s16, 8 }
  0x34   : > { %s6344_s4 = scalar_select %p5584_p9, 1, 0 }
  0x35   : > { %p5232_p11 = pneg %p5584_p9  ;;  %s5602_s20 = scalar_lea.hbm %s6329_s2, %s5174_s10 }
  0x36   : > { %s5330_s25 = scalar_lea.hbm %s6327_s0, 1024 }
  0x37   : > { %p5592_p12 = pnand %p5232_p11, %p6331_p0  ;;  %p5331_p1 = scmp.ne.s32.totalorder %s6327_s0, %s5330_s25 }
  0x38   : > { %p5337_p3 = scmp.lt.u32.totalorder %s5330_s25, %s6327_s0 }
  0x39   : > { %p5332_p13 = pneg %p5592_p12 }
  0x3b   : > { %p5333_p10 = pnand %p5332_p13, %p5331_p1 }
  0x3d   : > { %p5334_p2 = pneg %p5333_p10 }
  0x3f   : > { %p5339_p4 = pnand %p5337_p3, %p5334_p2 }
  0x41   : > { %5342 = shalt.err (!%p5339_p4)
}
  0x42   : > { %s5343_s10 = scalar_lea.vmem %s170_s7, 1024  ;;  %p5351_p7 = scmp.lt.s32.totalorder %s170_s7, %s170_s7 }
  0x43   : > { %p5344_p11 = scmp.ne.s32.totalorder %s170_s7, %s5343_s10  ;;  %p5352_p5 = scmp.lt.s32.totalorder %s5343_s10, %s5343_s10 }
  0x45   : > { %p5346_p0 = pnand %p5344_p11, %p5332_p13  ;;  %p5353_p9 = por %p5352_p5, %p5351_p7 }
  0x47   : > { %p5347_p8 = pneg %p5346_p0 }
  0x49   : > { %p5354_p6 = pnand %p5353_p9, %p5347_p8 }
  0x4b   : > { %5357 = shalt.err (!%p5354_p6)
}
  0x4c   : > { %s5449_s11 = smov 512   ;;  %s5450_s19 = smov 32  }
  0x4d   : > { %5235 = dma.hbm_to_vmem [thread:$0]  (!%p5592_p12), %s6327_s0, 1024, %s170_s7, [#allocation4], %s5449_s11, %s5449_s11, %s5450_s19  }
  0x4e   : > { %s211_s25 = scalar_lea.vmem [#allocation7], %s4632_s9  ;;  %s5358_s27 = scalar_lea.hbm %s5602_s20, 256 }
  0x4f   : > { %s219_s26 = sshll.u32 %s211_s25, 4  ;;  %p5359_p0 = scmp.ne.s32.totalorder %s5602_s20, %s5358_s27  ;;  %s220_s26 = int_to_ptr.vmem [resolvable:$true] %s219_s26 }
  0x50   : > { %p6346_p8 = scmp.ne.s32.totalorder %s6341_s29, 0  ;;  %s5363_s10 = scalar_lea.hbm %s6329_s2, 1536 }
  0x51   : > { %p5364_p9 = scmp.lt.u32.totalorder %s5602_s20, %s6329_s2  ;;  %p5365_p1 = scmp.lt.u32.totalorder %s5363_s10, %s5358_s27 }
  0x52   : > { %p6347_p6 = pneg %p6346_p8  ;;  %p5367_p12 = scmp.lt.u32.totalorder %s5358_s27, %s5602_s20 }
  0x53   : > { %p5366_p13 = por %p5365_p1, %p5364_p9 }
  0x54   : > { %p5361_p5 = pnand %p5359_p0, %p6347_p6 }
  0x55   : > { %p5368_p10 = por %p5367_p12, %p5366_p13 }
  0x56   : > { %p5362_p7 = pneg %p5361_p5 }
  0x58   : > { %p5369_p2 = pnand %p5368_p10, %p5362_p7 }
  0x5a   : > { %5372 = shalt.err (!%p5369_p2)
}
  0x5b   : > { %s5373_s7 = scalar_lea.vmem %s220_s26, 256  ;;  %p6348_p4 = pmov %p6347_p6 }
  0x5c   : > { %p5374_p3 = scmp.ne.s32.totalorder %s220_s26, %s5373_s7  ;;  %s5451_s8 = smov [#allocation7]  }
  0x5d   : > { %s5378_s9 = sshll.u32 %s5451_s8, 4  ;;  %s5379_s9 = int_to_ptr.vmem [resolvable:$false] %s5378_s9 }
  0x5e   : > { %p5376_p11 = pnand %p5374_p3, %p6348_p4  ;;  %s5380_s11 = scalar_lea.vmem %s5379_s9, 512 }
  0x5f   : > { %p5381_p6 = scmp.lt.s32.totalorder %s220_s26, %s5379_s9  ;;  %p5382_p5 = scmp.lt.s32.totalorder %s5380_s11, %s5373_s7 }
  0x60   : > { %p5377_p0 = pneg %p5376_p11 }
  0x61   : > { %p5383_p1 = por %p5382_p5, %p5381_p6 }
  0x63   : > { %p5384_p9 = pnand %p5383_p1, %p5377_p0 }
  0x65   : > { %5387 = shalt.err (!%p5384_p9)
}
  0x66   : > { %5242 = dma.hbm_to_vmem [thread:$0]  (!%p6346_p8), %s5602_s20, 256, %s220_s26, %s5534_s5  }
  0x67   : > { %p6349_p7 = scmp.ne.s32.totalorder %s6344_s4, 0 }
  0x68   : > { %p6350_p13 = scmp.eq.s32.totalorder (!%p6349_p7), %s5563_s30, 0 }
  0x69   : > { %228 = sbr.rel (%p6349_p7) target bundleno = 862 (0x35e), region = 32 }
  0x70   : > { %5413 = dma.done.wait (%p6350_p13), [#allocation4], 1024   ;;  %p6351_p12 = pmov %p6350_p13 }
  0x71   : > { %s234_s1 = sand.u32 1, %s5563_s30   ;;  %s5648_s18 = sand.u32 1, %s5426_s13  }
  0x72   : > { %5415 = vsyncadd (%p6351_p12), [#allocation4], 4294966272  ;;  %s4637_s29 = sshll.u32 %s5648_s18, 12  ;;  %s235_s19 = scalar_lea.sflag [#allocation6], %s234_s1 }
  0x73   : > { %s5651_s21 = scalar_lea.vmem [#allocation5], %s4637_s29  ;;  %p6352_p8 = scmp.ne.s32.totalorder %s6342_s6, 0 }
  0x75   : > { %5417 = dma.done.wait (%p6352_p8), %s235_s19, 65792  }
  0x76   : > { %5419 = vsyncadd (%p6352_p8), %s235_s19, 4294901504  ;;  %v361_v0 = vld [vmem:[%s5651_s21] sm:$0xff]  ;;  %v362_v2 = vld [vmem:[%s5651_s21 + $0x8] sm:$0xff]  ;;  %s4638_s5 = sshll.u32 %s5648_s18, 4  ;;  %s4639_s6 = sshll.u32 %s5648_s18, 7 }
  0x77   : > { %v369_v1 = vld [vmem:[%s5651_s21 + $0x40] sm:$0xff]  ;;  %v370_v4 = vld [vmem:[%s5651_s21 + $0x48] sm:$0xff]  ;;  %s6035_s30 = scalar_lea.vmem [#allocation7], %s4638_s5  ;;  %s6070_s4 = scalar_lea.vmem [#allocation8], %s4639_s6 }
  0x78   : > { %v4641_v3 = vcombine.high %v361_v0, %v369_v1  ;;  %v4640_v5 = vcombine.low %v361_v0, %v369_v1  ;;  %v377_v6 = vld [vmem:[%s5651_s21 + $0x80] sm:$0xff]  ;;  %v4643_v8 = vcombine.high %v362_v2, %v370_v4  ;;  %v4642_v9 = vcombine.low %v362_v2, %v370_v4  ;;  %v378_v11 = vld [vmem:[%s5651_s21 + $0x88] sm:$0xff]  ;;  %p6353_p10 = scmp.ne.s32.totalorder %s6343_s28, 0 }
  0x79   : > { %v385_v7 = vld [vmem:[%s5651_s21 + $0xc0] sm:$0xff]  ;;  %v386_v12 = vld [vmem:[%s5651_s21 + $0xc8] sm:$0xff]  ;;  %s5191_s20 = sshll.u32 (%p6353_p10), %s5434_s15, 6 }
  0x7a   : > { %v4657_v10 = vcombine.high %v377_v6, %v385_v7  ;;  %v393_v13 = vld [vmem:[%s5651_s21 + $0x100] sm:$0xff]  ;;  %3433 = vmatprep.subr.bf16.mxu0 %v4641_v3  ;;  %v4659_v14 = vcombine.high %v378_v11, %v386_v12  ;;  %v394_v16 = vld [vmem:[%s5651_s21 + $0x108] sm:$0xff]  ;;  %3519 = vmatprep.subr.bf16.mxu1 %v4643_v8  ;;  %v4656_v18 = vcombine.low %v377_v6, %v385_v7  ;;  %s4460_s26 = scalar_lea.vmem (%p6353_p10), %s6330_s3, %s5191_s20 }
  0x7b   : > { %v401_v15 = vld [vmem:[%s5651_s21 + $0x140] sm:$0xff]  ;;  %v402_v17 = vld [vmem:[%s5651_s21 + $0x148] sm:$0xff]  ;;  %3434 = vmatpush1.bf16.msra.mxu0 %v4640_v5  ;;  %3520 = vmatpush1.bf16.msra.mxu1 %v4642_v9  ;;  %v4658_v19 = vcombine.low %v378_v11, %v386_v12 }
  0x7c   : > { %3435 = vmatprep.subr.bf16.mxu0 %v4657_v10  ;;  %v4673_v20 = vcombine.high %v393_v13, %v401_v15  ;;  %3521 = vmatprep.subr.bf16.mxu1 %v4659_v14  ;;  %v4675_v21 = vcombine.high %v394_v16, %v402_v17  ;;  %v409_v22 = vld [vmem:[%s5651_s21 + $0x180] sm:$0xff]  ;;  %v410_v24 = vld [vmem:[%s5651_s21 + $0x188] sm:$0xff]  ;;  %v4672_v26 = vcombine.low %v393_v13, %v401_v15 }
  0x7d   : > { %v417_v23 = vld [vmem:[%s5651_s21 + $0x1c0] sm:$0xff]  ;;  %v418_v25 = vld [vmem:[%s5651_s21 + $0x1c8] sm:$0xff]  ;;  %v4674_v27 = vcombine.low %v394_v16, %v402_v17 }
  0x7e   : > { %v4689_v28 = vcombine.high %v409_v22, %v417_v23  ;;  %v4691_v29 = vcombine.high %v410_v24, %v418_v25  ;;  %v425_v30 = vld [vmem:[%s5651_s21 + $0x200] sm:$0xff]  ;;  %v426_v32 = vld [vmem:[%s5651_s21 + $0x208] sm:$0xff]  ;;  %v4688_v34 = vcombine.low %v409_v22, %v417_v23  ;;  %v4690_v35 = vcombine.low %v410_v24, %v418_v25 }
  0x7f   : > { %3436 = vmatpush1.bf16.msra.mxu0 %v4656_v18  ;;  %3522 = vmatpush1.bf16.msra.mxu1 %v4658_v19  ;;  %v433_v31 = vld [vmem:[%s5651_s21 + $0x240] sm:$0xff]  ;;  %v434_v33 = vld [vmem:[%s5651_s21 + $0x248] sm:$0xff] }
  0x80   : > { %3437 = vmatprep.subr.bf16.mxu0 %v4673_v20  ;;  %3523 = vmatprep.subr.bf16.mxu1 %v4675_v21  ;;  %v4705_v36 = vcombine.high %v425_v30, %v433_v31  ;;  %v4707_v37 = vcombine.high %v426_v32, %v434_v33  ;;  %v441_v38 = vld [vmem:[%s5651_s21 + $0x280] sm:$0xff]  ;;  %v442_v40 = vld [vmem:[%s5651_s21 + $0x288] sm:$0xff]  ;;  %v4704_v42 = vcombine.low %v425_v30, %v433_v31 }
  0x81   : > { %v449_v39 = vld [vmem:[%s5651_s21 + $0x2c0] sm:$0xff]  ;;  %v450_v41 = vld [vmem:[%s5651_s21 + $0x2c8] sm:$0xff]  ;;  %v4706_v43 = vcombine.low %v426_v32, %v434_v33 }
  0x82   : > { %v4721_v44 = vcombine.high %v441_v38, %v449_v39  ;;  %v4723_v45 = vcombine.high %v442_v40, %v450_v41  ;;  %v457_v46 = vld [vmem:[%s5651_s21 + $0x300] sm:$0xff]  ;;  %v458_v48 = vld [vmem:[%s5651_s21 + $0x308] sm:$0xff]  ;;  %v4720_v50 = vcombine.low %v441_v38, %v449_v39  ;;  %v4722_v51 = vcombine.low %v442_v40, %v450_v41 }
  0x83   : > { %3438 = vmatpush1.bf16.msra.mxu0 %v4672_v26  ;;  %3524 = vmatpush1.bf16.msra.mxu1 %v4674_v27  ;;  %v465_v47 = vld [vmem:[%s5651_s21 + $0x340] sm:$0xff]  ;;  %v466_v49 = vld [vmem:[%s5651_s21 + $0x348] sm:$0xff] }
  0x84   : > { %3439 = vmatprep.subr.bf16.mxu0 %v4689_v28  ;;  %3525 = vmatprep.subr.bf16.mxu1 %v4691_v29  ;;  %v4737_v52 = vcombine.high %v457_v46, %v465_v47  ;;  %v350_v53 = vld [vmem:[#allocation3 + $0x8] sm:$0xff]  ;;  %v4739_v55 = vcombine.high %v458_v48, %v466_v49  ;;  %v473_v56 = vld [vmem:[%s5651_s21 + $0x380] sm:$0xff]  ;;  %v4736_v61 = vcombine.low %v457_v46, %v465_v47 }
  0x85   : > { %v354_v54 = vld [vmem:[#allocation3 + $0x28] sm:$0xff]  ;;  %v481_v57 = vld [vmem:[%s5651_s21 + $0x3c0] sm:$0xff]  ;;  %v4738_v62 = vcombine.low %v458_v48, %v466_v49 }
  0x86   : > { %v5687_v58 = vpack.c.bf16 %v354_v54, %v350_v53  ;;  %v474_v59 = vld [vmem:[%s5651_s21 + $0x388] sm:$0xff]  ;;  %v4753_v63 = vcombine.high %v473_v56, %v481_v57  ;;  %v489_v1 = vld [vmem:[%s5651_s21 + $0x400] sm:$0xff]  ;;  %v4752_v5 = vcombine.low %v473_v56, %v481_v57 }
  0x87   : > { %3440 = vmatpush1.bf16.msra.mxu0 %v4688_v34  ;;  %3526 = vmatpush1.bf16.msra.mxu1 %v4690_v35  ;;  %v482_v60 = vld [vmem:[%s5651_s21 + $0x3c8] sm:$0xff]  ;;  %v497_v2 = vld [vmem:[%s5651_s21 + $0x440] sm:$0xff] }
  0x88   : > { %3441 = vmatprep.subr.bf16.mxu0 %v4705_v36  ;;  %3527 = vmatprep.subr.bf16.mxu1 %v4707_v37  ;;  %v4755_v0 = vcombine.high %v474_v59, %v482_v60  ;;  %v490_v3 = vld [vmem:[%s5651_s21 + $0x408] sm:$0xff]  ;;  %v4754_v6 = vcombine.low %v474_v59, %v482_v60  ;;  %v4769_v7 = vcombine.high %v489_v1, %v497_v2  ;;  %v505_v9 = vld [vmem:[%s5651_s21 + $0x480] sm:$0xff] }
  0x89   : > { %3465 = vmatprep.mubr.bf16.mxu0 %v5687_v58  ;;  %3551 = vmatprep.mubr.bf16.mxu1 %v5687_v58  ;;  %v498_v4 = vld [vmem:[%s5651_s21 + $0x448] sm:$0xff]  ;;  %v513_v10 = vld [vmem:[%s5651_s21 + $0x4c0] sm:$0xff]  ;;  %v4768_v13 = vcombine.low %v489_v1, %v497_v2 }
  0x8a   : > { %v4771_v8 = vcombine.high %v490_v3, %v498_v4  ;;  %v506_v11 = vld [vmem:[%s5651_s21 + $0x488] sm:$0xff]  ;;  %v4770_v14 = vcombine.low %v490_v3, %v498_v4  ;;  %v4785_v15 = vcombine.high %v505_v9, %v513_v10  ;;  %v521_v17 = vld [vmem:[%s5651_s21 + $0x500] sm:$0xff]  ;;  %v4784_v21 = vcombine.low %v505_v9, %v513_v10 }
  0x8b   : > { %3442 = vmatpush1.bf16.msra.mxu0 %v4704_v42  ;;  %3528 = vmatpush1.bf16.msra.mxu1 %v4706_v43  ;;  %v514_v12 = vld [vmem:[%s5651_s21 + $0x4c8] sm:$0xff]  ;;  %v529_v18 = vld [vmem:[%s5651_s21 + $0x540] sm:$0xff] }
  0x8c   : > { %3443 = vmatprep.subr.bf16.mxu0 %v4721_v44  ;;  %3529 = vmatprep.subr.bf16.mxu1 %v4723_v45  ;;  %v4787_v16 = vcombine.high %v506_v11, %v514_v12  ;;  %v522_v19 = vld [vmem:[%s5651_s21 + $0x508] sm:$0xff]  ;;  %v4786_v22 = vcombine.low %v506_v11, %v514_v12  ;;  %v4801_v23 = vcombine.high %v521_v17, %v529_v18  ;;  %v537_v25 = vld [vmem:[%s5651_s21 + $0x580] sm:$0xff] }
  0x8d   : > { %v530_v20 = vld [vmem:[%s5651_s21 + $0x548] sm:$0xff]  ;;  %v545_v26 = vld [vmem:[%s5651_s21 + $0x5c0] sm:$0xff]  ;;  %v4800_v29 = vcombine.low %v521_v17, %v529_v18  ;;  %v352_v17 = vld [vmem:[#allocation3 + $0x18] sm:$0xff] }
  0x8e   : > { %v4803_v24 = vcombine.high %v522_v19, %v530_v20  ;;  %v538_v27 = vld [vmem:[%s5651_s21 + $0x588] sm:$0xff]  ;;  %v4802_v30 = vcombine.low %v522_v19, %v530_v20  ;;  %v4817_v31 = vcombine.high %v537_v25, %v545_v26  ;;  %v553_v33 = vld [vmem:[%s5651_s21 + $0x600] sm:$0xff]  ;;  %v4816_v37 = vcombine.low %v537_v25, %v545_v26  ;;  %v356_v18 = vld [vmem:[#allocation3 + $0x38] sm:$0xff] }
  0x8f   : > { %3444 = vmatpush1.bf16.msra.mxu0 %v4720_v50  ;;  %3530 = vmatpush1.bf16.msra.mxu1 %v4722_v51  ;;  %v546_v28 = vld [vmem:[%s5651_s21 + $0x5c8] sm:$0xff]  ;;  %v561_v34 = vld [vmem:[%s5651_s21 + $0x640] sm:$0xff]  ;;  %v5737_v25 = vpack.c.bf16 %v356_v18, %v352_v17 }
  0x90   : > { %3445 = vmatprep.subr.bf16.mxu0 %v4737_v52  ;;  %3531 = vmatprep.subr.bf16.mxu1 %v4739_v55  ;;  %v4819_v32 = vcombine.high %v538_v27, %v546_v28  ;;  %v554_v35 = vld [vmem:[%s5651_s21 + $0x608] sm:$0xff]  ;;  %v4818_v38 = vcombine.low %v538_v27, %v546_v28  ;;  %v4833_v39 = vcombine.high %v553_v33, %v561_v34  ;;  %v569_v41 = vld [vmem:[%s5651_s21 + $0x680] sm:$0xff] }
  0x91   : > { %v562_v36 = vld [vmem:[%s5651_s21 + $0x648] sm:$0xff]  ;;  %v577_v42 = vld [vmem:[%s5651_s21 + $0x6c0] sm:$0xff]  ;;  %v4832_v45 = vcombine.low %v553_v33, %v561_v34 }
  0x92   : > { %v4835_v40 = vcombine.high %v554_v35, %v562_v36  ;;  %v570_v43 = vld [vmem:[%s5651_s21 + $0x688] sm:$0xff]  ;;  %v4834_v46 = vcombine.low %v554_v35, %v562_v36  ;;  %v4849_v47 = vcombine.high %v569_v41, %v577_v42  ;;  %v585_v49 = vld [vmem:[%s5651_s21 + $0x700] sm:$0xff]  ;;  %v4848_v53 = vcombine.low %v569_v41, %v577_v42 }
  0x93   : > { %3446 = vmatpush1.bf16.msra.mxu0 %v4736_v61  ;;  %3532 = vmatpush1.bf16.msra.mxu1 %v4738_v62  ;;  %v578_v44 = vld [vmem:[%s5651_s21 + $0x6c8] sm:$0xff]  ;;  %v593_v50 = vld [vmem:[%s5651_s21 + $0x740] sm:$0xff] }
  0x94   : > { %3447 = vmatprep.subr.bf16.mxu0 %v4753_v63  ;;  %3533 = vmatprep.subr.bf16.mxu1 %v4755_v0  ;;  %v4851_v48 = vcombine.high %v570_v43, %v578_v44  ;;  %v586_v51 = vld [vmem:[%s5651_s21 + $0x708] sm:$0xff]  ;;  %v4850_v54 = vcombine.low %v570_v43, %v578_v44  ;;  %v4865_v55 = vcombine.high %v585_v49, %v593_v50  ;;  %v601_v57 = vld [vmem:[%s5651_s21 + $0x780] sm:$0xff] }
  0x95   : > { %v594_v52 = vld [vmem:[%s5651_s21 + $0x748] sm:$0xff]  ;;  %v609_v59 = vld [vmem:[%s5651_s21 + $0x7c0] sm:$0xff]  ;;  %v4864_v62 = vcombine.low %v585_v49, %v593_v50 }
  0x96   : > { %v4867_v56 = vcombine.high %v586_v51, %v594_v52  ;;  %v602_v60 = vld [vmem:[%s5651_s21 + $0x788] sm:$0xff]  ;;  %v4866_v63 = vcombine.low %v586_v51, %v594_v52  ;;  %v4881_v0 = vcombine.high %v601_v57, %v609_v59  ;;  %v617_v2 = vld [vmem:[%s5651_s21 + $0x800] sm:$0xff] }
  0x97   : > { %3448 = vmatpush1.bf16.msra.mxu0 %v4752_v5  ;;  %3534 = vmatpush1.bf16.msra.mxu1 %v4754_v6  ;;  %v610_v61 = vld [vmem:[%s5651_s21 + $0x7c8] sm:$0xff]  ;;  %v625_v3 = vld [vmem:[%s5651_s21 + $0x840] sm:$0xff]  ;;  %v4880_v6 = vcombine.low %v601_v57, %v609_v59 }
  0x98   : > { %3449 = vmatprep.subr.bf16.mxu0 %v4769_v7  ;;  %3535 = vmatprep.subr.bf16.mxu1 %v4771_v8  ;;  %v4883_v1 = vcombine.high %v602_v60, %v610_v61  ;;  %v618_v4 = vld [vmem:[%s5651_s21 + $0x808] sm:$0xff]  ;;  %v349_v7 = vld [vmem:[#allocation3] sm:$0xff]  ;;  %v4882_v9 = vcombine.low %v602_v60, %v610_v61  ;;  %v4897_v10 = vcombine.high %v617_v2, %v625_v3 }
  0x99   : > { %v626_v5 = vld [vmem:[%s5651_s21 + $0x848] sm:$0xff]  ;;  %v353_v8 = vld [vmem:[#allocation3 + $0x20] sm:$0xff]  ;;  %v4896_v19 = vcombine.low %v617_v2, %v625_v3 }
  0x9a   : > { %v4899_v11 = vcombine.high %v618_v4, %v626_v5  ;;  %v633_v12 = vld [vmem:[%s5651_s21 + $0x880] sm:$0xff]  ;;  %v4898_v20 = vcombine.low %v618_v4, %v626_v5  ;;  %v650_v26 = vld [vmem:[%s5651_s21 + $0x908] sm:$0xff] }
  0x9b   : > { %3450 = vmatpush1.bf16.msra.mxu0 %v4768_v13  ;;  %3536 = vmatpush1.bf16.msra.mxu1 %v4770_v14  ;;  %v641_v13 = vld [vmem:[%s5651_s21 + $0x8c0] sm:$0xff]  ;;  %v634_v14 = vld [vmem:[%s5651_s21 + $0x888] sm:$0xff] }
  0x9c   : > { %3451 = vmatprep.subr.bf16.mxu0 %v4785_v15  ;;  %3537 = vmatprep.subr.bf16.mxu1 %v4787_v16  ;;  %v5732_v15 = vpack.c.bf16 %v353_v8, %v349_v7  ;;  %v642_v16 = vld [vmem:[%s5651_s21 + $0x8c8] sm:$0xff]  ;;  %v4912_v28 = vcombine.low %v633_v12, %v641_v13  ;;  %v673_v33 = vld [vmem:[%s5651_s21 + $0x9c0] sm:$0xff] }
  0x9d   : > { %v658_v27 = vld [vmem:[%s5651_s21 + $0x948] sm:$0xff]  ;;  %v689_v41 = vld [vmem:[%s5651_s21 + $0xa40] sm:$0xff] }
  0x9e   : > { %v666_v34 = vld [vmem:[%s5651_s21 + $0x988] sm:$0xff]  ;;  %v705_v49 = vld [vmem:[%s5651_s21 + $0xac0] sm:$0xff] }
  0x9f   : > { %3452 = vmatpush1.bf16.msra.mxu0 %v4784_v21  ;;  %3538 = vmatpush1.bf16.msra.mxu1 %v4786_v22  ;;  %v4913_v21 = vcombine.high %v633_v12, %v641_v13  ;;  %v4915_v22 = vcombine.high %v634_v14, %v642_v16  ;;  %v674_v35 = vld [vmem:[%s5651_s21 + $0x9c8] sm:$0xff]  ;;  %v721_v57 = vld [vmem:[%s5651_s21 + $0xb40] sm:$0xff] }
  0xa0   : > { %3453 = vmatprep.subr.bf16.mxu0 %v4801_v23  ;;  %3539 = vmatprep.subr.bf16.mxu1 %v4803_v24  ;;  %v649_v23 = vld [vmem:[%s5651_s21 + $0x900] sm:$0xff]  ;;  %v682_v42 = vld [vmem:[%s5651_s21 + $0xa08] sm:$0xff] }
  0xa1   : > { %v657_v24 = vld [vmem:[%s5651_s21 + $0x940] sm:$0xff]  ;;  %v690_v43 = vld [vmem:[%s5651_s21 + $0xa48] sm:$0xff] }
  0xa2   : > { %v4928_v36 = vcombine.low %v649_v23, %v657_v24  ;;  %v698_v50 = vld [vmem:[%s5651_s21 + $0xa88] sm:$0xff]  ;;  %v737_v2 = vld [vmem:[%s5651_s21 + $0xbc0] sm:$0xff] }
  0xa3   : > { %3454 = vmatpush1.bf16.msra.mxu0 %v4800_v29  ;;  %3540 = vmatpush1.bf16.msra.mxu1 %v4802_v30  ;;  %v4914_v29 = vcombine.low %v634_v14, %v642_v16  ;;  %v4929_v30 = vcombine.high %v649_v23, %v657_v24  ;;  %v706_v51 = vld [vmem:[%s5651_s21 + $0xac8] sm:$0xff]  ;;  %v761_v18 = vld [vmem:[%s5651_s21 + $0xc80] sm:$0xff] }
  0xa4   : > { %3455 = vmatprep.subr.bf16.mxu0 %v4817_v31  ;;  %3541 = vmatprep.subr.bf16.mxu1 %v4819_v32  ;;  %v4931_v31 = vcombine.high %v650_v26, %v658_v27  ;;  %v665_v32 = vld [vmem:[%s5651_s21 + $0x980] sm:$0xff]  ;;  %v714_v59 = vld [vmem:[%s5651_s21 + $0xb08] sm:$0xff] }
  0xa5   : > { %v4944_v44 = vcombine.low %v665_v32, %v673_v33  ;;  %v722_v60 = vld [vmem:[%s5651_s21 + $0xb48] sm:$0xff] }
  0xa6   : > { %v730_v3 = vld [vmem:[%s5651_s21 + $0xb88] sm:$0xff] }
  0xa7   : > { %3456 = vmatpush1.bf16.msra.mxu0 %v4816_v37  ;;  %3542 = vmatpush1.bf16.msra.mxu1 %v4818_v38  ;;  %v4930_v37 = vcombine.low %v650_v26, %v658_v27  ;;  %v4945_v38 = vcombine.high %v665_v32, %v673_v33  ;;  %v738_v4 = vld [vmem:[%s5651_s21 + $0xbc8] sm:$0xff]  ;;  %v777_v27 = vld [vmem:[%s5651_s21 + $0xd00] sm:$0xff] }
  0xa8   : > { %3457 = vmatprep.subr.bf16.mxu0 %v4833_v39  ;;  %3543 = vmatprep.subr.bf16.mxu1 %v4835_v40  ;;  %v4947_v39 = vcombine.high %v666_v34, %v674_v35  ;;  %v681_v40 = vld [vmem:[%s5651_s21 + $0xa00] sm:$0xff]  ;;  %v5011_v8 = vcombine.high %v730_v3, %v738_v4  ;;  %v754_v12 = vld [vmem:[%s5651_s21 + $0xc48] sm:$0xff]  ;;  %v5010_v14 = vcombine.low %v730_v3, %v738_v4 }
  0xa9   : > { %v4960_v52 = vcombine.low %v681_v40, %v689_v41  ;;  %v857_v4 = vld [vmem:[%s5651_s21 + $0xf80] sm:$0xff] }
  0xab   : > { %3458 = vmatpush1.bf16.msra.mxu0 %v4832_v45  ;;  %3544 = vmatpush1.bf16.msra.mxu1 %v4834_v46  ;;  %v4946_v45 = vcombine.low %v666_v34, %v674_v35  ;;  %v4961_v46 = vcombine.high %v681_v40, %v689_v41  ;;  %v793_v35 = vld [vmem:[%s5651_s21 + $0xd80] sm:$0xff] }
  0xac   : > { %3459 = vmatprep.subr.bf16.mxu0 %v4849_v47  ;;  %3545 = vmatprep.subr.bf16.mxu1 %v4851_v48  ;;  %v4963_v47 = vcombine.high %v682_v42, %v690_v43  ;;  %v697_v48 = vld [vmem:[%s5651_s21 + $0xa80] sm:$0xff] }
  0xad   : > { %v4976_v61 = vcombine.low %v697_v48, %v705_v49 }
  0xaf   : > { %3460 = vmatpush1.bf16.msra.mxu0 %v4848_v53  ;;  %3546 = vmatpush1.bf16.msra.mxu1 %v4850_v54  ;;  %v4962_v53 = vcombine.low %v682_v42, %v690_v43  ;;  %v4977_v54 = vcombine.high %v697_v48, %v705_v49  ;;  %v809_v43 = vld [vmem:[%s5651_s21 + $0xe00] sm:$0xff] }
  0xb0   : > { %3461 = vmatprep.subr.bf16.mxu0 %v4865_v55  ;;  %3547 = vmatprep.subr.bf16.mxu1 %v4867_v56  ;;  %v4979_v55 = vcombine.high %v698_v50, %v706_v51  ;;  %v713_v56 = vld [vmem:[%s5651_s21 + $0xb00] sm:$0xff] }
  0xb1   : > { %v4992_v5 = vcombine.low %v713_v56, %v721_v57 }
  0xb3   : > { %3462 = vmatpush1.bf16.msra.mxu0 %v4864_v62  ;;  %3548 = vmatpush1.bf16.msra.mxu1 %v4866_v63  ;;  %v4978_v62 = vcombine.low %v698_v50, %v706_v51  ;;  %v4993_v63 = vcombine.high %v713_v56, %v721_v57  ;;  %v825_v51 = vld [vmem:[%s5651_s21 + $0xe80] sm:$0xff] }
  0xb4   : > { %3463 = vmatprep.subr.bf16.mxu0 %v4881_v0  ;;  %3549 = vmatprep.subr.bf16.mxu1 %v4883_v1  ;;  %v4995_v0 = vcombine.high %v714_v59, %v722_v60  ;;  %v729_v1 = vld [vmem:[%s5651_s21 + $0xb80] sm:$0xff] }
  0xb5   : > { %v5009_v7 = vcombine.high %v729_v1, %v737_v2  ;;  %v5008_v13 = vcombine.low %v729_v1, %v737_v2 }
  0xb7   : > { %3464 = vmatpush1.bf16.msra.mxu0 %v4880_v6  ;;  %3550 = vmatpush1.bf16.msra.mxu1 %v4882_v9  ;;  %v4994_v6 = vcombine.low %v714_v59, %v722_v60  ;;  %v745_v9 = vld [vmem:[%s5651_s21 + $0xc00] sm:$0xff] }
  0xb8   : > { %3476 = vmatprep.subr.bf16.mxu0 %v4897_v10  ;;  %3562 = vmatprep.subr.bf16.mxu1 %v4899_v11  ;;  %v753_v10 = vld [vmem:[%s5651_s21 + $0xc40] sm:$0xff]  ;;  %v746_v11 = vld [vmem:[%s5651_s21 + $0xc08] sm:$0xff] }
  0xb9   : > { %v5025_v16 = vcombine.high %v745_v9, %v753_v10  ;;  %v5027_v17 = vcombine.high %v746_v11, %v754_v12  ;;  %v5026_v23 = vcombine.low %v746_v11, %v754_v12  ;;  %v841_v60 = vld [vmem:[%s5651_s21 + $0xf00] sm:$0xff]  ;;  %v363_v12 = vld [vmem:[%s5651_s21 + $0x10] sm:$0xff] }
  0xba   : > { %3466 = vmatmul.mubr.bf16.vlgmr.msra.gmra.mrb[0].mxu0 %v5732_v15  ;;  %3552 = vmatmul.mubr.bf16.vlgmr.msra.gmra.mrb[0].mxu1 %v5732_v15 }
  0xbb   : > { %3477 = vmatpush1.bf16.msra.mxu0 %v4896_v19  ;;  %3563 = vmatpush1.bf16.msra.mxu1 %v4898_v20  ;;  %v769_v19 = vld [vmem:[%s5651_s21 + $0xcc0] sm:$0xff]  ;;  %v762_v20 = vld [vmem:[%s5651_s21 + $0xc88] sm:$0xff] }
  0xbc   : > { %3478 = vmatprep.subr.bf16.mxu0 %v4913_v21  ;;  %3564 = vmatprep.subr.bf16.mxu1 %v4915_v22  ;;  %v770_v21 = vld [vmem:[%s5651_s21 + $0xcc8] sm:$0xff]  ;;  %v5024_v22 = vcombine.low %v745_v9, %v753_v10  ;;  %v5041_v24 = vcombine.high %v761_v18, %v769_v19 }
  0xbd   : > { %3508 = vmatprep.mubr.bf16.mxu0 %v5737_v25  ;;  %3594 = vmatprep.mubr.bf16.mxu1 %v5737_v25  ;;  %v5043_v26 = vcombine.high %v762_v20, %v770_v21  ;;  %v5042_v32 = vcombine.low %v762_v20, %v770_v21 }
  0xbf   : > { %3479 = vmatpush1.bf16.msra.mxu0 %v4912_v28  ;;  %3565 = vmatpush1.bf16.msra.mxu1 %v4914_v29  ;;  %v785_v28 = vld [vmem:[%s5651_s21 + $0xd40] sm:$0xff]  ;;  %v778_v29 = vld [vmem:[%s5651_s21 + $0xd08] sm:$0xff] }
  0xc0   : > { %3480 = vmatprep.subr.bf16.mxu0 %v4929_v30  ;;  %3566 = vmatprep.subr.bf16.mxu1 %v4931_v31  ;;  %v786_v30 = vld [vmem:[%s5651_s21 + $0xd48] sm:$0xff]  ;;  %v5040_v31 = vcombine.low %v761_v18, %v769_v19  ;;  %v5057_v33 = vcombine.high %v777_v27, %v785_v28  ;;  %v351_v18 = vld [vmem:[#allocation3 + $0x10] sm:$0xff] }
  0xc1   : > { %v5059_v34 = vcombine.high %v778_v29, %v786_v30  ;;  %v5058_v40 = vcombine.low %v778_v29, %v786_v30  ;;  %v355_v19 = vld [vmem:[#allocation3 + $0x30] sm:$0xff] }
  0xc3   : > { %3481 = vmatpush1.bf16.msra.mxu0 %v4928_v36  ;;  %3567 = vmatpush1.bf16.msra.mxu1 %v4930_v37  ;;  %v801_v36 = vld [vmem:[%s5651_s21 + $0xdc0] sm:$0xff]  ;;  %v794_v37 = vld [vmem:[%s5651_s21 + $0xd88] sm:$0xff] }
  0xc4   : > { %3482 = vmatprep.subr.bf16.mxu0 %v4945_v38  ;;  %3568 = vmatprep.subr.bf16.mxu1 %v4947_v39  ;;  %v802_v38 = vld [vmem:[%s5651_s21 + $0xdc8] sm:$0xff]  ;;  %v5056_v39 = vcombine.low %v777_v27, %v785_v28  ;;  %v5073_v41 = vcombine.high %v793_v35, %v801_v36  ;;  %v380_v27 = vld [vmem:[%s5651_s21 + $0x98] sm:$0xff] }
  0xc5   : > { %v5075_v42 = vcombine.high %v794_v37, %v802_v38  ;;  %v5074_v48 = vcombine.low %v794_v37, %v802_v38  ;;  %v388_v28 = vld [vmem:[%s5651_s21 + $0xd8] sm:$0xff] }
  0xc6   : > { %v4662_v38 = vcombine.low %v380_v27, %v388_v28 }
  0xc7   : > { %3483 = vmatpush1.bf16.msra.mxu0 %v4944_v44  ;;  %3569 = vmatpush1.bf16.msra.mxu1 %v4946_v45  ;;  %v817_v44 = vld [vmem:[%s5651_s21 + $0xe40] sm:$0xff]  ;;  %v810_v45 = vld [vmem:[%s5651_s21 + $0xe08] sm:$0xff] }
  0xc8   : > { %3484 = vmatprep.subr.bf16.mxu0 %v4961_v46  ;;  %3570 = vmatprep.subr.bf16.mxu1 %v4963_v47  ;;  %v818_v46 = vld [vmem:[%s5651_s21 + $0xe48] sm:$0xff]  ;;  %v5072_v47 = vcombine.low %v793_v35, %v801_v36  ;;  %v5089_v49 = vcombine.high %v809_v43, %v817_v44  ;;  %v396_v35 = vld [vmem:[%s5651_s21 + $0x118] sm:$0xff] }
  0xc9   : > { %v5091_v50 = vcombine.high %v810_v45, %v818_v46  ;;  %v5090_v56 = vcombine.low %v810_v45, %v818_v46  ;;  %v404_v36 = vld [vmem:[%s5651_s21 + $0x158] sm:$0xff] }
  0xca   : > { %v4678_v46 = vcombine.low %v396_v35, %v404_v36 }
  0xcb   : > { %3485 = vmatpush1.bf16.msra.mxu0 %v4960_v52  ;;  %3571 = vmatpush1.bf16.msra.mxu1 %v4962_v53  ;;  %v833_v52 = vld [vmem:[%s5651_s21 + $0xec0] sm:$0xff]  ;;  %v826_v53 = vld [vmem:[%s5651_s21 + $0xe88] sm:$0xff] }
  0xcc   : > { %3486 = vmatprep.subr.bf16.mxu0 %v4977_v54  ;;  %3572 = vmatprep.subr.bf16.mxu1 %v4979_v55  ;;  %v834_v54 = vld [vmem:[%s5651_s21 + $0xec8] sm:$0xff]  ;;  %v5088_v55 = vcombine.low %v809_v43, %v817_v44  ;;  %v5105_v57 = vcombine.high %v825_v51, %v833_v52  ;;  %v412_v43 = vld [vmem:[%s5651_s21 + $0x198] sm:$0xff] }
  0xcd   : > { %v5107_v59 = vcombine.high %v826_v53, %v834_v54  ;;  %v5106_v1 = vcombine.low %v826_v53, %v834_v54  ;;  %v420_v44 = vld [vmem:[%s5651_s21 + $0x1d8] sm:$0xff] }
  0xce   : > { %v4694_v54 = vcombine.low %v412_v43, %v420_v44 }
  0xcf   : > { %3487 = vmatpush1.bf16.msra.mxu0 %v4976_v61  ;;  %3573 = vmatpush1.bf16.msra.mxu1 %v4978_v62  ;;  %v849_v61 = vld [vmem:[%s5651_s21 + $0xf40] sm:$0xff]  ;;  %v842_v62 = vld [vmem:[%s5651_s21 + $0xf08] sm:$0xff] }
  0xd0   : > { %3488 = vmatprep.subr.bf16.mxu0 %v4993_v63  ;;  %3574 = vmatprep.subr.bf16.mxu1 %v4995_v0  ;;  %v850_v63 = vld [vmem:[%s5651_s21 + $0xf48] sm:$0xff]  ;;  %v5104_v0 = vcombine.low %v825_v51, %v833_v52  ;;  %v5121_v2 = vcombine.high %v841_v60, %v849_v61  ;;  %v428_v51 = vld [vmem:[%s5651_s21 + $0x218] sm:$0xff] }
  0xd1   : > { %v5123_v3 = vcombine.high %v842_v62, %v850_v63  ;;  %v5122_v9 = vcombine.low %v842_v62, %v850_v63  ;;  %v436_v52 = vld [vmem:[%s5651_s21 + $0x258] sm:$0xff] }
  0xd2   : > { %v4710_v63 = vcombine.low %v428_v51, %v436_v52 }
  0xd3   : > { %3489 = vmatpush1.bf16.msra.mxu0 %v4992_v5  ;;  %3575 = vmatpush1.bf16.msra.mxu1 %v4994_v6  ;;  %v865_v5 = vld [vmem:[%s5651_s21 + $0xfc0] sm:$0xff]  ;;  %v858_v6 = vld [vmem:[%s5651_s21 + $0xf88] sm:$0xff] }
  0xd4   : > { %3490 = vmatprep.subr.bf16.mxu0 %v5009_v7  ;;  %3576 = vmatprep.subr.bf16.mxu1 %v5011_v8  ;;  %v866_v7 = vld [vmem:[%s5651_s21 + $0xfc8] sm:$0xff]  ;;  %v5120_v8 = vcombine.low %v841_v60, %v849_v61  ;;  %v5137_v10 = vcombine.high %v857_v4, %v865_v5  ;;  %v444_v60 = vld [vmem:[%s5651_s21 + $0x298] sm:$0xff] }
  0xd5   : > { %v5139_v11 = vcombine.high %v858_v6, %v866_v7  ;;  %v5138_v20 = vcombine.low %v858_v6, %v866_v7  ;;  %v452_v61 = vld [vmem:[%s5651_s21 + $0x2d8] sm:$0xff] }
  0xd6   : > { %v4726_v7 = vcombine.low %v444_v60, %v452_v61 }
  0xd7   : > { %3491 = vmatpush1.bf16.msra.mxu0 %v5008_v13  ;;  %3577 = vmatpush1.bf16.msra.mxu1 %v5010_v14  ;;  %v371_v13 = vld [vmem:[%s5651_s21 + $0x50] sm:$0xff]  ;;  %v364_v14 = vld [vmem:[%s5651_s21 + $0x18] sm:$0xff] }
  0xd8   : > { %3492 = vmatprep.subr.bf16.mxu0 %v5025_v16  ;;  %3578 = vmatprep.subr.bf16.mxu1 %v5027_v17  ;;  %v372_v16 = vld [vmem:[%s5651_s21 + $0x58] sm:$0xff]  ;;  %v5136_v17 = vcombine.low %v857_v4, %v865_v5  ;;  %v4645_v21 = vcombine.high %v363_v12, %v371_v13  ;;  %v4644_v29 = vcombine.low %v363_v12, %v371_v13 }
  0xd9   : > { %v4646_v30 = vcombine.low %v364_v14, %v372_v16  ;;  %v460_v4 = vld [vmem:[%s5651_s21 + $0x318] sm:$0xff] }
  0xda   : > { %v468_v5 = vld [vmem:[%s5651_s21 + $0x358] sm:$0xff] }
  0xdb   : > { %3493 = vmatpush1.bf16.msra.mxu0 %v5024_v22  ;;  %3579 = vmatpush1.bf16.msra.mxu1 %v5026_v23  ;;  %v4647_v22 = vcombine.high %v364_v14, %v372_v16  ;;  %v379_v23 = vld [vmem:[%s5651_s21 + $0x90] sm:$0xff]  ;;  %v476_v12 = vld [vmem:[%s5651_s21 + $0x398] sm:$0xff]  ;;  %v4742_v16 = vcombine.low %v460_v4, %v468_v5 }
  0xdc   : > { %3494 = vmatprep.subr.bf16.mxu0 %v5041_v24  ;;  %3580 = vmatprep.subr.bf16.mxu1 %v5043_v26  ;;  %v387_v24 = vld [vmem:[%s5651_s21 + $0xd0] sm:$0xff]  ;;  %v5803_v26 = vpack.c.bf16 %v355_v19, %v351_v18  ;;  %v484_v13 = vld [vmem:[%s5651_s21 + $0x3d8] sm:$0xff] }
  0xdd   : > { %v4660_v37 = vcombine.low %v379_v23, %v387_v24  ;;  %v4759_v18 = vcombine.high %v476_v12, %v484_v13  ;;  %v491_v19 = vld [vmem:[%s5651_s21 + $0x410] sm:$0xff] }
  0xdf   : > { %3495 = vmatpush1.bf16.msra.mxu0 %v5040_v31  ;;  %3581 = vmatpush1.bf16.msra.mxu1 %v5042_v32  ;;  %v4661_v31 = vcombine.high %v379_v23, %v387_v24  ;;  %v4663_v32 = vcombine.high %v380_v27, %v388_v28  ;;  %v4758_v24 = vcombine.low %v476_v12, %v484_v13 }
  0xe0   : > { %3496 = vmatprep.subr.bf16.mxu0 %v5057_v33  ;;  %3582 = vmatprep.subr.bf16.mxu1 %v5059_v34  ;;  %v395_v33 = vld [vmem:[%s5651_s21 + $0x110] sm:$0xff] }
  0xe1   : > { %v403_v34 = vld [vmem:[%s5651_s21 + $0x150] sm:$0xff] }
  0xe2   : > { %v4676_v45 = vcombine.low %v395_v33, %v403_v34 }
  0xe3   : > { %3497 = vmatpush1.bf16.msra.mxu0 %v5056_v39  ;;  %3583 = vmatpush1.bf16.msra.mxu1 %v5058_v40  ;;  %v4677_v39 = vcombine.high %v395_v33, %v403_v34  ;;  %v4679_v40 = vcombine.high %v396_v35, %v404_v36 }
  0xe4   : > { %3498 = vmatprep.subr.bf16.mxu0 %v5073_v41  ;;  %3584 = vmatprep.subr.bf16.mxu1 %v5075_v42  ;;  %v411_v41 = vld [vmem:[%s5651_s21 + $0x190] sm:$0xff] }
  0xe5   : > { %v419_v42 = vld [vmem:[%s5651_s21 + $0x1d0] sm:$0xff] }
  0xe6   : > { %v4692_v53 = vcombine.low %v411_v41, %v419_v42 }
  0xe7   : > { %3499 = vmatpush1.bf16.msra.mxu0 %v5072_v47  ;;  %3585 = vmatpush1.bf16.msra.mxu1 %v5074_v48  ;;  %v4693_v47 = vcombine.high %v411_v41, %v419_v42  ;;  %v4695_v48 = vcombine.high %v412_v43, %v420_v44 }
  0xe8   : > { %3500 = vmatprep.subr.bf16.mxu0 %v5089_v49  ;;  %3586 = vmatprep.subr.bf16.mxu1 %v5091_v50  ;;  %v427_v49 = vld [vmem:[%s5651_s21 + $0x210] sm:$0xff] }
  0xe9   : > { %v435_v50 = vld [vmem:[%s5651_s21 + $0x250] sm:$0xff] }
  0xea   : > { %v4708_v62 = vcombine.low %v427_v49, %v435_v50 }
  0xeb   : > { %3501 = vmatpush1.bf16.msra.mxu0 %v5088_v55  ;;  %3587 = vmatpush1.bf16.msra.mxu1 %v5090_v56  ;;  %v4709_v55 = vcombine.high %v427_v49, %v435_v50  ;;  %v4711_v56 = vcombine.high %v428_v51, %v436_v52 }
  0xec   : > { %3502 = vmatprep.subr.bf16.mxu0 %v5105_v57  ;;  %3588 = vmatprep.subr.bf16.mxu1 %v5107_v59  ;;  %v443_v57 = vld [vmem:[%s5651_s21 + $0x290] sm:$0xff] }
  0xed   : > { %v451_v59 = vld [vmem:[%s5651_s21 + $0x2d0] sm:$0xff] }
  0xee   : > { %v4724_v6 = vcombine.low %v443_v57, %v451_v59 }
  0xef   : > { %3503 = vmatpush1.bf16.msra.mxu0 %v5104_v0  ;;  %3589 = vmatpush1.bf16.msra.mxu1 %v5106_v1  ;;  %v4725_v0 = vcombine.high %v443_v57, %v451_v59  ;;  %v4727_v1 = vcombine.high %v444_v60, %v452_v61 }
  0xf0   : > { %3504 = vmatprep.subr.bf16.mxu0 %v5121_v2  ;;  %3590 = vmatprep.subr.bf16.mxu1 %v5123_v3  ;;  %v459_v2 = vld [vmem:[%s5651_s21 + $0x310] sm:$0xff] }
  0xf1   : > { %v467_v3 = vld [vmem:[%s5651_s21 + $0x350] sm:$0xff] }
  0xf2   : > { %v4740_v14 = vcombine.low %v459_v2, %v467_v3 }
  0xf3   : > { %3505 = vmatpush1.bf16.msra.mxu0 %v5120_v8  ;;  %3591 = vmatpush1.bf16.msra.mxu1 %v5122_v9  ;;  %v4741_v8 = vcombine.high %v459_v2, %v467_v3  ;;  %v4743_v9 = vcombine.high %v460_v4, %v468_v5 }
  0xf4   : > { %3506 = vmatprep.subr.bf16.mxu0 %v5137_v10  ;;  %3592 = vmatprep.subr.bf16.mxu1 %v5139_v11  ;;  %v475_v10 = vld [vmem:[%s5651_s21 + $0x390] sm:$0xff] }
  0xf5   : > { %v483_v11 = vld [vmem:[%s5651_s21 + $0x3d0] sm:$0xff] }
  0xf6   : > { %v4756_v23 = vcombine.low %v475_v10, %v483_v11 }
  0xf7   : > { %3507 = vmatpush1.bf16.msra.mxu0 %v5136_v17  ;;  %3593 = vmatpush1.bf16.msra.mxu1 %v5138_v20  ;;  %v4757_v17 = vcombine.high %v475_v10, %v483_v11  ;;  %v499_v20 = vld [vmem:[%s5651_s21 + $0x450] sm:$0xff] }
  0xf8   : > { %3605 = vmatprep.subr.bf16.mxu0 %v4645_v21  ;;  %3691 = vmatprep.subr.bf16.mxu1 %v4647_v22  ;;  %v492_v21 = vld [vmem:[%s5651_s21 + $0x418] sm:$0xff]  ;;  %v4773_v27 = vcombine.high %v491_v19, %v499_v20  ;;  %v4772_v33 = vcombine.low %v491_v19, %v499_v20 }
  0xf9   : > { %v500_v22 = vld [vmem:[%s5651_s21 + $0x458] sm:$0xff] }
  0xfa   : > { %3509 = vmatmul.mubr.bf16.vlgmr.msra.gmra.mrb[0].mxu0 %v5803_v26  ;;  %3595 = vmatmul.mubr.bf16.vlgmr.msra.gmra.mrb[0].mxu1 %v5803_v26  ;;  %v4775_v28 = vcombine.high %v492_v21, %v500_v22  ;;  %v4774_v34 = vcombine.low %v492_v21, %v500_v22 }
  0xfb   : > { %3606 = vmatpush1.bf16.msra.mxu0 %v4644_v29  ;;  %3692 = vmatpush1.bf16.msra.mxu1 %v4646_v30  ;;  %v507_v29 = vld [vmem:[%s5651_s21 + $0x490] sm:$0xff] }
  0xfc   : > { %3607 = vmatprep.subr.bf16.mxu0 %v4661_v31  ;;  %3693 = vmatprep.subr.bf16.mxu1 %v4663_v32  ;;  %v515_v30 = vld [vmem:[%s5651_s21 + $0x4d0] sm:$0xff]  ;;  %v508_v31 = vld [vmem:[%s5651_s21 + $0x498] sm:$0xff] }
  0xfd   : > { %3637 = vmatprep.mubr.bf16.mxu0 %v5687_v58  ;;  %3723 = vmatprep.mubr.bf16.mxu1 %v5687_v58  ;;  %v516_v32 = vld [vmem:[%s5651_s21 + $0x4d8] sm:$0xff]  ;;  %v4789_v35 = vcombine.high %v507_v29, %v515_v30  ;;  %v4788_v41 = vcombine.low %v507_v29, %v515_v30 }
  0xfe   : > { %v4791_v36 = vcombine.high %v508_v31, %v516_v32  ;;  %v4790_v42 = vcombine.low %v508_v31, %v516_v32 }
  0xff   : > { %3608 = vmatpush1.bf16.msra.mxu0 %v4660_v37  ;;  %3694 = vmatpush1.bf16.msra.mxu1 %v4662_v38  ;;  %v523_v37 = vld [vmem:[%s5651_s21 + $0x510] sm:$0xff] }
 0x100   : > { %3609 = vmatprep.subr.bf16.mxu0 %v4677_v39  ;;  %3695 = vmatprep.subr.bf16.mxu1 %v4679_v40  ;;  %v531_v38 = vld [vmem:[%s5651_s21 + $0x550] sm:$0xff]  ;;  %v524_v39 = vld [vmem:[%s5651_s21 + $0x518] sm:$0xff] }
 0x101   : > { %v532_v40 = vld [vmem:[%s5651_s21 + $0x558] sm:$0xff]  ;;  %v4805_v43 = vcombine.high %v523_v37, %v531_v38  ;;  %v4804_v49 = vcombine.low %v523_v37, %v531_v38 }
 0x102   : > { %v4807_v44 = vcombine.high %v524_v39, %v532_v40  ;;  %v4806_v50 = vcombine.low %v524_v39, %v532_v40 }
 0x103   : > { %3610 = vmatpush1.bf16.msra.mxu0 %v4676_v45  ;;  %3696 = vmatpush1.bf16.msra.mxu1 %v4678_v46  ;;  %v539_v45 = vld [vmem:[%s5651_s21 + $0x590] sm:$0xff] }
 0x104   : > { %3611 = vmatprep.subr.bf16.mxu0 %v4693_v47  ;;  %3697 = vmatprep.subr.bf16.mxu1 %v4695_v48  ;;  %v547_v46 = vld [vmem:[%s5651_s21 + $0x5d0] sm:$0xff]  ;;  %v540_v47 = vld [vmem:[%s5651_s21 + $0x598] sm:$0xff] }
 0x105   : > { %v548_v48 = vld [vmem:[%s5651_s21 + $0x5d8] sm:$0xff]  ;;  %v4821_v51 = vcombine.high %v539_v45, %v547_v46  ;;  %v4820_v57 = vcombine.low %v539_v45, %v547_v46 }
 0x106   : > { %v4823_v52 = vcombine.high %v540_v47, %v548_v48  ;;  %v4822_v59 = vcombine.low %v540_v47, %v548_v48 }
 0x107   : > { %3612 = vmatpush1.bf16.msra.mxu0 %v4692_v53  ;;  %3698 = vmatpush1.bf16.msra.mxu1 %v4694_v54  ;;  %v555_v53 = vld [vmem:[%s5651_s21 + $0x610] sm:$0xff] }
 0x108   : > { %3613 = vmatprep.subr.bf16.mxu0 %v4709_v55  ;;  %3699 = vmatprep.subr.bf16.mxu1 %v4711_v56  ;;  %v563_v54 = vld [vmem:[%s5651_s21 + $0x650] sm:$0xff]  ;;  %v556_v55 = vld [vmem:[%s5651_s21 + $0x618] sm:$0xff] }
 0x109   : > { %v564_v56 = vld [vmem:[%s5651_s21 + $0x658] sm:$0xff]  ;;  %v4837_v60 = vcombine.high %v555_v53, %v563_v54  ;;  %v4836_v2 = vcombine.low %v555_v53, %v563_v54 }
 0x10a   : > { %v4839_v61 = vcombine.high %v556_v55, %v564_v56  ;;  %v4838_v3 = vcombine.low %v556_v55, %v564_v56 }
 0x10b   : > { %3614 = vmatpush1.bf16.msra.mxu0 %v4708_v62  ;;  %3700 = vmatpush1.bf16.msra.mxu1 %v4710_v63  ;;  %v571_v62 = vld [vmem:[%s5651_s21 + $0x690] sm:$0xff] }
 0x10c   : > { %3615 = vmatprep.subr.bf16.mxu0 %v4725_v0  ;;  %3701 = vmatprep.subr.bf16.mxu1 %v4727_v1  ;;  %v579_v63 = vld [vmem:[%s5651_s21 + $0x6d0] sm:$0xff]  ;;  %v572_v0 = vld [vmem:[%s5651_s21 + $0x698] sm:$0xff] }
 0x10d   : > { %v580_v1 = vld [vmem:[%s5651_s21 + $0x6d8] sm:$0xff]  ;;  %v4853_v4 = vcombine.high %v571_v62, %v579_v63  ;;  %v4852_v10 = vcombine.low %v571_v62, %v579_v63 }
 0x10e   : > { %v4855_v5 = vcombine.high %v572_v0, %v580_v1  ;;  %v4854_v11 = vcombine.low %v572_v0, %v580_v1 }
 0x10f   : > { %3616 = vmatpush1.bf16.msra.mxu0 %v4724_v6  ;;  %3702 = vmatpush1.bf16.msra.mxu1 %v4726_v7  ;;  %v587_v6 = vld [vmem:[%s5651_s21 + $0x710] sm:$0xff] }
 0x110   : > { %3617 = vmatprep.subr.bf16.mxu0 %v4741_v8  ;;  %3703 = vmatprep.subr.bf16.mxu1 %v4743_v9  ;;  %v595_v7 = vld [vmem:[%s5651_s21 + $0x750] sm:$0xff]  ;;  %v588_v8 = vld [vmem:[%s5651_s21 + $0x718] sm:$0xff] }
 0x111   : > { %v596_v9 = vld [vmem:[%s5651_s21 + $0x758] sm:$0xff]  ;;  %v4869_v12 = vcombine.high %v587_v6, %v595_v7  ;;  %v4868_v19 = vcombine.low %v587_v6, %v595_v7 }
 0x112   : > { %v4871_v13 = vcombine.high %v588_v8, %v596_v9  ;;  %v4870_v20 = vcombine.low %v588_v8, %v596_v9 }
 0x113   : > { %3618 = vmatpush1.bf16.msra.mxu0 %v4740_v14  ;;  %3704 = vmatpush1.bf16.msra.mxu1 %v4742_v16  ;;  %v603_v14 = vld [vmem:[%s5651_s21 + $0x790] sm:$0xff] }
 0x114   : > { %3619 = vmatprep.subr.bf16.mxu0 %v4757_v17  ;;  %3705 = vmatprep.subr.bf16.mxu1 %v4759_v18  ;;  %v611_v16 = vld [vmem:[%s5651_s21 + $0x7d0] sm:$0xff]  ;;  %v604_v17 = vld [vmem:[%s5651_s21 + $0x798] sm:$0xff] }
 0x115   : > { %v612_v18 = vld [vmem:[%s5651_s21 + $0x7d8] sm:$0xff]  ;;  %v4885_v21 = vcombine.high %v603_v14, %v611_v16  ;;  %v4884_v29 = vcombine.low %v603_v14, %v611_v16 }
 0x116   : > { %v4887_v22 = vcombine.high %v604_v17, %v612_v18  ;;  %v4886_v30 = vcombine.low %v604_v17, %v612_v18 }
 0x117   : > { %3620 = vmatpush1.bf16.msra.mxu0 %v4756_v23  ;;  %3706 = vmatpush1.bf16.msra.mxu1 %v4758_v24  ;;  %v619_v23 = vld [vmem:[%s5651_s21 + $0x810] sm:$0xff] }
 0x118   : > { %3621 = vmatprep.subr.bf16.mxu0 %v4773_v27  ;;  %3707 = vmatprep.subr.bf16.mxu1 %v4775_v28  ;;  %v627_v24 = vld [vmem:[%s5651_s21 + $0x850] sm:$0xff]  ;;  %v620_v27 = vld [vmem:[%s5651_s21 + $0x818] sm:$0xff] }
 0x119   : > { %v628_v28 = vld [vmem:[%s5651_s21 + $0x858] sm:$0xff]  ;;  %v4901_v31 = vcombine.high %v619_v23, %v627_v24  ;;  %v4900_v37 = vcombine.low %v619_v23, %v627_v24 }
 0x11a   : > { %v4903_v32 = vcombine.high %v620_v27, %v628_v28  ;;  %v4902_v38 = vcombine.low %v620_v27, %v628_v28 }
 0x11b   : > { %3622 = vmatpush1.bf16.msra.mxu0 %v4772_v33  ;;  %3708 = vmatpush1.bf16.msra.mxu1 %v4774_v34  ;;  %v635_v33 = vld [vmem:[%s5651_s21 + $0x890] sm:$0xff] }
 0x11c   : > { %3623 = vmatprep.subr.bf16.mxu0 %v4789_v35  ;;  %3709 = vmatprep.subr.bf16.mxu1 %v4791_v36  ;;  %v643_v34 = vld [vmem:[%s5651_s21 + $0x8d0] sm:$0xff]  ;;  %v636_v35 = vld [vmem:[%s5651_s21 + $0x898] sm:$0xff] }
 0x11d   : > { %v644_v36 = vld [vmem:[%s5651_s21 + $0x8d8] sm:$0xff]  ;;  %v4917_v39 = vcombine.high %v635_v33, %v643_v34  ;;  %v4916_v45 = vcombine.low %v635_v33, %v643_v34 }
 0x11e   : > { %v4919_v40 = vcombine.high %v636_v35, %v644_v36  ;;  %v4918_v46 = vcombine.low %v636_v35, %v644_v36 }
 0x11f   : > { %3624 = vmatpush1.bf16.msra.mxu0 %v4788_v41  ;;  %3710 = vmatpush1.bf16.msra.mxu1 %v4790_v42  ;;  %v651_v41 = vld [vmem:[%s5651_s21 + $0x910] sm:$0xff] }
 0x120   : > { %3625 = vmatprep.subr.bf16.mxu0 %v4805_v43  ;;  %3711 = vmatprep.subr.bf16.mxu1 %v4807_v44  ;;  %v659_v42 = vld [vmem:[%s5651_s21 + $0x950] sm:$0xff]  ;;  %v652_v43 = vld [vmem:[%s5651_s21 + $0x918] sm:$0xff] }
 0x121   : > { %v660_v44 = vld [vmem:[%s5651_s21 + $0x958] sm:$0xff]  ;;  %v4933_v47 = vcombine.high %v651_v41, %v659_v42  ;;  %v4932_v53 = vcombine.low %v651_v41, %v659_v42 }
 0x122   : > { %v4935_v48 = vcombine.high %v652_v43, %v660_v44  ;;  %v4934_v54 = vcombine.low %v652_v43, %v660_v44 }
 0x123   : > { %3626 = vmatpush1.bf16.msra.mxu0 %v4804_v49  ;;  %3712 = vmatpush1.bf16.msra.mxu1 %v4806_v50  ;;  %v667_v49 = vld [vmem:[%s5651_s21 + $0x990] sm:$0xff] }
 0x124   : > { %3627 = vmatprep.subr.bf16.mxu0 %v4821_v51  ;;  %3713 = vmatprep.subr.bf16.mxu1 %v4823_v52  ;;  %v675_v50 = vld [vmem:[%s5651_s21 + $0x9d0] sm:$0xff]  ;;  %v668_v51 = vld [vmem:[%s5651_s21 + $0x998] sm:$0xff] }
 0x125   : > { %v676_v52 = vld [vmem:[%s5651_s21 + $0x9d8] sm:$0xff]  ;;  %v4949_v55 = vcombine.high %v667_v49, %v675_v50  ;;  %v4948_v62 = vcombine.low %v667_v49, %v675_v50 }
 0x126   : > { %v4951_v56 = vcombine.high %v668_v51, %v676_v52  ;;  %v4950_v63 = vcombine.low %v668_v51, %v676_v52 }
 0x127   : > { %3628 = vmatpush1.bf16.msra.mxu0 %v4820_v57  ;;  %3714 = vmatpush1.bf16.msra.mxu1 %v4822_v59  ;;  %v683_v57 = vld [vmem:[%s5651_s21 + $0xa10] sm:$0xff] }
 0x128   : > { %3629 = vmatprep.subr.bf16.mxu0 %v4837_v60  ;;  %3715 = vmatprep.subr.bf16.mxu1 %v4839_v61  ;;  %v691_v59 = vld [vmem:[%s5651_s21 + $0xa50] sm:$0xff]  ;;  %v684_v60 = vld [vmem:[%s5651_s21 + $0xa18] sm:$0xff] }
 0x129   : > { %v692_v61 = vld [vmem:[%s5651_s21 + $0xa58] sm:$0xff]  ;;  %v4965_v0 = vcombine.high %v683_v57, %v691_v59  ;;  %v4964_v6 = vcombine.low %v683_v57, %v691_v59 }
 0x12a   : > { %v4967_v1 = vcombine.high %v684_v60, %v692_v61  ;;  %v4966_v7 = vcombine.low %v684_v60, %v692_v61 }
 0x12b   : > { %3630 = vmatpush1.bf16.msra.mxu0 %v4836_v2  ;;  %3716 = vmatpush1.bf16.msra.mxu1 %v4838_v3  ;;  %v699_v2 = vld [vmem:[%s5651_s21 + $0xa90] sm:$0xff] }
 0x12c   : > { %3631 = vmatprep.subr.bf16.mxu0 %v4853_v4  ;;  %3717 = vmatprep.subr.bf16.mxu1 %v4855_v5  ;;  %v707_v3 = vld [vmem:[%s5651_s21 + $0xad0] sm:$0xff]  ;;  %v700_v4 = vld [vmem:[%s5651_s21 + $0xa98] sm:$0xff] }
 0x12d   : > { %v708_v5 = vld [vmem:[%s5651_s21 + $0xad8] sm:$0xff]  ;;  %v4981_v8 = vcombine.high %v699_v2, %v707_v3  ;;  %v4980_v14 = vcombine.low %v699_v2, %v707_v3 }
 0x12e   : > { %v4983_v9 = vcombine.high %v700_v4, %v708_v5  ;;  %v4982_v16 = vcombine.low %v700_v4, %v708_v5 }
 0x12f   : > { %3632 = vmatpush1.bf16.msra.mxu0 %v4852_v10  ;;  %3718 = vmatpush1.bf16.msra.mxu1 %v4854_v11  ;;  %v715_v10 = vld [vmem:[%s5651_s21 + $0xb10] sm:$0xff] }
 0x130   : > { %3633 = vmatprep.subr.bf16.mxu0 %v4869_v12  ;;  %3719 = vmatprep.subr.bf16.mxu1 %v4871_v13  ;;  %v723_v11 = vld [vmem:[%s5651_s21 + $0xb50] sm:$0xff]  ;;  %v716_v12 = vld [vmem:[%s5651_s21 + $0xb18] sm:$0xff] }
 0x131   : > { %v724_v13 = vld [vmem:[%s5651_s21 + $0xb58] sm:$0xff]  ;;  %v4997_v17 = vcombine.high %v715_v10, %v723_v11  ;;  %v4996_v23 = vcombine.low %v715_v10, %v723_v11 }
 0x132   : > { %v4999_v18 = vcombine.high %v716_v12, %v724_v13  ;;  %v4998_v24 = vcombine.low %v716_v12, %v724_v13 }
 0x133   : > { %3634 = vmatpush1.bf16.msra.mxu0 %v4868_v19  ;;  %3720 = vmatpush1.bf16.msra.mxu1 %v4870_v20  ;;  %v731_v19 = vld [vmem:[%s5651_s21 + $0xb90] sm:$0xff] }
 0x134   : > { %3635 = vmatprep.subr.bf16.mxu0 %v4885_v21  ;;  %3721 = vmatprep.subr.bf16.mxu1 %v4887_v22  ;;  %v739_v20 = vld [vmem:[%s5651_s21 + $0xbd0] sm:$0xff]  ;;  %v732_v21 = vld [vmem:[%s5651_s21 + $0xb98] sm:$0xff] }
 0x135   : > { %v740_v22 = vld [vmem:[%s5651_s21 + $0xbd8] sm:$0xff]  ;;  %v5013_v27 = vcombine.high %v731_v19, %v739_v20  ;;  %v5012_v33 = vcombine.low %v731_v19, %v739_v20 }
 0x136   : > { %v5015_v28 = vcombine.high %v732_v21, %v740_v22  ;;  %v5014_v34 = vcombine.low %v732_v21, %v740_v22 }
 0x137   : > { %3636 = vmatpush1.bf16.msra.mxu0 %v4884_v29  ;;  %3722 = vmatpush1.bf16.msra.mxu1 %v4886_v30  ;;  %v747_v29 = vld [vmem:[%s5651_s21 + $0xc10] sm:$0xff] }
 0x138   : > { %3648 = vmatprep.subr.bf16.mxu0 %v4901_v31  ;;  %3734 = vmatprep.subr.bf16.mxu1 %v4903_v32  ;;  %v755_v30 = vld [vmem:[%s5651_s21 + $0xc50] sm:$0xff]  ;;  %v748_v31 = vld [vmem:[%s5651_s21 + $0xc18] sm:$0xff] }
 0x139   : > { %v756_v32 = vld [vmem:[%s5651_s21 + $0xc58] sm:$0xff]  ;;  %v5029_v35 = vcombine.high %v747_v29, %v755_v30  ;;  %v5028_v41 = vcombine.low %v747_v29, %v755_v30 }
 0x13a   : > { %3638 = vmatmul.mubr.bf16.vlgmr.msra.gmra.mrb[4].mxu0 %v5732_v15  ;;  %3724 = vmatmul.mubr.bf16.vlgmr.msra.gmra.mrb[4].mxu1 %v5732_v15  ;;  %v5031_v36 = vcombine.high %v748_v31, %v756_v32  ;;  %v5030_v42 = vcombine.low %v748_v31, %v756_v32 }
 0x13b   : > { %3649 = vmatpush1.bf16.msra.mxu0 %v4900_v37  ;;  %3735 = vmatpush1.bf16.msra.mxu1 %v4902_v38  ;;  %v763_v37 = vld [vmem:[%s5651_s21 + $0xc90] sm:$0xff] }
 0x13c   : > { %3650 = vmatprep.subr.bf16.mxu0 %v4917_v39  ;;  %3736 = vmatprep.subr.bf16.mxu1 %v4919_v40  ;;  %v771_v38 = vld [vmem:[%s5651_s21 + $0xcd0] sm:$0xff]  ;;  %v764_v39 = vld [vmem:[%s5651_s21 + $0xc98] sm:$0xff] }
 0x13d   : > { %3680 = vmatprep.mubr.bf16.mxu0 %v5737_v25  ;;  %3766 = vmatprep.mubr.bf16.mxu1 %v5737_v25  ;;  %v772_v40 = vld [vmem:[%s5651_s21 + $0xcd8] sm:$0xff]  ;;  %v5045_v43 = vcombine.high %v763_v37, %v771_v38  ;;  %v5044_v49 = vcombine.low %v763_v37, %v771_v38 }
 0x13e   : > { %v5047_v44 = vcombine.high %v764_v39, %v772_v40  ;;  %v5046_v50 = vcombine.low %v764_v39, %v772_v40 }
 0x13f   : > { %3651 = vmatpush1.bf16.msra.mxu0 %v4916_v45  ;;  %3737 = vmatpush1.bf16.msra.mxu1 %v4918_v46  ;;  %v779_v45 = vld [vmem:[%s5651_s21 + $0xd10] sm:$0xff] }
 0x140   : > { %3652 = vmatprep.subr.bf16.mxu0 %v4933_v47  ;;  %3738 = vmatprep.subr.bf16.mxu1 %v4935_v48  ;;  %v787_v46 = vld [vmem:[%s5651_s21 + $0xd50] sm:$0xff]  ;;  %v780_v47 = vld [vmem:[%s5651_s21 + $0xd18] sm:$0xff] }
 0x141   : > { %v788_v48 = vld [vmem:[%s5651_s21 + $0xd58] sm:$0xff]  ;;  %v5061_v51 = vcombine.high %v779_v45, %v787_v46  ;;  %v5060_v57 = vcombine.low %v779_v45, %v787_v46 }
 0x142   : > { %v5063_v52 = vcombine.high %v780_v47, %v788_v48  ;;  %v5062_v59 = vcombine.low %v780_v47, %v788_v48 }
 0x143   : > { %3653 = vmatpush1.bf16.msra.mxu0 %v4932_v53  ;;  %3739 = vmatpush1.bf16.msra.mxu1 %v4934_v54  ;;  %v795_v53 = vld [vmem:[%s5651_s21 + $0xd90] sm:$0xff] }
 0x144   : > { %3654 = vmatprep.subr.bf16.mxu0 %v4949_v55  ;;  %3740 = vmatprep.subr.bf16.mxu1 %v4951_v56  ;;  %v803_v54 = vld [vmem:[%s5651_s21 + $0xdd0] sm:$0xff]  ;;  %v796_v55 = vld [vmem:[%s5651_s21 + $0xd98] sm:$0xff] }
 0x145   : > { %v804_v56 = vld [vmem:[%s5651_s21 + $0xdd8] sm:$0xff]  ;;  %v5077_v60 = vcombine.high %v795_v53, %v803_v54  ;;  %v5076_v2 = vcombine.low %v795_v53, %v803_v54 }
 0x146   : > { %v5079_v61 = vcombine.high %v796_v55, %v804_v56  ;;  %v5078_v3 = vcombine.low %v796_v55, %v804_v56 }
 0x147   : > { %3655 = vmatpush1.bf16.msra.mxu0 %v4948_v62  ;;  %3741 = vmatpush1.bf16.msra.mxu1 %v4950_v63  ;;  %v811_v62 = vld [vmem:[%s5651_s21 + $0xe10] sm:$0xff] }
 0x148   : > { %3656 = vmatprep.subr.bf16.mxu0 %v4965_v0  ;;  %3742 = vmatprep.subr.bf16.mxu1 %v4967_v1  ;;  %v819_v63 = vld [vmem:[%s5651_s21 + $0xe50] sm:$0xff]  ;;  %v812_v0 = vld [vmem:[%s5651_s21 + $0xe18] sm:$0xff] }
 0x149   : > { %v820_v1 = vld [vmem:[%s5651_s21 + $0xe58] sm:$0xff]  ;;  %v5093_v4 = vcombine.high %v811_v62, %v819_v63  ;;  %v5092_v10 = vcombine.low %v811_v62, %v819_v63 }
 0x14a   : > { %v5095_v5 = vcombine.high %v812_v0, %v820_v1  ;;  %v5094_v11 = vcombine.low %v812_v0, %v820_v1 }
 0x14b   : > { %3657 = vmatpush1.bf16.msra.mxu0 %v4964_v6  ;;  %3743 = vmatpush1.bf16.msra.mxu1 %v4966_v7  ;;  %v827_v6 = vld [vmem:[%s5651_s21 + $0xe90] sm:$0xff] }
 0x14c   : > { %3658 = vmatprep.subr.bf16.mxu0 %v4981_v8  ;;  %3744 = vmatprep.subr.bf16.mxu1 %v4983_v9  ;;  %v835_v7 = vld [vmem:[%s5651_s21 + $0xed0] sm:$0xff]  ;;  %v828_v8 = vld [vmem:[%s5651_s21 + $0xe98] sm:$0xff] }
 0x14d   : > { %v836_v9 = vld [vmem:[%s5651_s21 + $0xed8] sm:$0xff]  ;;  %v5109_v12 = vcombine.high %v827_v6, %v835_v7  ;;  %v5108_v19 = vcombine.low %v827_v6, %v835_v7 }
 0x14e   : > { %v5111_v13 = vcombine.high %v828_v8, %v836_v9  ;;  %v5110_v20 = vcombine.low %v828_v8, %v836_v9 }
 0x14f   : > { %3659 = vmatpush1.bf16.msra.mxu0 %v4980_v14  ;;  %3745 = vmatpush1.bf16.msra.mxu1 %v4982_v16  ;;  %v843_v14 = vld [vmem:[%s5651_s21 + $0xf10] sm:$0xff] }
 0x150   : > { %3660 = vmatprep.subr.bf16.mxu0 %v4997_v17  ;;  %3746 = vmatprep.subr.bf16.mxu1 %v4999_v18  ;;  %v851_v16 = vld [vmem:[%s5651_s21 + $0xf50] sm:$0xff]  ;;  %v844_v17 = vld [vmem:[%s5651_s21 + $0xf18] sm:$0xff] }
 0x151   : > { %v852_v18 = vld [vmem:[%s5651_s21 + $0xf58] sm:$0xff]  ;;  %v5125_v21 = vcombine.high %v843_v14, %v851_v16  ;;  %v5124_v29 = vcombine.low %v843_v14, %v851_v16 }
 0x152   : > { %v5127_v22 = vcombine.high %v844_v17, %v852_v18  ;;  %v5126_v30 = vcombine.low %v844_v17, %v852_v18 }
 0x153   : > { %3661 = vmatpush1.bf16.msra.mxu0 %v4996_v23  ;;  %3747 = vmatpush1.bf16.msra.mxu1 %v4998_v24  ;;  %v859_v23 = vld [vmem:[%s5651_s21 + $0xf90] sm:$0xff] }
 0x154   : > { %3662 = vmatprep.subr.bf16.mxu0 %v5013_v27  ;;  %3748 = vmatprep.subr.bf16.mxu1 %v5015_v28  ;;  %v867_v24 = vld [vmem:[%s5651_s21 + $0xfd0] sm:$0xff]  ;;  %v860_v27 = vld [vmem:[%s5651_s21 + $0xf98] sm:$0xff] }
 0x155   : > { %v868_v28 = vld [vmem:[%s5651_s21 + $0xfd8] sm:$0xff]  ;;  %v5141_v31 = vcombine.high %v859_v23, %v867_v24  ;;  %v5140_v37 = vcombine.low %v859_v23, %v867_v24 }
 0x156   : > { %v5143_v32 = vcombine.high %v860_v27, %v868_v28  ;;  %v5142_v38 = vcombine.low %v860_v27, %v868_v28 }
 0x157   : > { %3663 = vmatpush1.bf16.msra.mxu0 %v5012_v33  ;;  %3749 = vmatpush1.bf16.msra.mxu1 %v5014_v34  ;;  %v365_v33 = vld [vmem:[%s5651_s21 + $0x20] sm:$0xff] }
 0x158   : > { %3664 = vmatprep.subr.bf16.mxu0 %v5029_v35  ;;  %3750 = vmatprep.subr.bf16.mxu1 %v5031_v36  ;;  %v373_v34 = vld [vmem:[%s5651_s21 + $0x60] sm:$0xff]  ;;  %v366_v35 = vld [vmem:[%s5651_s21 + $0x28] sm:$0xff] }
 0x159   : > { %v374_v36 = vld [vmem:[%s5651_s21 + $0x68] sm:$0xff]  ;;  %v4649_v39 = vcombine.high %v365_v33, %v373_v34  ;;  %v4648_v45 = vcombine.low %v365_v33, %v373_v34 }
 0x15a   : > { %v4651_v40 = vcombine.high %v366_v35, %v374_v36  ;;  %v4650_v46 = vcombine.low %v366_v35, %v374_v36 }
 0x15b   : > { %3665 = vmatpush1.bf16.msra.mxu0 %v5028_v41  ;;  %3751 = vmatpush1.bf16.msra.mxu1 %v5030_v42  ;;  %v381_v41 = vld [vmem:[%s5651_s21 + $0xa0] sm:$0xff] }
 0x15c   : > { %3666 = vmatprep.subr.bf16.mxu0 %v5045_v43  ;;  %3752 = vmatprep.subr.bf16.mxu1 %v5047_v44  ;;  %v389_v42 = vld [vmem:[%s5651_s21 + $0xe0] sm:$0xff]  ;;  %v382_v43 = vld [vmem:[%s5651_s21 + $0xa8] sm:$0xff] }
 0x15d   : > { %v390_v44 = vld [vmem:[%s5651_s21 + $0xe8] sm:$0xff]  ;;  %v4665_v47 = vcombine.high %v381_v41, %v389_v42  ;;  %v4664_v53 = vcombine.low %v381_v41, %v389_v42 }
 0x15e   : > { %v4667_v48 = vcombine.high %v382_v43, %v390_v44  ;;  %v4666_v54 = vcombine.low %v382_v43, %v390_v44 }
 0x15f   : > { %3667 = vmatpush1.bf16.msra.mxu0 %v5044_v49  ;;  %3753 = vmatpush1.bf16.msra.mxu1 %v5046_v50  ;;  %v397_v49 = vld [vmem:[%s5651_s21 + $0x120] sm:$0xff] }
 0x160   : > { %3668 = vmatprep.subr.bf16.mxu0 %v5061_v51  ;;  %3754 = vmatprep.subr.bf16.mxu1 %v5063_v52  ;;  %v405_v50 = vld [vmem:[%s5651_s21 + $0x160] sm:$0xff]  ;;  %v398_v51 = vld [vmem:[%s5651_s21 + $0x128] sm:$0xff] }
 0x161   : > { %v406_v52 = vld [vmem:[%s5651_s21 + $0x168] sm:$0xff]  ;;  %v4681_v55 = vcombine.high %v397_v49, %v405_v50  ;;  %v4680_v62 = vcombine.low %v397_v49, %v405_v50 }
 0x162   : > { %v4683_v56 = vcombine.high %v398_v51, %v406_v52  ;;  %v4682_v63 = vcombine.low %v398_v51, %v406_v52 }
 0x163   : > { %3669 = vmatpush1.bf16.msra.mxu0 %v5060_v57  ;;  %3755 = vmatpush1.bf16.msra.mxu1 %v5062_v59  ;;  %v413_v57 = vld [vmem:[%s5651_s21 + $0x1a0] sm:$0xff] }
 0x164   : > { %3670 = vmatprep.subr.bf16.mxu0 %v5077_v60  ;;  %3756 = vmatprep.subr.bf16.mxu1 %v5079_v61  ;;  %v421_v59 = vld [vmem:[%s5651_s21 + $0x1e0] sm:$0xff]  ;;  %v414_v60 = vld [vmem:[%s5651_s21 + $0x1a8] sm:$0xff] }
 0x165   : > { %v422_v61 = vld [vmem:[%s5651_s21 + $0x1e8] sm:$0xff]  ;;  %v4697_v0 = vcombine.high %v413_v57, %v421_v59  ;;  %v4696_v6 = vcombine.low %v413_v57, %v421_v59 }
 0x166   : > { %v4699_v1 = vcombine.high %v414_v60, %v422_v61  ;;  %v4698_v7 = vcombine.low %v414_v60, %v422_v61 }
 0x167   : > { %3671 = vmatpush1.bf16.msra.mxu0 %v5076_v2  ;;  %3757 = vmatpush1.bf16.msra.mxu1 %v5078_v3  ;;  %v429_v2 = vld [vmem:[%s5651_s21 + $0x220] sm:$0xff] }
 0x168   : > { %3672 = vmatprep.subr.bf16.mxu0 %v5093_v4  ;;  %3758 = vmatprep.subr.bf16.mxu1 %v5095_v5  ;;  %v437_v3 = vld [vmem:[%s5651_s21 + $0x260] sm:$0xff]  ;;  %v430_v4 = vld [vmem:[%s5651_s21 + $0x228] sm:$0xff] }
 0x169   : > { %v438_v5 = vld [vmem:[%s5651_s21 + $0x268] sm:$0xff]  ;;  %v4713_v8 = vcombine.high %v429_v2, %v437_v3  ;;  %v4712_v14 = vcombine.low %v429_v2, %v437_v3 }
 0x16a   : > { %v4715_v9 = vcombine.high %v430_v4, %v438_v5  ;;  %v4714_v16 = vcombine.low %v430_v4, %v438_v5 }
 0x16b   : > { %3673 = vmatpush1.bf16.msra.mxu0 %v5092_v10  ;;  %3759 = vmatpush1.bf16.msra.mxu1 %v5094_v11  ;;  %v445_v10 = vld [vmem:[%s5651_s21 + $0x2a0] sm:$0xff] }
 0x16c   : > { %3674 = vmatprep.subr.bf16.mxu0 %v5109_v12  ;;  %3760 = vmatprep.subr.bf16.mxu1 %v5111_v13  ;;  %v453_v11 = vld [vmem:[%s5651_s21 + $0x2e0] sm:$0xff]  ;;  %v446_v12 = vld [vmem:[%s5651_s21 + $0x2a8] sm:$0xff] }
 0x16d   : > { %v454_v13 = vld [vmem:[%s5651_s21 + $0x2e8] sm:$0xff]  ;;  %v4729_v17 = vcombine.high %v445_v10, %v453_v11  ;;  %v4728_v23 = vcombine.low %v445_v10, %v453_v11 }
 0x16e   : > { %v4731_v18 = vcombine.high %v446_v12, %v454_v13  ;;  %v4730_v24 = vcombine.low %v446_v12, %v454_v13 }
 0x16f   : > { %3675 = vmatpush1.bf16.msra.mxu0 %v5108_v19  ;;  %3761 = vmatpush1.bf16.msra.mxu1 %v5110_v20  ;;  %v461_v19 = vld [vmem:[%s5651_s21 + $0x320] sm:$0xff] }
 0x170   : > { %3676 = vmatprep.subr.bf16.mxu0 %v5125_v21  ;;  %3762 = vmatprep.subr.bf16.mxu1 %v5127_v22  ;;  %v469_v20 = vld [vmem:[%s5651_s21 + $0x360] sm:$0xff]  ;;  %v462_v21 = vld [vmem:[%s5651_s21 + $0x328] sm:$0xff] }
 0x171   : > { %v470_v22 = vld [vmem:[%s5651_s21 + $0x368] sm:$0xff]  ;;  %v4745_v27 = vcombine.high %v461_v19, %v469_v20  ;;  %v4744_v33 = vcombine.low %v461_v19, %v469_v20 }
 0x172   : > { %v4747_v28 = vcombine.high %v462_v21, %v470_v22  ;;  %v4746_v34 = vcombine.low %v462_v21, %v470_v22 }
 0x173   : > { %3677 = vmatpush1.bf16.msra.mxu0 %v5124_v29  ;;  %3763 = vmatpush1.bf16.msra.mxu1 %v5126_v30  ;;  %v477_v29 = vld [vmem:[%s5651_s21 + $0x3a0] sm:$0xff] }
 0x174   : > { %3678 = vmatprep.subr.bf16.mxu0 %v5141_v31  ;;  %3764 = vmatprep.subr.bf16.mxu1 %v5143_v32  ;;  %v485_v30 = vld [vmem:[%s5651_s21 + $0x3e0] sm:$0xff]  ;;  %v478_v31 = vld [vmem:[%s5651_s21 + $0x3a8] sm:$0xff] }
 0x175   : > { %v486_v32 = vld [vmem:[%s5651_s21 + $0x3e8] sm:$0xff]  ;;  %v4761_v35 = vcombine.high %v477_v29, %v485_v30  ;;  %v4760_v41 = vcombine.low %v477_v29, %v485_v30 }
 0x176   : > { %v4763_v36 = vcombine.high %v478_v31, %v486_v32  ;;  %v4762_v42 = vcombine.low %v478_v31, %v486_v32 }
 0x177   : > { %3679 = vmatpush1.bf16.msra.mxu0 %v5140_v37  ;;  %3765 = vmatpush1.bf16.msra.mxu1 %v5142_v38  ;;  %v493_v37 = vld [vmem:[%s5651_s21 + $0x420] sm:$0xff] }
 0x178   : > { %3777 = vmatprep.subr.bf16.mxu0 %v4649_v39  ;;  %3863 = vmatprep.subr.bf16.mxu1 %v4651_v40  ;;  %v501_v38 = vld [vmem:[%s5651_s21 + $0x460] sm:$0xff]  ;;  %v494_v39 = vld [vmem:[%s5651_s21 + $0x428] sm:$0xff] }
 0x179   : > { %v502_v40 = vld [vmem:[%s5651_s21 + $0x468] sm:$0xff]  ;;  %v4777_v43 = vcombine.high %v493_v37, %v501_v38  ;;  %v4776_v49 = vcombine.low %v493_v37, %v501_v38 }
 0x17a   : > { %3681 = vmatmul.mubr.bf16.vlgmr.msra.gmra.mrb[4].mxu0 %v5803_v26  ;;  %3767 = vmatmul.mubr.bf16.vlgmr.msra.gmra.mrb[4].mxu1 %v5803_v26  ;;  %v4779_v44 = vcombine.high %v494_v39, %v502_v40  ;;  %v4778_v50 = vcombine.low %v494_v39, %v502_v40 }
 0x17b   : > { %3778 = vmatpush1.bf16.msra.mxu0 %v4648_v45  ;;  %3864 = vmatpush1.bf16.msra.mxu1 %v4650_v46  ;;  %v509_v45 = vld [vmem:[%s5651_s21 + $0x4a0] sm:$0xff] }
 0x17c   : > { %3779 = vmatprep.subr.bf16.mxu0 %v4665_v47  ;;  %3865 = vmatprep.subr.bf16.mxu1 %v4667_v48  ;;  %v517_v46 = vld [vmem:[%s5651_s21 + $0x4e0] sm:$0xff]  ;;  %v510_v47 = vld [vmem:[%s5651_s21 + $0x4a8] sm:$0xff] }
 0x17d   : > { %3809 = vmatprep.mubr.bf16.mxu0 %v5687_v58  ;;  %3895 = vmatprep.mubr.bf16.mxu1 %v5687_v58  ;;  %v518_v48 = vld [vmem:[%s5651_s21 + $0x4e8] sm:$0xff]  ;;  %v4793_v51 = vcombine.high %v509_v45, %v517_v46  ;;  %v4792_v57 = vcombine.low %v509_v45, %v517_v46 }
 0x17e   : > { %v4795_v52 = vcombine.high %v510_v47, %v518_v48  ;;  %v4794_v59 = vcombine.low %v510_v47, %v518_v48 }
 0x17f   : > { %3780 = vmatpush1.bf16.msra.mxu0 %v4664_v53  ;;  %3866 = vmatpush1.bf16.msra.mxu1 %v4666_v54  ;;  %v525_v53 = vld [vmem:[%s5651_s21 + $0x520] sm:$0xff] }
 0x180   : > { %3781 = vmatprep.subr.bf16.mxu0 %v4681_v55  ;;  %3867 = vmatprep.subr.bf16.mxu1 %v4683_v56  ;;  %v533_v54 = vld [vmem:[%s5651_s21 + $0x560] sm:$0xff]  ;;  %v526_v55 = vld [vmem:[%s5651_s21 + $0x528] sm:$0xff] }
 0x181   : > { %v534_v56 = vld [vmem:[%s5651_s21 + $0x568] sm:$0xff]  ;;  %v4809_v60 = vcombine.high %v525_v53, %v533_v54  ;;  %v4808_v2 = vcombine.low %v525_v53, %v533_v54 }
 0x182   : > { %v4811_v61 = vcombine.high %v526_v55, %v534_v56  ;;  %v4810_v3 = vcombine.low %v526_v55, %v534_v56 }
 0x183   : > { %3782 = vmatpush1.bf16.msra.mxu0 %v4680_v62  ;;  %3868 = vmatpush1.bf16.msra.mxu1 %v4682_v63  ;;  %v541_v62 = vld [vmem:[%s5651_s21 + $0x5a0] sm:$0xff] }
 0x184   : > { %3783 = vmatprep.subr.bf16.mxu0 %v4697_v0  ;;  %3869 = vmatprep.subr.bf16.mxu1 %v4699_v1  ;;  %v549_v63 = vld [vmem:[%s5651_s21 + $0x5e0] sm:$0xff]  ;;  %v542_v0 = vld [vmem:[%s5651_s21 + $0x5a8] sm:$0xff] }
 0x185   : > { %v550_v1 = vld [vmem:[%s5651_s21 + $0x5e8] sm:$0xff]  ;;  %v4825_v4 = vcombine.high %v541_v62, %v549_v63  ;;  %v4824_v10 = vcombine.low %v541_v62, %v549_v63 }
 0x186   : > { %v4827_v5 = vcombine.high %v542_v0, %v550_v1  ;;  %v4826_v11 = vcombine.low %v542_v0, %v550_v1 }
 0x187   : > { %3784 = vmatpush1.bf16.msra.mxu0 %v4696_v6  ;;  %3870 = vmatpush1.bf16.msra.mxu1 %v4698_v7  ;;  %v557_v6 = vld [vmem:[%s5651_s21 + $0x620] sm:$0xff] }
 0x188   : > { %3785 = vmatprep.subr.bf16.mxu0 %v4713_v8  ;;  %3871 = vmatprep.subr.bf16.mxu1 %v4715_v9  ;;  %v565_v7 = vld [vmem:[%s5651_s21 + $0x660] sm:$0xff]  ;;  %v558_v8 = vld [vmem:[%s5651_s21 + $0x628] sm:$0xff] }
 0x189   : > { %v566_v9 = vld [vmem:[%s5651_s21 + $0x668] sm:$0xff]  ;;  %v4841_v12 = vcombine.high %v557_v6, %v565_v7  ;;  %v4840_v19 = vcombine.low %v557_v6, %v565_v7  ;;  %v4224_v6 = vlaneseq }
 0x18a   : > { %v4843_v13 = vcombine.high %v558_v8, %v566_v9  ;;  %v4842_v20 = vcombine.low %v558_v8, %v566_v9 }
 0x18b   : > { %3786 = vmatpush1.bf16.msra.mxu0 %v4712_v14  ;;  %3872 = vmatpush1.bf16.msra.mxu1 %v4714_v16  ;;  %v573_v14 = vld [vmem:[%s5651_s21 + $0x6a0] sm:$0xff] }
 0x18c   : > { %3787 = vmatprep.subr.bf16.mxu0 %v4729_v17  ;;  %3873 = vmatprep.subr.bf16.mxu1 %v4731_v18  ;;  %v581_v16 = vld [vmem:[%s5651_s21 + $0x6e0] sm:$0xff]  ;;  %v574_v17 = vld [vmem:[%s5651_s21 + $0x6a8] sm:$0xff] }
 0x18d   : > { %v582_v18 = vld [vmem:[%s5651_s21 + $0x6e8] sm:$0xff]  ;;  %v4857_v21 = vcombine.high %v573_v14, %v581_v16  ;;  %v4856_v29 = vcombine.low %v573_v14, %v581_v16  ;;  %v6028_v16 = vshrl.u32 %v4224_v6, 7 }
 0x18e   : > { %v4859_v22 = vcombine.high %v574_v17, %v582_v18  ;;  %v4858_v30 = vcombine.low %v574_v17, %v582_v18  ;;  %v694_v14 = vld [vmem:[%s5651_s21 + $0xa68] sm:$0xff] }
 0x18f   : > { %3788 = vmatpush1.bf16.msra.mxu0 %v4728_v23  ;;  %3874 = vmatpush1.bf16.msra.mxu1 %v4730_v24  ;;  %v589_v23 = vld [vmem:[%s5651_s21 + $0x720] sm:$0xff] }
 0x190   : > { %3789 = vmatprep.subr.bf16.mxu0 %v4745_v27  ;;  %3875 = vmatprep.subr.bf16.mxu1 %v4747_v28  ;;  %v597_v24 = vld [vmem:[%s5651_s21 + $0x760] sm:$0xff]  ;;  %v590_v27 = vld [vmem:[%s5651_s21 + $0x728] sm:$0xff] }
 0x191   : > { %v598_v28 = vld [vmem:[%s5651_s21 + $0x768] sm:$0xff]  ;;  %v4873_v31 = vcombine.high %v589_v23, %v597_v24  ;;  %v4872_v37 = vcombine.low %v589_v23, %v597_v24  ;;  %v4226_v23 = vsub.s32 0, %v6028_v16 }
 0x192   : > { %v4875_v32 = vcombine.high %v590_v27, %v598_v28  ;;  %v4874_v38 = vcombine.low %v590_v27, %v598_v28  ;;  %v702_v24 = vld [vmem:[%s5651_s21 + $0xaa8] sm:$0xff] }
 0x193   : > { %3790 = vmatpush1.bf16.msra.mxu0 %v4744_v33  ;;  %3876 = vmatpush1.bf16.msra.mxu1 %v4746_v34  ;;  %v605_v33 = vld [vmem:[%s5651_s21 + $0x7a0] sm:$0xff]  ;;  %v710_v27 = vld [vmem:[%s5651_s21 + $0xae8] sm:$0xff] }
 0x194   : > { %3791 = vmatprep.subr.bf16.mxu0 %v4761_v35  ;;  %3877 = vmatprep.subr.bf16.mxu1 %v4763_v36  ;;  %v613_v34 = vld [vmem:[%s5651_s21 + $0x7e0] sm:$0xff]  ;;  %v606_v35 = vld [vmem:[%s5651_s21 + $0x7a8] sm:$0xff] }
 0x195   : > { %v614_v36 = vld [vmem:[%s5651_s21 + $0x7e8] sm:$0xff]  ;;  %v4889_v39 = vcombine.high %v605_v33, %v613_v34  ;;  %v4888_v45 = vcombine.low %v605_v33, %v613_v34  ;;  %v4238_v33 = vsub.s32 3, %v6028_v16 }
 0x196   : > { %v4891_v40 = vcombine.high %v606_v35, %v614_v36  ;;  %v4890_v46 = vcombine.low %v606_v35, %v614_v36  ;;  %v4987_v35 = vcombine.high %v702_v24, %v710_v27  ;;  %v717_v36 = vld [vmem:[%s5651_s21 + $0xb20] sm:$0xff] }
 0x197   : > { %3792 = vmatpush1.bf16.msra.mxu0 %v4760_v41  ;;  %3878 = vmatpush1.bf16.msra.mxu1 %v4762_v42  ;;  %v621_v41 = vld [vmem:[%s5651_s21 + $0x820] sm:$0xff] }
 0x198   : > { %3793 = vmatprep.subr.bf16.mxu0 %v4777_v43  ;;  %3879 = vmatprep.subr.bf16.mxu1 %v4779_v44  ;;  %v629_v42 = vld [vmem:[%s5651_s21 + $0x860] sm:$0xff]  ;;  %v622_v43 = vld [vmem:[%s5651_s21 + $0x828] sm:$0xff] }
 0x199   : > { %v630_v44 = vld [vmem:[%s5651_s21 + $0x868] sm:$0xff]  ;;  %v4905_v47 = vcombine.high %v621_v41, %v629_v42  ;;  %v4904_v53 = vcombine.low %v621_v41, %v629_v42 }
 0x19a   : > { %v4907_v48 = vcombine.high %v622_v43, %v630_v44  ;;  %v4906_v54 = vcombine.low %v622_v43, %v630_v44 }
 0x19b   : > { %3794 = vmatpush1.bf16.msra.mxu0 %v4776_v49  ;;  %3880 = vmatpush1.bf16.msra.mxu1 %v4778_v50  ;;  %v637_v49 = vld [vmem:[%s5651_s21 + $0x8a0] sm:$0xff] }
 0x19c   : > { %3795 = vmatprep.subr.bf16.mxu0 %v4793_v51  ;;  %3881 = vmatprep.subr.bf16.mxu1 %v4795_v52  ;;  %v645_v50 = vld [vmem:[%s5651_s21 + $0x8e0] sm:$0xff]  ;;  %v638_v51 = vld [vmem:[%s5651_s21 + $0x8a8] sm:$0xff] }
 0x19d   : > { %v646_v52 = vld [vmem:[%s5651_s21 + $0x8e8] sm:$0xff]  ;;  %v4921_v55 = vcombine.high %v637_v49, %v645_v50  ;;  %v4920_v62 = vcombine.low %v637_v49, %v645_v50  ;;  %v733_v49 = vld [vmem:[%s5651_s21 + $0xba0] sm:$0xff] }
 0x19e   : > { %v4923_v56 = vcombine.high %v638_v51, %v646_v52  ;;  %v4922_v63 = vcombine.low %v638_v51, %v646_v52  ;;  %v741_v50 = vld [vmem:[%s5651_s21 + $0xbe0] sm:$0xff] }
 0x19f   : > { %3796 = vmatpush1.bf16.msra.mxu0 %v4792_v57  ;;  %3882 = vmatpush1.bf16.msra.mxu1 %v4794_v59  ;;  %v653_v57 = vld [vmem:[%s5651_s21 + $0x920] sm:$0xff] }
 0x1a0   : > { %3797 = vmatprep.subr.bf16.mxu0 %v4809_v60  ;;  %3883 = vmatprep.subr.bf16.mxu1 %v4811_v61  ;;  %v661_v59 = vld [vmem:[%s5651_s21 + $0x960] sm:$0xff]  ;;  %v654_v60 = vld [vmem:[%s5651_s21 + $0x928] sm:$0xff] }
 0x1a1   : > { %v662_v61 = vld [vmem:[%s5651_s21 + $0x968] sm:$0xff]  ;;  %v4937_v0 = vcombine.high %v653_v57, %v661_v59  ;;  %v4936_v7 = vcombine.low %v653_v57, %v661_v59 }
 0x1a2   : > { %v4939_v1 = vcombine.high %v654_v60, %v662_v61  ;;  %v4938_v8 = vcombine.low %v654_v60, %v662_v61 }
 0x1a3   : > { %3798 = vmatpush1.bf16.msra.mxu0 %v4808_v2  ;;  %3884 = vmatpush1.bf16.msra.mxu1 %v4810_v3  ;;  %v669_v2 = vld [vmem:[%s5651_s21 + $0x9a0] sm:$0xff] }
 0x1a4   : > { %3799 = vmatprep.subr.bf16.mxu0 %v4825_v4  ;;  %3885 = vmatprep.subr.bf16.mxu1 %v4827_v5  ;;  %v677_v3 = vld [vmem:[%s5651_s21 + $0x9e0] sm:$0xff]  ;;  %v670_v4 = vld [vmem:[%s5651_s21 + $0x9a8] sm:$0xff] }
 0x1a5   : > { %v678_v5 = vld [vmem:[%s5651_s21 + $0x9e8] sm:$0xff]  ;;  %v4953_v9 = vcombine.high %v669_v2, %v677_v3  ;;  %v4952_v17 = vcombine.low %v669_v2, %v677_v3  ;;  %v5017_v3 = vcombine.high %v733_v49, %v741_v50 }
 0x1a6   : > { %v4954_v18 = vcombine.low %v670_v4, %v678_v5 }
 0x1a7   : > { %3800 = vmatpush1.bf16.msra.mxu0 %v4824_v10  ;;  %3886 = vmatpush1.bf16.msra.mxu1 %v4826_v11  ;;  %v4955_v10 = vcombine.high %v670_v4, %v678_v5  ;;  %v685_v11 = vld [vmem:[%s5651_s21 + $0xa20] sm:$0xff] }
 0x1a8   : > { %3801 = vmatprep.subr.bf16.mxu0 %v4841_v12  ;;  %3887 = vmatprep.subr.bf16.mxu1 %v4843_v13  ;;  %v693_v12 = vld [vmem:[%s5651_s21 + $0xa60] sm:$0xff]  ;;  %v686_v13 = vld [vmem:[%s5651_s21 + $0xa28] sm:$0xff] }
 0x1a9   : > { %v4968_v28 = vcombine.low %v685_v11, %v693_v12 }
 0x1ab   : > { %3802 = vmatpush1.bf16.msra.mxu0 %v4840_v19  ;;  %3888 = vmatpush1.bf16.msra.mxu1 %v4842_v20  ;;  %v4969_v19 = vcombine.high %v685_v11, %v693_v12  ;;  %v4971_v20 = vcombine.high %v686_v13, %v694_v14 }
 0x1ac   : > { %3803 = vmatprep.subr.bf16.mxu0 %v4857_v21  ;;  %3889 = vmatprep.subr.bf16.mxu1 %v4859_v22  ;;  %v701_v21 = vld [vmem:[%s5651_s21 + $0xaa0] sm:$0xff] }
 0x1ad   : > { %v709_v22 = vld [vmem:[%s5651_s21 + $0xae0] sm:$0xff] }
 0x1ae   : > { %v4985_v34 = vcombine.high %v701_v21, %v709_v22  ;;  %v4984_v43 = vcombine.low %v701_v21, %v709_v22 }
 0x1af   : > { %3804 = vmatpush1.bf16.msra.mxu0 %v4856_v29  ;;  %3890 = vmatpush1.bf16.msra.mxu1 %v4858_v30  ;;  %v6038_v29 = vld [vmem:[%s6035_s30] sm:$0xff]  ;;  %v4234_v30 = vsub.s32 2, %v6028_v16 }
 0x1b0   : > { %3805 = vmatprep.subr.bf16.mxu0 %v4873_v31  ;;  %3891 = vmatprep.subr.bf16.mxu1 %v4875_v32  ;;  %v4230_v31 = vsub.s32 1, %v6028_v16  ;;  %v4970_v32 = vcombine.low %v686_v13, %v694_v14  ;;  %v4239_v44 = vrot.slane %v6038_v29, %v4238_v33  ;;  %v750_v13 = vld [vmem:[%s5651_s21 + $0xc28] sm:$0xff] }
 0x1b1   : > { %v4235_v41 = vrot.slane %v6038_v29, %v4234_v30  ;;  %v758_v14 = vld [vmem:[%s5651_s21 + $0xc68] sm:$0xff] }
 0x1b2   : > { %v4231_v42 = vrot.slane %v6038_v29, %v4230_v31  ;;  %v5035_v22 = vcombine.high %v750_v13, %v758_v14 }
 0x1b3   : > { %3806 = vmatpush1.bf16.msra.mxu0 %v4872_v37  ;;  %3892 = vmatpush1.bf16.msra.mxu1 %v4874_v38  ;;  %v725_v37 = vld [vmem:[%s5651_s21 + $0xb60] sm:$0xff]  ;;  %v4227_v38 = vrot.slane %v6038_v29, %v4226_v23 }
 0x1b4   : > { %3807 = vmatprep.subr.bf16.mxu0 %v4889_v39  ;;  %3893 = vmatprep.subr.bf16.mxu1 %v4891_v40  ;;  %v718_v39 = vld [vmem:[%s5651_s21 + $0xb28] sm:$0xff]  ;;  %v5000_v61 = vcombine.low %v717_v36, %v725_v37 }
 0x1b5   : > { %v726_v40 = vld [vmem:[%s5651_s21 + $0xb68] sm:$0xff] }
 0x1b7   : > { %3808 = vmatpush1.bf16.msra.mxu0 %v4888_v45  ;;  %3894 = vmatpush1.bf16.msra.mxu1 %v4890_v46  ;;  %v4986_v45 = vcombine.low %v702_v24, %v710_v27  ;;  %v5001_v46 = vcombine.high %v717_v36, %v725_v37  ;;  %v765_v24 = vld [vmem:[%s5651_s21 + $0xca0] sm:$0xff] }
 0x1b8   : > { %3820 = vmatprep.subr.bf16.mxu0 %v4905_v47  ;;  %3906 = vmatprep.subr.bf16.mxu1 %v4907_v48  ;;  %v5003_v48 = vcombine.high %v718_v39, %v726_v40  ;;  %v773_v27 = vld [vmem:[%s5651_s21 + $0xce0] sm:$0xff] }
 0x1b9   : > { %v5049_v36 = vcombine.high %v765_v24, %v773_v27 }
 0x1ba   : > { %3810 = vmatmul.mubr.bf16.vlgmr.msra.gmra.mrb[8].mxu0 %v5732_v15  ;;  %3896 = vmatmul.mubr.bf16.vlgmr.msra.gmra.mrb[8].mxu1 %v5732_v15 }
 0x1bb   : > { %3821 = vmatpush1.bf16.msra.mxu0 %v4904_v53  ;;  %3907 = vmatpush1.bf16.msra.mxu1 %v4906_v54  ;;  %v734_v54 = vld [vmem:[%s5651_s21 + $0xba8] sm:$0xff] }
 0x1bc   : > { %3822 = vmatprep.subr.bf16.mxu0 %v4921_v55  ;;  %3908 = vmatprep.subr.bf16.mxu1 %v4923_v56  ;;  %v742_v55 = vld [vmem:[%s5651_s21 + $0xbe8] sm:$0xff] }
 0x1bd   : > { %3852 = vmatprep.mubr.bf16.mxu0 %v5737_v25  ;;  %3938 = vmatprep.mubr.bf16.mxu1 %v5737_v25 }
 0x1bf   : > { %3823 = vmatpush1.bf16.msra.mxu0 %v4920_v62  ;;  %3909 = vmatpush1.bf16.msra.mxu1 %v4922_v63  ;;  %v5002_v62 = vcombine.low %v718_v39, %v726_v40  ;;  %v789_v39 = vld [vmem:[%s5651_s21 + $0xd60] sm:$0xff]  ;;  %v782_v40 = vld [vmem:[%s5651_s21 + $0xd28] sm:$0xff] }
 0x1c0   : > { %3824 = vmatprep.subr.bf16.mxu0 %v4937_v0  ;;  %3910 = vmatprep.subr.bf16.mxu1 %v4939_v1 }
 0x1c3   : > { %3825 = vmatpush1.bf16.msra.mxu0 %v4936_v7  ;;  %3911 = vmatpush1.bf16.msra.mxu1 %v4938_v8  ;;  %v5019_v8 = vcombine.high %v734_v54, %v742_v55 }
 0x1c4   : > { %3826 = vmatprep.subr.bf16.mxu0 %v4953_v9  ;;  %3912 = vmatprep.subr.bf16.mxu1 %v4955_v10  ;;  %v749_v9 = vld [vmem:[%s5651_s21 + $0xc20] sm:$0xff] }
 0x1c5   : > { %v757_v10 = vld [vmem:[%s5651_s21 + $0xc60] sm:$0xff] }
 0x1c6   : > { %v5033_v21 = vcombine.high %v749_v9, %v757_v10 }
 0x1c7   : > { %3827 = vmatpush1.bf16.msra.mxu0 %v4952_v17  ;;  %3913 = vmatpush1.bf16.msra.mxu1 %v4954_v18  ;;  %v5016_v18 = vcombine.low %v733_v49, %v741_v50  ;;  %v806_v49 = vld [vmem:[%s5651_s21 + $0xde8] sm:$0xff] }
 0x1c8   : > { %3828 = vmatprep.subr.bf16.mxu0 %v4969_v19  ;;  %3914 = vmatprep.subr.bf16.mxu1 %v4971_v20  ;;  %v5018_v20 = vcombine.low %v734_v54, %v742_v55  ;;  %v813_v54 = vld [vmem:[%s5651_s21 + $0xe20] sm:$0xff] }
 0x1c9   : > { %v821_v55 = vld [vmem:[%s5651_s21 + $0xe60] sm:$0xff] }
 0x1cb   : > { %3829 = vmatpush1.bf16.msra.mxu0 %v4968_v28  ;;  %3915 = vmatpush1.bf16.msra.mxu1 %v4970_v32  ;;  %v766_v28 = vld [vmem:[%s5651_s21 + $0xca8] sm:$0xff] }
 0x1cc   : > { %3830 = vmatprep.subr.bf16.mxu0 %v4985_v34  ;;  %3916 = vmatprep.subr.bf16.mxu1 %v4987_v35  ;;  %v774_v32 = vld [vmem:[%s5651_s21 + $0xce8] sm:$0xff]  ;;  %v5032_v34 = vcombine.low %v749_v9, %v757_v10  ;;  %v5034_v35 = vcombine.low %v750_v13, %v758_v14 }
 0x1cd   : > { %v3510_v47 = vpop.f32.mrb[0].mxu0  ;;  %v3596_v52 = vpop.f32.mrb[0].mxu1  ;;  %v5051_v37 = vcombine.high %v766_v28, %v774_v32  ;;  %v846_v9 = vld [vmem:[%s5651_s21 + $0xf28] sm:$0xff] }
 0x1ce   : > { %v4304_v51 = vadd.f32 %v4227_v38, %v3510_v47  ;;  %v3512_v53 = vpop.f32.mrb[1].mxu0  ;;  %v4306_v56 = vadd.f32 %v4235_v41, %v3596_v52  ;;  %v3598_v59 = vpop.f32.mrb[1].mxu1  ;;  %v805_v47 = vld [vmem:[%s5651_s21 + $0xde0] sm:$0xff]  ;;  %v854_v10 = vld [vmem:[%s5651_s21 + $0xf68] sm:$0xff] }
 0x1cf   : > { %v4305_v57 = vadd.f32 %v4231_v42, %v3512_v53  ;;  %v3514_v60 = vpop.f32.mrb[2].mxu0  ;;  %3831 = vmatpush1.bf16.msra.mxu0 %v4984_v43  ;;  %v4307_v63 = vadd.f32 %v4239_v44, %v3598_v59  ;;  %v3600_v1 = vpop.f32.mrb[2].mxu1  ;;  %3917 = vmatpush1.bf16.msra.mxu1 %v4986_v45  ;;  %v5050_v43 = vcombine.low %v766_v28, %v774_v32  ;;  %v367_v28 = vld [vmem:[%s5651_s21 + $0x30] sm:$0xff] }
 0x1d0   : > { %v4320_v0 = vadd.f32 %v4227_v38, %v3514_v60  ;;  %v3516_v2 = vpop.f32.mrb[3].mxu0  ;;  %3832 = vmatprep.subr.bf16.mxu0 %v5001_v46  ;;  %v4322_v5 = vadd.f32 %v4235_v41, %v3600_v1  ;;  %v3602_v7 = vpop.f32.mrb[3].mxu1  ;;  %3918 = vmatprep.subr.bf16.mxu1 %v5003_v48  ;;  %v781_v38 = vld [vmem:[%s5651_s21 + $0xd20] sm:$0xff]  ;;  %v790_v41 = vld [vmem:[%s5651_s21 + $0xd68] sm:$0xff]  ;;  %v5131_v14 = vcombine.high %v846_v9, %v854_v10  ;;  %v375_v32 = vld [vmem:[%s5651_s21 + $0x70] sm:$0xff] }
 0x1d1   : > { %v5175_v4 = vpack.c.bf16 %v4305_v57, %v4304_v51  ;;  %v4321_v6 = vadd.f32 %v4231_v42, %v3516_v2  ;;  %v5176_v11 = vpack.c.bf16 %v4307_v63, %v4306_v56  ;;  %v4323_v12 = vadd.f32 %v4239_v44, %v3602_v7  ;;  %v797_v46 = vld [vmem:[%s5651_s21 + $0xda0] sm:$0xff]  ;;  %v798_v48 = vld [vmem:[%s5651_s21 + $0xda8] sm:$0xff] }
 0x1d2   : > { %v5048_v42 = vcombine.low %v765_v24, %v773_v27  ;;  %v5065_v44 = vcombine.high %v781_v38, %v789_v39  ;;  %v5067_v45 = vcombine.high %v782_v40, %v790_v41  ;;  %v5064_v50 = vcombine.low %v781_v38, %v789_v39  ;;  %v814_v56 = vld [vmem:[%s5651_s21 + $0xe28] sm:$0xff]  ;;  %v829_v63 = vld [vmem:[%s5651_s21 + $0xea0] sm:$0xff] }
 0x1d3   : > { %4432 = vst [vmem:[%s6070_s4] sm:$0xff] %v5175_v4  ;;  %v5183_v17 = vpack.c.bf16 %v4321_v6, %v4320_v0  ;;  %3833 = vmatpush1.bf16.msra.mxu0 %v5000_v61  ;;  %4433 = vst [vmem:[%s6070_s4 + $0x8] sm:$0xff] %v5176_v11  ;;  %v5184_v19 = vpack.c.bf16 %v4323_v12, %v4322_v5  ;;  %3919 = vmatpush1.bf16.msra.mxu1 %v5002_v62  ;;  %v822_v57 = vld [vmem:[%s5651_s21 + $0xe68] sm:$0xff]  ;;  %v837_v0 = vld [vmem:[%s5651_s21 + $0xee0] sm:$0xff] }
 0x1d4   : > { %3834 = vmatprep.subr.bf16.mxu0 %v5017_v3  ;;  %3920 = vmatprep.subr.bf16.mxu1 %v5019_v8  ;;  %v5066_v51 = vcombine.low %v782_v40, %v790_v41  ;;  %v5081_v52 = vcombine.high %v797_v46, %v805_v47  ;;  %v5083_v53 = vcombine.high %v798_v48, %v806_v49  ;;  %v830_v1 = vld [vmem:[%s5651_s21 + $0xea8] sm:$0xff]  ;;  %v845_v7 = vld [vmem:[%s5651_s21 + $0xf20] sm:$0xff]  ;;  %v383_v40 = vld [vmem:[%s5651_s21 + $0xb0] sm:$0xff] }
 0x1d5   : > { %4440 = vst [vmem:[%s6070_s4 + $0x40] sm:$0xff] %v5183_v17  ;;  %4441 = vst [vmem:[%s6070_s4 + $0x48] sm:$0xff] %v5184_v19  ;;  %v5080_v59 = vcombine.low %v797_v46, %v805_v47  ;;  %v5082_v60 = vcombine.low %v798_v48, %v806_v49  ;;  %v5097_v61 = vcombine.high %v813_v54, %v821_v55  ;;  %v838_v2 = vld [vmem:[%s5651_s21 + $0xee8] sm:$0xff]  ;;  %v853_v8 = vld [vmem:[%s5651_s21 + $0xf60] sm:$0xff] }
 0x1d6   : > { %v5099_v62 = vcombine.high %v814_v56, %v822_v57  ;;  %v5096_v3 = vcombine.low %v813_v54, %v821_v55  ;;  %v5098_v4 = vcombine.low %v814_v56, %v822_v57  ;;  %v5113_v5 = vcombine.high %v829_v63, %v837_v0  ;;  %v861_v17 = vld [vmem:[%s5651_s21 + $0xfa0] sm:$0xff]  ;;  %v862_v19 = vld [vmem:[%s5651_s21 + $0xfa8] sm:$0xff]  ;;  %v391_v41 = vld [vmem:[%s5651_s21 + $0xf0] sm:$0xff] }
 0x1d7   : > { %3835 = vmatpush1.bf16.msra.mxu0 %v5016_v18  ;;  %3921 = vmatpush1.bf16.msra.mxu1 %v5018_v20  ;;  %v5115_v6 = vcombine.high %v830_v1, %v838_v2  ;;  %v5112_v11 = vcombine.low %v829_v63, %v837_v0  ;;  %v5114_v12 = vcombine.low %v830_v1, %v838_v2  ;;  %v869_v18 = vld [vmem:[%s5651_s21 + $0xfe0] sm:$0xff]  ;;  %v870_v20 = vld [vmem:[%s5651_s21 + $0xfe8] sm:$0xff]  ;;  %v399_v48 = vld [vmem:[%s5651_s21 + $0x130] sm:$0xff] }
 0x1d8   : > { %3836 = vmatprep.subr.bf16.mxu0 %v5033_v21  ;;  %3922 = vmatprep.subr.bf16.mxu1 %v5035_v22  ;;  %v5129_v13 = vcombine.high %v845_v7, %v853_v8  ;;  %v5128_v21 = vcombine.low %v845_v7, %v853_v8  ;;  %v5130_v22 = vcombine.low %v846_v9, %v854_v10  ;;  %v407_v49 = vld [vmem:[%s5651_s21 + $0x170] sm:$0xff]  ;;  %v448_v10 = vld [vmem:[%s5651_s21 + $0x2b8] sm:$0xff] }
 0x1d9   : > { %v5145_v24 = vcombine.high %v861_v17, %v869_v18  ;;  %v5147_v27 = vcombine.high %v862_v19, %v870_v20  ;;  %v4653_v38 = vcombine.high %v367_v28, %v375_v32  ;;  %v4669_v46 = vcombine.high %v383_v40, %v391_v41  ;;  %v415_v56 = vld [vmem:[%s5651_s21 + $0x1b0] sm:$0xff] }
 0x1da   : > { %v4685_v54 = vcombine.high %v399_v48, %v407_v49  ;;  %v423_v57 = vld [vmem:[%s5651_s21 + $0x1f0] sm:$0xff] }
 0x1db   : > { %3837 = vmatpush1.bf16.msra.mxu0 %v5032_v34  ;;  %3923 = vmatpush1.bf16.msra.mxu1 %v5034_v35  ;;  %v368_v34 = vld [vmem:[%s5651_s21 + $0x38] sm:$0xff]  ;;  %v4701_v63 = vcombine.high %v415_v56, %v423_v57  ;;  %v431_v1 = vld [vmem:[%s5651_s21 + $0x230] sm:$0xff] }
 0x1dc   : > { %3838 = vmatprep.subr.bf16.mxu0 %v5049_v36  ;;  %3924 = vmatprep.subr.bf16.mxu1 %v5051_v37  ;;  %v376_v35 = vld [vmem:[%s5651_s21 + $0x78] sm:$0xff]  ;;  %v5144_v36 = vcombine.low %v861_v17, %v869_v18  ;;  %v5146_v37 = vcombine.low %v862_v19, %v870_v20  ;;  %v439_v2 = vld [vmem:[%s5651_s21 + $0x270] sm:$0xff] }
 0x1dd   : > { %v4655_v39 = vcombine.high %v368_v34, %v376_v35  ;;  %v447_v8 = vld [vmem:[%s5651_s21 + $0x2b0] sm:$0xff]  ;;  %v464_v20 = vld [vmem:[%s5651_s21 + $0x338] sm:$0xff] }
 0x1de   : > { %v455_v9 = vld [vmem:[%s5651_s21 + $0x2f0] sm:$0xff] }
 0x1df   : > { %3839 = vmatpush1.bf16.msra.mxu0 %v5048_v42  ;;  %3925 = vmatpush1.bf16.msra.mxu1 %v5050_v43  ;;  %v384_v42 = vld [vmem:[%s5651_s21 + $0xb8] sm:$0xff]  ;;  %v463_v18 = vld [vmem:[%s5651_s21 + $0x330] sm:$0xff] }
 0x1e0   : > { %3840 = vmatprep.subr.bf16.mxu0 %v5065_v44  ;;  %3926 = vmatprep.subr.bf16.mxu1 %v5067_v45  ;;  %v392_v43 = vld [vmem:[%s5651_s21 + $0xf8] sm:$0xff]  ;;  %v4652_v44 = vcombine.low %v367_v28, %v375_v32  ;;  %v4654_v45 = vcombine.low %v368_v34, %v376_v35  ;;  %v471_v19 = vld [vmem:[%s5651_s21 + $0x370] sm:$0xff] }
 0x1e1   : > { %v4671_v47 = vcombine.high %v384_v42, %v392_v43  ;;  %v479_v32 = vld [vmem:[%s5651_s21 + $0x3b0] sm:$0xff]  ;;  %v480_v35 = vld [vmem:[%s5651_s21 + $0x3b8] sm:$0xff] }
 0x1e2   : > { %v487_v34 = vld [vmem:[%s5651_s21 + $0x3f0] sm:$0xff] }
 0x1e3   : > { %3841 = vmatpush1.bf16.msra.mxu0 %v5064_v50  ;;  %3927 = vmatpush1.bf16.msra.mxu1 %v5066_v51  ;;  %v400_v50 = vld [vmem:[%s5651_s21 + $0x138] sm:$0xff] }
 0x1e4   : > { %3842 = vmatprep.subr.bf16.mxu0 %v5081_v52  ;;  %3928 = vmatprep.subr.bf16.mxu1 %v5083_v53  ;;  %v408_v51 = vld [vmem:[%s5651_s21 + $0x178] sm:$0xff]  ;;  %v4668_v52 = vcombine.low %v383_v40, %v391_v41  ;;  %v4670_v53 = vcombine.low %v384_v42, %v392_v43  ;;  %v495_v41 = vld [vmem:[%s5651_s21 + $0x430] sm:$0xff] }
 0x1e5   : > { %v4687_v55 = vcombine.high %v400_v50, %v408_v51  ;;  %v503_v42 = vld [vmem:[%s5651_s21 + $0x470] sm:$0xff]  ;;  %v496_v43 = vld [vmem:[%s5651_s21 + $0x438] sm:$0xff] }
 0x1e7   : > { %3843 = vmatpush1.bf16.msra.mxu0 %v5080_v59  ;;  %3929 = vmatpush1.bf16.msra.mxu1 %v5082_v60  ;;  %v416_v59 = vld [vmem:[%s5651_s21 + $0x1b8] sm:$0xff] }
 0x1e8   : > { %3844 = vmatprep.subr.bf16.mxu0 %v5097_v61  ;;  %3930 = vmatprep.subr.bf16.mxu1 %v5099_v62  ;;  %v424_v60 = vld [vmem:[%s5651_s21 + $0x1f8] sm:$0xff]  ;;  %v4684_v61 = vcombine.low %v399_v48, %v407_v49  ;;  %v4686_v62 = vcombine.low %v400_v50, %v408_v51  ;;  %v511_v49 = vld [vmem:[%s5651_s21 + $0x4b0] sm:$0xff] }
 0x1e9   : > { %v4703_v0 = vcombine.high %v416_v59, %v424_v60  ;;  %v519_v50 = vld [vmem:[%s5651_s21 + $0x4f0] sm:$0xff]  ;;  %v512_v51 = vld [vmem:[%s5651_s21 + $0x4b8] sm:$0xff] }
 0x1eb   : > { %3845 = vmatpush1.bf16.msra.mxu0 %v5096_v3  ;;  %3931 = vmatpush1.bf16.msra.mxu1 %v5098_v4  ;;  %v432_v3 = vld [vmem:[%s5651_s21 + $0x238] sm:$0xff] }
 0x1ec   : > { %3846 = vmatprep.subr.bf16.mxu0 %v5113_v5  ;;  %3932 = vmatprep.subr.bf16.mxu1 %v5115_v6  ;;  %v440_v4 = vld [vmem:[%s5651_s21 + $0x278] sm:$0xff]  ;;  %v4700_v5 = vcombine.low %v415_v56, %v423_v57  ;;  %v4717_v6 = vcombine.high %v431_v1, %v439_v2  ;;  %v527_v57 = vld [vmem:[%s5651_s21 + $0x530] sm:$0xff] }
 0x1ed   : > { %v4719_v7 = vcombine.high %v432_v3, %v440_v4 }
 0x1ef   : > { %3847 = vmatpush1.bf16.msra.mxu0 %v5112_v11  ;;  %3933 = vmatpush1.bf16.msra.mxu1 %v5114_v12  ;;  %v456_v11 = vld [vmem:[%s5651_s21 + $0x2f8] sm:$0xff]  ;;  %v4716_v12 = vcombine.low %v431_v1, %v439_v2  ;;  %v543_v2 = vld [vmem:[%s5651_s21 + $0x5b0] sm:$0xff] }
 0x1f0   : > { %3848 = vmatprep.subr.bf16.mxu0 %v5129_v13  ;;  %3934 = vmatprep.subr.bf16.mxu1 %v5131_v14  ;;  %v4718_v13 = vcombine.low %v432_v3, %v440_v4  ;;  %v4733_v14 = vcombine.high %v447_v8, %v455_v9  ;;  %v4735_v17 = vcombine.high %v448_v10, %v456_v11  ;;  %v551_v3 = vld [vmem:[%s5651_s21 + $0x5f0] sm:$0xff]  ;;  %v544_v4 = vld [vmem:[%s5651_s21 + $0x5b8] sm:$0xff] }
 0x1f3   : > { %3849 = vmatpush1.bf16.msra.mxu0 %v5128_v21  ;;  %3935 = vmatpush1.bf16.msra.mxu1 %v5130_v22  ;;  %v472_v21 = vld [vmem:[%s5651_s21 + $0x378] sm:$0xff]  ;;  %v4732_v22 = vcombine.low %v447_v8, %v455_v9  ;;  %v559_v9 = vld [vmem:[%s5651_s21 + $0x630] sm:$0xff] }
 0x1f4   : > { %3850 = vmatprep.subr.bf16.mxu0 %v5145_v24  ;;  %3936 = vmatprep.subr.bf16.mxu1 %v5147_v27  ;;  %v4734_v24 = vcombine.low %v448_v10, %v456_v11  ;;  %v4749_v27 = vcombine.high %v463_v18, %v471_v19  ;;  %v4751_v28 = vcombine.high %v464_v20, %v472_v21  ;;  %v567_v10 = vld [vmem:[%s5651_s21 + $0x670] sm:$0xff]  ;;  %v560_v11 = vld [vmem:[%s5651_s21 + $0x638] sm:$0xff] }
 0x1f7   : > { %3851 = vmatpush1.bf16.msra.mxu0 %v5144_v36  ;;  %3937 = vmatpush1.bf16.msra.mxu1 %v5146_v37  ;;  %v488_v36 = vld [vmem:[%s5651_s21 + $0x3f8] sm:$0xff]  ;;  %v4748_v37 = vcombine.low %v463_v18, %v471_v19  ;;  %v575_v19 = vld [vmem:[%s5651_s21 + $0x6b0] sm:$0xff] }
 0x1f8   : > { %3949 = vmatprep.subr.bf16.mxu0 %v4653_v38  ;;  %4035 = vmatprep.subr.bf16.mxu1 %v4655_v39  ;;  %v4750_v38 = vcombine.low %v464_v20, %v472_v21  ;;  %v4765_v39 = vcombine.high %v479_v32, %v487_v34  ;;  %v4767_v40 = vcombine.high %v480_v35, %v488_v36  ;;  %v583_v20 = vld [vmem:[%s5651_s21 + $0x6f0] sm:$0xff]  ;;  %v576_v21 = vld [vmem:[%s5651_s21 + $0x6b8] sm:$0xff] }
 0x1fa   : > { %3853 = vmatmul.mubr.bf16.vlgmr.msra.gmra.mrb[8].mxu0 %v5803_v26  ;;  %3939 = vmatmul.mubr.bf16.vlgmr.msra.gmra.mrb[8].mxu1 %v5803_v26 }
 0x1fb   : > { %3950 = vmatpush1.bf16.msra.mxu0 %v4652_v44  ;;  %4036 = vmatpush1.bf16.msra.mxu1 %v4654_v45  ;;  %v504_v44 = vld [vmem:[%s5651_s21 + $0x478] sm:$0xff]  ;;  %v4764_v45 = vcombine.low %v479_v32, %v487_v34  ;;  %v591_v34 = vld [vmem:[%s5651_s21 + $0x730] sm:$0xff] }
 0x1fc   : > { %3951 = vmatprep.subr.bf16.mxu0 %v4669_v46  ;;  %4037 = vmatprep.subr.bf16.mxu1 %v4671_v47  ;;  %v4766_v46 = vcombine.low %v480_v35, %v488_v36  ;;  %v4781_v47 = vcombine.high %v495_v41, %v503_v42  ;;  %v4783_v48 = vcombine.high %v496_v43, %v504_v44  ;;  %v599_v35 = vld [vmem:[%s5651_s21 + $0x770] sm:$0xff]  ;;  %v592_v36 = vld [vmem:[%s5651_s21 + $0x738] sm:$0xff] }
 0x1fd   : > { %3981 = vmatprep.mubr.bf16.mxu0 %v5687_v58  ;;  %4067 = vmatprep.mubr.bf16.mxu1 %v5687_v58  ;;  %v4702_v58 = vcombine.low %v416_v59, %v424_v60  ;;  %v535_v59 = vld [vmem:[%s5651_s21 + $0x570] sm:$0xff]  ;;  %v528_v60 = vld [vmem:[%s5651_s21 + $0x538] sm:$0xff] }
 0x1ff   : > { %3952 = vmatpush1.bf16.msra.mxu0 %v4668_v52  ;;  %4038 = vmatpush1.bf16.msra.mxu1 %v4670_v53  ;;  %v520_v52 = vld [vmem:[%s5651_s21 + $0x4f8] sm:$0xff]  ;;  %v4780_v53 = vcombine.low %v495_v41, %v503_v42  ;;  %v607_v42 = vld [vmem:[%s5651_s21 + $0x7b0] sm:$0xff] }
 0x200   : > { %3953 = vmatprep.subr.bf16.mxu0 %v4685_v54  ;;  %4039 = vmatprep.subr.bf16.mxu1 %v4687_v55  ;;  %v4782_v54 = vcombine.low %v496_v43, %v504_v44  ;;  %v4797_v55 = vcombine.high %v511_v49, %v519_v50  ;;  %v4799_v56 = vcombine.high %v512_v51, %v520_v52  ;;  %v615_v43 = vld [vmem:[%s5651_s21 + $0x7f0] sm:$0xff]  ;;  %v608_v44 = vld [vmem:[%s5651_s21 + $0x7b8] sm:$0xff] }
 0x203   : > { %3954 = vmatpush1.bf16.msra.mxu0 %v4684_v61  ;;  %4040 = vmatpush1.bf16.msra.mxu1 %v4686_v62  ;;  %v536_v61 = vld [vmem:[%s5651_s21 + $0x578] sm:$0xff]  ;;  %v4796_v62 = vcombine.low %v511_v49, %v519_v50  ;;  %v623_v50 = vld [vmem:[%s5651_s21 + $0x830] sm:$0xff] }
 0x204   : > { %3955 = vmatprep.subr.bf16.mxu0 %v4701_v63  ;;  %4041 = vmatprep.subr.bf16.mxu1 %v4703_v0  ;;  %v4798_v63 = vcombine.low %v512_v51, %v520_v52  ;;  %v4813_v0 = vcombine.high %v527_v57, %v535_v59  ;;  %v4815_v1 = vcombine.high %v528_v60, %v536_v61  ;;  %v631_v51 = vld [vmem:[%s5651_s21 + $0x870] sm:$0xff]  ;;  %v624_v52 = vld [vmem:[%s5651_s21 + $0x838] sm:$0xff] }
 0x207   : > { %3956 = vmatpush1.bf16.msra.mxu0 %v4700_v5  ;;  %4042 = vmatpush1.bf16.msra.mxu1 %v4702_v58  ;;  %v552_v5 = vld [vmem:[%s5651_s21 + $0x5f8] sm:$0xff]  ;;  %v4812_v58 = vcombine.low %v527_v57, %v535_v59  ;;  %v639_v59 = vld [vmem:[%s5651_s21 + $0x8b0] sm:$0xff] }
 0x208   : > { %3957 = vmatprep.subr.bf16.mxu0 %v4717_v6  ;;  %4043 = vmatprep.subr.bf16.mxu1 %v4719_v7  ;;  %v4814_v6 = vcombine.low %v528_v60, %v536_v61  ;;  %v4829_v7 = vcombine.high %v543_v2, %v551_v3  ;;  %v4831_v8 = vcombine.high %v544_v4, %v552_v5  ;;  %v647_v60 = vld [vmem:[%s5651_s21 + $0x8f0] sm:$0xff]  ;;  %v640_v61 = vld [vmem:[%s5651_s21 + $0x8b8] sm:$0xff] }
 0x20b   : > { %3958 = vmatpush1.bf16.msra.mxu0 %v4716_v12  ;;  %4044 = vmatpush1.bf16.msra.mxu1 %v4718_v13  ;;  %v568_v12 = vld [vmem:[%s5651_s21 + $0x678] sm:$0xff]  ;;  %v4828_v13 = vcombine.low %v543_v2, %v551_v3  ;;  %v655_v3 = vld [vmem:[%s5651_s21 + $0x930] sm:$0xff] }
 0x20c   : > { %3959 = vmatprep.subr.bf16.mxu0 %v4733_v14  ;;  %4045 = vmatprep.subr.bf16.mxu1 %v4735_v17  ;;  %v4830_v14 = vcombine.low %v544_v4, %v552_v5  ;;  %v4845_v17 = vcombine.high %v559_v9, %v567_v10  ;;  %v4847_v18 = vcombine.high %v560_v11, %v568_v12  ;;  %v663_v4 = vld [vmem:[%s5651_s21 + $0x970] sm:$0xff]  ;;  %v656_v5 = vld [vmem:[%s5651_s21 + $0x938] sm:$0xff] }
 0x20f   : > { %3960 = vmatpush1.bf16.msra.mxu0 %v4732_v22  ;;  %4046 = vmatpush1.bf16.msra.mxu1 %v4734_v24  ;;  %v584_v22 = vld [vmem:[%s5651_s21 + $0x6f8] sm:$0xff]  ;;  %v4844_v24 = vcombine.low %v559_v9, %v567_v10  ;;  %v671_v10 = vld [vmem:[%s5651_s21 + $0x9b0] sm:$0xff] }
 0x210   : > { %3961 = vmatprep.subr.bf16.mxu0 %v4749_v27  ;;  %4047 = vmatprep.subr.bf16.mxu1 %v4751_v28  ;;  %v4846_v27 = vcombine.low %v560_v11, %v568_v12  ;;  %v4861_v28 = vcombine.high %v575_v19, %v583_v20  ;;  %v4863_v32 = vcombine.high %v576_v21, %v584_v22  ;;  %v679_v11 = vld [vmem:[%s5651_s21 + $0x9f0] sm:$0xff]  ;;  %v672_v12 = vld [vmem:[%s5651_s21 + $0x9b8] sm:$0xff] }
 0x213   : > { %3962 = vmatpush1.bf16.msra.mxu0 %v4748_v37  ;;  %4048 = vmatpush1.bf16.msra.mxu1 %v4750_v38  ;;  %v600_v37 = vld [vmem:[%s5651_s21 + $0x778] sm:$0xff]  ;;  %v4860_v38 = vcombine.low %v575_v19, %v583_v20  ;;  %v687_v19 = vld [vmem:[%s5651_s21 + $0xa30] sm:$0xff] }
 0x214   : > { %3963 = vmatprep.subr.bf16.mxu0 %v4765_v39  ;;  %4049 = vmatprep.subr.bf16.mxu1 %v4767_v40  ;;  %v4862_v39 = vcombine.low %v576_v21, %v584_v22  ;;  %v4877_v40 = vcombine.high %v591_v34, %v599_v35  ;;  %v4879_v41 = vcombine.high %v592_v36, %v600_v37  ;;  %v695_v20 = vld [vmem:[%s5651_s21 + $0xa70] sm:$0xff]  ;;  %v688_v21 = vld [vmem:[%s5651_s21 + $0xa38] sm:$0xff] }
 0x215   : > { %v696_v22 = vld [vmem:[%s5651_s21 + $0xa78] sm:$0xff] }
 0x217   : > { %3964 = vmatpush1.bf16.msra.mxu0 %v4764_v45  ;;  %4050 = vmatpush1.bf16.msra.mxu1 %v4766_v46  ;;  %v616_v45 = vld [vmem:[%s5651_s21 + $0x7f8] sm:$0xff]  ;;  %v4876_v46 = vcombine.low %v591_v34, %v599_v35  ;;  %v711_v34 = vld [vmem:[%s5651_s21 + $0xaf0] sm:$0xff]  ;;  %v4242_v35 = vsub.s32 4, %v6028_v16 }
 0x218   : > { %3965 = vmatprep.subr.bf16.mxu0 %v4781_v47  ;;  %4051 = vmatprep.subr.bf16.mxu1 %v4783_v48  ;;  %v4878_v47 = vcombine.low %v592_v36, %v600_v37  ;;  %v4893_v48 = vcombine.high %v607_v42, %v615_v43  ;;  %v4895_v49 = vcombine.high %v608_v44, %v616_v45  ;;  %v704_v36 = vld [vmem:[%s5651_s21 + $0xab8] sm:$0xff] }
 0x219   : > { %v712_v37 = vld [vmem:[%s5651_s21 + $0xaf8] sm:$0xff] }
 0x21b   : > { %3966 = vmatpush1.bf16.msra.mxu0 %v4780_v53  ;;  %4052 = vmatpush1.bf16.msra.mxu1 %v4782_v54  ;;  %v632_v53 = vld [vmem:[%s5651_s21 + $0x878] sm:$0xff]  ;;  %v4892_v54 = vcombine.low %v607_v42, %v615_v43  ;;  %v4254_v42 = vsub.s32 7, %v6028_v16 }
 0x21c   : > { %3967 = vmatprep.subr.bf16.mxu0 %v4797_v55  ;;  %4053 = vmatprep.subr.bf16.mxu1 %v4799_v56  ;;  %v4894_v55 = vcombine.low %v608_v44, %v616_v45  ;;  %v4909_v56 = vcombine.high %v623_v50, %v631_v51  ;;  %v4911_v57 = vcombine.high %v624_v52, %v632_v53  ;;  %v719_v45 = vld [vmem:[%s5651_s21 + $0xb30] sm:$0xff] }
 0x21d   : > { %v4991_v44 = vcombine.high %v704_v36, %v712_v37 }
 0x21f   : > { %3968 = vmatpush1.bf16.msra.mxu0 %v4796_v62  ;;  %4054 = vmatpush1.bf16.msra.mxu1 %v4798_v63  ;;  %v648_v62 = vld [vmem:[%s5651_s21 + $0x8f8] sm:$0xff]  ;;  %v4908_v63 = vcombine.low %v623_v50, %v631_v51 }
 0x220   : > { %3969 = vmatprep.subr.bf16.mxu0 %v4813_v0  ;;  %4055 = vmatprep.subr.bf16.mxu1 %v4815_v1  ;;  %v4910_v0 = vcombine.low %v624_v52, %v632_v53  ;;  %v4925_v1 = vcombine.high %v639_v59, %v647_v60  ;;  %v4927_v2 = vcombine.high %v640_v61, %v648_v62 }
 0x221   : > { %v4255_v53 = vrot.slane %v6038_v29, %v4254_v42 }
 0x223   : > { %3970 = vmatpush1.bf16.msra.mxu0 %v4812_v58  ;;  %4056 = vmatpush1.bf16.msra.mxu1 %v4814_v6  ;;  %v664_v58 = vld [vmem:[%s5651_s21 + $0x978] sm:$0xff]  ;;  %v4924_v6 = vcombine.low %v639_v59, %v647_v60  ;;  %v735_v59 = vld [vmem:[%s5651_s21 + $0xbb0] sm:$0xff] }
 0x224   : > { %3971 = vmatprep.subr.bf16.mxu0 %v4829_v7  ;;  %4057 = vmatprep.subr.bf16.mxu1 %v4831_v8  ;;  %v4926_v7 = vcombine.low %v640_v61, %v648_v62  ;;  %v4941_v8 = vcombine.high %v655_v3, %v663_v4  ;;  %v4943_v9 = vcombine.high %v656_v5, %v664_v58  ;;  %v743_v60 = vld [vmem:[%s5651_s21 + $0xbf0] sm:$0xff] }
 0x227   : > { %3972 = vmatpush1.bf16.msra.mxu0 %v4828_v13  ;;  %4058 = vmatpush1.bf16.msra.mxu1 %v4830_v14  ;;  %v680_v13 = vld [vmem:[%s5651_s21 + $0x9f8] sm:$0xff]  ;;  %v4942_v14 = vcombine.low %v656_v5, %v664_v58 }
 0x228   : > { %3973 = vmatprep.subr.bf16.mxu0 %v4845_v17  ;;  %4059 = vmatprep.subr.bf16.mxu1 %v4847_v18  ;;  %v4957_v17 = vcombine.high %v671_v10, %v679_v11  ;;  %v4959_v18 = vcombine.high %v672_v12, %v680_v13 }
 0x22b   : > { %3974 = vmatpush1.bf16.msra.mxu0 %v4844_v24  ;;  %4060 = vmatpush1.bf16.msra.mxu1 %v4846_v27  ;;  %v4956_v24 = vcombine.low %v671_v10, %v679_v11  ;;  %v4973_v27 = vcombine.high %v687_v19, %v695_v20  ;;  %v5021_v10 = vcombine.high %v735_v59, %v743_v60 }
 0x22c   : > { %3975 = vmatprep.subr.bf16.mxu0 %v4861_v28  ;;  %4061 = vmatprep.subr.bf16.mxu1 %v4863_v32  ;;  %v4975_v28 = vcombine.high %v688_v21, %v696_v22  ;;  %v703_v32 = vld [vmem:[%s5651_s21 + $0xab0] sm:$0xff] }
 0x22d   : > { %v4989_v43 = vcombine.high %v703_v32, %v711_v34  ;;  %v4988_v52 = vcombine.low %v703_v32, %v711_v34 }
 0x22f   : > { %3976 = vmatpush1.bf16.msra.mxu0 %v4860_v38  ;;  %4062 = vmatpush1.bf16.msra.mxu1 %v4862_v39  ;;  %v4972_v38 = vcombine.low %v687_v19, %v695_v20  ;;  %v4250_v39 = vsub.s32 6, %v6028_v16 }
 0x230   : > { %3977 = vmatprep.subr.bf16.mxu0 %v4877_v40  ;;  %4063 = vmatprep.subr.bf16.mxu1 %v4879_v41  ;;  %v4246_v40 = vsub.s32 5, %v6028_v16  ;;  %v4974_v41 = vcombine.low %v688_v21, %v696_v22  ;;  %v752_v21 = vld [vmem:[%s5651_s21 + $0xc38] sm:$0xff] }
 0x231   : > { %v4251_v50 = vrot.slane %v6038_v29, %v4250_v39  ;;  %v760_v22 = vld [vmem:[%s5651_s21 + $0xc78] sm:$0xff] }
 0x232   : > { %v4247_v51 = vrot.slane %v6038_v29, %v4246_v40  ;;  %v5039_v34 = vcombine.high %v752_v21, %v760_v22 }
 0x233   : > { %3978 = vmatpush1.bf16.msra.mxu0 %v4876_v46  ;;  %4064 = vmatpush1.bf16.msra.mxu1 %v4878_v47  ;;  %v727_v46 = vld [vmem:[%s5651_s21 + $0xb70] sm:$0xff]  ;;  %v4243_v47 = vrot.slane %v6038_v29, %v4242_v35 }
 0x234   : > { %3979 = vmatprep.subr.bf16.mxu0 %v4893_v48  ;;  %4065 = vmatprep.subr.bf16.mxu1 %v4895_v49  ;;  %v720_v48 = vld [vmem:[%s5651_s21 + $0xb38] sm:$0xff]  ;;  %v5004_v29 = vcombine.low %v719_v45, %v727_v46 }
 0x235   : > { %v728_v49 = vld [vmem:[%s5651_s21 + $0xb78] sm:$0xff] }
 0x236   : > { %v5006_v58 = vcombine.low %v720_v48, %v728_v49 }
 0x237   : > { %3980 = vmatpush1.bf16.msra.mxu0 %v4892_v54  ;;  %4066 = vmatpush1.bf16.msra.mxu1 %v4894_v55  ;;  %v4990_v54 = vcombine.low %v704_v36, %v712_v37  ;;  %v5005_v55 = vcombine.high %v719_v45, %v727_v46  ;;  %v767_v36 = vld [vmem:[%s5651_s21 + $0xcb0] sm:$0xff] }
 0x238   : > { %3992 = vmatprep.subr.bf16.mxu0 %v4909_v56  ;;  %4078 = vmatprep.subr.bf16.mxu1 %v4911_v57  ;;  %v5007_v57 = vcombine.high %v720_v48, %v728_v49  ;;  %v775_v37 = vld [vmem:[%s5651_s21 + $0xcf0] sm:$0xff]  ;;  %v784_v49 = vld [vmem:[%s5651_s21 + $0xd38] sm:$0xff] }
 0x239   : > { %v5053_v45 = vcombine.high %v767_v36, %v775_v37  ;;  %v791_v48 = vld [vmem:[%s5651_s21 + $0xd70] sm:$0xff] }
 0x23a   : > { %3982 = vmatmul.mubr.bf16.vlgmr.msra.gmra.mrb[12].mxu0 %v5732_v15  ;;  %4068 = vmatmul.mubr.bf16.vlgmr.msra.gmra.mrb[12].mxu1 %v5732_v15  ;;  %v4940_v15 = vcombine.low %v655_v3, %v663_v4 }
 0x23b   : > { %3993 = vmatpush1.bf16.msra.mxu0 %v4908_v63  ;;  %4079 = vmatpush1.bf16.msra.mxu1 %v4910_v0  ;;  %v736_v0 = vld [vmem:[%s5651_s21 + $0xbb8] sm:$0xff] }
 0x23c   : > { %3994 = vmatprep.subr.bf16.mxu0 %v4925_v1  ;;  %4080 = vmatprep.subr.bf16.mxu1 %v4927_v2  ;;  %v744_v1 = vld [vmem:[%s5651_s21 + $0xbf8] sm:$0xff] }
 0x23d   : > { %4024 = vmatprep.mubr.bf16.mxu0 %v5737_v25  ;;  %4110 = vmatprep.mubr.bf16.mxu1 %v5737_v25  ;;  %v4958_v25 = vcombine.low %v672_v12, %v680_v13 }
 0x23f   : > { %3995 = vmatpush1.bf16.msra.mxu0 %v4924_v6  ;;  %4081 = vmatpush1.bf16.msra.mxu1 %v4926_v7 }
 0x240   : > { %3996 = vmatprep.subr.bf16.mxu0 %v4941_v8  ;;  %4082 = vmatprep.subr.bf16.mxu1 %v4943_v9 }
 0x243   : > { %3997 = vmatpush1.bf16.msra.mxu0 %v4940_v15  ;;  %4083 = vmatpush1.bf16.msra.mxu1 %v4942_v14  ;;  %v5023_v14 = vcombine.high %v736_v0, %v744_v1 }
 0x244   : > { %3998 = vmatprep.subr.bf16.mxu0 %v4957_v17  ;;  %4084 = vmatprep.subr.bf16.mxu1 %v4959_v18  ;;  %v751_v17 = vld [vmem:[%s5651_s21 + $0xc30] sm:$0xff] }
 0x245   : > { %v759_v18 = vld [vmem:[%s5651_s21 + $0xc70] sm:$0xff] }
 0x246   : > { %v5037_v32 = vcombine.high %v751_v17, %v759_v18 }
 0x247   : > { %3999 = vmatpush1.bf16.msra.mxu0 %v4956_v24  ;;  %4085 = vmatpush1.bf16.msra.mxu1 %v4958_v25  ;;  %v5020_v25 = vcombine.low %v735_v59, %v743_v60  ;;  %v808_v59 = vld [vmem:[%s5651_s21 + $0xdf8] sm:$0xff] }
 0x248   : > { %4000 = vmatprep.subr.bf16.mxu0 %v4973_v27  ;;  %4086 = vmatprep.subr.bf16.mxu1 %v4975_v28  ;;  %v5022_v28 = vcombine.low %v736_v0, %v744_v1  ;;  %v815_v0 = vld [vmem:[%s5651_s21 + $0xe30] sm:$0xff] }
 0x249   : > { %v823_v1 = vld [vmem:[%s5651_s21 + $0xe70] sm:$0xff] }
 0x24b   : > { %4001 = vmatpush1.bf16.msra.mxu0 %v4972_v38  ;;  %4087 = vmatpush1.bf16.msra.mxu1 %v4974_v41  ;;  %v768_v38 = vld [vmem:[%s5651_s21 + $0xcb8] sm:$0xff] }
 0x24c   : > { %4002 = vmatprep.subr.bf16.mxu0 %v4989_v43  ;;  %4088 = vmatprep.subr.bf16.mxu1 %v4991_v44  ;;  %v776_v41 = vld [vmem:[%s5651_s21 + $0xcf8] sm:$0xff]  ;;  %v5036_v43 = vcombine.low %v751_v17, %v759_v18  ;;  %v5038_v44 = vcombine.low %v752_v21, %v760_v22 }
 0x24d   : > { %v3682_v56 = vpop.f32.mrb[4].mxu0  ;;  %v3768_v62 = vpop.f32.mrb[4].mxu1  ;;  %v5055_v46 = vcombine.high %v768_v38, %v776_v41  ;;  %v848_v17 = vld [vmem:[%s5651_s21 + $0xf38] sm:$0xff] }
 0x24e   : > { %v4308_v61 = vadd.f32 %v4243_v47, %v3682_v56  ;;  %v3684_v63 = vpop.f32.mrb[5].mxu0  ;;  %v4310_v2 = vadd.f32 %v4251_v50, %v3768_v62  ;;  %v3770_v4 = vpop.f32.mrb[5].mxu1  ;;  %v807_v56 = vld [vmem:[%s5651_s21 + $0xdf0] sm:$0xff]  ;;  %v856_v18 = vld [vmem:[%s5651_s21 + $0xf78] sm:$0xff] }
 0x24f   : > { %v4309_v3 = vadd.f32 %v4247_v51, %v3684_v63  ;;  %v3686_v5 = vpop.f32.mrb[6].mxu0  ;;  %4003 = vmatpush1.bf16.msra.mxu0 %v4988_v52  ;;  %v4311_v6 = vadd.f32 %v4255_v53, %v3770_v4  ;;  %v3772_v8 = vpop.f32.mrb[6].mxu1  ;;  %4089 = vmatpush1.bf16.msra.mxu1 %v4990_v54  ;;  %v5054_v52 = vcombine.low %v768_v38, %v776_v41 }
 0x250   : > { %v4324_v7 = vadd.f32 %v4243_v47, %v3686_v5  ;;  %v3688_v9 = vpop.f32.mrb[7].mxu0  ;;  %4004 = vmatprep.subr.bf16.mxu0 %v5005_v55  ;;  %v4326_v12 = vadd.f32 %v4251_v50, %v3772_v8  ;;  %v3774_v15 = vpop.f32.mrb[7].mxu1  ;;  %4090 = vmatprep.subr.bf16.mxu1 %v5007_v57  ;;  %v783_v47 = vld [vmem:[%s5651_s21 + $0xd30] sm:$0xff]  ;;  %v792_v50 = vld [vmem:[%s5651_s21 + $0xd78] sm:$0xff]  ;;  %v5135_v22 = vcombine.high %v848_v17, %v856_v18 }
 0x251   : > { %v5177_v11 = vpack.c.bf16 %v4309_v3, %v4308_v61  ;;  %v4325_v13 = vadd.f32 %v4247_v51, %v3688_v9  ;;  %v5178_v19 = vpack.c.bf16 %v4311_v6, %v4310_v2  ;;  %v4327_v20 = vadd.f32 %v4255_v53, %v3774_v15  ;;  %v799_v55 = vld [vmem:[%s5651_s21 + $0xdb0] sm:$0xff]  ;;  %v800_v57 = vld [vmem:[%s5651_s21 + $0xdb8] sm:$0xff] }
 0x252   : > { %v5052_v51 = vcombine.low %v767_v36, %v775_v37  ;;  %v5069_v53 = vcombine.high %v783_v47, %v791_v48  ;;  %v5071_v54 = vcombine.high %v784_v49, %v792_v50  ;;  %v5068_v60 = vcombine.low %v783_v47, %v791_v48  ;;  %v816_v2 = vld [vmem:[%s5651_s21 + $0xe38] sm:$0xff]  ;;  %v831_v6 = vld [vmem:[%s5651_s21 + $0xeb0] sm:$0xff] }
 0x253   : > { %4434 = vst [vmem:[%s6070_s4 + $0x10] sm:$0xff] %v5177_v11  ;;  %v5185_v24 = vpack.c.bf16 %v4325_v13, %v4324_v7  ;;  %4005 = vmatpush1.bf16.msra.mxu0 %v5004_v29  ;;  %4435 = vst [vmem:[%s6070_s4 + $0x18] sm:$0xff] %v5178_v19  ;;  %v5186_v27 = vpack.c.bf16 %v4327_v20, %v4326_v12  ;;  %4091 = vmatpush1.bf16.msra.mxu1 %v5006_v58  ;;  %v824_v3 = vld [vmem:[%s5651_s21 + $0xe78] sm:$0xff]  ;;  %v839_v7 = vld [vmem:[%s5651_s21 + $0xef0] sm:$0xff] }
 0x254   : > { %4006 = vmatprep.subr.bf16.mxu0 %v5021_v10  ;;  %4092 = vmatprep.subr.bf16.mxu1 %v5023_v14  ;;  %v5070_v61 = vcombine.low %v784_v49, %v792_v50  ;;  %v5085_v62 = vcombine.high %v799_v55, %v807_v56  ;;  %v5087_v63 = vcombine.high %v800_v57, %v808_v59  ;;  %v832_v8 = vld [vmem:[%s5651_s21 + $0xeb8] sm:$0xff]  ;;  %v847_v15 = vld [vmem:[%s5651_s21 + $0xf30] sm:$0xff] }
 0x255   : > { %4442 = vst [vmem:[%s6070_s4 + $0x50] sm:$0xff] %v5185_v24  ;;  %4443 = vst [vmem:[%s6070_s4 + $0x58] sm:$0xff] %v5186_v27  ;;  %v5084_v4 = vcombine.low %v799_v55, %v807_v56  ;;  %v5086_v5 = vcombine.low %v800_v57, %v808_v59  ;;  %v5101_v29 = vcombine.high %v815_v0, %v823_v1  ;;  %v840_v9 = vld [vmem:[%s5651_s21 + $0xef8] sm:$0xff]  ;;  %v855_v14 = vld [vmem:[%s5651_s21 + $0xf70] sm:$0xff] }
 0x256   : > { %v5103_v58 = vcombine.high %v816_v2, %v824_v3  ;;  %v5100_v10 = vcombine.low %v815_v0, %v823_v1  ;;  %v5102_v11 = vcombine.low %v816_v2, %v824_v3  ;;  %v5117_v12 = vcombine.high %v831_v6, %v839_v7  ;;  %v863_v24 = vld [vmem:[%s5651_s21 + $0xfb0] sm:$0xff]  ;;  %v864_v27 = vld [vmem:[%s5651_s21 + $0xfb8] sm:$0xff] }
 0x257   : > { %4007 = vmatpush1.bf16.msra.mxu0 %v5020_v25  ;;  %4093 = vmatpush1.bf16.msra.mxu1 %v5022_v28  ;;  %v5119_v13 = vcombine.high %v832_v8, %v840_v9  ;;  %v5116_v19 = vcombine.low %v831_v6, %v839_v7  ;;  %v5118_v20 = vcombine.low %v832_v8, %v840_v9  ;;  %v871_v25 = vld [vmem:[%s5651_s21 + $0xff0] sm:$0xff]  ;;  %v872_v28 = vld [vmem:[%s5651_s21 + $0xff8] sm:$0xff] }
 0x258   : > { %4008 = vmatprep.subr.bf16.mxu0 %v5037_v32  ;;  %4094 = vmatprep.subr.bf16.mxu1 %v5039_v34  ;;  %v5133_v21 = vcombine.high %v847_v15, %v855_v14  ;;  %v5132_v32 = vcombine.low %v847_v15, %v855_v14  ;;  %v5134_v34 = vcombine.low %v848_v17, %v856_v18  ;;  %v4473_v18 = vld [vmem:[%s6070_s4] sm:$0xff] (%p6353_p10) }
 0x259   : > { %v5149_v36 = vcombine.high %v863_v24, %v871_v25  ;;  %v5151_v37 = vcombine.high %v864_v27, %v872_v28  ;;  %v5148_v38 = vcombine.low %v863_v24, %v871_v25  ;;  %v5150_v41 = vcombine.low %v864_v27, %v872_v28  ;;  %4474 = vst [vmem:[%s4460_s26] sm:$0xff] (%p6353_p10), %v4473_v18  ;;  %v4489_v28 = vld [vmem:[%s6070_s4 + $0x40] sm:$0xff] (%p6353_p10) }
 0x25a   : > { %4490 = vst [vmem:[%s4460_s26 + $0x180] sm:$0xff] (%p6353_p10), %v4489_v28 }
 0x25b   : > { %4009 = vmatpush1.bf16.msra.mxu0 %v5036_v43  ;;  %4095 = vmatpush1.bf16.msra.mxu1 %v5038_v44  ;;  %v4221_v43 = vld [vmem:[%s6035_s30 + $0x8] sm:$0xff] }
 0x25c   : > { %4010 = vmatprep.subr.bf16.mxu0 %v5053_v45  ;;  %4096 = vmatprep.subr.bf16.mxu1 %v5055_v46  ;;  %v4259_v44 = vrot.slane %v4221_v43, %v4226_v23  ;;  %v4267_v45 = vrot.slane %v4221_v43, %v4234_v30  ;;  %v4263_v46 = vrot.slane %v4221_v43, %v4230_v31 }
 0x25d   : > { %v4271_v47 = vrot.slane %v4221_v43, %v4238_v33  ;;  %v4275_v0 = vrot.slane %v4221_v43, %v4242_v35  ;;  %v4283_v1 = vrot.slane %v4221_v43, %v4250_v39  ;;  %v4279_v2 = vrot.slane %v4221_v43, %v4246_v40 }
 0x25e   : > { %v4287_v3 = vrot.slane %v4221_v43, %v4254_v42 }
 0x25f   : > { %4011 = vmatpush1.bf16.msra.mxu0 %v5052_v51  ;;  %4097 = vmatpush1.bf16.msra.mxu1 %v5054_v52 }
 0x260   : > { %4012 = vmatprep.subr.bf16.mxu0 %v5069_v53  ;;  %4098 = vmatprep.subr.bf16.mxu1 %v5071_v54 }
 0x263   : > { %4013 = vmatpush1.bf16.msra.mxu0 %v5068_v60  ;;  %4099 = vmatpush1.bf16.msra.mxu1 %v5070_v61 }
 0x264   : > { %4014 = vmatprep.subr.bf16.mxu0 %v5085_v62  ;;  %4100 = vmatprep.subr.bf16.mxu1 %v5087_v63 }
 0x267   : > { %4015 = vmatpush1.bf16.msra.mxu0 %v5084_v4  ;;  %4101 = vmatpush1.bf16.msra.mxu1 %v5086_v5 }
 0x268   : > { %4016 = vmatprep.subr.bf16.mxu0 %v5101_v29  ;;  %4102 = vmatprep.subr.bf16.mxu1 %v5103_v58 }
 0x26b   : > { %4017 = vmatpush1.bf16.msra.mxu0 %v5100_v10  ;;  %4103 = vmatpush1.bf16.msra.mxu1 %v5102_v11 }
 0x26c   : > { %4018 = vmatprep.subr.bf16.mxu0 %v5117_v12  ;;  %4104 = vmatprep.subr.bf16.mxu1 %v5119_v13 }
 0x26f   : > { %4019 = vmatpush1.bf16.msra.mxu0 %v5116_v19  ;;  %4105 = vmatpush1.bf16.msra.mxu1 %v5118_v20  ;;  %v4475_v19 = vld [vmem:[%s6070_s4 + $0x8] sm:$0xff] (%p6353_p10)  ;;  %v4477_v20 = vld [vmem:[%s6070_s4 + $0x10] sm:$0xff] (%p6353_p10) }
 0x270   : > { %4020 = vmatprep.subr.bf16.mxu0 %v5133_v21  ;;  %4106 = vmatprep.subr.bf16.mxu1 %v5135_v22  ;;  %v4479_v21 = vld [vmem:[%s6070_s4 + $0x18] sm:$0xff] (%p6353_p10)  ;;  %4476 = vst [vmem:[%s4460_s26 + $0x8] sm:$0xff] (%p6353_p10), %v4475_v19  ;;  %4478 = vst [vmem:[%s4460_s26 + $0x10] sm:$0xff] (%p6353_p10), %v4477_v20 }
 0x271   : > { %4480 = vst [vmem:[%s4460_s26 + $0x18] sm:$0xff] (%p6353_p10), %v4479_v21 }
 0x273   : > { %4021 = vmatpush1.bf16.msra.mxu0 %v5132_v32  ;;  %4107 = vmatpush1.bf16.msra.mxu1 %v5134_v34  ;;  %v4491_v32 = vld [vmem:[%s6070_s4 + $0x48] sm:$0xff] (%p6353_p10)  ;;  %v4493_v34 = vld [vmem:[%s6070_s4 + $0x50] sm:$0xff] (%p6353_p10) }
 0x274   : > { %4022 = vmatprep.subr.bf16.mxu0 %v5149_v36  ;;  %4108 = vmatprep.subr.bf16.mxu1 %v5151_v37  ;;  %v4495_v36 = vld [vmem:[%s6070_s4 + $0x58] sm:$0xff] (%p6353_p10)  ;;  %4492 = vst [vmem:[%s4460_s26 + $0x188] sm:$0xff] (%p6353_p10), %v4491_v32  ;;  %4494 = vst [vmem:[%s4460_s26 + $0x190] sm:$0xff] (%p6353_p10), %v4493_v34 }
 0x275   : > { %4496 = vst [vmem:[%s4460_s26 + $0x198] sm:$0xff] (%p6353_p10), %v4495_v36 }
 0x277   : > { %4023 = vmatpush1.bf16.msra.mxu0 %v5148_v38  ;;  %4109 = vmatpush1.bf16.msra.mxu1 %v5150_v41 }
 0x27a   : > { %4025 = vmatmul.mubr.bf16.vlgmr.msra.gmra.mrb[12].mxu0 %v5803_v26  ;;  %4111 = vmatmul.mubr.bf16.vlgmr.msra.gmra.mrb[12].mxu1 %v5803_v26 }
 0x2cd   : > { %v3854_v48 = vpop.f32.mrb[8].mxu0  ;;  %v3940_v50 = vpop.f32.mrb[8].mxu1 }
 0x2ce   : > { %v4312_v49 = vadd.f32 %v4259_v44, %v3854_v48  ;;  %v3856_v51 = vpop.f32.mrb[9].mxu0  ;;  %v4314_v52 = vadd.f32 %v4267_v45, %v3940_v50  ;;  %v3942_v53 = vpop.f32.mrb[9].mxu1 }
 0x2cf   : > { %v4313_v26 = vadd.f32 %v4263_v46, %v3856_v51  ;;  %v3858_v23 = vpop.f32.mrb[10].mxu0  ;;  %v4315_v54 = vadd.f32 %v4271_v47, %v3942_v53  ;;  %v3944_v55 = vpop.f32.mrb[10].mxu1 }
 0x2d0   : > { %v4328_v30 = vadd.f32 %v4259_v44, %v3858_v23  ;;  %v3860_v56 = vpop.f32.mrb[11].mxu0  ;;  %v4330_v57 = vadd.f32 %v4267_v45, %v3944_v55  ;;  %v3946_v33 = vpop.f32.mrb[11].mxu1 }
 0x2d1   : > { %v5179_v31 = vpack.c.bf16 %v4313_v26, %v4312_v49  ;;  %v4329_v59 = vadd.f32 %v4263_v46, %v3860_v56  ;;  %v5180_v60 = vpack.c.bf16 %v4315_v54, %v4314_v52  ;;  %v4331_v61 = vadd.f32 %v4271_v47, %v3946_v33 }
 0x2d3   : > { %4436 = vst [vmem:[%s6070_s4 + $0x20] sm:$0xff] %v5179_v31  ;;  %v5187_v62 = vpack.c.bf16 %v4329_v59, %v4328_v30  ;;  %4437 = vst [vmem:[%s6070_s4 + $0x28] sm:$0xff] %v5180_v60  ;;  %v5188_v63 = vpack.c.bf16 %v4331_v61, %v4330_v57 }
 0x2d5   : > { %4444 = vst [vmem:[%s6070_s4 + $0x60] sm:$0xff] %v5187_v62  ;;  %4445 = vst [vmem:[%s6070_s4 + $0x68] sm:$0xff] %v5188_v63 }
 0x2da   : > { %v4481_v22 = vld [vmem:[%s6070_s4 + $0x20] sm:$0xff] (%p6353_p10)  ;;  %v4483_v24 = vld [vmem:[%s6070_s4 + $0x28] sm:$0xff] (%p6353_p10) }
 0x2db   : > { %4482 = vst [vmem:[%s4460_s26 + $0x20] sm:$0xff] (%p6353_p10), %v4481_v22  ;;  %4484 = vst [vmem:[%s4460_s26 + $0x28] sm:$0xff] (%p6353_p10), %v4483_v24 }
 0x2dc   : > { %v4497_v37 = vld [vmem:[%s6070_s4 + $0x60] sm:$0xff] (%p6353_p10)  ;;  %v4499_v38 = vld [vmem:[%s6070_s4 + $0x68] sm:$0xff] (%p6353_p10) }
 0x2dd   : > { %4498 = vst [vmem:[%s4460_s26 + $0x1a0] sm:$0xff] (%p6353_p10), %v4497_v37  ;;  %4500 = vst [vmem:[%s4460_s26 + $0x1a8] sm:$0xff] (%p6353_p10), %v4499_v38 }
 0x34d   : > { %v4026_v4 = vpop.f32.mrb[12].mxu0  ;;  %v4112_v29 = vpop.f32.mrb[12].mxu1 }
 0x34e   : > { %v4316_v5 = vadd.f32 %v4275_v0, %v4026_v4  ;;  %v4028_v58 = vpop.f32.mrb[13].mxu0  ;;  %v4318_v6 = vadd.f32 %v4283_v1, %v4112_v29  ;;  %v4114_v8 = vpop.f32.mrb[13].mxu1 }
 0x34f   : > { %v4317_v7 = vadd.f32 %v4279_v2, %v4028_v58  ;;  %v4030_v35 = vpop.f32.mrb[14].mxu0  ;;  %v4319_v9 = vadd.f32 %v4287_v3, %v4114_v8  ;;  %v4116_v10 = vpop.f32.mrb[14].mxu1  ;;  %4454 = sbr.rel (!%p6353_p10) target bundleno = 862 (0x35e), region = 56 }
 0x350   : > { %v4332_v39 = vadd.f32 %v4275_v0, %v4030_v35  ;;  %v4032_v11 = vpop.f32.mrb[15].mxu0  ;;  %v4334_v12 = vadd.f32 %v4283_v1, %v4116_v10  ;;  %v4118_v42 = vpop.f32.mrb[15].mxu1 }
 0x351   : > { %v5181_v40 = vpack.c.bf16 %v4317_v7, %v4316_v5  ;;  %v4333_v16 = vadd.f32 %v4279_v2, %v4032_v11  ;;  %v5182_v13 = vpack.c.bf16 %v4319_v9, %v4318_v6  ;;  %v4335_v15 = vadd.f32 %v4287_v3, %v4118_v42 }
 0x353   : > { %4438 = vst [vmem:[%s6070_s4 + $0x30] sm:$0xff] %v5181_v40  ;;  %v5189_v14 = vpack.c.bf16 %v4333_v16, %v4332_v39  ;;  %4439 = vst [vmem:[%s6070_s4 + $0x38] sm:$0xff] %v5182_v13  ;;  %v5190_v17 = vpack.c.bf16 %v4335_v15, %v4334_v12 }
 0x355   : > { %4446 = vst [vmem:[%s6070_s4 + $0x70] sm:$0xff] %v5189_v14  ;;  %4447 = vst [vmem:[%s6070_s4 + $0x78] sm:$0xff] %v5190_v17 }
 0x35a   : > { %v4485_v25 = vld [vmem:[%s6070_s4 + $0x30] sm:$0xff]  ;;  %v4487_v27 = vld [vmem:[%s6070_s4 + $0x38] sm:$0xff] }
 0x35b   : > { %4486 = vst [vmem:[%s4460_s26 + $0x30] sm:$0xff] %v4485_v25  ;;  %4488 = vst [vmem:[%s4460_s26 + $0x38] sm:$0xff] %v4487_v27 }
 0x35c   : > { %v4501_v41 = vld [vmem:[%s6070_s4 + $0x70] sm:$0xff]  ;;  %v4503_v43 = vld [vmem:[%s6070_s4 + $0x78] sm:$0xff] }
 0x35d   : > { %4502 = vst [vmem:[%s4460_s26 + $0x1b0] sm:$0xff] %v4501_v41  ;;  %4504 = vst [vmem:[%s4460_s26 + $0x1b8] sm:$0xff] %v4503_v43 }
 0x35e PF: > { %s17_s17 = sadd.s32 1, %s5442_s17   ;;  %s6354_s28 = sld [smem:[#allocation11_spill]] }
 0x35f   : > { %p14_p2 = scmp.ge.s32.totalorder %s17_s17, 8   ;;  %s6355_s12 = smov %s5426_s13 }
 0x360   : > { %s6356_s13 = smov %s5430_s14  ;;  %s6357_s14 = smov %s5519_s24 }
 0x361   : > { %s6358_s15 = smov %s5438_s16  ;;  %16 = sbr.rel (!%p14_p2) target bundleno = 7 (0x7), region = 120 }
 0x364   : > { %s6359_s16 = smov %s6354_s28 }
 0x368   :  { %4520 = vsyncpa [#allocation4], 1 }
 0x369   :  { %4522 = vsyncpa [#allocation4 + $0x1], 1 }
 0x36a   :  { %4523 = vsyncpa [#allocation6], 1 }
 0x36b   :  { %4525 = vsyncpa [#allocation6 + $0x1], 1 }

</bundles_post_ra>
